<compile_context>
chip_gen: v5e
topology: v5e:2x2
jax: 0.10.0
libtpu: 0.0.40
codegen_flags: <defaults>
</compile_context>

<pallas_src>
import functools

import jax
import jax.numpy as jnp
from jax.experimental import pallas as pl
from jax.experimental.pallas import tpu as pltpu


def _kpconv_tile_kernel(rel_ref, nf_ref, kpt_ref, kw_ref,
                        conv_ref, mean_ref, m2_ref, m_scratch,
                        *, inv_extent, cin, n_kpts):
    """Pass 1: KPConv for one N-tile (points on the 128-lane axis) + BN partials.

    rel_ref  : [3, H, tileN]    neighbor coords minus query point, coordinate-major
    nf_ref   : [Cin, H, tileN]  gathered neighbor features (shadow rows are zero)
    kpt_ref  : [3, K]  (SMEM)   kernel points, read as scalars
    kw_ref   : [Cout, KCpad]    transposed, zero-padded weights (col index = k*Cin + c)
    conv_ref : [Cout, tileN]    raw KPConv output for this tile (lane-dense store)
    mean_ref : [1, Cout, 1]     per-tile mean (BN pass-1 partial)
    m2_ref   : [1, Cout, 1]     per-tile centered sum of squares (BN pass-1 partial)
    m_scratch: [KCpad, tileN]   zero-padded, 128-aligned contraction operand
    """
    tile_n = conv_ref.shape[1]
    kc = n_kpts * cin
    kc_pad = m_scratch.shape[0]

    # Zero the padding rows every step (cheap; megacore-safe: every core's scratch is
    # fully defined regardless of which grid slice it executes).
    if kc_pad > kc:
        m_scratch[kc:, :] = jnp.zeros((kc_pad - kc, tile_n), jnp.float32)

    nf = nf_ref[...]                                      # [Cin, H, tileN]

    for k in range(n_kpts):                               # static unroll (K = 15)
        # squared distance to kernel point k: direct (a - b)^2, no cancellation,
        # kernel-point coords come from SMEM as scalars (sreg path).
        sq = None
        for a in range(3):
            d = rel_ref[a] - kpt_ref[a, k]                # [H, tileN] - scalar
            sq = d * d if sq is None else sq + d * d
        # linear kernel-point influence: clamp(1 - dist / extent, 0)   [H, tileN]
        wk = jnp.maximum(1.0 - jnp.sqrt(sq) * inv_extent, 0.0)
        # influence-weighted neighborhood feature: reduce over H ->     [Cin, tileN]
        col = jnp.sum(wk[None, :, :] * nf, axis=1)
        m_scratch[k * cin:(k + 1) * cin, :] = col         # static, sublane-aligned offset

    # ONE fused MXU matmul: [Cout, KCpad] x [KCpad, tileN], f32, aligned 128-deep K.
    conv = jnp.dot(kw_ref[...], m_scratch[...], preferred_element_type=jnp.float32)
    conv_ref[...] = conv

    # Per-tile BN partials (mean + centered M2 -> Chan-style merge in the wrapper).
    tmean = jnp.sum(conv, axis=1, keepdims=True) * (1.0 / tile_n)      # [Cout, 1]
    cdiff = conv - tmean
    m2 = jnp.sum(cdiff * cdiff, axis=1, keepdims=True)                 # [Cout, 1]
    mean_ref[...] = tmean[None]
    m2_ref[...] = m2[None]


def _bn_lrelu_kernel(x_ref, scale_ref, bias_ref, o_ref, *, negative_slope):
    """Pass 2: y = x * scale + bias (folded BN), then LeakyReLU. Lane-dense [Cout, cols]."""
    y = x_ref[...] * scale_ref[...] + bias_ref[...]
    o_ref[...] = jnp.where(y >= 0.0, y, negative_slope * y)


@functools.partial(jax.jit,
                   static_argnames=("point_influence", "negative_slope", "eps", "tile_n"))
def kpconv_simple_block(feats, xyz, batch, neighbor_idx, kpoints, kweights, gamma, beta,
                        point_influence, negative_slope=0.2, eps=1e-5, tile_n=256):
    del batch  # unused by the block's forward (matches the PyTorch module)
    N, Cin = feats.shape
    H = neighbor_idx.shape[1]
    K, _, Cout = kweights.shape
    assert N % tile_n == 0, "N must be a multiple of tile_n for this demo"
    T = N // tile_n
    kc = K * Cin
    kc_pad = ((kc + 127) // 128) * 128                    # pad contraction depth to 128

    # ---- XLA glue: shadow point/feature + neighbor gather + points-on-lanes layout ------
    # TODO(synk): do this gather in-kernel (scalar-prefetch neighbor_idx + DMA row gather)
    # at real sizes to avoid the H-expanded HBM round trip and the two transposes.
    support = jnp.concatenate([xyz, jnp.full((1, 3), 1e6, xyz.dtype)], axis=0)
    feats_aug = jnp.concatenate([feats, jnp.zeros((1, Cin), feats.dtype)], axis=0)
    rel = support[neighbor_idx] - xyz[:, None, :]                        # [N, H, 3]
    relh = jnp.transpose(rel, (2, 1, 0))                                 # [3, H, N]
    nfh = jnp.transpose(feats_aug[neighbor_idx], (2, 1, 0))              # [Cin, H, N]
    kpt = kpoints.T                                                      # [3, K] -> SMEM
    kw = jnp.transpose(kweights.reshape(kc, Cout))                       # [Cout, K*Cin]
    kw = jnp.pad(kw, ((0, 0), (0, kc_pad - kc)))                         # [Cout, KCpad]

    cost = pl.CostEstimate(
        flops=int(2 * N * H * K * Cin + 2 * N * kc_pad * Cout + 9 * N * H * K),
        transcendentals=int(N * H * K),
        bytes_accessed=int(relh.size * 4 + nfh.size * 4 + kw.size * 4
                           + N * Cout * 4 + 4 * T * Cout * 4),
    )

    conv, tmean, tm2 = pl.pallas_call(
        functools.partial(_kpconv_tile_kernel,
                          inv_extent=1.0 / float(point_influence), cin=Cin, n_kpts=K),
        out_shape=(jax.ShapeDtypeStruct((Cout, N), jnp.float32),
                   jax.ShapeDtypeStruct((T, Cout, 1), jnp.float32),
                   jax.ShapeDtypeStruct((T, Cout, 1), jnp.float32)),
        grid=(T,),
        in_specs=[pl.BlockSpec((3, H, tile_n), lambda i: (0, 0, i)),
                  pl.BlockSpec((Cin, H, tile_n), lambda i: (0, 0, i)),
                  pl.BlockSpec(memory_space=pltpu.MemorySpace.SMEM),
                  pl.BlockSpec((Cout, kc_pad), lambda i: (0, 0))],
        out_specs=(pl.BlockSpec((Cout, tile_n), lambda i: (0, i)),
                   pl.BlockSpec((1, Cout, 1), lambda i: (i, 0, 0)),
                   pl.BlockSpec((1, Cout, 1), lambda i: (i, 0, 0))),
        scratch_shapes=[pltpu.VMEM((kc_pad, tile_n), jnp.float32)],
        compiler_params=pltpu.CompilerParams(
            dimension_semantics=("parallel",),
            vmem_limit_bytes=32 * 1024 * 1024),
        cost_estimate=cost,
    )(relh, nfh, kpt, kw)

    # ---- tiny cross-tile reduction: Chan-style merge of per-tile (mean, M2) partials ----
    tmean = tmean.reshape(T, Cout)
    tm2 = tm2.reshape(T, Cout)
    mean = jnp.mean(tmean, axis=0)                             # equal tile counts
    m2 = jnp.sum(tm2, axis=0) + float(tile_n) * jnp.sum((tmean - mean) ** 2, axis=0)
    var = m2 / N                                               # biased (training-mode) var
    scale = gamma * jax.lax.rsqrt(var + eps)
    bias = beta - mean * scale

    # ---- pass 2: folded BN + LeakyReLU, large lane-dense blocks --------------------------
    bn_cols = tile_n
    while bn_cols * 2 <= min(N, 4096) and N % (bn_cols * 2) == 0:
        bn_cols *= 2

    out_t = pl.pallas_call(
        functools.partial(_bn_lrelu_kernel, negative_slope=float(negative_slope)),
        out_shape=jax.ShapeDtypeStruct((Cout, N), jnp.float32),
        grid=(N // bn_cols,),
        in_specs=[pl.BlockSpec((Cout, bn_cols), lambda i: (0, i)),
                  pl.BlockSpec((Cout, 1), lambda i: (0, 0)),
                  pl.BlockSpec((Cout, 1), lambda i: (0, 0))],
        out_specs=pl.BlockSpec((Cout, bn_cols), lambda i: (0, i)),
        compiler_params=pltpu.CompilerParams(dimension_semantics=("parallel",)),
    )(conv, scale.reshape(Cout, 1), bias.reshape(Cout, 1))

    return out_t.T                                             # [N, Cout]


def _reference(feats, xyz, neighbor_idx, kpoints, kweights, gamma, beta,
               extent, negative_slope=0.2, eps=1e-5):
    """Pure-JAX f32 mirror of the PyTorch KPConv_ops + BatchNorm1d(train) + LeakyReLU."""
    N, Cin = feats.shape
    support = jnp.concatenate([xyz, jnp.full((1, 3), 1e6, xyz.dtype)], axis=0)
    feats_aug = jnp.concatenate([feats, jnp.zeros((1, Cin), feats.dtype)], axis=0)
    neigh = support[neighbor_idx] - xyz[:, None, :]                      # [N,H,3]
    diff = neigh[:, :, None, :] - kpoints[None, None, :, :]              # [N,H,K,3]
    sqd = jnp.sum(diff * diff, axis=-1)                                  # [N,H,K]
    allw = jnp.clip(1.0 - jnp.sqrt(sqd) / extent, 0.0)                   # [N,H,K]
    allw = jnp.swapaxes(allw, 1, 2)                                      # [N,K,H]
    nf = feats_aug[neighbor_idx]                                         # [N,H,Cin]
    wf = jnp.matmul(allw, nf, precision="highest")                       # [N,K,Cin]
    wf = jnp.transpose(wf, (1, 0, 2))                                    # [K,N,Cin]
    ko = jnp.matmul(wf, kweights, precision="highest")                   # [K,N,Cout]
    out = jnp.sum(ko, axis=0)                                            # [N,Cout]
    mean = out.mean(axis=0)
    var = ((out - mean) ** 2).mean(axis=0)
    out = (out - mean) / jnp.sqrt(var + eps) * gamma + beta
    return jnp.where(out >= 0.0, out, negative_slope * out)


if __name__ == "__main__":
    key = jax.random.PRNGKey(0)
    N, Cin, Cout, H, K = 512, 8, 16, 16, 15
    tile_n = 256                                  # multiple of 128; grid of 2 tiles (even)
    prev_grid_size, sigma = 1.0, 1.0
    point_influence = prev_grid_size * sigma      # KP_extent
    kernel_radius = 1.5 * point_influence

    k1, k2, k3, k4, k5 = jax.random.split(key, 5)
    feats = jax.random.normal(k1, (N, Cin), jnp.float32)
    xyz = jax.random.uniform(k2, (N, 3), jnp.float32, 0.0, 1.0)
    batch = jnp.zeros((N,), jnp.int32)
    # index == N selects the shadow neighbor (as in KPConv_ops)
    neighbor_idx = jax.random.randint(k3, (N, H), 0, N + 1).astype(jnp.int32)

    # TODO(synk): real KPConvLayer loads an optimized kernel-point disposition via
    # load_kernels(); a deterministic center-fixed disposition of the same shape is
    # built in-script instead.
    kp_dir = jax.random.normal(k4, (K - 1, 3), jnp.float32)
    kp_dir = kp_dir / jnp.linalg.norm(kp_dir, axis=1, keepdims=True)
    kp_rad = jnp.linspace(0.3, 1.0, K - 1, dtype=jnp.float32)[:, None] * kernel_radius
    kpoints = jnp.concatenate([jnp.zeros((1, 3), jnp.float32), kp_dir * kp_rad], axis=0)

    # Xavier-normal-style deterministic init for the [K, Cin, Cout] weight tensor.
    std = (2.0 / (Cin + Cout)) ** 0.5
    kweights = std * jax.random.normal(k5, (K, Cin, Cout), jnp.float32)
    gamma = jnp.ones((Cout,), jnp.float32)   # BN affine defaults
    beta = jnp.zeros((Cout,), jnp.float32)

    out = kpconv_simple_block(feats, xyz, batch, neighbor_idx, kpoints, kweights,
                              gamma, beta, point_influence=point_influence, tile_n=tile_n)
    out = jax.block_until_ready(out)

    ref = _reference(feats, xyz, neighbor_idx, kpoints, kweights, gamma, beta,
                     point_influence)
    # f32 operands throughout (MXU f32 matmul); tolerance covers minor op-order /
    # matmul-precision differences on BN-normalized (~unit scale) outputs.
    if not jnp.allclose(out, ref, atol=2e-2, rtol=2e-2):
        err = float(jnp.max(jnp.abs(out - ref)))
        raise AssertionError(
            f"Pallas kernel output does not match JAX reference (max abs err {err:.4f})")
    print("KERNEL_OK")
</pallas_src>

<mosaic_0001>
module attributes {stable_mosaic.version = 11 : i64} {
  func.func @_kpconv_tile_kernel(%arg0: i32, %arg1: memref<3x16x256xf32, #tpu.memory_space<vmem>>, %arg2: memref<8x16x256xf32, #tpu.memory_space<vmem>>, %arg3: memref<3x15xf32, #tpu.memory_space<smem>>, %arg4: memref<16x128xf32, #tpu.memory_space<vmem>>, %arg5: memref<16x256xf32, #tpu.memory_space<vmem>>, %arg6: memref<1x16x1xf32, #tpu.memory_space<vmem>>, %arg7: memref<1x16x1xf32, #tpu.memory_space<vmem>>, %arg8: memref<128x256xf32, #tpu.memory_space<vmem>>) attributes {dimension_semantics = [#tpu.dimension_semantics<parallel>], iteration_bounds = array<i64: 2>, scalar_prefetch = 0 : i64, scratch_operands = 1 : i64, tpu.core_type = #tpu.core_type<tc>, window_params = [{transform_indices = @transform_0, window_bounds = array<i64: 3, 16, 256>}, {transform_indices = @transform_1, window_bounds = array<i64: 8, 16, 256>}, {transform_indices = @transform_2, window_bounds = array<i64: 3, 15>}, {pipeline_mode = #tpu.pipeline_mode<synchronous>, transform_indices = @transform_3, window_bounds = array<i64: 16, 128>}, {transform_indices = @transform_4, window_bounds = array<i64: 16, 256>}, {transform_indices = @transform_5, window_bounds = array<i64: 1, 16, 1>}, {transform_indices = @transform_6, window_bounds = array<i64: 1, 16, 1>}]} {
    %cst = arith.constant 0.000000e+00 : f32
    %0 = vector.broadcast %cst : f32 to vector<8x256xf32>
    %c120 = arith.constant 120 : index
    %c0 = arith.constant 0 : index
    %1 = vector.load %arg8[%c120, %c0] : memref<128x256xf32, #tpu.memory_space<vmem>>, vector<8x256xf32>
    tpu.vector_store %arg8[%c120, %c0], %0 {strides = array<i32>} : memref<128x256xf32, #tpu.memory_space<vmem>>, vector<8x256xf32>,
    %c0_0 = arith.constant 0 : index
    %c0_1 = arith.constant 0 : index
    %c0_2 = arith.constant 0 : index
    %2 = vector.load %arg2[%c0_0, %c0_1, %c0_2] : memref<8x16x256xf32, #tpu.memory_space<vmem>>, vector<8x16x256xf32>
    %c0_3 = arith.constant 0 : index
    %c0_4 = arith.constant 0 : index
    %c0_5 = arith.constant 0 : index
    %3 = vector.load %arg1[%c0_3, %c0_4, %c0_5] : memref<3x16x256xf32, #tpu.memory_space<vmem>>, vector<1x16x256xf32>
    %4 = vector.shape_cast %3 : vector<1x16x256xf32> to vector<16x256xf32>
    %c0_6 = arith.constant 0 : index
    %c0_7 = arith.constant 0 : index
    %5 = memref.load %arg3[%c0_6, %c0_7] : memref<3x15xf32, #tpu.memory_space<smem>>
    %6 = vector.broadcast %5 : f32 to vector<16x256xf32>
    %7 = arith.subf %4, %6 : vector<16x256xf32>
    %8 = arith.mulf %7, %7 : vector<16x256xf32>
    %c1 = arith.constant 1 : index
    %c0_8 = arith.constant 0 : index
    %c0_9 = arith.constant 0 : index
    %9 = vector.load %arg1[%c1, %c0_8, %c0_9] : memref<3x16x256xf32, #tpu.memory_space<vmem>>, vector<1x16x256xf32>
    %10 = vector.shape_cast %9 : vector<1x16x256xf32> to vector<16x256xf32>
    %c1_10 = arith.constant 1 : index
    %c0_11 = arith.constant 0 : index
    %11 = memref.load %arg3[%c1_10, %c0_11] : memref<3x15xf32, #tpu.memory_space<smem>>
    %12 = vector.broadcast %11 : f32 to vector<16x256xf32>
    %13 = arith.subf %10, %12 : vector<16x256xf32>
    %14 = arith.mulf %13, %13 : vector<16x256xf32>
    %15 = arith.addf %8, %14 : vector<16x256xf32>
    %c2 = arith.constant 2 : index
    %c0_12 = arith.constant 0 : index
    %c0_13 = arith.constant 0 : index
    %16 = vector.load %arg1[%c2, %c0_12, %c0_13] : memref<3x16x256xf32, #tpu.memory_space<vmem>>, vector<1x16x256xf32>
    %17 = vector.shape_cast %16 : vector<1x16x256xf32> to vector<16x256xf32>
    %c2_14 = arith.constant 2 : index
    %c0_15 = arith.constant 0 : index
    %18 = memref.load %arg3[%c2_14, %c0_15] : memref<3x15xf32, #tpu.memory_space<smem>>
    %19 = vector.broadcast %18 : f32 to vector<16x256xf32>
    %20 = arith.subf %17, %19 : vector<16x256xf32>
    %21 = arith.mulf %20, %20 : vector<16x256xf32>
    %22 = arith.addf %15, %21 : vector<16x256xf32>
    %23 = math.sqrt %22 : vector<16x256xf32>
    %cst_16 = arith.constant 1.000000e+00 : f32
    %24 = vector.broadcast %cst_16 : f32 to vector<16x256xf32>
    %25 = arith.mulf %23, %24 : vector<16x256xf32>
    %cst_17 = arith.constant 1.000000e+00 : f32
    %26 = vector.broadcast %cst_17 : f32 to vector<16x256xf32>
    %27 = arith.subf %26, %25 : vector<16x256xf32>
    %cst_18 = arith.constant 0.000000e+00 : f32
    %28 = vector.broadcast %cst_18 : f32 to vector<16x256xf32>
    %29 = arith.maximumf %27, %28 : vector<16x256xf32>
    %30 = vector.shape_cast %29 : vector<16x256xf32> to vector<1x16x256xf32>
    %31 = vector.broadcast %30 : vector<1x16x256xf32> to vector<8x16x256xf32>
    %32 = arith.mulf %31, %2 : vector<8x16x256xf32>
    %cst_19 = arith.constant dense<0.000000e+00> : vector<8x256xf32>
    %33 = vector.multi_reduction <add>, %32, %cst_19 [1] : vector<8x16x256xf32> to vector<8x256xf32>
    %c0_20 = arith.constant 0 : index
    %c0_21 = arith.constant 0 : index
    %34 = vector.load %arg8[%c0_20, %c0_21] : memref<128x256xf32, #tpu.memory_space<vmem>>, vector<8x256xf32>
    tpu.vector_store %arg8[%c0_20, %c0_21], %33 {strides = array<i32>} : memref<128x256xf32, #tpu.memory_space<vmem>>, vector<8x256xf32>,
    %c0_22 = arith.constant 0 : index
    %c0_23 = arith.constant 0 : index
    %c0_24 = arith.constant 0 : index
    %35 = vector.load %arg1[%c0_22, %c0_23, %c0_24] : memref<3x16x256xf32, #tpu.memory_space<vmem>>, vector<1x16x256xf32>
    %36 = vector.shape_cast %35 : vector<1x16x256xf32> to vector<16x256xf32>
    %c0_25 = arith.constant 0 : index
    %c1_26 = arith.constant 1 : index
    %37 = memref.load %arg3[%c0_25, %c1_26] : memref<3x15xf32, #tpu.memory_space<smem>>
    %38 = vector.broadcast %37 : f32 to vector<16x256xf32>
    %39 = arith.subf %36, %38 : vector<16x256xf32>
    %40 = arith.mulf %39, %39 : vector<16x256xf32>
    %c1_27 = arith.constant 1 : index
    %c0_28 = arith.constant 0 : index
    %c0_29 = arith.constant 0 : index
    %41 = vector.load %arg1[%c1_27, %c0_28, %c0_29] : memref<3x16x256xf32, #tpu.memory_space<vmem>>, vector<1x16x256xf32>
    %42 = vector.shape_cast %41 : vector<1x16x256xf32> to vector<16x256xf32>
    %c1_30 = arith.constant 1 : index
    %c1_31 = arith.constant 1 : index
    %43 = memref.load %arg3[%c1_30, %c1_31] : memref<3x15xf32, #tpu.memory_space<smem>>
    %44 = vector.broadcast %43 : f32 to vector<16x256xf32>
    %45 = arith.subf %42, %44 : vector<16x256xf32>
    %46 = arith.mulf %45, %45 : vector<16x256xf32>
    %47 = arith.addf %40, %46 : vector<16x256xf32>
    %c2_32 = arith.constant 2 : index
    %c0_33 = arith.constant 0 : index
    %c0_34 = arith.constant 0 : index
    %48 = vector.load %arg1[%c2_32, %c0_33, %c0_34] : memref<3x16x256xf32, #tpu.memory_space<vmem>>, vector<1x16x256xf32>
    %49 = vector.shape_cast %48 : vector<1x16x256xf32> to vector<16x256xf32>
    %c2_35 = arith.constant 2 : index
    %c1_36 = arith.constant 1 : index
    %50 = memref.load %arg3[%c2_35, %c1_36] : memref<3x15xf32, #tpu.memory_space<smem>>
    %51 = vector.broadcast %50 : f32 to vector<16x256xf32>
    %52 = arith.subf %49, %51 : vector<16x256xf32>
    %53 = arith.mulf %52, %52 : vector<16x256xf32>
    %54 = arith.addf %47, %53 : vector<16x256xf32>
    %55 = math.sqrt %54 : vector<16x256xf32>
    %cst_37 = arith.constant 1.000000e+00 : f32
    %56 = vector.broadcast %cst_37 : f32 to vector<16x256xf32>
    %57 = arith.mulf %55, %56 : vector<16x256xf32>
    %cst_38 = arith.constant 1.000000e+00 : f32
    %58 = vector.broadcast %cst_38 : f32 to vector<16x256xf32>
    %59 = arith.subf %58, %57 : vector<16x256xf32>
    %cst_39 = arith.constant 0.000000e+00 : f32
    %60 = vector.broadcast %cst_39 : f32 to vector<16x256xf32>
    %61 = arith.maximumf %59, %60 : vector<16x256xf32>
    %62 = vector.shape_cast %61 : vector<16x256xf32> to vector<1x16x256xf32>
    %63 = vector.broadcast %62 : vector<1x16x256xf32> to vector<8x16x256xf32>
    %64 = arith.mulf %63, %2 : vector<8x16x256xf32>
    %cst_40 = arith.constant dense<0.000000e+00> : vector<8x256xf32>
    %65 = vector.multi_reduction <add>, %64, %cst_40 [1] : vector<8x16x256xf32> to vector<8x256xf32>
    %c8 = arith.constant 8 : index
    %c0_41 = arith.constant 0 : index
    %66 = vector.load %arg8[%c8, %c0_41] : memref<128x256xf32, #tpu.memory_space<vmem>>, vector<8x256xf32>
    tpu.vector_store %arg8[%c8, %c0_41], %65 {strides = array<i32>} : memref<128x256xf32, #tpu.memory_space<vmem>>, vector<8x256xf32>,
    %c0_42 = arith.constant 0 : index
    %c0_43 = arith.constant 0 : index
    %c0_44 = arith.constant 0 : index
    %67 = vector.load %arg1[%c0_42, %c0_43, %c0_44] : memref<3x16x256xf32, #tpu.memory_space<vmem>>, vector<1x16x256xf32>
    %68 = vector.shape_cast %67 : vector<1x16x256xf32> to vector<16x256xf32>
    %c0_45 = arith.constant 0 : index
    %c2_46 = arith.constant 2 : index
    %69 = memref.load %arg3[%c0_45, %c2_46] : memref<3x15xf32, #tpu.memory_space<smem>>
    %70 = vector.broadcast %69 : f32 to vector<16x256xf32>
    %71 = arith.subf %68, %70 : vector<16x256xf32>
    %72 = arith.mulf %71, %71 : vector<16x256xf32>
    %c1_47 = arith.constant 1 : index
    %c0_48 = arith.constant 0 : index
    %c0_49 = arith.constant 0 : index
    %73 = vector.load %arg1[%c1_47, %c0_48, %c0_49] : memref<3x16x256xf32, #tpu.memory_space<vmem>>, vector<1x16x256xf32>
    %74 = vector.shape_cast %73 : vector<1x16x256xf32> to vector<16x256xf32>
    %c1_50 = arith.constant 1 : index
    %c2_51 = arith.constant 2 : index
    %75 = memref.load %arg3[%c1_50, %c2_51] : memref<3x15xf32, #tpu.memory_space<smem>>
    %76 = vector.broadcast %75 : f32 to vector<16x256xf32>
    %77 = arith.subf %74, %76 : vector<16x256xf32>
    %78 = arith.mulf %77, %77 : vector<16x256xf32>
    %79 = arith.addf %72, %78 : vector<16x256xf32>
    %c2_52 = arith.constant 2 : index
    %c0_53 = arith.constant 0 : index
    %c0_54 = arith.constant 0 : index
    %80 = vector.load %arg1[%c2_52, %c0_53, %c0_54] : memref<3x16x256xf32, #tpu.memory_space<vmem>>, vector<1x16x256xf32>
    %81 = vector.shape_cast %80 : vector<1x16x256xf32> to vector<16x256xf32>
    %c2_55 = arith.constant 2 : index
    %c2_56 = arith.constant 2 : index
    %82 = memref.load %arg3[%c2_55, %c2_56] : memref<3x15xf32, #tpu.memory_space<smem>>
    %83 = vector.broadcast %82 : f32 to vector<16x256xf32>
    %84 = arith.subf %81, %83 : vector<16x256xf32>
    %85 = arith.mulf %84, %84 : vector<16x256xf32>
    %86 = arith.addf %79, %85 : vector<16x256xf32>
    %87 = math.sqrt %86 : vector<16x256xf32>
    %cst_57 = arith.constant 1.000000e+00 : f32
    %88 = vector.broadcast %cst_57 : f32 to vector<16x256xf32>
    %89 = arith.mulf %87, %88 : vector<16x256xf32>
    %cst_58 = arith.constant 1.000000e+00 : f32
    %90 = vector.broadcast %cst_58 : f32 to vector<16x256xf32>
    %91 = arith.subf %90, %89 : vector<16x256xf32>
    %cst_59 = arith.constant 0.000000e+00 : f32
    %92 = vector.broadcast %cst_59 : f32 to vector<16x256xf32>
    %93 = arith.maximumf %91, %92 : vector<16x256xf32>
    %94 = vector.shape_cast %93 : vector<16x256xf32> to vector<1x16x256xf32>
    %95 = vector.broadcast %94 : vector<1x16x256xf32> to vector<8x16x256xf32>
    %96 = arith.mulf %95, %2 : vector<8x16x256xf32>
    %cst_60 = arith.constant dense<0.000000e+00> : vector<8x256xf32>
    %97 = vector.multi_reduction <add>, %96, %cst_60 [1] : vector<8x16x256xf32> to vector<8x256xf32>
    %c16 = arith.constant 16 : index
    %c0_61 = arith.constant 0 : index
    %98 = vector.load %arg8[%c16, %c0_61] : memref<128x256xf32, #tpu.memory_space<vmem>>, vector<8x256xf32>
    tpu.vector_store %arg8[%c16, %c0_61], %97 {strides = array<i32>} : memref<128x256xf32, #tpu.memory_space<vmem>>, vector<8x256xf32>,
    %c0_62 = arith.constant 0 : index
    %c0_63 = arith.constant 0 : index
    %c0_64 = arith.constant 0 : index
    %99 = vector.load %arg1[%c0_62, %c0_63, %c0_64] : memref<3x16x256xf32, #tpu.memory_space<vmem>>, vector<1x16x256xf32>
    %100 = vector.shape_cast %99 : vector<1x16x256xf32> to vector<16x256xf32>
    %c0_65 = arith.constant 0 : index
    %c3 = arith.constant 3 : index
    %101 = memref.load %arg3[%c0_65, %c3] : memref<3x15xf32, #tpu.memory_space<smem>>
    %102 = vector.broadcast %101 : f32 to vector<16x256xf32>
    %103 = arith.subf %100, %102 : vector<16x256xf32>
    %104 = arith.mulf %103, %103 : vector<16x256xf32>
    %c1_66 = arith.constant 1 : index
    %c0_67 = arith.constant 0 : index
    %c0_68 = arith.constant 0 : index
    %105 = vector.load %arg1[%c1_66, %c0_67, %c0_68] : memref<3x16x256xf32, #tpu.memory_space<vmem>>, vector<1x16x256xf32>
    %106 = vector.shape_cast %105 : vector<1x16x256xf32> to vector<16x256xf32>
    %c1_69 = arith.constant 1 : index
    %c3_70 = arith.constant 3 : index
    %107 = memref.load %arg3[%c1_69, %c3_70] : memref<3x15xf32, #tpu.memory_space<smem>>
    %108 = vector.broadcast %107 : f32 to vector<16x256xf32>
    %109 = arith.subf %106, %108 : vector<16x256xf32>
    %110 = arith.mulf %109, %109 : vector<16x256xf32>
    %111 = arith.addf %104, %110 : vector<16x256xf32>
    %c2_71 = arith.constant 2 : index
    %c0_72 = arith.constant 0 : index
    %c0_73 = arith.constant 0 : index
    %112 = vector.load %arg1[%c2_71, %c0_72, %c0_73] : memref<3x16x256xf32, #tpu.memory_space<vmem>>, vector<1x16x256xf32>
    %113 = vector.shape_cast %112 : vector<1x16x256xf32> to vector<16x256xf32>
    %c2_74 = arith.constant 2 : index
    %c3_75 = arith.constant 3 : index
    %114 = memref.load %arg3[%c2_74, %c3_75] : memref<3x15xf32, #tpu.memory_space<smem>>
    %115 = vector.broadcast %114 : f32 to vector<16x256xf32>
    %116 = arith.subf %113, %115 : vector<16x256xf32>
    %117 = arith.mulf %116, %116 : vector<16x256xf32>
    %118 = arith.addf %111, %117 : vector<16x256xf32>
    %119 = math.sqrt %118 : vector<16x256xf32>
    %cst_76 = arith.constant 1.000000e+00 : f32
    %120 = vector.broadcast %cst_76 : f32 to vector<16x256xf32>
    %121 = arith.mulf %119, %120 : vector<16x256xf32>
    %cst_77 = arith.constant 1.000000e+00 : f32
    %122 = vector.broadcast %cst_77 : f32 to vector<16x256xf32>
    %123 = arith.subf %122, %121 : vector<16x256xf32>
    %cst_78 = arith.constant 0.000000e+00 : f32
    %124 = vector.broadcast %cst_78 : f32 to vector<16x256xf32>
    %125 = arith.maximumf %123, %124 : vector<16x256xf32>
    %126 = vector.shape_cast %125 : vector<16x256xf32> to vector<1x16x256xf32>
    %127 = vector.broadcast %126 : vector<1x16x256xf32> to vector<8x16x256xf32>
    %128 = arith.mulf %127, %2 : vector<8x16x256xf32>
    %cst_79 = arith.constant dense<0.000000e+00> : vector<8x256xf32>
    %129 = vector.multi_reduction <add>, %128, %cst_79 [1] : vector<8x16x256xf32> to vector<8x256xf32>
    %c24 = arith.constant 24 : index
    %c0_80 = arith.constant 0 : index
    %130 = vector.load %arg8[%c24, %c0_80] : memref<128x256xf32, #tpu.memory_space<vmem>>, vector<8x256xf32>
    tpu.vector_store %arg8[%c24, %c0_80], %129 {strides = array<i32>} : memref<128x256xf32, #tpu.memory_space<vmem>>, vector<8x256xf32>,
    %c0_81 = arith.constant 0 : index
    %c0_82 = arith.constant 0 : index
    %c0_83 = arith.constant 0 : index
    %131 = vector.load %arg1[%c0_81, %c0_82, %c0_83] : memref<3x16x256xf32, #tpu.memory_space<vmem>>, vector<1x16x256xf32>
    %132 = vector.shape_cast %131 : vector<1x16x256xf32> to vector<16x256xf32>
    %c0_84 = arith.constant 0 : index
    %c4 = arith.constant 4 : index
    %133 = memref.load %arg3[%c0_84, %c4] : memref<3x15xf32, #tpu.memory_space<smem>>
    %134 = vector.broadcast %133 : f32 to vector<16x256xf32>
    %135 = arith.subf %132, %134 : vector<16x256xf32>
    %136 = arith.mulf %135, %135 : vector<16x256xf32>
    %c1_85 = arith.constant 1 : index
    %c0_86 = arith.constant 0 : index
    %c0_87 = arith.constant 0 : index
    %137 = vector.load %arg1[%c1_85, %c0_86, %c0_87] : memref<3x16x256xf32, #tpu.memory_space<vmem>>, vector<1x16x256xf32>
    %138 = vector.shape_cast %137 : vector<1x16x256xf32> to vector<16x256xf32>
    %c1_88 = arith.constant 1 : index
    %c4_89 = arith.constant 4 : index
    %139 = memref.load %arg3[%c1_88, %c4_89] : memref<3x15xf32, #tpu.memory_space<smem>>
    %140 = vector.broadcast %139 : f32 to vector<16x256xf32>
    %141 = arith.subf %138, %140 : vector<16x256xf32>
    %142 = arith.mulf %141, %141 : vector<16x256xf32>
    %143 = arith.addf %136, %142 : vector<16x256xf32>
    %c2_90 = arith.constant 2 : index
    %c0_91 = arith.constant 0 : index
    %c0_92 = arith.constant 0 : index
    %144 = vector.load %arg1[%c2_90, %c0_91, %c0_92] : memref<3x16x256xf32, #tpu.memory_space<vmem>>, vector<1x16x256xf32>
    %145 = vector.shape_cast %144 : vector<1x16x256xf32> to vector<16x256xf32>
    %c2_93 = arith.constant 2 : index
    %c4_94 = arith.constant 4 : index
    %146 = memref.load %arg3[%c2_93, %c4_94] : memref<3x15xf32, #tpu.memory_space<smem>>
    %147 = vector.broadcast %146 : f32 to vector<16x256xf32>
    %148 = arith.subf %145, %147 : vector<16x256xf32>
    %149 = arith.mulf %148, %148 : vector<16x256xf32>
    %150 = arith.addf %143, %149 : vector<16x256xf32>
    %151 = math.sqrt %150 : vector<16x256xf32>
    %cst_95 = arith.constant 1.000000e+00 : f32
    %152 = vector.broadcast %cst_95 : f32 to vector<16x256xf32>
    %153 = arith.mulf %151, %152 : vector<16x256xf32>
    %cst_96 = arith.constant 1.000000e+00 : f32
    %154 = vector.broadcast %cst_96 : f32 to vector<16x256xf32>
    %155 = arith.subf %154, %153 : vector<16x256xf32>
    %cst_97 = arith.constant 0.000000e+00 : f32
    %156 = vector.broadcast %cst_97 : f32 to vector<16x256xf32>
    %157 = arith.maximumf %155, %156 : vector<16x256xf32>
    %158 = vector.shape_cast %157 : vector<16x256xf32> to vector<1x16x256xf32>
    %159 = vector.broadcast %158 : vector<1x16x256xf32> to vector<8x16x256xf32>
    %160 = arith.mulf %159, %2 : vector<8x16x256xf32>
    %cst_98 = arith.constant dense<0.000000e+00> : vector<8x256xf32>
    %161 = vector.multi_reduction <add>, %160, %cst_98 [1] : vector<8x16x256xf32> to vector<8x256xf32>
    %c32 = arith.constant 32 : index
    %c0_99 = arith.constant 0 : index
    %162 = vector.load %arg8[%c32, %c0_99] : memref<128x256xf32, #tpu.memory_space<vmem>>, vector<8x256xf32>
    tpu.vector_store %arg8[%c32, %c0_99], %161 {strides = array<i32>} : memref<128x256xf32, #tpu.memory_space<vmem>>, vector<8x256xf32>,
    %c0_100 = arith.constant 0 : index
    %c0_101 = arith.constant 0 : index
    %c0_102 = arith.constant 0 : index
    %163 = vector.load %arg1[%c0_100, %c0_101, %c0_102] : memref<3x16x256xf32, #tpu.memory_space<vmem>>, vector<1x16x256xf32>
    %164 = vector.shape_cast %163 : vector<1x16x256xf32> to vector<16x256xf32>
    %c0_103 = arith.constant 0 : index
    %c5 = arith.constant 5 : index
    %165 = memref.load %arg3[%c0_103, %c5] : memref<3x15xf32, #tpu.memory_space<smem>>
    %166 = vector.broadcast %165 : f32 to vector<16x256xf32>
    %167 = arith.subf %164, %166 : vector<16x256xf32>
    %168 = arith.mulf %167, %167 : vector<16x256xf32>
    %c1_104 = arith.constant 1 : index
    %c0_105 = arith.constant 0 : index
    %c0_106 = arith.constant 0 : index
    %169 = vector.load %arg1[%c1_104, %c0_105, %c0_106] : memref<3x16x256xf32, #tpu.memory_space<vmem>>, vector<1x16x256xf32>
    %170 = vector.shape_cast %169 : vector<1x16x256xf32> to vector<16x256xf32>
    %c1_107 = arith.constant 1 : index
    %c5_108 = arith.constant 5 : index
    %171 = memref.load %arg3[%c1_107, %c5_108] : memref<3x15xf32, #tpu.memory_space<smem>>
    %172 = vector.broadcast %171 : f32 to vector<16x256xf32>
    %173 = arith.subf %170, %172 : vector<16x256xf32>
    %174 = arith.mulf %173, %173 : vector<16x256xf32>
    %175 = arith.addf %168, %174 : vector<16x256xf32>
    %c2_109 = arith.constant 2 : index
    %c0_110 = arith.constant 0 : index
    %c0_111 = arith.constant 0 : index
    %176 = vector.load %arg1[%c2_109, %c0_110, %c0_111] : memref<3x16x256xf32, #tpu.memory_space<vmem>>, vector<1x16x256xf32>
    %177 = vector.shape_cast %176 : vector<1x16x256xf32> to vector<16x256xf32>
    %c2_112 = arith.constant 2 : index
    %c5_113 = arith.constant 5 : index
    %178 = memref.load %arg3[%c2_112, %c5_113] : memref<3x15xf32, #tpu.memory_space<smem>>
    %179 = vector.broadcast %178 : f32 to vector<16x256xf32>
    %180 = arith.subf %177, %179 : vector<16x256xf32>
    %181 = arith.mulf %180, %180 : vector<16x256xf32>
    %182 = arith.addf %175, %181 : vector<16x256xf32>
    %183 = math.sqrt %182 : vector<16x256xf32>
    %cst_114 = arith.constant 1.000000e+00 : f32
    %184 = vector.broadcast %cst_114 : f32 to vector<16x256xf32>
    %185 = arith.mulf %183, %184 : vector<16x256xf32>
    %cst_115 = arith.constant 1.000000e+00 : f32
    %186 = vector.broadcast %cst_115 : f32 to vector<16x256xf32>
    %187 = arith.subf %186, %185 : vector<16x256xf32>
    %cst_116 = arith.constant 0.000000e+00 : f32
    %188 = vector.broadcast %cst_116 : f32 to vector<16x256xf32>
    %189 = arith.maximumf %187, %188 : vector<16x256xf32>
    %190 = vector.shape_cast %189 : vector<16x256xf32> to vector<1x16x256xf32>
    %191 = vector.broadcast %190 : vector<1x16x256xf32> to vector<8x16x256xf32>
    %192 = arith.mulf %191, %2 : vector<8x16x256xf32>
    %cst_117 = arith.constant dense<0.000000e+00> : vector<8x256xf32>
    %193 = vector.multi_reduction <add>, %192, %cst_117 [1] : vector<8x16x256xf32> to vector<8x256xf32>
    %c40 = arith.constant 40 : index
    %c0_118 = arith.constant 0 : index
    %194 = vector.load %arg8[%c40, %c0_118] : memref<128x256xf32, #tpu.memory_space<vmem>>, vector<8x256xf32>
    tpu.vector_store %arg8[%c40, %c0_118], %193 {strides = array<i32>} : memref<128x256xf32, #tpu.memory_space<vmem>>, vector<8x256xf32>,
    %c0_119 = arith.constant 0 : index
    %c0_120 = arith.constant 0 : index
    %c0_121 = arith.constant 0 : index
    %195 = vector.load %arg1[%c0_119, %c0_120, %c0_121] : memref<3x16x256xf32, #tpu.memory_space<vmem>>, vector<1x16x256xf32>
    %196 = vector.shape_cast %195 : vector<1x16x256xf32> to vector<16x256xf32>
    %c0_122 = arith.constant 0 : index
    %c6 = arith.constant 6 : index
    %197 = memref.load %arg3[%c0_122, %c6] : memref<3x15xf32, #tpu.memory_space<smem>>
    %198 = vector.broadcast %197 : f32 to vector<16x256xf32>
    %199 = arith.subf %196, %198 : vector<16x256xf32>
    %200 = arith.mulf %199, %199 : vector<16x256xf32>
    %c1_123 = arith.constant 1 : index
    %c0_124 = arith.constant 0 : index
    %c0_125 = arith.constant 0 : index
    %201 = vector.load %arg1[%c1_123, %c0_124, %c0_125] : memref<3x16x256xf32, #tpu.memory_space<vmem>>, vector<1x16x256xf32>
    %202 = vector.shape_cast %201 : vector<1x16x256xf32> to vector<16x256xf32>
    %c1_126 = arith.constant 1 : index
    %c6_127 = arith.constant 6 : index
    %203 = memref.load %arg3[%c1_126, %c6_127] : memref<3x15xf32, #tpu.memory_space<smem>>
    %204 = vector.broadcast %203 : f32 to vector<16x256xf32>
    %205 = arith.subf %202, %204 : vector<16x256xf32>
    %206 = arith.mulf %205, %205 : vector<16x256xf32>
    %207 = arith.addf %200, %206 : vector<16x256xf32>
    %c2_128 = arith.constant 2 : index
    %c0_129 = arith.constant 0 : index
    %c0_130 = arith.constant 0 : index
    %208 = vector.load %arg1[%c2_128, %c0_129, %c0_130] : memref<3x16x256xf32, #tpu.memory_space<vmem>>, vector<1x16x256xf32>
    %209 = vector.shape_cast %208 : vector<1x16x256xf32> to vector<16x256xf32>
    %c2_131 = arith.constant 2 : index
    %c6_132 = arith.constant 6 : index
    %210 = memref.load %arg3[%c2_131, %c6_132] : memref<3x15xf32, #tpu.memory_space<smem>>
    %211 = vector.broadcast %210 : f32 to vector<16x256xf32>
    %212 = arith.subf %209, %211 : vector<16x256xf32>
    %213 = arith.mulf %212, %212 : vector<16x256xf32>
    %214 = arith.addf %207, %213 : vector<16x256xf32>
    %215 = math.sqrt %214 : vector<16x256xf32>
    %cst_133 = arith.constant 1.000000e+00 : f32
    %216 = vector.broadcast %cst_133 : f32 to vector<16x256xf32>
    %217 = arith.mulf %215, %216 : vector<16x256xf32>
    %cst_134 = arith.constant 1.000000e+00 : f32
    %218 = vector.broadcast %cst_134 : f32 to vector<16x256xf32>
    %219 = arith.subf %218, %217 : vector<16x256xf32>
    %cst_135 = arith.constant 0.000000e+00 : f32
    %220 = vector.broadcast %cst_135 : f32 to vector<16x256xf32>
    %221 = arith.maximumf %219, %220 : vector<16x256xf32>
    %222 = vector.shape_cast %221 : vector<16x256xf32> to vector<1x16x256xf32>
    %223 = vector.broadcast %222 : vector<1x16x256xf32> to vector<8x16x256xf32>
    %224 = arith.mulf %223, %2 : vector<8x16x256xf32>
    %cst_136 = arith.constant dense<0.000000e+00> : vector<8x256xf32>
    %225 = vector.multi_reduction <add>, %224, %cst_136 [1] : vector<8x16x256xf32> to vector<8x256xf32>
    %c48 = arith.constant 48 : index
    %c0_137 = arith.constant 0 : index
    %226 = vector.load %arg8[%c48, %c0_137] : memref<128x256xf32, #tpu.memory_space<vmem>>, vector<8x256xf32>
    tpu.vector_store %arg8[%c48, %c0_137], %225 {strides = array<i32>} : memref<128x256xf32, #tpu.memory_space<vmem>>, vector<8x256xf32>,
    %c0_138 = arith.constant 0 : index
    %c0_139 = arith.constant 0 : index
    %c0_140 = arith.constant 0 : index
    %227 = vector.load %arg1[%c0_138, %c0_139, %c0_140] : memref<3x16x256xf32, #tpu.memory_space<vmem>>, vector<1x16x256xf32>
    %228 = vector.shape_cast %227 : vector<1x16x256xf32> to vector<16x256xf32>
    %c0_141 = arith.constant 0 : index
    %c7 = arith.constant 7 : index
    %229 = memref.load %arg3[%c0_141, %c7] : memref<3x15xf32, #tpu.memory_space<smem>>
    %230 = vector.broadcast %229 : f32 to vector<16x256xf32>
    %231 = arith.subf %228, %230 : vector<16x256xf32>
    %232 = arith.mulf %231, %231 : vector<16x256xf32>
    %c1_142 = arith.constant 1 : index
    %c0_143 = arith.constant 0 : index
    %c0_144 = arith.constant 0 : index
    %233 = vector.load %arg1[%c1_142, %c0_143, %c0_144] : memref<3x16x256xf32, #tpu.memory_space<vmem>>, vector<1x16x256xf32>
    %234 = vector.shape_cast %233 : vector<1x16x256xf32> to vector<16x256xf32>
    %c1_145 = arith.constant 1 : index
    %c7_146 = arith.constant 7 : index
    %235 = memref.load %arg3[%c1_145, %c7_146] : memref<3x15xf32, #tpu.memory_space<smem>>
    %236 = vector.broadcast %235 : f32 to vector<16x256xf32>
    %237 = arith.subf %234, %236 : vector<16x256xf32>
    %238 = arith.mulf %237, %237 : vector<16x256xf32>
    %239 = arith.addf %232, %238 : vector<16x256xf32>
    %c2_147 = arith.constant 2 : index
    %c0_148 = arith.constant 0 : index
    %c0_149 = arith.constant 0 : index
    %240 = vector.load %arg1[%c2_147, %c0_148, %c0_149] : memref<3x16x256xf32, #tpu.memory_space<vmem>>, vector<1x16x256xf32>
    %241 = vector.shape_cast %240 : vector<1x16x256xf32> to vector<16x256xf32>
    %c2_150 = arith.constant 2 : index
    %c7_151 = arith.constant 7 : index
    %242 = memref.load %arg3[%c2_150, %c7_151] : memref<3x15xf32, #tpu.memory_space<smem>>
    %243 = vector.broadcast %242 : f32 to vector<16x256xf32>
    %244 = arith.subf %241, %243 : vector<16x256xf32>
    %245 = arith.mulf %244, %244 : vector<16x256xf32>
    %246 = arith.addf %239, %245 : vector<16x256xf32>
    %247 = math.sqrt %246 : vector<16x256xf32>
    %cst_152 = arith.constant 1.000000e+00 : f32
    %248 = vector.broadcast %cst_152 : f32 to vector<16x256xf32>
    %249 = arith.mulf %247, %248 : vector<16x256xf32>
    %cst_153 = arith.constant 1.000000e+00 : f32
    %250 = vector.broadcast %cst_153 : f32 to vector<16x256xf32>
    %251 = arith.subf %250, %249 : vector<16x256xf32>
    %cst_154 = arith.constant 0.000000e+00 : f32
    %252 = vector.broadcast %cst_154 : f32 to vector<16x256xf32>
    %253 = arith.maximumf %251, %252 : vector<16x256xf32>
    %254 = vector.shape_cast %253 : vector<16x256xf32> to vector<1x16x256xf32>
    %255 = vector.broadcast %254 : vector<1x16x256xf32> to vector<8x16x256xf32>
    %256 = arith.mulf %255, %2 : vector<8x16x256xf32>
    %cst_155 = arith.constant dense<0.000000e+00> : vector<8x256xf32>
    %257 = vector.multi_reduction <add>, %256, %cst_155 [1] : vector<8x16x256xf32> to vector<8x256xf32>
    %c56 = arith.constant 56 : index
    %c0_156 = arith.constant 0 : index
    %258 = vector.load %arg8[%c56, %c0_156] : memref<128x256xf32, #tpu.memory_space<vmem>>, vector<8x256xf32>
    tpu.vector_store %arg8[%c56, %c0_156], %257 {strides = array<i32>} : memref<128x256xf32, #tpu.memory_space<vmem>>, vector<8x256xf32>,
    %c0_157 = arith.constant 0 : index
    %c0_158 = arith.constant 0 : index
    %c0_159 = arith.constant 0 : index
    %259 = vector.load %arg1[%c0_157, %c0_158, %c0_159] : memref<3x16x256xf32, #tpu.memory_space<vmem>>, vector<1x16x256xf32>
    %260 = vector.shape_cast %259 : vector<1x16x256xf32> to vector<16x256xf32>
    %c0_160 = arith.constant 0 : index
    %c8_161 = arith.constant 8 : index
    %261 = memref.load %arg3[%c0_160, %c8_161] : memref<3x15xf32, #tpu.memory_space<smem>>
    %262 = vector.broadcast %261 : f32 to vector<16x256xf32>
    %263 = arith.subf %260, %262 : vector<16x256xf32>
    %264 = arith.mulf %263, %263 : vector<16x256xf32>
    %c1_162 = arith.constant 1 : index
    %c0_163 = arith.constant 0 : index
    %c0_164 = arith.constant 0 : index
    %265 = vector.load %arg1[%c1_162, %c0_163, %c0_164] : memref<3x16x256xf32, #tpu.memory_space<vmem>>, vector<1x16x256xf32>
    %266 = vector.shape_cast %265 : vector<1x16x256xf32> to vector<16x256xf32>
    %c1_165 = arith.constant 1 : index
    %c8_166 = arith.constant 8 : index
    %267 = memref.load %arg3[%c1_165, %c8_166] : memref<3x15xf32, #tpu.memory_space<smem>>
    %268 = vector.broadcast %267 : f32 to vector<16x256xf32>
    %269 = arith.subf %266, %268 : vector<16x256xf32>
    %270 = arith.mulf %269, %269 : vector<16x256xf32>
    %271 = arith.addf %264, %270 : vector<16x256xf32>
    %c2_167 = arith.constant 2 : index
    %c0_168 = arith.constant 0 : index
    %c0_169 = arith.constant 0 : index
    %272 = vector.load %arg1[%c2_167, %c0_168, %c0_169] : memref<3x16x256xf32, #tpu.memory_space<vmem>>, vector<1x16x256xf32>
    %273 = vector.shape_cast %272 : vector<1x16x256xf32> to vector<16x256xf32>
    %c2_170 = arith.constant 2 : index
    %c8_171 = arith.constant 8 : index
    %274 = memref.load %arg3[%c2_170, %c8_171] : memref<3x15xf32, #tpu.memory_space<smem>>
    %275 = vector.broadcast %274 : f32 to vector<16x256xf32>
    %276 = arith.subf %273, %275 : vector<16x256xf32>
    %277 = arith.mulf %276, %276 : vector<16x256xf32>
    %278 = arith.addf %271, %277 : vector<16x256xf32>
    %279 = math.sqrt %278 : vector<16x256xf32>
    %cst_172 = arith.constant 1.000000e+00 : f32
    %280 = vector.broadcast %cst_172 : f32 to vector<16x256xf32>
    %281 = arith.mulf %279, %280 : vector<16x256xf32>
    %cst_173 = arith.constant 1.000000e+00 : f32
    %282 = vector.broadcast %cst_173 : f32 to vector<16x256xf32>
    %283 = arith.subf %282, %281 : vector<16x256xf32>
    %cst_174 = arith.constant 0.000000e+00 : f32
    %284 = vector.broadcast %cst_174 : f32 to vector<16x256xf32>
    %285 = arith.maximumf %283, %284 : vector<16x256xf32>
    %286 = vector.shape_cast %285 : vector<16x256xf32> to vector<1x16x256xf32>
    %287 = vector.broadcast %286 : vector<1x16x256xf32> to vector<8x16x256xf32>
    %288 = arith.mulf %287, %2 : vector<8x16x256xf32>
    %cst_175 = arith.constant dense<0.000000e+00> : vector<8x256xf32>
    %289 = vector.multi_reduction <add>, %288, %cst_175 [1] : vector<8x16x256xf32> to vector<8x256xf32>
    %c64 = arith.constant 64 : index
    %c0_176 = arith.constant 0 : index
    %290 = vector.load %arg8[%c64, %c0_176] : memref<128x256xf32, #tpu.memory_space<vmem>>, vector<8x256xf32>
    tpu.vector_store %arg8[%c64, %c0_176], %289 {strides = array<i32>} : memref<128x256xf32, #tpu.memory_space<vmem>>, vector<8x256xf32>,
    %c0_177 = arith.constant 0 : index
    %c0_178 = arith.constant 0 : index
    %c0_179 = arith.constant 0 : index
    %291 = vector.load %arg1[%c0_177, %c0_178, %c0_179] : memref<3x16x256xf32, #tpu.memory_space<vmem>>, vector<1x16x256xf32>
    %292 = vector.shape_cast %291 : vector<1x16x256xf32> to vector<16x256xf32>
    %c0_180 = arith.constant 0 : index
    %c9 = arith.constant 9 : index
    %293 = memref.load %arg3[%c0_180, %c9] : memref<3x15xf32, #tpu.memory_space<smem>>
    %294 = vector.broadcast %293 : f32 to vector<16x256xf32>
    %295 = arith.subf %292, %294 : vector<16x256xf32>
    %296 = arith.mulf %295, %295 : vector<16x256xf32>
    %c1_181 = arith.constant 1 : index
    %c0_182 = arith.constant 0 : index
    %c0_183 = arith.constant 0 : index
    %297 = vector.load %arg1[%c1_181, %c0_182, %c0_183] : memref<3x16x256xf32, #tpu.memory_space<vmem>>, vector<1x16x256xf32>
    %298 = vector.shape_cast %297 : vector<1x16x256xf32> to vector<16x256xf32>
    %c1_184 = arith.constant 1 : index
    %c9_185 = arith.constant 9 : index
    %299 = memref.load %arg3[%c1_184, %c9_185] : memref<3x15xf32, #tpu.memory_space<smem>>
    %300 = vector.broadcast %299 : f32 to vector<16x256xf32>
    %301 = arith.subf %298, %300 : vector<16x256xf32>
    %302 = arith.mulf %301, %301 : vector<16x256xf32>
    %303 = arith.addf %296, %302 : vector<16x256xf32>
    %c2_186 = arith.constant 2 : index
    %c0_187 = arith.constant 0 : index
    %c0_188 = arith.constant 0 : index
    %304 = vector.load %arg1[%c2_186, %c0_187, %c0_188] : memref<3x16x256xf32, #tpu.memory_space<vmem>>, vector<1x16x256xf32>
    %305 = vector.shape_cast %304 : vector<1x16x256xf32> to vector<16x256xf32>
    %c2_189 = arith.constant 2 : index
    %c9_190 = arith.constant 9 : index
    %306 = memref.load %arg3[%c2_189, %c9_190] : memref<3x15xf32, #tpu.memory_space<smem>>
    %307 = vector.broadcast %306 : f32 to vector<16x256xf32>
    %308 = arith.subf %305, %307 : vector<16x256xf32>
    %309 = arith.mulf %308, %308 : vector<16x256xf32>
    %310 = arith.addf %303, %309 : vector<16x256xf32>
    %311 = math.sqrt %310 : vector<16x256xf32>
    %cst_191 = arith.constant 1.000000e+00 : f32
    %312 = vector.broadcast %cst_191 : f32 to vector<16x256xf32>
    %313 = arith.mulf %311, %312 : vector<16x256xf32>
    %cst_192 = arith.constant 1.000000e+00 : f32
    %314 = vector.broadcast %cst_192 : f32 to vector<16x256xf32>
    %315 = arith.subf %314, %313 : vector<16x256xf32>
    %cst_193 = arith.constant 0.000000e+00 : f32
    %316 = vector.broadcast %cst_193 : f32 to vector<16x256xf32>
    %317 = arith.maximumf %315, %316 : vector<16x256xf32>
    %318 = vector.shape_cast %317 : vector<16x256xf32> to vector<1x16x256xf32>
    %319 = vector.broadcast %318 : vector<1x16x256xf32> to vector<8x16x256xf32>
    %320 = arith.mulf %319, %2 : vector<8x16x256xf32>
    %cst_194 = arith.constant dense<0.000000e+00> : vector<8x256xf32>
    %321 = vector.multi_reduction <add>, %320, %cst_194 [1] : vector<8x16x256xf32> to vector<8x256xf32>
    %c72 = arith.constant 72 : index
    %c0_195 = arith.constant 0 : index
    %322 = vector.load %arg8[%c72, %c0_195] : memref<128x256xf32, #tpu.memory_space<vmem>>, vector<8x256xf32>
    tpu.vector_store %arg8[%c72, %c0_195], %321 {strides = array<i32>} : memref<128x256xf32, #tpu.memory_space<vmem>>, vector<8x256xf32>,
    %c0_196 = arith.constant 0 : index
    %c0_197 = arith.constant 0 : index
    %c0_198 = arith.constant 0 : index
    %323 = vector.load %arg1[%c0_196, %c0_197, %c0_198] : memref<3x16x256xf32, #tpu.memory_space<vmem>>, vector<1x16x256xf32>
    %324 = vector.shape_cast %323 : vector<1x16x256xf32> to vector<16x256xf32>
    %c0_199 = arith.constant 0 : index
    %c10 = arith.constant 10 : index
    %325 = memref.load %arg3[%c0_199, %c10] : memref<3x15xf32, #tpu.memory_space<smem>>
    %326 = vector.broadcast %325 : f32 to vector<16x256xf32>
    %327 = arith.subf %324, %326 : vector<16x256xf32>
    %328 = arith.mulf %327, %327 : vector<16x256xf32>
    %c1_200 = arith.constant 1 : index
    %c0_201 = arith.constant 0 : index
    %c0_202 = arith.constant 0 : index
    %329 = vector.load %arg1[%c1_200, %c0_201, %c0_202] : memref<3x16x256xf32, #tpu.memory_space<vmem>>, vector<1x16x256xf32>
    %330 = vector.shape_cast %329 : vector<1x16x256xf32> to vector<16x256xf32>
    %c1_203 = arith.constant 1 : index
    %c10_204 = arith.constant 10 : index
    %331 = memref.load %arg3[%c1_203, %c10_204] : memref<3x15xf32, #tpu.memory_space<smem>>
    %332 = vector.broadcast %331 : f32 to vector<16x256xf32>
    %333 = arith.subf %330, %332 : vector<16x256xf32>
    %334 = arith.mulf %333, %333 : vector<16x256xf32>
    %335 = arith.addf %328, %334 : vector<16x256xf32>
    %c2_205 = arith.constant 2 : index
    %c0_206 = arith.constant 0 : index
    %c0_207 = arith.constant 0 : index
    %336 = vector.load %arg1[%c2_205, %c0_206, %c0_207] : memref<3x16x256xf32, #tpu.memory_space<vmem>>, vector<1x16x256xf32>
    %337 = vector.shape_cast %336 : vector<1x16x256xf32> to vector<16x256xf32>
    %c2_208 = arith.constant 2 : index
    %c10_209 = arith.constant 10 : index
    %338 = memref.load %arg3[%c2_208, %c10_209] : memref<3x15xf32, #tpu.memory_space<smem>>
    %339 = vector.broadcast %338 : f32 to vector<16x256xf32>
    %340 = arith.subf %337, %339 : vector<16x256xf32>
    %341 = arith.mulf %340, %340 : vector<16x256xf32>
    %342 = arith.addf %335, %341 : vector<16x256xf32>
    %343 = math.sqrt %342 : vector<16x256xf32>
    %cst_210 = arith.constant 1.000000e+00 : f32
    %344 = vector.broadcast %cst_210 : f32 to vector<16x256xf32>
    %345 = arith.mulf %343, %344 : vector<16x256xf32>
    %cst_211 = arith.constant 1.000000e+00 : f32
    %346 = vector.broadcast %cst_211 : f32 to vector<16x256xf32>
    %347 = arith.subf %346, %345 : vector<16x256xf32>
    %cst_212 = arith.constant 0.000000e+00 : f32
    %348 = vector.broadcast %cst_212 : f32 to vector<16x256xf32>
    %349 = arith.maximumf %347, %348 : vector<16x256xf32>
    %350 = vector.shape_cast %349 : vector<16x256xf32> to vector<1x16x256xf32>
    %351 = vector.broadcast %350 : vector<1x16x256xf32> to vector<8x16x256xf32>
    %352 = arith.mulf %351, %2 : vector<8x16x256xf32>
    %cst_213 = arith.constant dense<0.000000e+00> : vector<8x256xf32>
    %353 = vector.multi_reduction <add>, %352, %cst_213 [1] : vector<8x16x256xf32> to vector<8x256xf32>
    %c80 = arith.constant 80 : index
    %c0_214 = arith.constant 0 : index
    %354 = vector.load %arg8[%c80, %c0_214] : memref<128x256xf32, #tpu.memory_space<vmem>>, vector<8x256xf32>
    tpu.vector_store %arg8[%c80, %c0_214], %353 {strides = array<i32>} : memref<128x256xf32, #tpu.memory_space<vmem>>, vector<8x256xf32>,
    %c0_215 = arith.constant 0 : index
    %c0_216 = arith.constant 0 : index
    %c0_217 = arith.constant 0 : index
    %355 = vector.load %arg1[%c0_215, %c0_216, %c0_217] : memref<3x16x256xf32, #tpu.memory_space<vmem>>, vector<1x16x256xf32>
    %356 = vector.shape_cast %355 : vector<1x16x256xf32> to vector<16x256xf32>
    %c0_218 = arith.constant 0 : index
    %c11 = arith.constant 11 : index
    %357 = memref.load %arg3[%c0_218, %c11] : memref<3x15xf32, #tpu.memory_space<smem>>
    %358 = vector.broadcast %357 : f32 to vector<16x256xf32>
    %359 = arith.subf %356, %358 : vector<16x256xf32>
    %360 = arith.mulf %359, %359 : vector<16x256xf32>
    %c1_219 = arith.constant 1 : index
    %c0_220 = arith.constant 0 : index
    %c0_221 = arith.constant 0 : index
    %361 = vector.load %arg1[%c1_219, %c0_220, %c0_221] : memref<3x16x256xf32, #tpu.memory_space<vmem>>, vector<1x16x256xf32>
    %362 = vector.shape_cast %361 : vector<1x16x256xf32> to vector<16x256xf32>
    %c1_222 = arith.constant 1 : index
    %c11_223 = arith.constant 11 : index
    %363 = memref.load %arg3[%c1_222, %c11_223] : memref<3x15xf32, #tpu.memory_space<smem>>
    %364 = vector.broadcast %363 : f32 to vector<16x256xf32>
    %365 = arith.subf %362, %364 : vector<16x256xf32>
    %366 = arith.mulf %365, %365 : vector<16x256xf32>
    %367 = arith.addf %360, %366 : vector<16x256xf32>
    %c2_224 = arith.constant 2 : index
    %c0_225 = arith.constant 0 : index
    %c0_226 = arith.constant 0 : index
    %368 = vector.load %arg1[%c2_224, %c0_225, %c0_226] : memref<3x16x256xf32, #tpu.memory_space<vmem>>, vector<1x16x256xf32>
    %369 = vector.shape_cast %368 : vector<1x16x256xf32> to vector<16x256xf32>
    %c2_227 = arith.constant 2 : index
    %c11_228 = arith.constant 11 : index
    %370 = memref.load %arg3[%c2_227, %c11_228] : memref<3x15xf32, #tpu.memory_space<smem>>
    %371 = vector.broadcast %370 : f32 to vector<16x256xf32>
    %372 = arith.subf %369, %371 : vector<16x256xf32>
    %373 = arith.mulf %372, %372 : vector<16x256xf32>
    %374 = arith.addf %367, %373 : vector<16x256xf32>
    %375 = math.sqrt %374 : vector<16x256xf32>
    %cst_229 = arith.constant 1.000000e+00 : f32
    %376 = vector.broadcast %cst_229 : f32 to vector<16x256xf32>
    %377 = arith.mulf %375, %376 : vector<16x256xf32>
    %cst_230 = arith.constant 1.000000e+00 : f32
    %378 = vector.broadcast %cst_230 : f32 to vector<16x256xf32>
    %379 = arith.subf %378, %377 : vector<16x256xf32>
    %cst_231 = arith.constant 0.000000e+00 : f32
    %380 = vector.broadcast %cst_231 : f32 to vector<16x256xf32>
    %381 = arith.maximumf %379, %380 : vector<16x256xf32>
    %382 = vector.shape_cast %381 : vector<16x256xf32> to vector<1x16x256xf32>
    %383 = vector.broadcast %382 : vector<1x16x256xf32> to vector<8x16x256xf32>
    %384 = arith.mulf %383, %2 : vector<8x16x256xf32>
    %cst_232 = arith.constant dense<0.000000e+00> : vector<8x256xf32>
    %385 = vector.multi_reduction <add>, %384, %cst_232 [1] : vector<8x16x256xf32> to vector<8x256xf32>
    %c88 = arith.constant 88 : index
    %c0_233 = arith.constant 0 : index
    %386 = vector.load %arg8[%c88, %c0_233] : memref<128x256xf32, #tpu.memory_space<vmem>>, vector<8x256xf32>
    tpu.vector_store %arg8[%c88, %c0_233], %385 {strides = array<i32>} : memref<128x256xf32, #tpu.memory_space<vmem>>, vector<8x256xf32>,
    %c0_234 = arith.constant 0 : index
    %c0_235 = arith.constant 0 : index
    %c0_236 = arith.constant 0 : index
    %387 = vector.load %arg1[%c0_234, %c0_235, %c0_236] : memref<3x16x256xf32, #tpu.memory_space<vmem>>, vector<1x16x256xf32>
    %388 = vector.shape_cast %387 : vector<1x16x256xf32> to vector<16x256xf32>
    %c0_237 = arith.constant 0 : index
    %c12 = arith.constant 12 : index
    %389 = memref.load %arg3[%c0_237, %c12] : memref<3x15xf32, #tpu.memory_space<smem>>
    %390 = vector.broadcast %389 : f32 to vector<16x256xf32>
    %391 = arith.subf %388, %390 : vector<16x256xf32>
    %392 = arith.mulf %391, %391 : vector<16x256xf32>
    %c1_238 = arith.constant 1 : index
    %c0_239 = arith.constant 0 : index
    %c0_240 = arith.constant 0 : index
    %393 = vector.load %arg1[%c1_238, %c0_239, %c0_240] : memref<3x16x256xf32, #tpu.memory_space<vmem>>, vector<1x16x256xf32>
    %394 = vector.shape_cast %393 : vector<1x16x256xf32> to vector<16x256xf32>
    %c1_241 = arith.constant 1 : index
    %c12_242 = arith.constant 12 : index
    %395 = memref.load %arg3[%c1_241, %c12_242] : memref<3x15xf32, #tpu.memory_space<smem>>
    %396 = vector.broadcast %395 : f32 to vector<16x256xf32>
    %397 = arith.subf %394, %396 : vector<16x256xf32>
    %398 = arith.mulf %397, %397 : vector<16x256xf32>
    %399 = arith.addf %392, %398 : vector<16x256xf32>
    %c2_243 = arith.constant 2 : index
    %c0_244 = arith.constant 0 : index
    %c0_245 = arith.constant 0 : index
    %400 = vector.load %arg1[%c2_243, %c0_244, %c0_245] : memref<3x16x256xf32, #tpu.memory_space<vmem>>, vector<1x16x256xf32>
    %401 = vector.shape_cast %400 : vector<1x16x256xf32> to vector<16x256xf32>
    %c2_246 = arith.constant 2 : index
    %c12_247 = arith.constant 12 : index
    %402 = memref.load %arg3[%c2_246, %c12_247] : memref<3x15xf32, #tpu.memory_space<smem>>
    %403 = vector.broadcast %402 : f32 to vector<16x256xf32>
    %404 = arith.subf %401, %403 : vector<16x256xf32>
    %405 = arith.mulf %404, %404 : vector<16x256xf32>
    %406 = arith.addf %399, %405 : vector<16x256xf32>
    %407 = math.sqrt %406 : vector<16x256xf32>
    %cst_248 = arith.constant 1.000000e+00 : f32
    %408 = vector.broadcast %cst_248 : f32 to vector<16x256xf32>
    %409 = arith.mulf %407, %408 : vector<16x256xf32>
    %cst_249 = arith.constant 1.000000e+00 : f32
    %410 = vector.broadcast %cst_249 : f32 to vector<16x256xf32>
    %411 = arith.subf %410, %409 : vector<16x256xf32>
    %cst_250 = arith.constant 0.000000e+00 : f32
    %412 = vector.broadcast %cst_250 : f32 to vector<16x256xf32>
    %413 = arith.maximumf %411, %412 : vector<16x256xf32>
    %414 = vector.shape_cast %413 : vector<16x256xf32> to vector<1x16x256xf32>
    %415 = vector.broadcast %414 : vector<1x16x256xf32> to vector<8x16x256xf32>
    %416 = arith.mulf %415, %2 : vector<8x16x256xf32>
    %cst_251 = arith.constant dense<0.000000e+00> : vector<8x256xf32>
    %417 = vector.multi_reduction <add>, %416, %cst_251 [1] : vector<8x16x256xf32> to vector<8x256xf32>
    %c96 = arith.constant 96 : index
    %c0_252 = arith.constant 0 : index
    %418 = vector.load %arg8[%c96, %c0_252] : memref<128x256xf32, #tpu.memory_space<vmem>>, vector<8x256xf32>
    tpu.vector_store %arg8[%c96, %c0_252], %417 {strides = array<i32>} : memref<128x256xf32, #tpu.memory_space<vmem>>, vector<8x256xf32>,
    %c0_253 = arith.constant 0 : index
    %c0_254 = arith.constant 0 : index
    %c0_255 = arith.constant 0 : index
    %419 = vector.load %arg1[%c0_253, %c0_254, %c0_255] : memref<3x16x256xf32, #tpu.memory_space<vmem>>, vector<1x16x256xf32>
    %420 = vector.shape_cast %419 : vector<1x16x256xf32> to vector<16x256xf32>
    %c0_256 = arith.constant 0 : index
    %c13 = arith.constant 13 : index
    %421 = memref.load %arg3[%c0_256, %c13] : memref<3x15xf32, #tpu.memory_space<smem>>
    %422 = vector.broadcast %421 : f32 to vector<16x256xf32>
    %423 = arith.subf %420, %422 : vector<16x256xf32>
    %424 = arith.mulf %423, %423 : vector<16x256xf32>
    %c1_257 = arith.constant 1 : index
    %c0_258 = arith.constant 0 : index
    %c0_259 = arith.constant 0 : index
    %425 = vector.load %arg1[%c1_257, %c0_258, %c0_259] : memref<3x16x256xf32, #tpu.memory_space<vmem>>, vector<1x16x256xf32>
    %426 = vector.shape_cast %425 : vector<1x16x256xf32> to vector<16x256xf32>
    %c1_260 = arith.constant 1 : index
    %c13_261 = arith.constant 13 : index
    %427 = memref.load %arg3[%c1_260, %c13_261] : memref<3x15xf32, #tpu.memory_space<smem>>
    %428 = vector.broadcast %427 : f32 to vector<16x256xf32>
    %429 = arith.subf %426, %428 : vector<16x256xf32>
    %430 = arith.mulf %429, %429 : vector<16x256xf32>
    %431 = arith.addf %424, %430 : vector<16x256xf32>
    %c2_262 = arith.constant 2 : index
    %c0_263 = arith.constant 0 : index
    %c0_264 = arith.constant 0 : index
    %432 = vector.load %arg1[%c2_262, %c0_263, %c0_264] : memref<3x16x256xf32, #tpu.memory_space<vmem>>, vector<1x16x256xf32>
    %433 = vector.shape_cast %432 : vector<1x16x256xf32> to vector<16x256xf32>
    %c2_265 = arith.constant 2 : index
    %c13_266 = arith.constant 13 : index
    %434 = memref.load %arg3[%c2_265, %c13_266] : memref<3x15xf32, #tpu.memory_space<smem>>
    %435 = vector.broadcast %434 : f32 to vector<16x256xf32>
    %436 = arith.subf %433, %435 : vector<16x256xf32>
    %437 = arith.mulf %436, %436 : vector<16x256xf32>
    %438 = arith.addf %431, %437 : vector<16x256xf32>
    %439 = math.sqrt %438 : vector<16x256xf32>
    %cst_267 = arith.constant 1.000000e+00 : f32
    %440 = vector.broadcast %cst_267 : f32 to vector<16x256xf32>
    %441 = arith.mulf %439, %440 : vector<16x256xf32>
    %cst_268 = arith.constant 1.000000e+00 : f32
    %442 = vector.broadcast %cst_268 : f32 to vector<16x256xf32>
    %443 = arith.subf %442, %441 : vector<16x256xf32>
    %cst_269 = arith.constant 0.000000e+00 : f32
    %444 = vector.broadcast %cst_269 : f32 to vector<16x256xf32>
    %445 = arith.maximumf %443, %444 : vector<16x256xf32>
    %446 = vector.shape_cast %445 : vector<16x256xf32> to vector<1x16x256xf32>
    %447 = vector.broadcast %446 : vector<1x16x256xf32> to vector<8x16x256xf32>
    %448 = arith.mulf %447, %2 : vector<8x16x256xf32>
    %cst_270 = arith.constant dense<0.000000e+00> : vector<8x256xf32>
    %449 = vector.multi_reduction <add>, %448, %cst_270 [1] : vector<8x16x256xf32> to vector<8x256xf32>
    %c104 = arith.constant 104 : index
    %c0_271 = arith.constant 0 : index
    %450 = vector.load %arg8[%c104, %c0_271] : memref<128x256xf32, #tpu.memory_space<vmem>>, vector<8x256xf32>
    tpu.vector_store %arg8[%c104, %c0_271], %449 {strides = array<i32>} : memref<128x256xf32, #tpu.memory_space<vmem>>, vector<8x256xf32>,
    %c0_272 = arith.constant 0 : index
    %c0_273 = arith.constant 0 : index
    %c0_274 = arith.constant 0 : index
    %451 = vector.load %arg1[%c0_272, %c0_273, %c0_274] : memref<3x16x256xf32, #tpu.memory_space<vmem>>, vector<1x16x256xf32>
    %452 = vector.shape_cast %451 : vector<1x16x256xf32> to vector<16x256xf32>
    %c0_275 = arith.constant 0 : index
    %c14 = arith.constant 14 : index
    %453 = memref.load %arg3[%c0_275, %c14] : memref<3x15xf32, #tpu.memory_space<smem>>
    %454 = vector.broadcast %453 : f32 to vector<16x256xf32>
    %455 = arith.subf %452, %454 : vector<16x256xf32>
    %456 = arith.mulf %455, %455 : vector<16x256xf32>
    %c1_276 = arith.constant 1 : index
    %c0_277 = arith.constant 0 : index
    %c0_278 = arith.constant 0 : index
    %457 = vector.load %arg1[%c1_276, %c0_277, %c0_278] : memref<3x16x256xf32, #tpu.memory_space<vmem>>, vector<1x16x256xf32>
    %458 = vector.shape_cast %457 : vector<1x16x256xf32> to vector<16x256xf32>
    %c1_279 = arith.constant 1 : index
    %c14_280 = arith.constant 14 : index
    %459 = memref.load %arg3[%c1_279, %c14_280] : memref<3x15xf32, #tpu.memory_space<smem>>
    %460 = vector.broadcast %459 : f32 to vector<16x256xf32>
    %461 = arith.subf %458, %460 : vector<16x256xf32>
    %462 = arith.mulf %461, %461 : vector<16x256xf32>
    %463 = arith.addf %456, %462 : vector<16x256xf32>
    %c2_281 = arith.constant 2 : index
    %c0_282 = arith.constant 0 : index
    %c0_283 = arith.constant 0 : index
    %464 = vector.load %arg1[%c2_281, %c0_282, %c0_283] : memref<3x16x256xf32, #tpu.memory_space<vmem>>, vector<1x16x256xf32>
    %465 = vector.shape_cast %464 : vector<1x16x256xf32> to vector<16x256xf32>
    %c2_284 = arith.constant 2 : index
    %c14_285 = arith.constant 14 : index
    %466 = memref.load %arg3[%c2_284, %c14_285] : memref<3x15xf32, #tpu.memory_space<smem>>
    %467 = vector.broadcast %466 : f32 to vector<16x256xf32>
    %468 = arith.subf %465, %467 : vector<16x256xf32>
    %469 = arith.mulf %468, %468 : vector<16x256xf32>
    %470 = arith.addf %463, %469 : vector<16x256xf32>
    %471 = math.sqrt %470 : vector<16x256xf32>
    %cst_286 = arith.constant 1.000000e+00 : f32
    %472 = vector.broadcast %cst_286 : f32 to vector<16x256xf32>
    %473 = arith.mulf %471, %472 : vector<16x256xf32>
    %cst_287 = arith.constant 1.000000e+00 : f32
    %474 = vector.broadcast %cst_287 : f32 to vector<16x256xf32>
    %475 = arith.subf %474, %473 : vector<16x256xf32>
    %cst_288 = arith.constant 0.000000e+00 : f32
    %476 = vector.broadcast %cst_288 : f32 to vector<16x256xf32>
    %477 = arith.maximumf %475, %476 : vector<16x256xf32>
    %478 = vector.shape_cast %477 : vector<16x256xf32> to vector<1x16x256xf32>
    %479 = vector.broadcast %478 : vector<1x16x256xf32> to vector<8x16x256xf32>
    %480 = arith.mulf %479, %2 : vector<8x16x256xf32>
    %cst_289 = arith.constant dense<0.000000e+00> : vector<8x256xf32>
    %481 = vector.multi_reduction <add>, %480, %cst_289 [1] : vector<8x16x256xf32> to vector<8x256xf32>
    %c112 = arith.constant 112 : index
    %c0_290 = arith.constant 0 : index
    %482 = vector.load %arg8[%c112, %c0_290] : memref<128x256xf32, #tpu.memory_space<vmem>>, vector<8x256xf32>
    tpu.vector_store %arg8[%c112, %c0_290], %481 {strides = array<i32>} : memref<128x256xf32, #tpu.memory_space<vmem>>, vector<8x256xf32>,
    %c0_291 = arith.constant 0 : index
    %c0_292 = arith.constant 0 : index
    %483 = vector.load %arg4[%c0_291, %c0_292] : memref<16x128xf32, #tpu.memory_space<vmem>>, vector<16x128xf32>
    %c0_293 = arith.constant 0 : index
    %c0_294 = arith.constant 0 : index
    %484 = vector.load %arg8[%c0_293, %c0_294] : memref<128x256xf32, #tpu.memory_space<vmem>>, vector<128x256xf32>
    %cst_295 = arith.constant dense<0.000000e+00> : vector<16x256xf32>
    %485 = tpu.matmul %483, %484, %cst_295 {dimension_numbers = #tpu.dot_dimension_numbers<[1], [0], [0], [1], [0, 0, 1, 1], [], []>} : vector<16x128xf32>, vector<128x256xf32>, vector<16x256xf32> -> vector<16x256xf32>
    %c0_296 = arith.constant 0 : index
    %c0_297 = arith.constant 0 : index
    %486 = vector.load %arg5[%c0_296, %c0_297] : memref<16x256xf32, #tpu.memory_space<vmem>>, vector<16x256xf32>
    tpu.vector_store %arg5[%c0_296, %c0_297], %485 {strides = array<i32>} : memref<16x256xf32, #tpu.memory_space<vmem>>, vector<16x256xf32>,
    %cst_298 = arith.constant dense<0.000000e+00> : vector<16xf32>
    %487 = vector.multi_reduction <add>, %485, %cst_298 [1] : vector<16x256xf32> to vector<16xf32>
    %488 = vector.shape_cast %487 : vector<16xf32> to vector<16x1xf32>
    %cst_299 = arith.constant 3.906250e-03 : f32
    %489 = vector.broadcast %cst_299 : f32 to vector<16x1xf32>
    %490 = arith.mulf %488, %489 : vector<16x1xf32>
    %491 = vector.broadcast %490 : vector<16x1xf32> to vector<16x256xf32>
    %492 = arith.subf %485, %491 : vector<16x256xf32>
    %493 = arith.mulf %492, %492 : vector<16x256xf32>
    %cst_300 = arith.constant dense<0.000000e+00> : vector<16xf32>
    %494 = vector.multi_reduction <add>, %493, %cst_300 [1] : vector<16x256xf32> to vector<16xf32>
    %495 = vector.shape_cast %494 : vector<16xf32> to vector<16x1xf32>
    %496 = vector.shape_cast %490 : vector<16x1xf32> to vector<1x16x1xf32>
    %c0_301 = arith.constant 0 : index
    %c0_302 = arith.constant 0 : index
    %c0_303 = arith.constant 0 : index
    %497 = vector.load %arg6[%c0_301, %c0_302, %c0_303] : memref<1x16x1xf32, #tpu.memory_space<vmem>>, vector<1x16x1xf32>
    tpu.vector_store %arg6[%c0_301, %c0_302, %c0_303], %496 {strides = array<i32>} : memref<1x16x1xf32, #tpu.memory_space<vmem>>, vector<1x16x1xf32>,
    %498 = vector.shape_cast %495 : vector<16x1xf32> to vector<1x16x1xf32>
    %c0_304 = arith.constant 0 : index
    %c0_305 = arith.constant 0 : index
    %c0_306 = arith.constant 0 : index
    %499 = vector.load %arg7[%c0_304, %c0_305, %c0_306] : memref<1x16x1xf32, #tpu.memory_space<vmem>>, vector<1x16x1xf32>
    tpu.vector_store %arg7[%c0_304, %c0_305, %c0_306], %498 {strides = array<i32>} : memref<1x16x1xf32, #tpu.memory_space<vmem>>, vector<1x16x1xf32>,
    return
  }
  func.func @transform_0(%arg0: i32) -> (i32, i32, i32) {
    %c0_i32 = arith.constant 0 : i32
    %c0_i32_0 = arith.constant 0 : i32
    %c0_i32_1 = arith.constant 0 : i32
    return %c0_i32, %c0_i32_0, %arg0 : i32, i32, i32
  }
  func.func @transform_1(%arg0: i32) -> (i32, i32, i32) {
    %c0_i32 = arith.constant 0 : i32
    %c0_i32_0 = arith.constant 0 : i32
    %c0_i32_1 = arith.constant 0 : i32
    return %c0_i32, %c0_i32_0, %arg0 : i32, i32, i32
  }
  func.func @transform_2(%arg0: i32) -> (i32, i32) {
    %c0_i32 = arith.constant 0 : i32
    %c0_i32_0 = arith.constant 0 : i32
    %c0_i32_1 = arith.constant 0 : i32
    return %c0_i32, %c0_i32_0 : i32, i32
  }
  func.func @transform_3(%arg0: i32) -> (i32, i32) {
    %c0_i32 = arith.constant 0 : i32
    %c0_i32_0 = arith.constant 0 : i32
    %c0_i32_1 = arith.constant 0 : i32
    return %c0_i32, %c0_i32_0 : i32, i32
  }
  func.func @transform_4(%arg0: i32) -> (i32, i32) {
    %c0_i32 = arith.constant 0 : i32
    %c0_i32_0 = arith.constant 0 : i32
    return %c0_i32, %arg0 : i32, i32
  }
  func.func @transform_5(%arg0: i32) -> (i32, i32, i32) {
    %c0_i32 = arith.constant 0 : i32
    %c0_i32_0 = arith.constant 0 : i32
    %c0_i32_1 = arith.constant 0 : i32
    return %arg0, %c0_i32, %c0_i32_0 : i32, i32, i32
  }
  func.func @transform_6(%arg0: i32) -> (i32, i32, i32) {
    %c0_i32 = arith.constant 0 : i32
    %c0_i32_0 = arith.constant 0 : i32
    %c0_i32_1 = arith.constant 0 : i32
    return %arg0, %c0_i32, %c0_i32_0 : i32, i32, i32
  }
}

module attributes {stable_mosaic.version = 11 : i64} {
  func.func @_bn_lrelu_kernel(%arg0: i32, %arg1: memref<16x512xf32, #tpu.memory_space<vmem>>, %arg2: memref<16x1xf32, #tpu.memory_space<vmem>>, %arg3: memref<16x1xf32, #tpu.memory_space<vmem>>, %arg4: memref<16x512xf32, #tpu.memory_space<vmem>>) attributes {dimension_semantics = [#tpu.dimension_semantics<parallel>], iteration_bounds = array<i64: 1>, scalar_prefetch = 0 : i64, scratch_operands = 0 : i64, tpu.core_type = #tpu.core_type<tc>, window_params = [{transform_indices = @transform_0, window_bounds = array<i64: 16, 512>}, {pipeline_mode = #tpu.pipeline_mode<synchronous>, transform_indices = @transform_1, window_bounds = array<i64: 16, 1>}, {pipeline_mode = #tpu.pipeline_mode<synchronous>, transform_indices = @transform_2, window_bounds = array<i64: 16, 1>}, {transform_indices = @transform_3, window_bounds = array<i64: 16, 512>}]} {
    %c0 = arith.constant 0 : index
    %c0_0 = arith.constant 0 : index
    %0 = vector.load %arg1[%c0, %c0_0] : memref<16x512xf32, #tpu.memory_space<vmem>>, vector<16x512xf32>
    %c0_1 = arith.constant 0 : index
    %c0_2 = arith.constant 0 : index
    %1 = vector.load %arg2[%c0_1, %c0_2] : memref<16x1xf32, #tpu.memory_space<vmem>>, vector<16x1xf32>
    %2 = vector.broadcast %1 : vector<16x1xf32> to vector<16x512xf32>
    %3 = arith.mulf %0, %2 : vector<16x512xf32>
    %c0_3 = arith.constant 0 : index
    %c0_4 = arith.constant 0 : index
    %4 = vector.load %arg3[%c0_3, %c0_4] : memref<16x1xf32, #tpu.memory_space<vmem>>, vector<16x1xf32>
    %5 = vector.broadcast %4 : vector<16x1xf32> to vector<16x512xf32>
    %6 = arith.addf %3, %5 : vector<16x512xf32>
    %cst = arith.constant 0.000000e+00 : f32
    %7 = vector.broadcast %cst : f32 to vector<16x512xf32>
    %8 = arith.cmpf oge, %6, %7 : vector<16x512xf32>
    %cst_5 = arith.constant 2.000000e-01 : f32
    %9 = vector.broadcast %cst_5 : f32 to vector<16x512xf32>
    %10 = arith.mulf %9, %6 : vector<16x512xf32>
    %11 = arith.select %8, %6, %10 : vector<16x512xi1>, vector<16x512xf32>
    %c0_6 = arith.constant 0 : index
    %c0_7 = arith.constant 0 : index
    %12 = vector.load %arg4[%c0_6, %c0_7] : memref<16x512xf32, #tpu.memory_space<vmem>>, vector<16x512xf32>
    tpu.vector_store %arg4[%c0_6, %c0_7], %11 {strides = array<i32>} : memref<16x512xf32, #tpu.memory_space<vmem>>, vector<16x512xf32>,
    return
  }
  func.func @transform_0(%arg0: i32) -> (i32, i32) {
    %c0_i32 = arith.constant 0 : i32
    %c0_i32_0 = arith.constant 0 : i32
    return %c0_i32, %arg0 : i32, i32
  }
  func.func @transform_1(%arg0: i32) -> (i32, i32) {
    %c0_i32 = arith.constant 0 : i32
    %c0_i32_0 = arith.constant 0 : i32
    %c0_i32_1 = arith.constant 0 : i32
    return %c0_i32, %c0_i32_0 : i32, i32
  }
  func.func @transform_2(%arg0: i32) -> (i32, i32) {
    %c0_i32 = arith.constant 0 : i32
    %c0_i32_0 = arith.constant 0 : i32
    %c0_i32_1 = arith.constant 0 : i32
    return %c0_i32, %c0_i32_0 : i32, i32
  }
  func.func @transform_3(%arg0: i32) -> (i32, i32) {
    %c0_i32 = arith.constant 0 : i32
    %c0_i32_0 = arith.constant 0 : i32
    return %c0_i32, %arg0 : i32, i32
  }
}

</mosaic_0001>

<bundles_post_ra>
// kernel: kpconv_simple_block.3
= control target key start
LH: loop header
LB: loop body
LE: loop exit
PB: predicated region body
PF: predicated region fallthrough
CT: control target
= control target key end

     0   :  { %v145_v2 = vmov 0   ;;  %s208_s0 = inlined_call_operand.vmem [shape: f32[16,512], index: 0, kind: input, shape index: {}]   ;;  %s209_s1 = inlined_call_operand.vmem [shape: f32[16,1], index: 1, kind: input, shape index: {}]   ;;  %s210_s2 = inlined_call_operand.vmem [shape: f32[16,1], index: 2, kind: input, shape index: {}]   ;;  %s211_s3 = inlined_call_operand.hbm [shape: f32[16,512], index: 3, kind: output, shape index: {}]  }
   0x1   :  { %v43_v0 = vld [vmem:[%s210_s2] sm:$0xff]  ;;  %118 = vset.pattern.permute.xlu1 %v145_v2  ;;  %117 = vset.pattern.permute.xlu0 %v145_v2 }
   0x2   :  { %v23_v1 = vld [vmem:[%s209_s1] sm:$0xff] }
   0x3   :  { %8 = vsyncpa [#allocation3], 0  ;;  %47 = vperm.xlu1 %118, %v43_v0   ;;  %27 = vperm.xlu0 %117, %v23_v1   ;;  %v44_v3 = vld [vmem:[%s210_s2 + $0x8] sm:$0xff]  ;;  %v15_v5 = vld [vmem:[%s208_s0] sm:$0xff]  ;;  %s146_s7 = smov [#allocation2]   ;;  %s101_s10 = sshll.u32 %s211_s3, 4  ;;  %s102_s10 = int_to_ptr.hbm [resolvable:$true] %s101_s10 }
   0x4   :  { %v24_v4 = vld [vmem:[%s209_s1 + $0x8] sm:$0xff]  ;;  %v17_v7 = vld [vmem:[%s208_s0 + $0x10] sm:$0xff]  ;;  %v18_v8 = vld [vmem:[%s208_s0 + $0x18] sm:$0xff]  ;;  %s147_s11 = smov 512   ;;  %s148_s12 = smov 32  }
   0x5   :  { %v16_v6 = vld [vmem:[%s208_s0 + $0x8] sm:$0xff]  ;;  %v19_v19 = vld [vmem:[%s208_s0 + $0x20] sm:$0xff]  ;;  %v21_v21 = vld [vmem:[%s208_s0 + $0x30] sm:$0xff] }
   0x6   :  { %v20_v20 = vld [vmem:[%s208_s0 + $0x28] sm:$0xff]  ;;  %v22_v26 = vld [vmem:[%s208_s0 + $0x38] sm:$0xff]  ;;  %s99_s0 = sshll.u32 %s146_s7, 4  ;;  %s100_s0 = int_to_ptr.vmem [resolvable:$true] %s99_s0 }
   0xb   :  { %52 = vperm.xlu1 %118, %v44_v3   ;;  %32 = vperm.xlu0 %117, %v24_v4  }
  0x75   :  { %v48_v9 = vpop.permute.xlu1 %47  ;;  %v28_v10 = vpop.permute.xlu0 %27 }
  0x76   :  { %v35_v11 = vmul.f32 %v28_v10, %v15_v5  ;;  %v36_v12 = vmul.f32 %v28_v10, %v16_v6  ;;  %v37_v13 = vmul.f32 %v28_v10, %v17_v7  ;;  %v38_v14 = vmul.f32 %v28_v10, %v18_v8 }
  0x78   :  { %v55_v15 = vadd.f32 %v48_v9, %v35_v11  ;;  %v56_v16 = vadd.f32 %v48_v9, %v36_v12  ;;  %v57_v17 = vadd.f32 %v48_v9, %v37_v13  ;;  %v58_v18 = vadd.f32 %v48_v9, %v38_v14 }
  0x7a   :  { %vm63_vm0 = vcmp.ge.f32.partialorder %v55_v15, 0.0  ;;  %vm64_vm1 = vcmp.ge.f32.partialorder %v56_v16, 0.0  ;;  %vm65_vm2 = vcmp.ge.f32.partialorder %v57_v17, 0.0  ;;  %vm66_vm3 = vcmp.ge.f32.partialorder %v58_v18, 0.0 }
  0x7b   :  { %v71_v22 = vmul.f32 0.2, %v55_v15  ;;  %v72_v23 = vmul.f32 0.2, %v56_v16  ;;  %v73_v24 = vmul.f32 0.2, %v57_v17 }
  0x7c   :  { %v74_v25 = vmul.f32 0.2, %v58_v18 }
  0x7d   :  { %v79_v27 = vsel %vm63_vm0, %v55_v15, %v71_v22  ;;  %v80_v28 = vsel %vm64_vm1, %v56_v16, %v72_v23  ;;  %v81_v29 = vsel %vm65_vm2, %v57_v17, %v73_v24  ;;  %v33_v30 = vpop.permute.xlu0 %32  ;;  %v53_v35 = vpop.permute.xlu1 %52 }
  0x7e   :  { %v82_v31 = vsel %vm66_vm3, %v58_v18, %v74_v25  ;;  %87 = vst [vmem:[#allocation2] sm:$0xff] %v79_v27  ;;  %v39_v32 = vmul.f32 %v33_v30, %v19_v19  ;;  %v40_v33 = vmul.f32 %v33_v30, %v20_v20  ;;  %v41_v34 = vmul.f32 %v33_v30, %v21_v21 }
  0x7f   :  { %88 = vst [vmem:[#allocation2 + $0x8] sm:$0xff] %v80_v28  ;;  %v42_v36 = vmul.f32 %v33_v30, %v22_v26 }
  0x80   :  { %89 = vst [vmem:[#allocation2 + $0x10] sm:$0xff] %v81_v29  ;;  %v59_v37 = vadd.f32 %v53_v35, %v39_v32  ;;  %v60_v38 = vadd.f32 %v53_v35, %v40_v33  ;;  %v61_v39 = vadd.f32 %v53_v35, %v41_v34 }
  0x81   :  { %90 = vst [vmem:[#allocation2 + $0x18] sm:$0xff] %v82_v31  ;;  %v62_v40 = vadd.f32 %v53_v35, %v42_v36 }
  0x82   :  { %vm67_vm4 = vcmp.ge.f32.partialorder %v59_v37, 0.0  ;;  %vm68_vm5 = vcmp.ge.f32.partialorder %v60_v38, 0.0  ;;  %vm69_vm6 = vcmp.ge.f32.partialorder %v61_v39, 0.0  ;;  %v75_v41 = vmul.f32 0.2, %v59_v37 }
  0x83   :  { %vm70_vm7 = vcmp.ge.f32.partialorder %v62_v40, 0.0  ;;  %v76_v42 = vmul.f32 0.2, %v60_v38  ;;  %v77_v43 = vmul.f32 0.2, %v61_v39 }
  0x84   :  { %v78_v44 = vmul.f32 0.2, %v62_v40  ;;  %v83_v45 = vsel %vm67_vm4, %v59_v37, %v75_v41 }
  0x85   :  { %v84_v46 = vsel %vm68_vm5, %v60_v38, %v76_v42  ;;  %v85_v47 = vsel %vm69_vm6, %v61_v39, %v77_v43  ;;  %91 = vst [vmem:[#allocation2 + $0x20] sm:$0xff] %v83_v45 }
  0x86   :  { %v86_v48 = vsel %vm70_vm7, %v62_v40, %v78_v44  ;;  %92 = vst [vmem:[#allocation2 + $0x28] sm:$0xff] %v84_v46 }
  0x87   :  { %93 = vst [vmem:[#allocation2 + $0x30] sm:$0xff] %v85_v47 }
  0x88   :  { %94 = vst [vmem:[#allocation2 + $0x38] sm:$0xff] %v86_v48 }
  0x89   :  { %107 = dma.vmem_to_hbm [thread:$0]  %s100_s0, 1024, %s102_s10, [#allocation3], %s147_s11, %s147_s11, %s148_s12  }
  0x8a   :  { %143 = dma.done.wait [#allocation3], 1024  }
  0x8b   :  { %144 = vsyncadd [#allocation3], 4294966272 }
  0x8c   :  { %112 = vsyncpa [#allocation3], 1 }

// kernel: kpconv_simple_block.2
= control target key start
LH: loop header
LB: loop body
LE: loop exit
PB: predicated region body
PF: predicated region fallthrough
CT: control target
= control target key end

     0   :  { %12 = vsyncpa [#allocation6], 0  ;;  %s5697_s21 = smov 0   ;;  %s5699_s22 = smov 0   ;;  %s9481_s0 = inlined_call_operand.vmem [shape: f32[3,16,512], index: 0, kind: input, shape index: {}]   ;;  %s9482_s1 = inlined_call_operand.vmem [shape: f32[8,16,512], index: 1, kind: input, shape index: {}]   ;;  %s9483_s2 = inlined_call_operand.vmem [shape: f32[3,15], index: 2, kind: input, shape index: {}]   ;;  %s9484_s3 = inlined_call_operand.vmem [shape: f32[16,128], index: 3, kind: input, shape index: {}]   ;;  %s9485_s4 = inlined_call_operand.vmem [shape: f32[16,512], index: 4, kind: output, shape index: {0}]   ;;  %s9486_s5 = inlined_call_operand.vmem [shape: f32[2,16,1], index: 5, kind: output, shape index: {1}]   ;;  %s9487_s6 = inlined_call_operand.vmem [shape: f32[2,16,1], index: 6, kind: output, shape index: {2}]  }
   0x1   :  { %s5701_s23 = smov 0  }
   0x2 LB: > { %s5713_s24 = sadd.s32 4294967295, %s5659_s23   ;;  %s5716_s25 = sadd.s32 1, %s5659_s23   ;;  %s5659_s23 = sphi %s5701_s23, %s9785_s23   ;;  %s5655_s22 = sphi %s5699_s22, %s9784_s22   ;;  %s5651_s21 = sphi %s5697_s21, %s9783_s21  }
   0x3   : > { %s22_s26 = ssub.s32 %s5659_s23, %s5716_s25  ;;  %s25_s27 = sadd.s32 1, %s5655_s22 }
   0x4   : > { %p23_p0 = scmp.eq.s32.totalorder %s22_s26, 0  ;;  %p32_p1 = scmp.ne.s32.totalorder %s5655_s22, %s5651_s21 }
   0x5   : > { %p33_p2 = scmp.eq.s32.totalorder %s5659_s23, 0  ;;  %p130_p3 = scmp.eq.s32.totalorder %s5713_s24, 1 }
   0x6   : > { %s5726_s28 = scalar_select %p23_p0, %s5655_s22, %s25_s27  }
   0x7   : > { %p5728_p4 = por %p33_p2, %p32_p1  ;;  %p5732_p5 = por %p130_p3, %p32_p1 }
   0x8   : > { %p5033_p6 = scmp.ge.s32.totalorder %s5659_s23, 1  ;;  %p195_p7 = scmp.lt.s32.totalorder %s5659_s23, 3 }
   0x9   : > { %p5263_p8 = scmp.eq.s32.totalorder %s5713_s24, 0  ;;  %s207_s10 = sshll.u32 %s9483_s2, 4  ;;  %s208_s10 = int_to_ptr.vmem [resolvable:$true] %s207_s10 }
   0xa   : > { %p5739_p9 = pnand %p5033_p6, %p195_p7  ;;  %s5661_s11 = smov [#allocation5]  }
   0xb   : > { %p5035_p12 = scmp.ge.s32.totalorder %s5659_s23, 2 }
   0xc   : > { %p5259_p10 = pneg %p5739_p9 }
   0xd   : > { %217 = sbr.rel (%p5035_p12) target bundleno = 70 (0x46), region = 24 }
   0xe   : > { %p5260_p11 = pnand %p5263_p8, %p5259_p10 }
  0x10   : > { %5262 = dma.vmem_to_smem (!%p5260_p11), %s208_s10, 64, %s5661_s11, [#allocation6]  }
  0x12   : > { %220 = sbr.rel (!%p5728_p4) target bundleno = 34 (0x22), region = 28  ;;  %s222_s12 = sand.u32 (%p5728_p4), 1, %s5655_s22  }
  0x13   : > { %s5218_s13 = sshll.u32 (%p5728_p4), %s5659_s23, 4  ;;  %s5253_s14 = smul.u32 (%p5728_p4), 96, %s222_s12 }
  0x14   : > { %s227_s17 = scalar_lea.vmem (%p5728_p4), %s9481_s0, %s5218_s13 }
  0x15   : > { %v240_v0 = vld [vmem:[%s227_s17] sm:$0xff] (%p5728_p4)  ;;  %v242_v1 = vld [vmem:[%s227_s17 + $0x8] sm:$0xff] (%p5728_p4)  ;;  %s224_s18 = scalar_lea.vmem (%p5728_p4), [#allocation3], %s5253_s14 }
  0x16   : > { %v244_v2 = vld [vmem:[%s227_s17 + $0x20] sm:$0xff] (%p5728_p4)  ;;  %241 = vst [vmem:[%s224_s18] sm:$0xff] (%p5728_p4), %v240_v0  ;;  %v246_v3 = vld [vmem:[%s227_s17 + $0x28] sm:$0xff] (%p5728_p4) }
  0x17   : > { %243 = vst [vmem:[%s224_s18 + $0x8] sm:$0xff] %v242_v1  ;;  %v248_v4 = vld [vmem:[%s227_s17 + $0x40] sm:$0xff]  ;;  %v250_v5 = vld [vmem:[%s227_s17 + $0x48] sm:$0xff] }
  0x18   : > { %245 = vst [vmem:[%s224_s18 + $0x10] sm:$0xff] %v244_v2  ;;  %v252_v6 = vld [vmem:[%s227_s17 + $0x60] sm:$0xff]  ;;  %v254_v7 = vld [vmem:[%s227_s17 + $0x68] sm:$0xff] }
  0x19   : > { %247 = vst [vmem:[%s224_s18 + $0x18] sm:$0xff] %v246_v3  ;;  %v256_v8 = vld [vmem:[%s227_s17 + $0x80] sm:$0xff]  ;;  %v258_v9 = vld [vmem:[%s227_s17 + $0x88] sm:$0xff] }
  0x1a   : > { %249 = vst [vmem:[%s224_s18 + $0x20] sm:$0xff] %v248_v4  ;;  %v260_v10 = vld [vmem:[%s227_s17 + $0xa0] sm:$0xff]  ;;  %v262_v11 = vld [vmem:[%s227_s17 + $0xa8] sm:$0xff] }
  0x1b   : > { %251 = vst [vmem:[%s224_s18 + $0x28] sm:$0xff] %v250_v5 }
  0x1c   : > { %253 = vst [vmem:[%s224_s18 + $0x30] sm:$0xff] %v252_v6 }
  0x1d   : > { %255 = vst [vmem:[%s224_s18 + $0x38] sm:$0xff] %v254_v7 }
  0x1e   : > { %257 = vst [vmem:[%s224_s18 + $0x40] sm:$0xff] %v256_v8 }
  0x1f   : > { %259 = vst [vmem:[%s224_s18 + $0x48] sm:$0xff] %v258_v9 }
  0x20   : > { %261 = vst [vmem:[%s224_s18 + $0x50] sm:$0xff] %v260_v10 }
  0x21   : > { %263 = vst [vmem:[%s224_s18 + $0x58] sm:$0xff] %v262_v11 }
  0x22 PF: > { %269 = sbr.rel (!%p5728_p4) target bundleno = 70 (0x46), region = 51  ;;  %s271_s19 = sand.u32 (%p5728_p4), 1, %s5655_s22  }
  0x23   : > { %s5219_s20 = sshll.u32 (%p5728_p4), %s5659_s23, 4  ;;  %s5038_s26 = sshll.u32 (%p5728_p4), %s271_s19, 8 }
  0x24   : > { %s5765_s9 = scalar_lea.vmem (%p5728_p4), %s9482_s1, %s5219_s20  ;;  %s5770_s23 = scalar_lea.vmem (%p5728_p4), [#allocation4], %s5038_s26 }
  0x25   : > { %v289_v12 = vld [vmem:[%s5765_s9] sm:$0xff] (%p5728_p4)  ;;  %v291_v13 = vld [vmem:[%s5765_s9 + $0x8] sm:$0xff] (%p5728_p4) }
  0x26   : > { %v293_v14 = vld [vmem:[%s5765_s9 + $0x20] sm:$0xff] (%p5728_p4)  ;;  %290 = vst [vmem:[%s5770_s23] sm:$0xff] (%p5728_p4), %v289_v12  ;;  %v295_v15 = vld [vmem:[%s5765_s9 + $0x28] sm:$0xff] (%p5728_p4) }
  0x27   : > { %292 = vst [vmem:[%s5770_s23 + $0x8] sm:$0xff] %v291_v13  ;;  %v297_v16 = vld [vmem:[%s5765_s9 + $0x40] sm:$0xff]  ;;  %v299_v17 = vld [vmem:[%s5765_s9 + $0x48] sm:$0xff] }
  0x28   : > { %294 = vst [vmem:[%s5770_s23 + $0x10] sm:$0xff] %v293_v14  ;;  %v301_v18 = vld [vmem:[%s5765_s9 + $0x60] sm:$0xff]  ;;  %v303_v19 = vld [vmem:[%s5765_s9 + $0x68] sm:$0xff] }
  0x29   : > { %296 = vst [vmem:[%s5770_s23 + $0x18] sm:$0xff] %v295_v15  ;;  %v305_v20 = vld [vmem:[%s5765_s9 + $0x80] sm:$0xff]  ;;  %v307_v21 = vld [vmem:[%s5765_s9 + $0x88] sm:$0xff] }
  0x2a   : > { %298 = vst [vmem:[%s5770_s23 + $0x20] sm:$0xff] %v297_v16  ;;  %v309_v22 = vld [vmem:[%s5765_s9 + $0xa0] sm:$0xff]  ;;  %v311_v23 = vld [vmem:[%s5765_s9 + $0xa8] sm:$0xff] }
  0x2b   : > { %300 = vst [vmem:[%s5770_s23 + $0x28] sm:$0xff] %v299_v17  ;;  %v313_v24 = vld [vmem:[%s5765_s9 + $0xc0] sm:$0xff]  ;;  %v315_v25 = vld [vmem:[%s5765_s9 + $0xc8] sm:$0xff] }
  0x2c   : > { %302 = vst [vmem:[%s5770_s23 + $0x30] sm:$0xff] %v301_v18  ;;  %v317_v26 = vld [vmem:[%s5765_s9 + $0xe0] sm:$0xff]  ;;  %v319_v27 = vld [vmem:[%s5765_s9 + $0xe8] sm:$0xff] }
  0x2d   : > { %304 = vst [vmem:[%s5770_s23 + $0x38] sm:$0xff] %v303_v19  ;;  %v321_v28 = vld [vmem:[%s5765_s9 + $0x100] sm:$0xff]  ;;  %v323_v29 = vld [vmem:[%s5765_s9 + $0x108] sm:$0xff] }
  0x2e   : > { %306 = vst [vmem:[%s5770_s23 + $0x40] sm:$0xff] %v305_v20  ;;  %v325_v30 = vld [vmem:[%s5765_s9 + $0x120] sm:$0xff]  ;;  %v327_v31 = vld [vmem:[%s5765_s9 + $0x128] sm:$0xff] }
  0x2f   : > { %308 = vst [vmem:[%s5770_s23 + $0x48] sm:$0xff] %v307_v21  ;;  %v329_v32 = vld [vmem:[%s5765_s9 + $0x140] sm:$0xff]  ;;  %v331_v33 = vld [vmem:[%s5765_s9 + $0x148] sm:$0xff] }
  0x30   : > { %310 = vst [vmem:[%s5770_s23 + $0x50] sm:$0xff] %v309_v22  ;;  %v333_v34 = vld [vmem:[%s5765_s9 + $0x160] sm:$0xff]  ;;  %v335_v35 = vld [vmem:[%s5765_s9 + $0x168] sm:$0xff] }
  0x31   : > { %312 = vst [vmem:[%s5770_s23 + $0x58] sm:$0xff] %v311_v23  ;;  %v337_v36 = vld [vmem:[%s5765_s9 + $0x180] sm:$0xff]  ;;  %v339_v37 = vld [vmem:[%s5765_s9 + $0x188] sm:$0xff] }
  0x32   : > { %314 = vst [vmem:[%s5770_s23 + $0x60] sm:$0xff] %v313_v24  ;;  %v341_v38 = vld [vmem:[%s5765_s9 + $0x1a0] sm:$0xff]  ;;  %v343_v39 = vld [vmem:[%s5765_s9 + $0x1a8] sm:$0xff] }
  0x33   : > { %316 = vst [vmem:[%s5770_s23 + $0x68] sm:$0xff] %v315_v25  ;;  %v345_v40 = vld [vmem:[%s5765_s9 + $0x1c0] sm:$0xff]  ;;  %v347_v41 = vld [vmem:[%s5765_s9 + $0x1c8] sm:$0xff] }
  0x34   : > { %318 = vst [vmem:[%s5770_s23 + $0x70] sm:$0xff] %v317_v26  ;;  %v349_v42 = vld [vmem:[%s5765_s9 + $0x1e0] sm:$0xff]  ;;  %v351_v43 = vld [vmem:[%s5765_s9 + $0x1e8] sm:$0xff] }
  0x35   : > { %320 = vst [vmem:[%s5770_s23 + $0x78] sm:$0xff] %v319_v27 }
  0x36   : > { %322 = vst [vmem:[%s5770_s23 + $0x80] sm:$0xff] %v321_v28 }
  0x37   : > { %324 = vst [vmem:[%s5770_s23 + $0x88] sm:$0xff] %v323_v29 }
  0x38   : > { %326 = vst [vmem:[%s5770_s23 + $0x90] sm:$0xff] %v325_v30 }
  0x39   : > { %328 = vst [vmem:[%s5770_s23 + $0x98] sm:$0xff] %v327_v31 }
  0x3a   : > { %330 = vst [vmem:[%s5770_s23 + $0xa0] sm:$0xff] %v329_v32 }
  0x3b   : > { %332 = vst [vmem:[%s5770_s23 + $0xa8] sm:$0xff] %v331_v33 }
  0x3c   : > { %334 = vst [vmem:[%s5770_s23 + $0xb0] sm:$0xff] %v333_v34 }
  0x3d   : > { %336 = vst [vmem:[%s5770_s23 + $0xb8] sm:$0xff] %v335_v35 }
  0x3e   : > { %338 = vst [vmem:[%s5770_s23 + $0xc0] sm:$0xff] %v337_v36 }
  0x3f   : > { %340 = vst [vmem:[%s5770_s23 + $0xc8] sm:$0xff] %v339_v37 }
  0x40   : > { %342 = vst [vmem:[%s5770_s23 + $0xd0] sm:$0xff] %v341_v38 }
  0x41   : > { %344 = vst [vmem:[%s5770_s23 + $0xd8] sm:$0xff] %v343_v39 }
  0x42   : > { %346 = vst [vmem:[%s5770_s23 + $0xe0] sm:$0xff] %v345_v40 }
  0x43   : > { %348 = vst [vmem:[%s5770_s23 + $0xe8] sm:$0xff] %v347_v41 }
  0x44   : > { %350 = vst [vmem:[%s5770_s23 + $0xf0] sm:$0xff] %v349_v42 }
  0x45   : > { %352 = vst [vmem:[%s5770_s23 + $0xf8] sm:$0xff] %v351_v43 }
  0x46 PF: > { %361 = sbr.rel (%p5739_p9) target bundleno = 1431 (0x597), region = 74 }
  0x4b   : > { %s5836_s29 = sand.u32 1, %s5651_s21  }
  0x4c   : > { %s5254_s10 = smul.u32 96, %s5836_s29  ;;  %s5042_s11 = sshll.u32 %s5836_s29, 8 }
  0x4d   : > { %s5842_s13 = scalar_lea.vmem [#allocation4], %s5042_s11 }
  0x4e   : > { %s5840_s12 = scalar_lea.vmem [#allocation3], %s5254_s10 }
  0x4f   : > { %5646 = dma.done.wait (%p5263_p8), [#allocation6], 64  }
  0x50   : > { %5648 = vsyncadd (%p5263_p8), [#allocation6], 4294967232 }
  0x51   : > { %382 = sfence }
  0x52   : > { %s5202_s7 = sld [smem:[#allocation5 + $0xe]]  ;;  %v4451_v44 = vld [vmem:[%s5840_s12] sm:$0xff]  ;;  %v4453_v45 = vld [vmem:[%s5840_s12 + $0x10] sm:$0xff]  ;;  %v5853_v48 = vld [vmem:[%s5840_s12 + $0x8] sm:$0xff]  ;;  %vm734_vm7 = vcmask 1041409   ;;  %vm736_vm9 = vcmask 1042434  }
  0x53   : > { %s5207_s21 = sld [smem:[#allocation5 + $0x8e]]  ;;  %v5203_v46 = vld [vmem:[%s5840_s12 + $0x20] sm:$0xff]  ;;  %v5205_v47 = vld [vmem:[%s5840_s12 + $0x30] sm:$0xff]  ;;  %v5856_v49 = vld [vmem:[%s5840_s12 + $0x18] sm:$0xff]  ;;  %vm738_vm10 = vcmask 1043459   ;;  %vm740_vm11 = vcmask 1044484  }
  0x54   : > { %s5212_s14 = sld [smem:[#allocation5 + $0x10e]]  ;;  %v5208_v51 = vld [vmem:[%s5840_s12 + $0x40] sm:$0xff]  ;;  %v5862_v52 = vld [vmem:[%s5840_s12 + $0x50] sm:$0xff]  ;;  %v5867_v61 = vld [vmem:[%s5840_s12 + $0x28] sm:$0xff]  ;;  %vm742_vm12 = vcmask 1045509   ;;  %vm744_vm13 = vcmask 1046534  }
  0x55   : > { %s5858_s15 = sld [smem:[#allocation5 + $0xd]]  ;;  %v5870_v62 = vld [vmem:[%s5840_s12 + $0x38] sm:$0xff]  ;;  %v5876_v3 = vld [vmem:[%s5840_s12 + $0x48] sm:$0xff]  ;;  %vm746_vm14 = vcmask 1047559   ;;  %p422_p13 = scmp.lt.s32.totalorder %s5713_s24, 1 }
  0x56   : > { %s5872_s16 = sld [smem:[#allocation5 + $0x8d]]  ;;  %v5879_v4 = vld [vmem:[%s5840_s12 + $0x58] sm:$0xff] }
  0x57   : > { %s5201_s17 = sld [smem:[#allocation5 + $0x10d]] }
  0x58   : > { %v4456_v50 = vstv %s5202_s7  ;;  %s6128_s18 = sld [smem:[#allocation5 + $0xc]] }
  0x59   : > { %v4457_v53 = vsub.f32 %v4451_v44, %v4456_v50  ;;  %v4459_v54 = vsub.f32 %v4453_v45, %v4456_v50  ;;  %v4470_v55 = vstv %s5207_s21  ;;  %v4458_v56 = vsub.f32 %v5853_v48, %v4456_v50  ;;  %s6136_s19 = sld [smem:[#allocation5 + $0x8c]] }
  0x5a   : > { %v4471_v57 = vsub.f32 %v5203_v46, %v4470_v55  ;;  %v4473_v58 = vsub.f32 %v5205_v47, %v4470_v55  ;;  %v4488_v59 = vstv %s5212_s14  ;;  %v4460_v60 = vsub.f32 %v5856_v49, %v4456_v50  ;;  %s6166_s20 = sld [smem:[#allocation5 + $0x10c]] }
  0x5b   : > { %v4461_v63 = vmul.f32 %v4457_v53, %v4457_v53  ;;  %v4463_v0 = vmul.f32 %v4459_v54, %v4459_v54  ;;  %v4489_v1 = vsub.f32 %v5208_v51, %v4488_v59  ;;  %v4491_v2 = vsub.f32 %v5862_v52, %v4488_v59  ;;  %s6356_s26 = sld [smem:[#allocation5 + $0xb]] }
  0x5c   : > { %v4475_v5 = vmul.f32 %v4471_v57, %v4471_v57  ;;  %v4477_v6 = vmul.f32 %v4473_v58, %v4473_v58  ;;  %v4462_v7 = vmul.f32 %v4458_v56, %v4458_v56  ;;  %v4464_v8 = vmul.f32 %v4460_v60, %v4460_v60  ;;  %s6358_s27 = sld [smem:[#allocation5 + $0x8b]] }
  0x5d   : > { %v4493_v9 = vmul.f32 %v4489_v1, %v4489_v1  ;;  %v4495_v10 = vmul.f32 %v4491_v2, %v4491_v2  ;;  %v4472_v11 = vsub.f32 %v5867_v61, %v4470_v55  ;;  %v4474_v12 = vsub.f32 %v5870_v62, %v4470_v55  ;;  %s6374_s8 = sld [smem:[#allocation5 + $0x10b]] }
  0x5e   : > { %v4479_v13 = vadd.f32 %v4475_v5, %v4461_v63  ;;  %v4481_v14 = vadd.f32 %v4477_v6, %v4463_v0  ;;  %v4490_v15 = vsub.f32 %v5876_v3, %v4488_v59  ;;  %v4492_v16 = vsub.f32 %v5879_v4, %v4488_v59  ;;  %s6636_s9 = sld [smem:[#allocation5 + $0xa]] }
  0x5f   : > { %v4476_v17 = vmul.f32 %v4472_v11, %v4472_v11  ;;  %v4478_v18 = vmul.f32 %v4474_v12, %v4474_v12  ;;  %v4172_v19 = vstv %s5858_s15  ;;  %v4186_v27 = vstv %s5872_s16  ;;  %s6638_s23 = sld [smem:[#allocation5 + $0x8a]] }
  0x60   : > { %v5886_v20 = vadd.f32 %v4493_v9, %v4479_v13  ;;  %v5888_v21 = vadd.f32 %v4495_v10, %v4481_v14  ;;  %v4494_v22 = vmul.f32 %v4490_v15, %v4490_v15  ;;  %v4496_v23 = vmul.f32 %v4492_v16, %v4492_v16  ;;  %s6641_s10 = sld [smem:[#allocation5 + $0x10a]] }
  0x61   : > { %v4480_v24 = vadd.f32 %v4476_v17, %v4462_v7  ;;  %v4482_v25 = vadd.f32 %v4478_v18, %v4464_v8  ;;  %v4173_v26 = vsub.f32 %v4451_v44, %v4172_v19  ;;  %v4187_v30 = vsub.f32 %v5203_v46, %v4186_v27  ;;  %s6801_s11 = sld [smem:[#allocation5 + $0x9]] }
  0x62   : > { %5290 = vrsqrt.f32 %v5886_v20  ;;  %v5897_v31 = vstv %s5201_s17  ;;  %v4175_v33 = vsub.f32 %v4453_v45, %v4172_v19  ;;  %v4189_v35 = vsub.f32 %v5205_v47, %v4186_v27  ;;  %s6860_s7 = sld [smem:[#allocation5 + $0x89]] }
  0x63   : > { %5292 = vrsqrt.f32 %v5888_v21  ;;  %v5893_v28 = vadd.f32 %v4494_v22, %v4480_v24  ;;  %v5895_v29 = vadd.f32 %v4496_v23, %v4482_v25  ;;  %v4177_v32 = vmul.f32 %v4173_v26, %v4173_v26  ;;  %v5937_v25 = vld [vmem:[%s5842_s13] sm:$0xff]  ;;  %s6865_s21 = sld [smem:[#allocation5 + $0x109]] }
  0x64   : > { %v4191_v36 = vmul.f32 %v4187_v30, %v4187_v30  ;;  %v4205_v37 = vsub.f32 %v5208_v51, %v5897_v31  ;;  %vm4508_vm0 = vcmp.eq.f32.partialorder %v5886_v20, inf  ;;  %vm4510_vm1 = vcmp.eq.f32.partialorder %v5886_v20, 0.0  ;;  %s7134_s14 = sld [smem:[#allocation5 + $0x8]] }
  0x65   : > { %5294 = vrsqrt.f32 %v5893_v28  ;;  %v4511_v44 = vand.u32 2147483648, %v5886_v20  ;;  %vm4532_vm2 = vcmp.eq.f32.partialorder %v5888_v21, inf  ;;  %v4179_v45 = vmul.f32 %v4175_v33, %v4175_v33  ;;  %v5948_v33 = vld [vmem:[%s5842_s13 + $0x20] sm:$0xff]  ;;  %s7136_s15 = sld [smem:[#allocation5 + $0x88]] }
  0x66   : > { %5296 = vrsqrt.f32 %v5895_v29  ;;  %v4195_v41 = vadd.f32 %v4191_v36, %v4177_v32  ;;  %v4209_v42 = vmul.f32 %v4205_v37, %v4205_v37  ;;  %v4193_v50 = vmul.f32 %v4189_v35, %v4189_v35  ;;  %v5945_v32 = vld [vmem:[%s5842_s13 + $0x10] sm:$0xff]  ;;  %s7158_s16 = sld [smem:[#allocation5 + $0x108]] }
  0x67   : > { %v4207_v51 = vsub.f32 %v5862_v52, %v5897_v31  ;;  %vm4534_vm3 = vcmp.eq.f32.partialorder %v5888_v21, 0.0  ;;  %v4535_v56 = vand.u32 2147483648, %v5888_v21  ;;  %vm4520_vm4 = vcmp.eq.f32.partialorder %v5893_v28, inf  ;;  %s7358_s17 = sld [smem:[#allocation5 + $0x7]] }
  0x68   : > { %v5291_v34 = vpop.eup %5290  ;;  %v5910_v53 = vadd.f32 %v4209_v42, %v4195_v41  ;;  %vm4522_vm5 = vcmp.eq.f32.partialorder %v5893_v28, 0.0  ;;  %v4523_v52 = vand.u32 2147483648, %v5893_v28  ;;  %v4197_v2 = vadd.f32 %v4193_v50, %v4179_v45  ;;  %v5975_v45 = vld [vmem:[%s5842_s13 + $0x80] sm:$0xff] }
  0x69   : > { %v5293_v38 = vpop.eup %5292  ;;  %v4502_v39 = vmul.f32 %v5291_v34, %v5886_v20  ;;  %v4211_v5 = vmul.f32 %v4207_v51, %v4207_v51  ;;  %v4174_v8 = vsub.f32 %v5853_v48, %v4172_v19  ;;  %v4176_v9 = vsub.f32 %v5856_v49, %v4172_v19 }
  0x6a   : > { %v4526_v40 = vmul.f32 %v5293_v38, %v5888_v21  ;;  %5298 = vrsqrt.f32 %v5910_v53  ;;  %vm4544_vm6 = vcmp.eq.f32.partialorder %v5895_v29, inf  ;;  %v4188_v12 = vsub.f32 %v5867_v61, %v4186_v27 }
  0x6b   : > { %v4503_v43 = vmul.f32 %v5291_v34, %v4502_v39  ;;  %v5295_v46 = vpop.eup %5294  ;;  %v4178_v15 = vmul.f32 %v4174_v8, %v4174_v8  ;;  %v4180_v16 = vmul.f32 %v4176_v9, %v4176_v9  ;;  %v4190_v18 = vsub.f32 %v5870_v62, %v4186_v27  ;;  %v5961_v39 = vld [vmem:[%s5842_s13 + $0x50] sm:$0xff] }
  0x6c   : > { %v4527_v47 = vmul.f32 %v5293_v38, %v4526_v40  ;;  %v5297_v54 = vpop.eup %5296  ;;  %v4514_v57 = vmul.f32 %v5295_v46, %v5893_v28  ;;  %v4192_v19 = vmul.f32 %v4188_v12, %v4188_v12  ;;  %v5932_v23 = vadd.f32 %v4211_v5, %v4197_v2  ;;  %v5964_v40 = vld [vmem:[%s5842_s13 + $0x60] sm:$0xff] }
  0x6d   : > { %v4504_v55 = vmul.f32 0.5, %v4503_v43  ;;  %v4538_v59 = vmul.f32 %v5297_v54, %v5895_v29  ;;  %v4194_v30 = vmul.f32 %v4190_v18, %v4190_v18  ;;  %v4547_v51 = vand.u32 2147483648, %v5895_v29 }
  0x6e   : > { %v4528_v58 = vmul.f32 0.5, %v4527_v47  ;;  %v4515_v63 = vmul.f32 %v5295_v46, %v4514_v57  ;;  %v5967_v43 = vadd.f32 %v4192_v19, %v4178_v15  ;;  %5300 = vrsqrt.f32 %v5932_v23 }
  0x6f   : > { %v4505_v60 = vsub.f32 1.5, %v4504_v55  ;;  %v4539_v1 = vmul.f32 %v5297_v54, %v4538_v59  ;;  %v5989_v55 = vld [vmem:[%s5842_s13 + $0xb0] sm:$0xff]  ;;  %vm4546_vm8 = vcmp.eq.f32.partialorder %v5895_v29, 0.0  ;;  %vm4224_vm15 = vcmp.eq.f32.partialorder %v5910_v53, inf }
  0x70   : > { %v4529_v0 = vsub.f32 1.5, %v4528_v58  ;;  %v4516_v7 = vmul.f32 0.5, %v4515_v63  ;;  %v5925_v17 = vpop.eup %5298  ;;  %v6006_v63 = vld [vmem:[%s5842_s13 + $0xd0] sm:$0xff] }
  0x71   : > { %v4506_v6 = vmul.f32 %v5291_v34, %v4505_v60  ;;  %v4540_v11 = vmul.f32 0.5, %v4539_v1  ;;  %v4218_v24 = vmul.f32 %v5925_v17, %v5910_v53  ;;  %v5951_v34 = vld [vmem:[%s5842_s13 + $0x30] sm:$0xff] }
  0x72   : > { %v4530_v10 = vmul.f32 %v5293_v38, %v4529_v0  ;;  %v4517_v14 = vsub.f32 1.5, %v4516_v7  ;;  %v5958_v38 = vld [vmem:[%s5842_s13 + $0x40] sm:$0xff]  ;;  %v6012_v1 = vld [vmem:[%s5842_s13 + $0xf0] sm:$0xff] }
  0x73   : > { %v4507_v13 = vmul.f32 %v4506_v6, %v5886_v20  ;;  %v4541_v49 = vsub.f32 1.5, %v4540_v11  ;;  %v4219_v37 = vmul.f32 %v5925_v17, %v4218_v24  ;;  %v6009_v0 = vld [vmem:[%s5842_s13 + $0xe0] sm:$0xff] }
  0x74   : > { %v4531_v48 = vmul.f32 %v4530_v10, %v5888_v21  ;;  %v4518_v22 = vmul.f32 %v5295_v46, %v4517_v14  ;;  %v5978_v46 = vld [vmem:[%s5842_s13 + $0x90] sm:$0xff] }
  0x75   : > { %v4509_v61 = vsel %vm4508_vm0, %v5886_v20, %v4507_v13  ;;  %v4542_v27 = vmul.f32 %v5297_v54, %v4541_v49  ;;  %v5986_v54 = vld [vmem:[%s5842_s13 + $0xa0] sm:$0xff]  ;;  %v6003_v60 = vmul.f32 0.5, %v4219_v37  ;;  %v6030_v49 = vpop.eup %5300  ;;  %vm4226_vm0 = vcmp.eq.f32.partialorder %v5910_v53, 0.0 }
  0x76   : > { %v4512_v26 = vsel %vm4510_vm1, %v4511_v44, %v4509_v61  ;;  %v4533_v62 = vsel %vm4532_vm2, %v5888_v21, %v4531_v48  ;;  %v4519_v36 = vmul.f32 %v4518_v22, %v5893_v28  ;;  %v5969_v21 = vadd.f32 %v4194_v30, %v4180_v16  ;;  %v5972_v44 = vld [vmem:[%s5842_s13 + $0x70] sm:$0xff] }
  0x77   : > { %v4536_v35 = vsel %vm4534_vm3, %v4535_v56, %v4533_v62  ;;  %v4549_v20 = vsub.f32 1.0, %v4512_v26  ;;  %v4543_v42 = vmul.f32 %v4542_v27, %v5895_v29  ;;  %v5992_v56 = vld [vmem:[%s5842_s13 + $0xc0] sm:$0xff]  ;;  %vm4248_vm1 = vcmp.eq.f32.partialorder %v5932_v23, inf }
  0x78   : > { %v4551_v41 = vsub.f32 1.0, %v4536_v35  ;;  %v4521_v50 = vsel %vm4520_vm4, %v5893_v28, %v4519_v36  ;;  %vm4250_vm2 = vcmp.eq.f32.partialorder %v5932_v23, 0.0 }
  0x79   : > { %v4553_v47 = vmax.f32 %v4549_v20, 0.0  ;;  %v5996_v58 = vsel %vm4522_vm5, %v4523_v52, %v4521_v50  ;;  %v6001_v59 = vsel %vm4544_vm6, %v5895_v29, %v4543_v42  ;;  %v6058_v29 = vsub.f32 %v5876_v3, %v5897_v31 }
  0x7a   : > { %v4555_v57 = vmax.f32 %v4551_v41, 0.0 }
  0x7b   : > { %v4557_v2 = vmul.f32 %v4553_v47, %v5937_v25  ;;  %v4561_v5 = vmul.f32 %v4553_v47, %v5948_v33  ;;  %v4565_v28 = vmul.f32 %v4553_v47, %v5958_v38  ;;  %v4569_v52 = vmul.f32 %v4553_v47, %v5964_v40 }
  0x7c   : > { %v4559_v6 = vmul.f32 %v4555_v57, %v5945_v32  ;;  %v4563_v7 = vmul.f32 %v4555_v57, %v5951_v34  ;;  %v4567_v8 = vmul.f32 %v4555_v57, %v5961_v39  ;;  %v4571_v9 = vmul.f32 %v4555_v57, %v5972_v44 }
  0x7d   : > { %v4573_v10 = vmul.f32 %v4553_v47, %v5975_v45  ;;  %v4575_v11 = vmul.f32 %v4555_v57, %v5978_v46  ;;  %v4577_v12 = vmul.f32 %v4553_v47, %v5986_v54  ;;  %v4579_v13 = vmul.f32 %v4555_v57, %v5989_v55 }
  0x7e   : > { %v4581_v14 = vmul.f32 %v4553_v47, %v5992_v56  ;;  %v4583_v15 = vmul.f32 %v4555_v57, %v6006_v63  ;;  %v4585_v16 = vmul.f32 %v4553_v47, %v6009_v0  ;;  %v4587_v48 = vmul.f32 %v4555_v57, %v6012_v1 }
  0x7f   : > { %v4589_v18 = vadd.f32 %v4559_v6, %v4557_v2  ;;  %v4603_v19 = vadd.f32 %v4563_v7, %v4561_v5  ;;  %v4617_v61 = vadd.f32 %v4567_v8, %v4565_v28  ;;  %v4631_v22 = vadd.f32 %v4571_v9, %v4569_v52 }
  0x80   : > { %v4645_v24 = vadd.f32 %v4575_v11, %v4573_v10  ;;  %v4659_v26 = vadd.f32 %v4579_v13, %v4577_v12  ;;  %v4673_v62 = vadd.f32 %v4583_v15, %v4581_v14  ;;  %v4687_v27 = vadd.f32 %v4587_v48, %v4585_v16 }
  0x81   : > { %v4590_v30 = vrot.slane %v4589_v18, 4  ;;  %v4604_v35 = vrot.slane %v4603_v19, 4  ;;  %v4618_v20 = vrot.slane %v4617_v61, 4  ;;  %v4632_v36 = vrot.slane %v4631_v22, 4 }
  0x82   : > { %v4646_v37 = vrot.slane %v4645_v24, 4  ;;  %v4660_v41 = vrot.slane %v4659_v26, 4  ;;  %v4674_v42 = vrot.slane %v4673_v62, 4  ;;  %v4688_v47 = vrot.slane %v4687_v27, 4 }
  0x83   : > { %v4591_v50 = vadd.f32 %v4590_v30, %v4589_v18  ;;  %v4605_v57 = vadd.f32 %v4604_v35, %v4603_v19  ;;  %v4619_v2 = vadd.f32 %v4618_v20, %v4617_v61  ;;  %v4633_v5 = vadd.f32 %v4632_v36, %v4631_v22 }
  0x84   : > { %v4647_v28 = vadd.f32 %v4646_v37, %v4645_v24  ;;  %v4661_v52 = vadd.f32 %v4660_v41, %v4659_v26  ;;  %v4675_v6 = vadd.f32 %v4674_v42, %v4673_v62  ;;  %v4689_v7 = vadd.f32 %v4688_v47, %v4687_v27 }
  0x85   : > { %v4592_v8 = vrot.slane %v4591_v50, 2  ;;  %v4606_v9 = vrot.slane %v4605_v57, 2  ;;  %v4620_v10 = vrot.slane %v4619_v2, 2  ;;  %v4634_v11 = vrot.slane %v4633_v5, 2 }
  0x86   : > { %v4648_v12 = vrot.slane %v4647_v28, 2  ;;  %v4662_v13 = vrot.slane %v4661_v52, 2  ;;  %v4676_v14 = vrot.slane %v4675_v6, 2  ;;  %v4690_v15 = vrot.slane %v4689_v7, 2 }
  0x87   : > { %v4593_v16 = vadd.f32 %v4592_v8, %v4591_v50  ;;  %v4607_v48 = vadd.f32 %v4606_v9, %v4605_v57  ;;  %v4621_v18 = vadd.f32 %v4620_v10, %v4619_v2  ;;  %v4635_v19 = vadd.f32 %v4634_v11, %v4633_v5 }
  0x88   : > { %v4649_v61 = vadd.f32 %v4648_v12, %v4647_v28  ;;  %v4663_v22 = vadd.f32 %v4662_v13, %v4661_v52  ;;  %v4677_v24 = vadd.f32 %v4676_v14, %v4675_v6  ;;  %v4691_v26 = vadd.f32 %v4690_v15, %v4689_v7  ;;  %v6037_v6 = vld [vmem:[%s5842_s13 + $0x8] sm:$0xff]  ;;  %v6048_v12 = vld [vmem:[%s5842_s13 + $0x18] sm:$0xff] }
  0x89   : > { %v4594_v62 = vrot.slane %v4593_v16, 1  ;;  %v4608_v27 = vrot.slane %v4607_v48, 1  ;;  %v4622_v30 = vrot.slane %v4621_v18, 1  ;;  %v4636_v35 = vrot.slane %v4635_v19, 1  ;;  %v6051_v13 = vld [vmem:[%s5842_s13 + $0x28] sm:$0xff] }
  0x8a   : > { %v4650_v20 = vrot.slane %v4649_v61, 1  ;;  %v4664_v36 = vrot.slane %v4663_v22, 1  ;;  %v4678_v37 = vrot.slane %v4677_v24, 1  ;;  %v4692_v41 = vrot.slane %v4691_v26, 1  ;;  %9588 = vst [vmem:[#allocation9_spill] sm:$0xff] %v6051_v13  ;;  %v6054_v14 = vld [vmem:[%s5842_s13 + $0x48] sm:$0xff] }
  0x8b   : > { %v4595_v42 = vadd.f32 %v4594_v62, %v4593_v16  ;;  %v4609_v47 = vadd.f32 %v4608_v27, %v4607_v48  ;;  %v4623_v50 = vadd.f32 %v4622_v30, %v4621_v18  ;;  %v4637_v57 = vadd.f32 %v4636_v35, %v4635_v19  ;;  %9589 = vst [vmem:[#allocation10_spill] sm:$0xff] %v6054_v14  ;;  %v6068_v16 = vld [vmem:[%s5842_s13 + $0x68] sm:$0xff]  ;;  %v6076_v19 = vld [vmem:[%s5842_s13 + $0x78] sm:$0xff] }
  0x8c   : > { %v4651_v2 = vadd.f32 %v4650_v20, %v4649_v61  ;;  %v4665_v5 = vadd.f32 %v4664_v36, %v4663_v22  ;;  %v4242_v28 = vmul.f32 %v6030_v49, %v5932_v23  ;;  %v4548_v7 = vsel %vm4546_vm8, %v4547_v51, %v6001_v59  ;;  %v6062_v59 = vld [vmem:[%s5842_s13 + $0x38] sm:$0xff]  ;;  %9592 = vst [vmem:[#allocation13_spill] sm:$0xff] %v6068_v16  ;;  %v6079_v61 = vld [vmem:[%s5842_s13 + $0x88] sm:$0xff] }
  0x8d   : > { %v4717_v52 = vsel %vm734_vm7, %v4609_v47, %v4595_v42  ;;  %v4550_v8 = vsub.f32 1.0, %v5996_v58  ;;  %v4221_v9 = vsub.f32 1.5, %v6003_v60  ;;  %v4679_v10 = vadd.f32 %v4678_v37, %v4677_v24  ;;  %9590 = vst [vmem:[#allocation11_spill] sm:$0xff] %v6062_v59  ;;  %v6065_v60 = vld [vmem:[%s5842_s13 + $0x58] sm:$0xff]  ;;  %v6098_v30 = vld [vmem:[%s5842_s13 + $0xc8] sm:$0xff] }
  0x8e   : > { %v4718_v11 = vsel %vm736_vm9, %v4623_v50, %v4717_v52  ;;  %v4552_v15 = vsub.f32 1.0, %v4548_v7  ;;  %v4693_v51 = vadd.f32 %v4692_v41, %v4691_v26  ;;  %9591 = vst [vmem:[#allocation12_spill] sm:$0xff] %v6065_v60  ;;  %v6072_v18 = vsub.f32 %v5879_v4, %v5897_v31  ;;  %v6082_v22 = vld [vmem:[%s5842_s13 + $0x98] sm:$0xff]  ;;  %v6092_v31 = vld [vmem:[%s5842_s13 + $0xa8] sm:$0xff] }
  0x8f   : > { %v4719_v58 = vsel %vm738_vm10, %v4637_v57, %v4718_v11  ;;  %v4554_v48 = vmax.f32 %v4550_v8, 0.0  ;;  %9593 = vst [vmem:[#allocation14_spill] sm:$0xff] %v6076_v19  ;;  %v6085_v26 = vmul.f32 %v5925_v17, %v4221_v9  ;;  %v6088_v62 = vmul.f32 %v6030_v49, %v4242_v28  ;;  %v6095_v27 = vld [vmem:[%s5842_s13 + $0xb8] sm:$0xff]  ;;  %v6108_v41 = vld [vmem:[%s5842_s13 + $0xe8] sm:$0xff] }
  0x90   : > { %v4720_v3 = vsel %vm740_vm11, %v4651_v2, %v4719_v58  ;;  %9594 = vst [vmem:[#allocation15_spill] sm:$0xff] %v6079_v61  ;;  %v4556_v24 = vmax.f32 %v4552_v15, 0.0  ;;  %v6105_v37 = vld [vmem:[%s5842_s13 + $0xd8] sm:$0xff] }
  0x91   : > { %9595 = vst [vmem:[#allocation16_spill] sm:$0xff] %v6082_v22  ;;  %v4721_v4 = vsel %vm742_vm12, %v4665_v5, %v4720_v3  ;;  %v4558_v35 = vmul.f32 %v4554_v48, %v6037_v6  ;;  %v4562_v20 = vmul.f32 %v4554_v48, %v6051_v13  ;;  %v4566_v36 = vmul.f32 %v4554_v48, %v6054_v14  ;;  %v6111_v42 = vld [vmem:[%s5842_s13 + $0xf8] sm:$0xff] }
  0x92   : > { %9596 = vst [vmem:[#allocation17_spill] sm:$0xff] %v6092_v31  ;;  %v4722_v17 = vsel %vm744_vm13, %v4679_v10, %v4721_v4  ;;  %v4560_v47 = vmul.f32 %v4556_v24, %v6048_v12  ;;  %v4564_v50 = vmul.f32 %v4556_v24, %v6062_v59  ;;  %v4568_v57 = vmul.f32 %v4556_v24, %v6065_v60 }
  0x93   : > { %9597 = vst [vmem:[#allocation18_spill] sm:$0xff] %v6095_v27  ;;  %v4723_v2 = vsel %vm746_vm14, %v4693_v51, %v4722_v17  ;;  %v4570_v5 = vmul.f32 %v4554_v48, %v6068_v16  ;;  %v4572_v28 = vmul.f32 %v4556_v24, %v6076_v19  ;;  %v4574_v52 = vmul.f32 %v4554_v48, %v6079_v61 }
  0x94   : > { %9598 = vst [vmem:[#allocation19_spill] sm:$0xff] %v6098_v30  ;;  %4770 = vmatpush.msra.mxu0 %v4723_v2  ;;  %v4576_v7 = vmul.f32 %v4556_v24, %v6082_v22  ;;  %v4578_v8 = vmul.f32 %v4554_v48, %v6092_v31  ;;  %v4580_v9 = vmul.f32 %v4556_v24, %v6095_v27 }
  0x95   : > { %9599 = vst [vmem:[#allocation20_spill] sm:$0xff] %v6105_v37  ;;  %v4582_v10 = vmul.f32 %v4554_v48, %v6098_v30  ;;  %v4584_v11 = vmul.f32 %v4556_v24, %v6105_v37  ;;  %v4586_v15 = vmul.f32 %v4554_v48, %v6108_v41  ;;  %v4588_v51 = vmul.f32 %v4556_v24, %v6111_v42 }
  0x96   : > { %9600 = vst [vmem:[#allocation21_spill] sm:$0xff] %v6108_v41  ;;  %v4596_v58 = vadd.f32 %v4560_v47, %v4558_v35  ;;  %5223 = vmatpush.msra.mxu2 %v4723_v2  ;;  %v4610_v3 = vadd.f32 %v4564_v50, %v4562_v20  ;;  %v4624_v4 = vadd.f32 %v4568_v57, %v4566_v36 }
  0x97   : > { %v4638_v17 = vadd.f32 %v4572_v28, %v4570_v5  ;;  %v4652_v61 = vadd.f32 %v4576_v7, %v4574_v52  ;;  %v4666_v22 = vadd.f32 %v4580_v9, %v4578_v8  ;;  %v4680_v16 = vadd.f32 %v4584_v11, %v4582_v10 }
  0x98   : > { %v4597_v19 = vrot.slane %v4596_v58, 4  ;;  %v4694_v31 = vadd.f32 %v4588_v51, %v4586_v15  ;;  %v4611_v60 = vrot.slane %v4610_v3, 4  ;;  %v4625_v27 = vrot.slane %v4624_v4, 4 }
  0x99   : > { %v4639_v14 = vrot.slane %v4638_v17, 4  ;;  %v4653_v30 = vrot.slane %v4652_v61, 4  ;;  %v4667_v37 = vrot.slane %v4666_v22, 4  ;;  %v4681_v13 = vrot.slane %v4680_v16, 4 }
  0x9a   : > { %v4598_v59 = vadd.f32 %v4597_v19, %v4596_v58  ;;  %v4695_v48 = vrot.slane %v4694_v31, 4  ;;  %v4612_v41 = vadd.f32 %v4611_v60, %v4610_v3  ;;  %v4626_v24 = vadd.f32 %v4625_v27, %v4624_v4 }
  0x9b   : > { %v4640_v35 = vadd.f32 %v4639_v14, %v4638_v17  ;;  %v4654_v47 = vadd.f32 %v4653_v30, %v4652_v61  ;;  %v4668_v36 = vadd.f32 %v4667_v37, %v4666_v22  ;;  %v4682_v50 = vadd.f32 %v4681_v13, %v4680_v16 }
  0x9c   : > { %v4599_v20 = vrot.slane %v4598_v59, 2  ;;  %v4696_v57 = vadd.f32 %v4695_v48, %v4694_v31  ;;  %v4613_v2 = vrot.slane %v4612_v41, 2  ;;  %v4627_v5 = vrot.slane %v4626_v24, 2 }
  0x9d   : > { %v4641_v28 = vrot.slane %v4640_v35, 2  ;;  %v4655_v52 = vrot.slane %v4654_v47, 2  ;;  %v4669_v8 = vrot.slane %v4668_v36, 2  ;;  %v4683_v19 = vrot.slane %v4682_v50, 2 }
  0x9e   : > { %v4600_v7 = vadd.f32 %v4599_v20, %v4598_v59  ;;  %v4697_v9 = vrot.slane %v4696_v57, 2  ;;  %v4614_v10 = vadd.f32 %v4613_v2, %v4612_v41  ;;  %v4628_v11 = vadd.f32 %v4627_v5, %v4626_v24 }
  0x9f   : > { %v4642_v60 = vadd.f32 %v4641_v28, %v4640_v35  ;;  %v4656_v27 = vadd.f32 %v4655_v52, %v4654_v47  ;;  %v4670_v61 = vadd.f32 %v4669_v8, %v4668_v36  ;;  %v4684_v30 = vadd.f32 %v4683_v19, %v4682_v50 }
  0xa0   : > { %v4601_v14 = vrot.slane %v4600_v7, 1  ;;  %v4698_v15 = vadd.f32 %v4697_v9, %v4696_v57  ;;  %v4615_v51 = vrot.slane %v4614_v10, 1  ;;  %v4629_v22 = vrot.slane %v4628_v11, 1 }
  0xa1   : > { %v4643_v13 = vrot.slane %v4642_v60, 1  ;;  %v4657_v16 = vrot.slane %v4656_v27, 1  ;;  %v4671_v37 = vrot.slane %v4670_v61, 1  ;;  %v4685_v59 = vrot.slane %v4684_v30, 1 }
  0xa2   : > { %v4602_v31 = vadd.f32 %v4601_v14, %v4600_v7  ;;  %v4227_v58 = vand.u32 2147483648, %v5910_v53  ;;  %v4616_v3 = vadd.f32 %v4615_v51, %v4614_v10  ;;  %v4630_v41 = vadd.f32 %v4629_v22, %v4628_v11  ;;  %v6161_v10 = vld [vmem:[%s5840_s12 + $0x10] sm:$0xff]  ;;  %v6185_v22 = vld [vmem:[%s5840_s12 + $0x20] sm:$0xff] }
  0xa3   : > { %v4644_v4 = vadd.f32 %v4643_v13, %v4642_v60  ;;  %v4699_v17 = vrot.slane %v4698_v15, 1  ;;  %v4658_v48 = vadd.f32 %v4657_v16, %v4656_v27  ;;  %v4223_v24 = vmul.f32 %v6085_v26, %v5910_v53  ;;  %v6188_v13 = vld [vmem:[%s5840_s12 + $0x30] sm:$0xff] }
  0xa4   : > { %v4672_v35 = vadd.f32 %v4671_v37, %v4670_v61  ;;  %v4686_v47 = vadd.f32 %v4685_v59, %v4684_v30  ;;  %v4724_v20 = vsel %vm734_vm7, %v4616_v3, %v4602_v31  ;;  %v4244_v36 = vmul.f32 0.5, %v6088_v62 }
  0xa5   : > { %v4725_v50 = vsel %vm736_vm9, %v4630_v41, %v4724_v20  ;;  %v4225_v57 = vsel %vm4224_vm15, %v5910_v53, %v4223_v24  ;;  %v4210_v26 = vmul.f32 %v6058_v29, %v6058_v29  ;;  %v4212_v2 = vmul.f32 %v6072_v18, %v6072_v18  ;;  %v6158_v18 = vld [vmem:[%s5840_s12] sm:$0xff] }
  0xa6   : > { %v4700_v5 = vadd.f32 %v4699_v17, %v4698_v15  ;;  %v4726_v62 = vsel %vm738_vm10, %v4644_v4, %v4725_v50  ;;  %v4228_v28 = vsel %vm4226_vm0, %v4227_v58, %v4225_v57  ;;  %v4245_v52 = vsub.f32 1.5, %v4244_v36  ;;  %v6200_v41 = vld [vmem:[%s5840_s12 + $0x40] sm:$0xff] }
  0xa7   : > { %v4727_v7 = vsel %vm740_vm11, %v4658_v48, %v4726_v62  ;;  %v4265_v8 = vsub.f32 1.0, %v4228_v28  ;;  %v6149_v19 = vadd.f32 %v4210_v26, %v5967_v43  ;;  %v6152_v53 = vadd.f32 %v4212_v2, %v5969_v21 }
  0xa8   : > { %v4728_v9 = vsel %vm742_vm12, %v4672_v35, %v4727_v7  ;;  %v4246_v29 = vmul.f32 %v6030_v49, %v4245_v52  ;;  %v6164_v11 = vstv %s6128_s18  ;;  %v4251_v21 = vand.u32 2147483648, %v5932_v23  ;;  %s7360_s18 = sld [smem:[#allocation5 + $0x87]] }
  0xa9   : > { %v4729_v43 = vsel %vm744_vm13, %v4686_v47, %v4728_v9  ;;  %v4269_v60 = vmax.f32 %v4265_v8, 0.0  ;;  %5302 = vrsqrt.f32 %v6149_v19  ;;  %v3889_v14 = vsub.f32 %v6158_v18, %v6164_v11 }
  0xaa   : > { %v4730_v49 = vsel %vm746_vm14, %v4700_v5, %v4729_v43  ;;  %v4247_v27 = vmul.f32 %v4246_v29, %v5932_v23  ;;  %5304 = vrsqrt.f32 %v6152_v53  ;;  %v3891_v61 = vsub.f32 %v6161_v10, %v6164_v11 }
  0xab   : > { %4793 = vmatpush.msra.mxu1 %v4730_v49  ;;  %v4273_v15 = vmul.f32 %v4269_v60, %v5937_v25  ;;  %v4277_v51 = vmul.f32 %v4269_v60, %v5948_v33  ;;  %5238 = vmatpush.msra.mxu3 %v4730_v49  ;;  %v6191_v16 = vstv %s6136_s19  ;;  %v4281_v37 = vmul.f32 %v4269_v60, %v5958_v38  ;;  %s7390_s19 = sld [smem:[#allocation5 + $0x107]] }
  0xac   : > { %v4249_v30 = vsel %vm4248_vm1, %v5932_v23, %v4247_v27  ;;  %v4285_v59 = vmul.f32 %v4269_v60, %v5964_v40  ;;  %v4289_v58 = vmul.f32 %v4269_v60, %v5975_v45  ;;  %v4293_v25 = vmul.f32 %v4269_v60, %v5986_v54 }
  0xad   : > { %v4252_v31 = vsel %vm4250_vm2, %v4251_v21, %v4249_v30  ;;  %v4297_v33 = vmul.f32 %v4269_v60, %v5992_v56  ;;  %v4301_v3 = vmul.f32 %v4269_v60, %v6009_v0  ;;  %v4239_v17 = vand.u32 2147483648, %v6149_v19 }
  0xae   : > { %v4267_v23 = vsub.f32 1.0, %v4252_v31  ;;  %v6205_v48 = vmul.f32 %v3889_v14, %v3889_v14  ;;  %v3903_v38 = vsub.f32 %v6185_v22, %v6191_v16  ;;  %v3905_v40 = vsub.f32 %v6188_v13, %v6191_v16 }
  0xaf   : > { %v6202_v4 = vpop.eup %5302  ;;  %v6217_v0 = vmul.f32 %v3891_v61, %v3891_v61  ;;  %v6220_v24 = vstv %s6166_s20  ;;  %vm4236_vm3 = vcmp.eq.f32.partialorder %v6149_v19, inf  ;;  %vm4238_vm4 = vcmp.eq.f32.partialorder %v6149_v19, 0.0  ;;  %s7646_s20 = sld [smem:[#allocation5 + $0x6]] }
  0xb0   : > { %v6211_v45 = vpop.eup %5304  ;;  %v4271_v54 = vmax.f32 %v4267_v23, 0.0  ;;  %v6215_v56 = vmul.f32 %v6202_v4, %v6149_v19  ;;  %v6226_v47 = vmul.f32 %v3903_v38, %v3903_v38  ;;  %v6228_v20 = vmul.f32 %v3905_v40, %v3905_v40 }
  0xb1   : > { %v6224_v35 = vmul.f32 %v6211_v45, %v6152_v53  ;;  %v6232_v36 = vsub.f32 %v6200_v41, %v6220_v24  ;;  %vm4260_vm5 = vcmp.eq.f32.partialorder %v6152_v53, inf  ;;  %vm4262_vm6 = vcmp.eq.f32.partialorder %v6152_v53, 0.0 }
  0xb2   : > { %v4275_v50 = vmul.f32 %v4271_v54, %v5945_v32  ;;  %v4279_v57 = vmul.f32 %v4271_v54, %v5951_v34  ;;  %v4283_v26 = vmul.f32 %v4271_v54, %v5961_v39  ;;  %v4287_v2 = vmul.f32 %v4271_v54, %v5972_v44 }
  0xb3   : > { %v4291_v5 = vmul.f32 %v4271_v54, %v5978_v46  ;;  %v4295_v62 = vmul.f32 %v4271_v54, %v5989_v55  ;;  %v4299_v28 = vmul.f32 %v4271_v54, %v6006_v63  ;;  %v4303_v52 = vmul.f32 %v4271_v54, %v6012_v1 }
  0xb4   : > { %v4305_v7 = vadd.f32 %v4275_v50, %v4273_v15  ;;  %v4319_v8 = vadd.f32 %v4279_v57, %v4277_v51  ;;  %v4333_v9 = vadd.f32 %v4283_v26, %v4281_v37  ;;  %v4347_v29 = vadd.f32 %v4287_v2, %v4285_v59 }
  0xb5   : > { %v4361_v43 = vadd.f32 %v4291_v5, %v4289_v58  ;;  %v4375_v32 = vadd.f32 %v4295_v62, %v4293_v25  ;;  %v4389_v21 = vadd.f32 %v4299_v28, %v4297_v33  ;;  %v4403_v34 = vadd.f32 %v4303_v52, %v4301_v3 }
  0xb6   : > { %v4306_v60 = vrot.slane %v4305_v7, 4  ;;  %v4320_v39 = vrot.slane %v4319_v8, 4  ;;  %v4334_v49 = vrot.slane %v4333_v9, 4  ;;  %v4348_v44 = vrot.slane %v4347_v29, 4 }
  0xb7   : > { %v4362_v27 = vrot.slane %v4361_v43, 4  ;;  %v4376_v46 = vrot.slane %v4375_v32, 4  ;;  %v4390_v14 = vrot.slane %v4389_v21, 4  ;;  %v4404_v55 = vrot.slane %v4403_v34, 4 }
  0xb8   : > { %v4307_v61 = vadd.f32 %v4306_v60, %v4305_v7  ;;  %v4321_v63 = vadd.f32 %v4320_v39, %v4319_v8  ;;  %v4335_v30 = vadd.f32 %v4334_v49, %v4333_v9  ;;  %v4349_v1 = vadd.f32 %v4348_v44, %v4347_v29  ;;  %v6243_v44 = vld [vmem:[%s5840_s12 + $0x50] sm:$0xff] }
  0xb9   : > { %v4363_v15 = vadd.f32 %v4362_v27, %v4361_v43  ;;  %v4377_v51 = vadd.f32 %v4376_v46, %v4375_v32  ;;  %v4391_v31 = vadd.f32 %v4390_v14, %v4389_v21  ;;  %v4405_v37 = vadd.f32 %v4404_v55, %v4403_v34 }
  0xba   : > { %v4308_v59 = vrot.slane %v4307_v61, 2  ;;  %v4322_v58 = vrot.slane %v4321_v63, 2  ;;  %v4336_v23 = vrot.slane %v4335_v30, 2  ;;  %v4350_v25 = vrot.slane %v4349_v1, 2 }
  0xbb   : > { %v4364_v33 = vrot.slane %v4363_v15, 2  ;;  %v4378_v3 = vrot.slane %v4377_v51, 2  ;;  %v4392_v38 = vrot.slane %v4391_v31, 2  ;;  %v4406_v40 = vrot.slane %v4405_v37, 2 }
  0xbc   : > { %v4309_v54 = vadd.f32 %v4308_v59, %v4307_v61  ;;  %v4323_v50 = vadd.f32 %v4322_v58, %v4321_v63  ;;  %v4337_v57 = vadd.f32 %v4336_v23, %v4335_v30  ;;  %v4351_v26 = vadd.f32 %v4350_v25, %v4349_v1  ;;  %v6247_v61 = vld [vmem:[%s5840_s12 + $0x8] sm:$0xff]  ;;  %v6265_v59 = vld [vmem:[%s5840_s12 + $0x18] sm:$0xff] }
  0xbd   : > { %v4365_v2 = vadd.f32 %v4364_v33, %v4363_v15  ;;  %v4379_v5 = vadd.f32 %v4378_v3, %v4377_v51  ;;  %v4393_v62 = vadd.f32 %v4392_v38, %v4391_v31  ;;  %v4407_v28 = vadd.f32 %v4406_v40, %v4405_v37  ;;  %v6275_v25 = vld [vmem:[%s5840_s12 + $0x28] sm:$0xff]  ;;  %v6281_v40 = vld [vmem:[%s5840_s12 + $0x38] sm:$0xff] }
  0xbe   : > { %v4310_v52 = vrot.slane %v4309_v54, 1  ;;  %v4324_v7 = vrot.slane %v4323_v50, 1  ;;  %v4338_v8 = vrot.slane %v4337_v57, 1  ;;  %v4352_v9 = vrot.slane %v4351_v26, 1 }
  0xbf   : > { %v4366_v29 = vrot.slane %v4365_v2, 1  ;;  %v4380_v43 = vrot.slane %v4379_v5, 1  ;;  %v4394_v32 = vrot.slane %v4393_v62, 1  ;;  %v4408_v21 = vrot.slane %v4407_v28, 1 }
  0xc0   : > { %v4311_v34 = vadd.f32 %v4310_v52, %v4309_v54  ;;  %v4325_v60 = vadd.f32 %v4324_v7, %v4323_v50  ;;  %v4339_v39 = vadd.f32 %v4338_v8, %v4337_v57  ;;  %v4353_v49 = vadd.f32 %v4352_v9, %v4351_v26  ;;  %v6284_v54 = vld [vmem:[%s5840_s12 + $0x48] sm:$0xff] }
  0xc1   : > { %v4367_v27 = vadd.f32 %v4366_v29, %v4365_v2  ;;  %v4381_v46 = vadd.f32 %v4380_v43, %v4379_v5  ;;  %v4395_v14 = vadd.f32 %v4394_v32, %v4393_v62  ;;  %v4409_v55 = vadd.f32 %v4408_v21, %v4407_v28  ;;  %v6296_v28 = vld [vmem:[%s5840_s12 + $0x58] sm:$0xff] }
  0xc2   : > { %v4433_v63 = vsel %vm734_vm7, %v4325_v60, %v4311_v34  ;;  %v4231_v30 = vmul.f32 %v6202_v4, %v6215_v56  ;;  %v4255_v1 = vmul.f32 %v6211_v45, %v6224_v35  ;;  %v3911_v15 = vadd.f32 %v6226_v47, %v6205_v48 }
  0xc3   : > { %v4434_v51 = vsel %vm736_vm9, %v4339_v39, %v4433_v63  ;;  %v3913_v31 = vadd.f32 %v6228_v20, %v6217_v0  ;;  %v3923_v37 = vsub.f32 %v6243_v44, %v6220_v24  ;;  %v3925_v56 = vmul.f32 %v6232_v36, %v6232_v36 }
  0xc4   : > { %v4435_v35 = vsel %vm738_vm10, %v4353_v49, %v4434_v51  ;;  %v4232_v58 = vmul.f32 0.5, %v4231_v30  ;;  %v4256_v23 = vmul.f32 0.5, %v4255_v1  ;;  %v3890_v48 = vsub.f32 %v6247_v61, %v6164_v11 }
  0xc5   : > { %v4436_v47 = vsel %vm740_vm11, %v4367_v27, %v4435_v35  ;;  %v3927_v0 = vmul.f32 %v3923_v37, %v3923_v37  ;;  %v6272_v20 = vadd.f32 %v3925_v56, %v3911_v15  ;;  %v3892_v38 = vsub.f32 %v6265_v59, %v6164_v11  ;;  %v9601_v35 = vld [vmem:[#allocation9_spill] sm:$0xff] }
  0xc6   : > { %v4437_v36 = vsel %vm742_vm12, %v4381_v46, %v4436_v47  ;;  %v4233_v33 = vsub.f32 1.5, %v4232_v58  ;;  %v4257_v3 = vsub.f32 1.5, %v4256_v23  ;;  %v3894_v26 = vmul.f32 %v3890_v48, %v3890_v48  ;;  %v9602_v23 = vld [vmem:[#allocation11_spill] sm:$0xff]  ;;  %v9603_v47 = vld [vmem:[#allocation10_spill] sm:$0xff] }
  0xc7   : > { %v4438_v50 = vsel %vm744_vm13, %v4395_v14, %v4437_v36  ;;  %v6287_v57 = vadd.f32 %v3927_v0, %v3913_v31  ;;  %5306 = vrsqrt.f32 %v6272_v20  ;;  %v3904_v11 = vsub.f32 %v6275_v25, %v6191_v16  ;;  %v9604_v36 = vld [vmem:[#allocation12_spill] sm:$0xff] }
  0xc8   : > { %v4439_v2 = vsel %vm746_vm14, %v4409_v55, %v4438_v50  ;;  %v4234_v5 = vmul.f32 %v6202_v4, %v4233_v33  ;;  %v4258_v62 = vmul.f32 %v6211_v45, %v4257_v3  ;;  %v4263_v52 = vand.u32 2147483648, %v6152_v53  ;;  %v9605_v3 = vld [vmem:[#allocation13_spill] sm:$0xff]  ;;  %v9606_v50 = vld [vmem:[#allocation14_spill] sm:$0xff] }
  0xc9   : > { %4771 = vmatpush.msra.mxu0 %v4439_v2  ;;  %5224 = vmatpush.msra.mxu2 %v4439_v2  ;;  %5308 = vrsqrt.f32 %v6287_v57  ;;  %v3906_v7 = vsub.f32 %v6281_v40, %v6191_v16  ;;  %v3922_v8 = vsub.f32 %v6284_v54, %v6220_v24  ;;  %v3908_v9 = vmul.f32 %v3904_v11, %v3904_v11  ;;  %v9607_v2 = vld [vmem:[#allocation15_spill] sm:$0xff] }
  0xca   : > { %v4235_v4 = vmul.f32 %v4234_v5, %v6149_v19  ;;  %v4259_v45 = vmul.f32 %v4258_v62, %v6152_v53  ;;  %v3896_v29 = vmul.f32 %v3892_v38, %v3892_v38  ;;  %v3924_v32 = vsub.f32 %v6296_v28, %v6220_v24  ;;  %v9608_v62 = vld [vmem:[#allocation16_spill] sm:$0xff] }
  0xcb   : > { %v3910_v43 = vmul.f32 %v3906_v7, %v3906_v7  ;;  %v3926_v21 = vmul.f32 %v3922_v8, %v3922_v8  ;;  %v3912_v60 = vadd.f32 %v3908_v9, %v3894_v26  ;;  %v3943_v51 = vand.u32 2147483648, %v6272_v20  ;;  %v9610_v7 = vld [vmem:[#allocation18_spill] sm:$0xff]  ;;  %v9611_v8 = vld [vmem:[#allocation19_spill] sm:$0xff] }
  0xcc   : > { %v4237_v16 = vsel %vm4236_vm3, %v6149_v19, %v4235_v4  ;;  %v4261_v34 = vsel %vm4260_vm5, %v6152_v53, %v4259_v45  ;;  %v3928_v30 = vmul.f32 %v3924_v32, %v3924_v32  ;;  %v9612_v45 = vld [vmem:[#allocation20_spill] sm:$0xff]  ;;  %vm3940_vm8 = vcmp.eq.f32.partialorder %v6272_v20, inf }
  0xcd   : > { %v6315_v39 = vpop.eup %5306  ;;  %v4240_v49 = vsel %vm4238_vm4, %v4239_v17, %v4237_v16  ;;  %v4264_v27 = vsel %vm4262_vm6, %v4263_v52, %v4261_v34  ;;  %v3914_v63 = vadd.f32 %v3910_v43, %v3896_v29  ;;  %v6325_v1 = vadd.f32 %v3926_v21, %v3912_v60  ;;  %v9609_v52 = vld [vmem:[#allocation17_spill] sm:$0xff] }
  0xce   : > { %v4266_v46 = vsub.f32 1.0, %v4240_v49  ;;  %v4268_v24 = vsub.f32 1.0, %v4264_v27  ;;  %v3934_v14 = vmul.f32 %v6315_v39, %v6272_v20  ;;  %v9613_v29 = vld [vmem:[#allocation21_spill] sm:$0xff]  ;;  %vm3942_vm15 = vcmp.eq.f32.partialorder %v6272_v20, 0.0 }
  0xcf   : > { %v6323_v55 = vpop.eup %5308  ;;  %v6335_v17 = vadd.f32 %v3928_v30, %v3914_v63  ;;  %5310 = vrsqrt.f32 %v6325_v1  ;;  %vm3964_vm0 = vcmp.eq.f32.partialorder %v6287_v57, inf  ;;  %vm3966_vm1 = vcmp.eq.f32.partialorder %v6287_v57, 0.0 }
  0xd0   : > { %v4270_v53 = vmax.f32 %v4266_v46, 0.0  ;;  %v4272_v15 = vmax.f32 %v4268_v24, 0.0  ;;  %v6329_v31 = vmul.f32 %v6315_v39, %v3934_v14  ;;  %v6333_v19 = vmul.f32 %v6323_v55, %v6287_v57 }
  0xd1   : > { %5312 = vrsqrt.f32 %v6335_v17  ;;  %vm3952_vm2 = vcmp.eq.f32.partialorder %v6325_v1, inf  ;;  %vm3954_vm3 = vcmp.eq.f32.partialorder %v6325_v1, 0.0  ;;  %vm3976_vm4 = vcmp.eq.f32.partialorder %v6335_v17, inf }
  0xd2   : > { %v4274_v37 = vmul.f32 %v4270_v53, %v6037_v6  ;;  %v4276_v56 = vmul.f32 %v4272_v15, %v6048_v12  ;;  %v4278_v58 = vmul.f32 %v4270_v53, %v9601_v35  ;;  %v4280_v48 = vmul.f32 %v4272_v15, %v9602_v23 }
  0xd3   : > { %v4282_v0 = vmul.f32 %v4270_v53, %v9603_v47  ;;  %v4284_v33 = vmul.f32 %v4272_v15, %v9604_v36  ;;  %v4286_v38 = vmul.f32 %v4270_v53, %v9605_v3  ;;  %v4288_v26 = vmul.f32 %v4272_v15, %v9606_v50 }
  0xd4   : > { %v4290_v5 = vmul.f32 %v4270_v53, %v9607_v2  ;;  %v4292_v11 = vmul.f32 %v4272_v15, %v9608_v62  ;;  %v4294_v6 = vmul.f32 %v4270_v53, %v9609_v52  ;;  %v4296_v12 = vmul.f32 %v4272_v15, %v9610_v7 }
  0xd5   : > { %v4298_v4 = vmul.f32 %v4270_v53, %v9611_v8  ;;  %v4300_v9 = vmul.f32 %v4272_v15, %v9612_v45  ;;  %v4302_v43 = vmul.f32 %v4270_v53, %v9613_v29  ;;  %v4304_v32 = vmul.f32 %v4272_v15, %v6111_v42  ;;  %v6354_v49 = vpop.eup %5310 }
  0xd6   : > { %v4312_v21 = vadd.f32 %v4276_v56, %v4274_v37  ;;  %v4326_v16 = vadd.f32 %v4280_v48, %v4278_v58  ;;  %v4340_v34 = vadd.f32 %v4284_v33, %v4282_v0  ;;  %v4354_v60 = vadd.f32 %v4288_v26, %v4286_v38 }
  0xd7   : > { %v4368_v27 = vadd.f32 %v4292_v11, %v4290_v5  ;;  %v4382_v46 = vadd.f32 %v4296_v12, %v4294_v6  ;;  %v4396_v24 = vadd.f32 %v4300_v9, %v4298_v4  ;;  %v4410_v14 = vadd.f32 %v4304_v32, %v4302_v43 }
  0xd8   : > { %v4313_v63 = vrot.slane %v4312_v21, 4  ;;  %v4327_v30 = vrot.slane %v4326_v16, 4  ;;  %v4341_v35 = vrot.slane %v4340_v34, 4  ;;  %v4355_v23 = vrot.slane %v4354_v60, 4 }
  0xd9   : > { %v4369_v47 = vrot.slane %v4368_v27, 4  ;;  %v4383_v36 = vrot.slane %v4382_v46, 4  ;;  %v4397_v3 = vrot.slane %v4396_v24, 4  ;;  %v4411_v53 = vrot.slane %v4410_v14, 4 }
  0xda   : > { %v4314_v50 = vadd.f32 %v4313_v63, %v4312_v21  ;;  %v4328_v42 = vadd.f32 %v4327_v30, %v4326_v16  ;;  %v4342_v15 = vadd.f32 %v4341_v35, %v4340_v34  ;;  %v4356_v37 = vadd.f32 %v4355_v23, %v4354_v60 }
  0xdb   : > { %v4370_v56 = vadd.f32 %v4369_v47, %v4368_v27  ;;  %v4384_v58 = vadd.f32 %v4383_v36, %v4382_v46  ;;  %v4398_v48 = vadd.f32 %v4397_v3, %v4396_v24  ;;  %v4412_v0 = vadd.f32 %v4411_v53, %v4410_v14 }
  0xdc   : > { %v4315_v33 = vrot.slane %v4314_v50, 2  ;;  %v4329_v38 = vrot.slane %v4328_v42, 2  ;;  %v4343_v26 = vrot.slane %v4342_v15, 2  ;;  %v4357_v2 = vrot.slane %v4356_v37, 2 }
  0xdd   : > { %v4371_v5 = vrot.slane %v4370_v56, 2  ;;  %v4385_v62 = vrot.slane %v4384_v58, 2  ;;  %v4399_v11 = vrot.slane %v4398_v48, 2  ;;  %v4413_v52 = vrot.slane %v4412_v0, 2 }
  0xde   : > { %v4316_v6 = vadd.f32 %v4315_v33, %v4314_v50  ;;  %v4330_v7 = vadd.f32 %v4329_v38, %v4328_v42  ;;  %v4344_v12 = vadd.f32 %v4343_v26, %v4342_v15  ;;  %v4358_v8 = vadd.f32 %v4357_v2, %v4356_v37 }
  0xdf   : > { %v4372_v4 = vadd.f32 %v4371_v5, %v4370_v56  ;;  %v4386_v45 = vadd.f32 %v4385_v62, %v4384_v58  ;;  %v4400_v9 = vadd.f32 %v4399_v11, %v4398_v48  ;;  %v4414_v29 = vadd.f32 %v4413_v52, %v4412_v0 }
  0xe0   : > { %v4317_v43 = vrot.slane %v4316_v6, 1  ;;  %v4331_v32 = vrot.slane %v4330_v7, 1  ;;  %v4345_v21 = vrot.slane %v4344_v12, 1  ;;  %v4359_v16 = vrot.slane %v4358_v8, 1 }
  0xe1   : > { %v4373_v34 = vrot.slane %v4372_v4, 1  ;;  %v4387_v60 = vrot.slane %v4386_v45, 1  ;;  %v4401_v27 = vrot.slane %v4400_v9, 1  ;;  %v4415_v46 = vrot.slane %v4414_v29, 1 }
  0xe2   : > { %v4318_v24 = vadd.f32 %v4317_v43, %v4316_v6  ;;  %v4332_v14 = vadd.f32 %v4331_v32, %v4330_v7  ;;  %v4346_v63 = vadd.f32 %v4345_v21, %v4344_v12  ;;  %v4360_v30 = vadd.f32 %v4359_v16, %v4358_v8 }
  0xe3   : > { %v4374_v35 = vadd.f32 %v4373_v34, %v4372_v4  ;;  %v4388_v23 = vadd.f32 %v4387_v60, %v4386_v45  ;;  %v4402_v47 = vadd.f32 %v4401_v27, %v4400_v9  ;;  %v3936_v3 = vmul.f32 0.5, %v6329_v31 }
  0xe4   : > { %v4440_v36 = vsel %vm734_vm7, %v4332_v14, %v4318_v24  ;;  %v3959_v53 = vmul.f32 %v6323_v55, %v6333_v19  ;;  %v3946_v50 = vmul.f32 %v6354_v49, %v6325_v1  ;;  %v4416_v42 = vadd.f32 %v4415_v46, %v4414_v29 }
  0xe5   : > { %v4441_v15 = vsel %vm736_vm9, %v4346_v63, %v4440_v36  ;;  %v6372_v37 = vstv %s6356_s26  ;;  %v3937_v58 = vsub.f32 1.5, %v3936_v3  ;;  %v3967_v0 = vand.u32 2147483648, %v6287_v57  ;;  %s7648_s26 = sld [smem:[#allocation5 + $0x86]] }
  0xe6   : > { %v4442_v56 = vsel %vm738_vm10, %v4360_v30, %v4441_v15  ;;  %v3960_v48 = vmul.f32 0.5, %v3959_v53  ;;  %v3947_v31 = vmul.f32 %v6354_v49, %v3946_v50  ;;  %v3605_v33 = vsub.f32 %v6158_v18, %v6372_v37  ;;  %v6456_v53 = vld [vmem:[%s5842_s13 + $0x40] sm:$0xff] }
  0xe7   : > { %v4443_v19 = vsel %vm740_vm11, %v4374_v35, %v4442_v56  ;;  %v6383_v38 = vstv %s6358_s27  ;;  %v3938_v2 = vmul.f32 %v6315_v39, %v3937_v58  ;;  %v3607_v52 = vsub.f32 %v6161_v10, %v6372_v37  ;;  %v6395_v39 = vpop.eup %5312  ;;  %v6460_v50 = vld [vmem:[%s5842_s13 + $0x60] sm:$0xff]  ;;  %s7653_s27 = sld [smem:[#allocation5 + $0x106]] }
  0xe8   : > { %v4444_v26 = vsel %vm742_vm12, %v4388_v23, %v4443_v19  ;;  %v3961_v5 = vsub.f32 1.5, %v3960_v48  ;;  %v3948_v62 = vmul.f32 0.5, %v3947_v31  ;;  %v3609_v8 = vmul.f32 %v3605_v33, %v3605_v33  ;;  %v6464_v15 = vld [vmem:[%s5842_s13 + $0x80] sm:$0xff] }
  0xe9   : > { %v4445_v11 = vsel %vm744_vm13, %v4402_v47, %v4444_v26  ;;  %v3939_v18 = vmul.f32 %v3938_v2, %v6272_v20  ;;  %v3619_v4 = vsub.f32 %v6185_v22, %v6383_v38  ;;  %v3621_v10 = vsub.f32 %v6188_v13, %v6383_v38  ;;  %v6448_v47 = vld [vmem:[%s5842_s13] sm:$0xff]  ;;  %v6480_v26 = vld [vmem:[%s5842_s13 + $0x30] sm:$0xff] }
  0xea   : > { %v4446_v6 = vsel %vm746_vm14, %v4416_v42, %v4445_v11  ;;  %v3962_v7 = vmul.f32 %v6323_v55, %v3961_v5  ;;  %v3949_v12 = vsub.f32 1.5, %v3948_v62  ;;  %v3970_v29 = vmul.f32 %v6395_v39, %v6335_v17  ;;  %v6468_v58 = vld [vmem:[%s5842_s13 + $0xa0] sm:$0xff]  ;;  %v6484_v5 = vld [vmem:[%s5842_s13 + $0x50] sm:$0xff] }
  0xeb   : > { %4794 = vmatpush.msra.mxu1 %v4446_v6  ;;  %5239 = vmatpush.msra.mxu3 %v4446_v6  ;;  %v3941_v45 = vsel %vm3940_vm8, %v6272_v20, %v3939_v18  ;;  %v3955_v22 = vand.u32 2147483648, %v6325_v1  ;;  %v3623_v32 = vmul.f32 %v3619_v4, %v3619_v4  ;;  %v6415_v13 = vstv %s6374_s8  ;;  %v6472_v31 = vld [vmem:[%s5842_s13 + $0xc0] sm:$0xff]  ;;  %9614 = vst [vmem:[#allocation9_spill] sm:$0xff] %v6484_v5  ;;  %v6488_v11 = vld [vmem:[%s5842_s13 + $0x70] sm:$0xff]  ;;  %s7862_s8 = sld [smem:[#allocation5 + $0x5]] }
  0xec   : > { %v3963_v55 = vmul.f32 %v3962_v7, %v6287_v57  ;;  %v3950_v9 = vmul.f32 %v6354_v49, %v3949_v12  ;;  %v3944_v43 = vsel %vm3942_vm15, %v3943_v51, %v3941_v45  ;;  %v3971_v34 = vmul.f32 %v6395_v39, %v3970_v29  ;;  %9615 = vst [vmem:[#allocation11_spill] sm:$0xff] %v6488_v11  ;;  %v6492_v6 = vld [vmem:[%s5842_s13 + $0x90] sm:$0xff] }
  0xed   : > { %v3981_v16 = vsub.f32 1.0, %v3944_v43  ;;  %v6424_v51 = vmul.f32 %v3607_v52, %v3607_v52  ;;  %v6426_v60 = vmul.f32 %v3621_v10, %v3621_v10  ;;  %v3637_v27 = vsub.f32 %v6200_v41, %v6415_v13  ;;  %9616 = vst [vmem:[#allocation10_spill] sm:$0xff] %v6492_v6  ;;  %v6496_v7 = vld [vmem:[%s5842_s13 + $0xb0] sm:$0xff]  ;;  %v6504_v10 = vld [vmem:[%s5842_s13 + $0xe0] sm:$0xff] }
  0xee   : > { %v3965_v21 = vsel %vm3964_vm0, %v6287_v57, %v3963_v55  ;;  %v3951_v49 = vmul.f32 %v3950_v9, %v6325_v1  ;;  %v6433_v63 = vadd.f32 %v3623_v32, %v3609_v8  ;;  %v6439_v30 = vmul.f32 0.5, %v3971_v34  ;;  %9617 = vst [vmem:[#allocation12_spill] sm:$0xff] %v6496_v7  ;;  %v6500_v8 = vld [vmem:[%s5842_s13 + $0xd0] sm:$0xff] }
  0xef   : > { %v3968_v20 = vsel %vm3966_vm1, %v3967_v0, %v3965_v21  ;;  %v3985_v24 = vmax.f32 %v3981_v16, 0.0  ;;  %v6443_v41 = vsub.f32 %v6243_v44, %v6415_v13  ;;  %v6445_v35 = vmul.f32 %v3637_v27, %v3637_v27  ;;  %v6476_v0 = vld [vmem:[%s5842_s13 + $0x10] sm:$0xff]  ;;  %9618 = vst [vmem:[#allocation13_spill] sm:$0xff] %v6500_v8 }
  0xf0   : > { %v3983_v46 = vsub.f32 1.0, %v3968_v20  ;;  %v3953_v14 = vsel %vm3952_vm2, %v6325_v1, %v3951_v49  ;;  %v6452_v1 = vld [vmem:[%s5842_s13 + $0x20] sm:$0xff]  ;;  %9619 = vst [vmem:[#allocation14_spill] sm:$0xff] %v6504_v10  ;;  %v6508_v55 = vld [vmem:[%s5842_s13 + $0xf0] sm:$0xff]  ;;  %vm3978_vm5 = vcmp.eq.f32.partialorder %v6335_v17, 0.0 }
  0xf1   : > { %v6437_v57 = vsel %vm3954_vm3, %v3955_v22, %v3953_v14  ;;  %v3989_v36 = vmul.f32 %v6448_v47, %v3985_v24  ;;  %v3993_v3 = vmul.f32 %v6452_v1, %v3985_v24  ;;  %v3997_v44 = vmul.f32 %v6456_v53, %v3985_v24 }
  0xf2   : > { %v3987_v23 = vmax.f32 %v3983_v46, 0.0  ;;  %v4001_v42 = vmul.f32 %v6460_v50, %v3985_v24  ;;  %v4005_v56 = vmul.f32 %v6464_v15, %v3985_v24  ;;  %v4009_v48 = vmul.f32 %v6468_v58, %v3985_v24 }
  0xf3   : > { %v4013_v19 = vmul.f32 %v6472_v31, %v3985_v24  ;;  %v4017_v45 = vmul.f32 %v6504_v10, %v3985_v24 }
  0xf4   : > { %v3991_v33 = vmul.f32 %v6476_v0, %v3987_v23  ;;  %v3995_v2 = vmul.f32 %v6480_v26, %v3987_v23  ;;  %v3999_v62 = vmul.f32 %v6484_v5, %v3987_v23  ;;  %v4003_v52 = vmul.f32 %v6488_v11, %v3987_v23 }
  0xf5   : > { %v4007_v18 = vmul.f32 %v6492_v6, %v3987_v23  ;;  %v4011_v12 = vmul.f32 %v6496_v7, %v3987_v23  ;;  %v4015_v4 = vmul.f32 %v6500_v8, %v3987_v23  ;;  %v4019_v9 = vmul.f32 %v6508_v55, %v3987_v23 }
  0xf6   : > { %v4021_v29 = vadd.f32 %v3991_v33, %v3989_v36  ;;  %v4035_v43 = vadd.f32 %v3995_v2, %v3993_v3  ;;  %v4049_v22 = vadd.f32 %v3999_v62, %v3997_v44  ;;  %v4063_v32 = vadd.f32 %v4003_v52, %v4001_v42 }
  0xf7   : > { %v4077_v21 = vadd.f32 %v4007_v18, %v4005_v56  ;;  %v4091_v16 = vadd.f32 %v4011_v12, %v4009_v48  ;;  %v4105_v49 = vadd.f32 %v4015_v4, %v4013_v19  ;;  %v4119_v46 = vadd.f32 %v4019_v9, %v4017_v45 }
  0xf8   : > { %v4022_v34 = vrot.slane %v4021_v29, 4  ;;  %v4036_v20 = vrot.slane %v4035_v43, 4  ;;  %v4050_v27 = vrot.slane %v4049_v22, 4  ;;  %v4064_v14 = vrot.slane %v4063_v32, 4 }
  0xf9   : > { %v4078_v8 = vrot.slane %v4077_v21, 4  ;;  %v4092_v7 = vrot.slane %v4091_v16, 4  ;;  %v4106_v6 = vrot.slane %v4105_v49, 4  ;;  %v4120_v5 = vrot.slane %v4119_v46, 4 }
  0xfa   : > { %v4023_v24 = vadd.f32 %v4022_v34, %v4021_v29  ;;  %v4037_v10 = vadd.f32 %v4036_v20, %v4035_v43  ;;  %v4051_v11 = vadd.f32 %v4050_v27, %v4049_v22  ;;  %v4065_v23 = vadd.f32 %v4064_v14, %v4063_v32 }
  0xfb   : > { %v4079_v36 = vadd.f32 %v4078_v8, %v4077_v21  ;;  %v4093_v3 = vadd.f32 %v4092_v7, %v4091_v16  ;;  %v4107_v44 = vadd.f32 %v4106_v6, %v4105_v49  ;;  %v4121_v19 = vadd.f32 %v4120_v5, %v4119_v46 }
  0xfc   : > { %v4024_v42 = vrot.slane %v4023_v24, 2  ;;  %v4038_v56 = vrot.slane %v4037_v10, 2  ;;  %v4052_v48 = vrot.slane %v4051_v11, 2  ;;  %v4066_v33 = vrot.slane %v4065_v23, 2 }
  0xfd   : > { %v4080_v2 = vrot.slane %v4079_v36, 2  ;;  %v4094_v62 = vrot.slane %v4093_v3, 2  ;;  %v4108_v52 = vrot.slane %v4107_v44, 2  ;;  %v4122_v45 = vrot.slane %v4121_v19, 2 }
  0xfe   : > { %v4025_v18 = vadd.f32 %v4024_v42, %v4023_v24  ;;  %v4039_v12 = vadd.f32 %v4038_v56, %v4037_v10  ;;  %v4053_v4 = vadd.f32 %v4052_v48, %v4051_v11  ;;  %v4067_v9 = vadd.f32 %v4066_v33, %v4065_v23 }
  0xff   : > { %v4081_v29 = vadd.f32 %v4080_v2, %v4079_v36  ;;  %v4095_v43 = vadd.f32 %v4094_v62, %v4093_v3  ;;  %v4109_v22 = vadd.f32 %v4108_v52, %v4107_v44  ;;  %v4123_v32 = vadd.f32 %v4122_v45, %v4121_v19  ;;  %v6552_v45 = vld [vmem:[%s5842_s13 + $0x28] sm:$0xff] }
 0x100   : > { %v4026_v7 = vrot.slane %v4025_v18, 1  ;;  %v4040_v6 = vrot.slane %v4039_v12, 1  ;;  %v4054_v8 = vrot.slane %v4053_v4, 1  ;;  %v4068_v21 = vrot.slane %v4067_v9, 1 }
 0x101   : > { %v4082_v5 = vrot.slane %v4081_v29, 1  ;;  %v4096_v16 = vrot.slane %v4095_v43, 1  ;;  %v4110_v49 = vrot.slane %v4109_v22, 1  ;;  %v4124_v10 = vrot.slane %v4123_v32, 1 }
 0x102   : > { %v4027_v34 = vadd.f32 %v4026_v7, %v4025_v18  ;;  %v4041_v20 = vadd.f32 %v4040_v6, %v4039_v12  ;;  %v4055_v27 = vadd.f32 %v4054_v8, %v4053_v4  ;;  %v4069_v11 = vadd.f32 %v4068_v21, %v4067_v9  ;;  %v6548_v12 = vld [vmem:[%s5842_s13 + $0x8] sm:$0xff] }
 0x103   : > { %v4083_v46 = vadd.f32 %v4082_v5, %v4081_v29  ;;  %v3629_v14 = vadd.f32 %v6426_v60, %v6424_v51  ;;  %v3606_v24 = vsub.f32 %v6247_v61, %v6372_v37  ;;  %v4097_v23 = vadd.f32 %v4096_v16, %v4095_v43  ;;  %v6564_v6 = vld [vmem:[%s5842_s13 + $0x88] sm:$0xff] }
 0x104   : > { %v4149_v36 = vsel %vm734_vm7, %v4041_v20, %v4027_v34  ;;  %v3973_v3 = vsub.f32 1.5, %v6439_v30  ;;  %v3982_v44 = vsub.f32 1.0, %v6437_v57  ;;  %v4111_v42 = vadd.f32 %v4110_v49, %v4109_v22  ;;  %v6560_v22 = vld [vmem:[%s5842_s13 + $0x68] sm:$0xff]  ;;  %9620 = vst [vmem:[#allocation15_spill] sm:$0xff] %v6564_v6 }
 0x105   : > { %v4125_v56 = vadd.f32 %v4124_v10, %v4123_v32  ;;  %v4150_v48 = vsel %vm736_vm9, %v4055_v27, %v4149_v36  ;;  %v6522_v19 = vadd.f32 %v6445_v35, %v6433_v63  ;;  %v3643_v61 = vmul.f32 %v6443_v41, %v6443_v41  ;;  %v6570_v21 = vld [vmem:[%s5842_s13 + $0xa8] sm:$0xff]  ;;  %v6607_v36 = vld [vmem:[%s5842_s13 + $0x38] sm:$0xff] }
 0x106   : > { %v4151_v51 = vsel %vm738_vm10, %v4069_v11, %v4150_v48  ;;  %v3974_v60 = vmul.f32 %v6395_v39, %v3973_v3  ;;  %v3608_v30 = vsub.f32 %v6265_v59, %v6372_v37  ;;  %v3979_v33 = vand.u32 2147483648, %v6335_v17  ;;  %9621 = vst [vmem:[#allocation16_spill] sm:$0xff] %v6570_v21  ;;  %v6574_v16 = vld [vmem:[%s5842_s13 + $0xc8] sm:$0xff]  ;;  %v6619_v48 = vld [vmem:[%s5842_s13 + $0x98] sm:$0xff] }
 0x107   : > { %v4152_v57 = vsel %vm740_vm11, %v4083_v46, %v4151_v51  ;;  %v3986_v2 = vmax.f32 %v3982_v44, 0.0  ;;  %5314 = vrsqrt.f32 %v6522_v19  ;;  %v6537_v59 = vmul.f32 %v3606_v24, %v3606_v24  ;;  %9622 = vst [vmem:[#allocation17_spill] sm:$0xff] %v6574_v16  ;;  %v6582_v10 = vld [vmem:[%s5842_s13 + $0xe8] sm:$0xff]  ;;  %v6603_v24 = vld [vmem:[%s5842_s13 + $0x18] sm:$0xff] }
 0x108   : > { %v4153_v63 = vsel %vm742_vm12, %v4097_v23, %v4152_v57  ;;  %v3975_v35 = vmul.f32 %v3974_v60, %v6335_v17  ;;  %v6543_v62 = vadd.f32 %v3643_v61, %v3629_v14  ;;  %v6545_v52 = vmul.f32 %v3608_v30, %v3608_v30  ;;  %9623 = vst [vmem:[#allocation18_spill] sm:$0xff] %v6582_v10  ;;  %v6611_v44 = vld [vmem:[%s5842_s13 + $0x58] sm:$0xff] }
 0x109   : > { %v4154_v39 = vsel %vm744_vm13, %v4111_v42, %v4153_v63  ;;  %v3990_v4 = vmul.f32 %v6548_v12, %v3986_v2  ;;  %v3994_v9 = vmul.f32 %v6552_v45, %v3986_v2  ;;  %v4002_v7 = vmul.f32 %v6560_v22, %v3986_v2  ;;  %9625 = vst [vmem:[#allocation20_spill] sm:$0xff] %v6619_v48  ;;  %v6627_v60 = vld [vmem:[%s5842_s13 + $0xd8] sm:$0xff] }
 0x10a   : > { %v4155_v37 = vsel %vm746_vm14, %v4125_v56, %v4154_v39  ;;  %v3977_v41 = vsel %vm3976_vm4, %v6335_v17, %v3975_v35  ;;  %v6556_v17 = vld [vmem:[%s5842_s13 + $0x48] sm:$0xff]  ;;  %v4006_v8 = vmul.f32 %v6564_v6, %v3986_v2  ;;  %v4010_v5 = vmul.f32 %v6570_v21, %v3986_v2  ;;  %v6615_v56 = vld [vmem:[%s5842_s13 + $0x78] sm:$0xff]  ;;  %9627 = vst [vmem:[#allocation22_spill] sm:$0xff] %v6627_v60 }
 0x10b   : > { %4772 = vmatpush.msra.mxu0 %v4155_v37  ;;  %v3980_v18 = vsel %vm3978_vm5, %v3979_v33, %v3977_v41  ;;  %5225 = vmatpush.msra.mxu2 %v4155_v37  ;;  %v3998_v43 = vmul.f32 %v6556_v17, %v3986_v2  ;;  %v4014_v49 = vmul.f32 %v6574_v16, %v3986_v2  ;;  %5316 = vrsqrt.f32 %v6543_v62  ;;  %v6631_v30 = vld [vmem:[%s5842_s13 + $0xf8] sm:$0xff] }
 0x10c   : > { %v3984_v29 = vsub.f32 1.0, %v3980_v18  ;;  %v3620_v34 = vsub.f32 %v6275_v25, %v6383_v38  ;;  %v3622_v20 = vsub.f32 %v6281_v40, %v6383_v38  ;;  %v4018_v11 = vmul.f32 %v6582_v10, %v3986_v2  ;;  %9624 = vst [vmem:[#allocation19_spill] sm:$0xff] %v6615_v56 }
 0x10d   : > { %v6567_v32 = vpop.eup %5314  ;;  %v6596_v40 = vsub.f32 %v6284_v54, %v6415_v13  ;;  %v6600_v38 = vsub.f32 %v6296_v28, %v6415_v13  ;;  %v6623_v13 = vld [vmem:[%s5842_s13 + $0xb8] sm:$0xff]  ;;  %9628 = vst [vmem:[#allocation23_spill] sm:$0xff] %v6631_v30  ;;  %vm3656_vm6 = vcmp.eq.f32.partialorder %v6522_v19, inf  ;;  %vm3658_vm8 = vcmp.eq.f32.partialorder %v6522_v19, 0.0 }
 0x10e   : > { %v3988_v27 = vmax.f32 %v3984_v29, 0.0  ;;  %v6587_v46 = vmul.f32 %v6567_v32, %v6522_v19  ;;  %v6590_v14 = vmul.f32 %v3620_v34, %v3620_v34  ;;  %v6592_v25 = vmul.f32 %v3622_v20, %v3622_v20  ;;  %9626 = vst [vmem:[#allocation21_spill] sm:$0xff] %v6623_v13 }
 0x10f   : > { %vm3680_vm15 = vcmp.eq.f32.partialorder %v6543_v62, inf  ;;  %vm3682_vm0 = vcmp.eq.f32.partialorder %v6543_v62, 0.0 }
 0x110   : > { %v3992_v23 = vmul.f32 %v6603_v24, %v3988_v27  ;;  %v3996_v3 = vmul.f32 %v6607_v36, %v3988_v27  ;;  %v4000_v42 = vmul.f32 %v6611_v44, %v3988_v27  ;;  %v4004_v54 = vmul.f32 %v6615_v56, %v3988_v27 }
 0x111   : > { %v4008_v28 = vmul.f32 %v6619_v48, %v3988_v27  ;;  %v4012_v51 = vmul.f32 %v6623_v13, %v3988_v27  ;;  %v4016_v61 = vmul.f32 %v6627_v60, %v3988_v27  ;;  %v4020_v57 = vmul.f32 %v6631_v30, %v3988_v27  ;;  %v6634_v29 = vpop.eup %5316 }
 0x112   : > { %v4028_v33 = vadd.f32 %v3992_v23, %v3990_v4  ;;  %v4042_v2 = vadd.f32 %v3996_v3, %v3994_v9  ;;  %v4056_v63 = vadd.f32 %v4000_v42, %v3998_v43  ;;  %v4070_v35 = vadd.f32 %v4004_v54, %v4002_v7 }
 0x113   : > { %v4084_v39 = vadd.f32 %v4008_v28, %v4006_v8  ;;  %v4098_v37 = vadd.f32 %v4012_v51, %v4010_v5  ;;  %v4112_v41 = vadd.f32 %v4016_v61, %v4014_v49  ;;  %v4126_v18 = vadd.f32 %v4020_v57, %v4018_v11 }
 0x114   : > { %v4029_v34 = vrot.slane %v4028_v33, 4  ;;  %v4043_v20 = vrot.slane %v4042_v2, 4  ;;  %v4057_v10 = vrot.slane %v4056_v63, 4  ;;  %v4071_v16 = vrot.slane %v4070_v35, 4 }
 0x115   : > { %v4085_v13 = vrot.slane %v4084_v39, 4  ;;  %v4099_v60 = vrot.slane %v4098_v37, 4  ;;  %v4113_v21 = vrot.slane %v4112_v41, 4  ;;  %v4127_v48 = vrot.slane %v4126_v18, 4 }
 0x116   : > { %v4030_v6 = vadd.f32 %v4029_v34, %v4028_v33  ;;  %v4044_v27 = vadd.f32 %v4043_v20, %v4042_v2  ;;  %v4058_v4 = vadd.f32 %v4057_v10, %v4056_v63  ;;  %v4072_v9 = vadd.f32 %v4071_v16, %v4070_v35 }
 0x117   : > { %v4086_v43 = vadd.f32 %v4085_v13, %v4084_v39  ;;  %v4100_v7 = vadd.f32 %v4099_v60, %v4098_v37  ;;  %v4114_v8 = vadd.f32 %v4113_v21, %v4112_v41  ;;  %v4128_v5 = vadd.f32 %v4127_v48, %v4126_v18 }
 0x118   : > { %v4031_v49 = vrot.slane %v4030_v6, 2  ;;  %v4045_v11 = vrot.slane %v4044_v27, 2  ;;  %v4059_v23 = vrot.slane %v4058_v4, 2  ;;  %v4073_v3 = vrot.slane %v4072_v9, 2 }
 0x119   : > { %v4087_v42 = vrot.slane %v4086_v43, 2  ;;  %v4101_v54 = vrot.slane %v4100_v7, 2  ;;  %v4115_v28 = vrot.slane %v4114_v8, 2  ;;  %v4129_v51 = vrot.slane %v4128_v5, 2 }
 0x11a   : > { %v4032_v61 = vadd.f32 %v4031_v49, %v4030_v6  ;;  %v4046_v57 = vadd.f32 %v4045_v11, %v4044_v27  ;;  %v4060_v30 = vadd.f32 %v4059_v23, %v4058_v4  ;;  %v4074_v56 = vadd.f32 %v4073_v3, %v4072_v9 }
 0x11b   : > { %v4088_v10 = vadd.f32 %v4087_v42, %v4086_v43  ;;  %v4102_v16 = vadd.f32 %v4101_v54, %v4100_v7  ;;  %v4116_v13 = vadd.f32 %v4115_v28, %v4114_v8  ;;  %v4130_v60 = vadd.f32 %v4129_v51, %v4128_v5 }
 0x11c   : > { %v4033_v21 = vrot.slane %v4032_v61, 1  ;;  %v4047_v48 = vrot.slane %v4046_v57, 1  ;;  %v4061_v33 = vrot.slane %v4060_v30, 1  ;;  %v4075_v2 = vrot.slane %v4074_v56, 1 }
 0x11d   : > { %v4089_v63 = vrot.slane %v4088_v10, 1  ;;  %v4103_v35 = vrot.slane %v4102_v16, 1  ;;  %v4117_v39 = vrot.slane %v4116_v13, 1  ;;  %v4131_v37 = vrot.slane %v4130_v60, 1 }
 0x11e   : > { %v4034_v6 = vadd.f32 %v4033_v21, %v4032_v61  ;;  %v4048_v41 = vadd.f32 %v4047_v48, %v4046_v57  ;;  %v4062_v18 = vadd.f32 %v4061_v33, %v4060_v30  ;;  %v4076_v34 = vadd.f32 %v4075_v2, %v4074_v56  ;;  %v6678_v61 = vld [vmem:[%s5840_s12 + $0x20] sm:$0xff]  ;;  %v6681_v57 = vld [vmem:[%s5840_s12 + $0x30] sm:$0xff] }
 0x11f   : > { %v4090_v20 = vadd.f32 %v4089_v63, %v4088_v10  ;;  %v4104_v27 = vadd.f32 %v4103_v35, %v4102_v16  ;;  %v4118_v4 = vadd.f32 %v4117_v39, %v4116_v13  ;;  %v4132_v9 = vadd.f32 %v4131_v37, %v4130_v60  ;;  %v6691_v60 = vld [vmem:[%s5840_s12 + $0x40] sm:$0xff]  ;;  %v6694_v21 = vld [vmem:[%s5840_s12 + $0x50] sm:$0xff] }
 0x120   : > { %v4156_v43 = vsel %vm734_vm7, %v4048_v41, %v4034_v6  ;;  %v3651_v7 = vmul.f32 %v6567_v32, %v6587_v46  ;;  %v3674_v30 = vmul.f32 %v6634_v29, %v6543_v62  ;;  %v3628_v56 = vadd.f32 %v6590_v14, %v6537_v59  ;;  %v6658_v46 = vld [vmem:[%s5840_s12] sm:$0xff]  ;;  %v6663_v14 = vld [vmem:[%s5840_s12 + $0x10] sm:$0xff] }
 0x121   : > { %v4157_v8 = vsel %vm736_vm9, %v4062_v18, %v4156_v43  ;;  %v3630_v5 = vadd.f32 %v6592_v25, %v6545_v52  ;;  %v3642_v49 = vmul.f32 %v6596_v40, %v6596_v40  ;;  %v3644_v11 = vmul.f32 %v6600_v38, %v6600_v38 }
 0x122   : > { %v4158_v23 = vsel %vm738_vm10, %v4076_v34, %v4157_v8  ;;  %v3652_v3 = vmul.f32 0.5, %v3651_v7  ;;  %v3675_v59 = vmul.f32 %v6634_v29, %v3674_v30  ;;  %v6666_v52 = vstv %s6636_s9  ;;  %s7864_s9 = sld [smem:[#allocation5 + $0x85]] }
 0x123   : > { %v4159_v25 = vsel %vm740_vm11, %v4090_v20, %v4158_v23  ;;  %v6670_v40 = vadd.f32 %v3642_v49, %v3628_v56  ;;  %v6672_v38 = vadd.f32 %v3644_v11, %v3630_v5  ;;  %v3321_v51 = vsub.f32 %v6658_v46, %v6666_v52 }
 0x124   : > { %v4160_v42 = vsel %vm742_vm12, %v4104_v27, %v4159_v25  ;;  %v3653_v54 = vsub.f32 1.5, %v3652_v3  ;;  %v3676_v28 = vmul.f32 0.5, %v3675_v59  ;;  %v3323_v16 = vsub.f32 %v6663_v14, %v6666_v52 }
 0x125   : > { %v4161_v10 = vsel %vm744_vm13, %v4118_v4, %v4160_v42  ;;  %5318 = vrsqrt.f32 %v6670_v40  ;;  %v6688_v13 = vstv %s6638_s23  ;;  %v3659_v63 = vand.u32 2147483648, %v6522_v19  ;;  %s7887_s23 = sld [smem:[#allocation5 + $0x105]] }
 0x126   : > { %v4162_v48 = vsel %vm746_vm14, %v4132_v9, %v4161_v10  ;;  %v3654_v33 = vmul.f32 %v6567_v32, %v3653_v54  ;;  %v3677_v2 = vsub.f32 1.5, %v3676_v28  ;;  %5320 = vrsqrt.f32 %v6672_v38 }
 0x127   : > { %4795 = vmatpush.msra.mxu1 %v4162_v48  ;;  %5240 = vmatpush.msra.mxu3 %v4162_v48  ;;  %v3335_v35 = vsub.f32 %v6678_v61, %v6688_v13  ;;  %v3337_v39 = vsub.f32 %v6681_v57, %v6688_v13  ;;  %v6705_v37 = vstv %s6641_s10  ;;  %v3683_v34 = vand.u32 2147483648, %v6543_v62  ;;  %s8146_s10 = sld [smem:[#allocation5 + $0x4]] }
 0x128   : > { %v3655_v6 = vmul.f32 %v3654_v33, %v6522_v19  ;;  %v3678_v41 = vmul.f32 %v6634_v29, %v3677_v2  ;;  %v3353_v32 = vsub.f32 %v6691_v60, %v6705_v37  ;;  %v3355_v18 = vsub.f32 %v6694_v21, %v6705_v37 }
 0x129   : > { %v3325_v20 = vmul.f32 %v3321_v51, %v3321_v51  ;;  %v3327_v27 = vmul.f32 %v3323_v16, %v3323_v16  ;;  %v3339_v7 = vmul.f32 %v3335_v35, %v3335_v35  ;;  %v3341_v30 = vmul.f32 %v3337_v39, %v3337_v39 }
 0x12a   : > { %v3657_v4 = vsel %vm3656_vm6, %v6522_v19, %v3655_v6  ;;  %v3679_v9 = vmul.f32 %v3678_v41, %v6543_v62  ;;  %v3357_v56 = vmul.f32 %v3353_v32, %v3353_v32  ;;  %v3359_v23 = vmul.f32 %v3355_v18, %v3355_v18 }
 0x12b   : > { %v6720_v29 = vpop.eup %5318  ;;  %v3660_v43 = vsel %vm3658_vm8, %v3659_v63, %v3657_v4  ;;  %v3343_v25 = vadd.f32 %v3339_v7, %v3325_v20  ;;  %v3345_v42 = vadd.f32 %v3341_v30, %v3327_v27  ;;  %v3671_v28 = vand.u32 2147483648, %v6670_v40  ;;  %v9630_v27 = vld [vmem:[#allocation11_spill] sm:$0xff]  ;;  %v9631_v4 = vld [vmem:[#allocation10_spill] sm:$0xff] }
 0x12c   : > { %v6724_v8 = vpop.eup %5320  ;;  %v3681_v5 = vsel %vm3680_vm15, %v6543_v62, %v3679_v9  ;;  %v3697_v49 = vsub.f32 1.0, %v3660_v43  ;;  %v3662_v11 = vmul.f32 %v6720_v29, %v6670_v40  ;;  %v9632_v9 = vld [vmem:[#allocation12_spill] sm:$0xff]  ;;  %v9633_v43 = vld [vmem:[#allocation13_spill] sm:$0xff]  ;;  %v9634_v7 = vld [vmem:[#allocation14_spill] sm:$0xff]  ;;  %vm3668_vm1 = vcmp.eq.f32.partialorder %v6670_v40, inf }
 0x12d   : > { %v3684_v3 = vsel %vm3682_vm0, %v3683_v34, %v3681_v5  ;;  %v3686_v59 = vmul.f32 %v6724_v8, %v6672_v38  ;;  %v6738_v10 = vadd.f32 %v3357_v56, %v3343_v25  ;;  %v6740_v16 = vadd.f32 %v3359_v23, %v3345_v42  ;;  %v9629_v34 = vld [vmem:[#allocation9_spill] sm:$0xff] }
 0x12e   : > { %v3699_v19 = vsub.f32 1.0, %v3684_v3  ;;  %v3701_v54 = vmax.f32 %v3697_v49, 0.0  ;;  %v6733_v51 = vmul.f32 %v6720_v29, %v3662_v11  ;;  %vm3692_vm2 = vcmp.eq.f32.partialorder %v6672_v38, inf }
 0x12f   : > { %v6736_v62 = vmul.f32 %v6724_v8, %v3686_v59  ;;  %5322 = vrsqrt.f32 %v6738_v10  ;;  %vm3670_vm3 = vcmp.eq.f32.partialorder %v6670_v40, 0.0  ;;  %vm3694_vm4 = vcmp.eq.f32.partialorder %v6672_v38, 0.0 }
 0x130   : > { %v3703_v48 = vmax.f32 %v3699_v19, 0.0  ;;  %v3705_v33 = vmul.f32 %v6448_v47, %v3701_v54  ;;  %v3709_v2 = vmul.f32 %v6452_v1, %v3701_v54  ;;  %v3713_v63 = vmul.f32 %v6456_v53, %v3701_v54 }
 0x131   : > { %v3717_v35 = vmul.f32 %v6460_v50, %v3701_v54  ;;  %v3721_v39 = vmul.f32 %v6464_v15, %v3701_v54  ;;  %v3725_v6 = vmul.f32 %v6468_v58, %v3701_v54  ;;  %v3729_v41 = vmul.f32 %v6472_v31, %v3701_v54 }
 0x132   : > { %v3707_v32 = vmul.f32 %v6476_v0, %v3703_v48  ;;  %v3711_v18 = vmul.f32 %v6480_v26, %v3703_v48  ;;  %v3715_v20 = vmul.f32 %v9629_v34, %v3703_v48  ;;  %v3719_v47 = vmul.f32 %v9630_v27, %v3703_v48 }
 0x133   : > { %v3723_v1 = vmul.f32 %v9631_v4, %v3703_v48  ;;  %v3727_v53 = vmul.f32 %v9632_v9, %v3703_v48  ;;  %v3731_v50 = vmul.f32 %v9633_v43, %v3703_v48  ;;  %v3733_v15 = vmul.f32 %v9634_v7, %v3701_v54 }
 0x134   : > { %v3735_v58 = vmul.f32 %v6508_v55, %v3703_v48  ;;  %v3737_v30 = vadd.f32 %v3707_v32, %v3705_v33  ;;  %v3751_v31 = vadd.f32 %v3711_v18, %v3709_v2  ;;  %v3765_v56 = vadd.f32 %v3715_v20, %v3713_v63 }
 0x135   : > { %v3779_v0 = vadd.f32 %v3719_v47, %v3717_v35  ;;  %v3793_v5 = vadd.f32 %v3723_v1, %v3721_v39  ;;  %v3807_v26 = vadd.f32 %v3727_v53, %v3725_v6  ;;  %v3821_v49 = vadd.f32 %v3731_v50, %v3729_v41 }
 0x136   : > { %v3738_v11 = vrot.slane %v3737_v30, 4  ;;  %v3752_v23 = vrot.slane %v3751_v31, 4  ;;  %v3766_v3 = vrot.slane %v3765_v56, 4  ;;  %v3835_v59 = vadd.f32 %v3735_v58, %v3733_v15 }
 0x137   : > { %v3780_v25 = vrot.slane %v3779_v0, 4  ;;  %v3794_v42 = vrot.slane %v3793_v5, 4  ;;  %v3808_v19 = vrot.slane %v3807_v26, 4  ;;  %v3822_v34 = vrot.slane %v3821_v49, 4 }
 0x138   : > { %v3739_v27 = vadd.f32 %v3738_v11, %v3737_v30  ;;  %v3753_v4 = vadd.f32 %v3752_v23, %v3751_v31  ;;  %v3767_v54 = vadd.f32 %v3766_v3, %v3765_v56  ;;  %v3836_v9 = vrot.slane %v3835_v59, 4 }
 0x139   : > { %v3781_v55 = vadd.f32 %v3780_v25, %v3779_v0  ;;  %v3795_v48 = vadd.f32 %v3794_v42, %v3793_v5  ;;  %v3809_v33 = vadd.f32 %v3808_v19, %v3807_v26  ;;  %v3823_v2 = vadd.f32 %v3822_v34, %v3821_v49  ;;  %v6759_v5 = vld [vmem:[%s5840_s12 + $0x8] sm:$0xff]  ;;  %v6763_v19 = vld [vmem:[%s5840_s12 + $0x18] sm:$0xff] }
 0x13a   : > { %v3740_v63 = vrot.slane %v3739_v27, 2  ;;  %v3754_v35 = vrot.slane %v3753_v4, 2  ;;  %v3768_v39 = vrot.slane %v3767_v54, 2  ;;  %v3837_v6 = vadd.f32 %v3836_v9, %v3835_v59 }
 0x13b   : > { %v3782_v41 = vrot.slane %v3781_v55, 2  ;;  %v3796_v32 = vrot.slane %v3795_v48, 2  ;;  %v3810_v18 = vrot.slane %v3809_v33, 2  ;;  %v3824_v20 = vrot.slane %v3823_v2, 2 }
 0x13c   : > { %v3741_v47 = vadd.f32 %v3740_v63, %v3739_v27  ;;  %v3755_v1 = vadd.f32 %v3754_v35, %v3753_v4  ;;  %v3769_v53 = vadd.f32 %v3768_v39, %v3767_v54  ;;  %v3838_v43 = vrot.slane %v3837_v6, 2  ;;  %v6774_v63 = vld [vmem:[%s5840_s12 + $0x38] sm:$0xff] }
 0x13d   : > { %v3783_v50 = vadd.f32 %v3782_v41, %v3781_v55  ;;  %v3797_v7 = vadd.f32 %v3796_v32, %v3795_v48  ;;  %v3811_v15 = vadd.f32 %v3810_v18, %v3809_v33  ;;  %v3825_v58 = vadd.f32 %v3824_v20, %v3823_v2  ;;  %v6771_v2 = vld [vmem:[%s5840_s12 + $0x28] sm:$0xff] }
 0x13e   : > { %v3742_v30 = vrot.slane %v3741_v47, 1  ;;  %v3756_v31 = vrot.slane %v3755_v1, 1  ;;  %v3770_v56 = vrot.slane %v3769_v53, 1  ;;  %v3839_v0 = vadd.f32 %v3838_v43, %v3837_v6  ;;  %v6793_v43 = vld [vmem:[%s5840_s12 + $0x48] sm:$0xff] }
 0x13f   : > { %v3784_v26 = vrot.slane %v3783_v50, 1  ;;  %v3798_v49 = vrot.slane %v3797_v7, 1  ;;  %v3812_v11 = vrot.slane %v3811_v15, 1  ;;  %v3826_v23 = vrot.slane %v3825_v58, 1 }
 0x140   : > { %v3743_v3 = vadd.f32 %v3742_v30, %v3741_v47  ;;  %v3757_v59 = vadd.f32 %v3756_v31, %v3755_v1  ;;  %v3771_v25 = vadd.f32 %v3770_v56, %v3769_v53  ;;  %v3840_v42 = vrot.slane %v3839_v0, 1  ;;  %v6806_v30 = vpop.eup %5322 }
 0x141   : > { %v3785_v34 = vadd.f32 %v3784_v26, %v3783_v50  ;;  %v3799_v27 = vadd.f32 %v3798_v49, %v3797_v7  ;;  %v3813_v4 = vadd.f32 %v3812_v11, %v3811_v15  ;;  %v3322_v54 = vsub.f32 %v6759_v5, %v6666_v52  ;;  %v6799_v15 = vld [vmem:[%s5840_s12 + $0x58] sm:$0xff] }
 0x142   : > { %v3827_v9 = vadd.f32 %v3826_v23, %v3825_v58  ;;  %v3865_v55 = vsel %vm734_vm7, %v3757_v59, %v3743_v3  ;;  %v3664_v48 = vmul.f32 0.5, %v6733_v51  ;;  %v3688_v33 = vmul.f32 0.5, %v6736_v62 }
 0x143   : > { %v3841_v35 = vadd.f32 %v3840_v42, %v3839_v0  ;;  %v3866_v39 = vsel %vm736_vm9, %v3771_v25, %v3865_v55  ;;  %v3324_v6 = vsub.f32 %v6763_v19, %v6666_v52  ;;  %5324 = vrsqrt.f32 %v6740_v16 }
 0x144   : > { %v3867_v41 = vsel %vm738_vm10, %v3785_v34, %v3866_v39  ;;  %v3665_v32 = vsub.f32 1.5, %v3664_v48  ;;  %v3689_v51 = vsub.f32 1.5, %v3688_v33  ;;  %v3336_v18 = vsub.f32 %v6771_v2, %v6688_v13 }
 0x145   : > { %v3868_v62 = vsel %vm740_vm11, %v3799_v27, %v3867_v41  ;;  %v3338_v20 = vsub.f32 %v6774_v63, %v6688_v13  ;;  %v3695_v53 = vand.u32 2147483648, %v6672_v38  ;;  %v3326_v7 = vmul.f32 %v3322_v54, %v3322_v54 }
 0x146   : > { %v3869_v47 = vsel %vm742_vm12, %v3813_v4, %v3868_v62  ;;  %v3666_v52 = vmul.f32 %v6720_v29, %v3665_v32  ;;  %v3690_v1 = vmul.f32 %v6724_v8, %v3689_v51  ;;  %v3328_v58 = vmul.f32 %v3324_v6, %v3324_v6 }
 0x147   : > { %v3870_v50 = vsel %vm744_vm13, %v3827_v9, %v3869_v47  ;;  %v3340_v31 = vmul.f32 %v3336_v18, %v3336_v18  ;;  %v3342_v56 = vmul.f32 %v3338_v20, %v3338_v20  ;;  %v3354_v0 = vsub.f32 %v6793_v43, %v6705_v37 }
 0x148   : > { %v3871_v13 = vsel %vm746_vm14, %v3841_v35, %v3870_v50  ;;  %v3667_v29 = vmul.f32 %v3666_v52, %v6670_v40  ;;  %v3691_v8 = vmul.f32 %v3690_v1, %v6672_v38  ;;  %v3366_v23 = vmul.f32 %v6806_v30, %v6738_v10  ;;  %v9635_v1 = vld [vmem:[#allocation19_spill] sm:$0xff] }
 0x149   : > { %4773 = vmatpush.msra.mxu0 %v3871_v13  ;;  %5226 = vmatpush.msra.mxu2 %v3871_v13  ;;  %v6810_v26 = vpop.eup %5324  ;;  %v3356_v3 = vsub.f32 %v6799_v15, %v6705_v37  ;;  %v3344_v34 = vadd.f32 %v3340_v31, %v3326_v7  ;;  %v3346_v9 = vadd.f32 %v3342_v56, %v3328_v58  ;;  %v6842_v41 = vstv %s6801_s11  ;;  %v9636_v50 = vld [vmem:[#allocation15_spill] sm:$0xff]  ;;  %v9637_v13 = vld [vmem:[#allocation20_spill] sm:$0xff]  ;;  %v9639_v58 = vld [vmem:[#allocation21_spill] sm:$0xff]  ;;  %s8148_s11 = sld [smem:[#allocation5 + $0x84]] }
 0x14a   : > { %v3669_v49 = vsel %vm3668_vm1, %v6670_v40, %v3667_v29  ;;  %v3693_v11 = vsel %vm3692_vm2, %v6672_v38, %v3691_v8  ;;  %v3390_v42 = vmul.f32 %v6810_v26, %v6740_v16  ;;  %v3367_v54 = vmul.f32 %v6806_v30, %v3366_v23  ;;  %v9638_v8 = vld [vmem:[#allocation16_spill] sm:$0xff]  ;;  %v9640_v31 = vld [vmem:[#allocation17_spill] sm:$0xff]  ;;  %v9641_v56 = vld [vmem:[#allocation22_spill] sm:$0xff] }
 0x14b   : > { %v3672_v59 = vsel %vm3670_vm3, %v3671_v28, %v3669_v49  ;;  %v3696_v25 = vsel %vm3694_vm4, %v3695_v53, %v3693_v11  ;;  %v3358_v55 = vmul.f32 %v3354_v0, %v3354_v0  ;;  %v3360_v48 = vmul.f32 %v3356_v3, %v3356_v3  ;;  %v9642_v0 = vld [vmem:[#allocation18_spill] sm:$0xff]  ;;  %v9643_v49 = vld [vmem:[#allocation23_spill] sm:$0xff] }
 0x14c   : > { %v3698_v27 = vsub.f32 1.0, %v3672_v59  ;;  %v3700_v4 = vsub.f32 1.0, %v3696_v25  ;;  %v3391_v37 = vmul.f32 %v6810_v26, %v3390_v42  ;;  %v6832_v28 = vmul.f32 0.5, %v3367_v54 }
 0x14d   : > { %v3375_v38 = vand.u32 2147483648, %v6738_v10  ;;  %v6837_v39 = vadd.f32 %v3358_v55, %v3344_v34  ;;  %v6839_v6 = vadd.f32 %v3360_v48, %v3346_v9  ;;  %vm3372_vm5 = vcmp.eq.f32.partialorder %v6738_v10, inf }
 0x14e   : > { %v3702_v33 = vmax.f32 %v3698_v27, 0.0  ;;  %v3704_v40 = vmax.f32 %v3700_v4, 0.0  ;;  %v6835_v35 = vmul.f32 0.5, %v3391_v37  ;;  %vm3374_vm6 = vcmp.eq.f32.partialorder %v6738_v10, 0.0 }
 0x14f   : > { %5326 = vrsqrt.f32 %v6837_v39  ;;  %vm3396_vm8 = vcmp.eq.f32.partialorder %v6740_v16, inf  ;;  %vm3398_vm15 = vcmp.eq.f32.partialorder %v6740_v16, 0.0  ;;  %vm3384_vm0 = vcmp.eq.f32.partialorder %v6837_v39, inf }
 0x150   : > { %v3706_v32 = vmul.f32 %v6548_v12, %v3702_v33  ;;  %v3708_v51 = vmul.f32 %v6603_v24, %v3704_v40  ;;  %v3710_v62 = vmul.f32 %v6552_v45, %v3702_v33  ;;  %v3712_v18 = vmul.f32 %v6607_v36, %v3704_v40 }
 0x151   : > { %v3714_v20 = vmul.f32 %v6556_v17, %v3702_v33  ;;  %v3716_v47 = vmul.f32 %v6611_v44, %v3704_v40  ;;  %v3718_v52 = vmul.f32 %v6560_v22, %v3702_v33  ;;  %v3720_v53 = vmul.f32 %v9635_v1, %v3704_v40 }
 0x152   : > { %v3722_v7 = vmul.f32 %v9636_v50, %v3702_v33  ;;  %v3724_v29 = vmul.f32 %v9637_v13, %v3704_v40  ;;  %v3726_v12 = vmul.f32 %v9638_v8, %v3702_v33  ;;  %v3728_v24 = vmul.f32 %v9639_v58, %v3704_v40 }
 0x153   : > { %v3730_v45 = vmul.f32 %v9640_v31, %v3702_v33  ;;  %v3732_v36 = vmul.f32 %v9641_v56, %v3704_v40  ;;  %v3734_v17 = vmul.f32 %v9642_v0, %v3702_v33  ;;  %v3736_v44 = vmul.f32 %v9643_v49, %v3704_v40 }
 0x154   : > { %v3744_v11 = vadd.f32 %v3708_v51, %v3706_v32  ;;  %v3758_v22 = vadd.f32 %v3712_v18, %v3710_v62  ;;  %v3772_v23 = vadd.f32 %v3716_v47, %v3714_v20  ;;  %v3786_v3 = vadd.f32 %v3720_v53, %v3718_v52 }
 0x155   : > { %v3800_v59 = vadd.f32 %v3724_v29, %v3722_v7  ;;  %v3814_v25 = vadd.f32 %v3728_v24, %v3726_v12  ;;  %v3828_v42 = vadd.f32 %v3732_v36, %v3730_v45  ;;  %v3842_v34 = vadd.f32 %v3736_v44, %v3734_v17 }
 0x156   : > { %v3745_v27 = vrot.slane %v3744_v11, 4  ;;  %v3759_v4 = vrot.slane %v3758_v22, 4  ;;  %v3773_v54 = vrot.slane %v3772_v23, 4  ;;  %v3787_v9 = vrot.slane %v3786_v3, 4 }
 0x157   : > { %v3801_v37 = vrot.slane %v3800_v59, 4  ;;  %v3815_v55 = vrot.slane %v3814_v25, 4  ;;  %v3829_v48 = vrot.slane %v3828_v42, 4  ;;  %v3843_v1 = vrot.slane %v3842_v34, 4 }
 0x158   : > { %v3746_v50 = vadd.f32 %v3745_v27, %v3744_v11  ;;  %v3760_v33 = vadd.f32 %v3759_v4, %v3758_v22  ;;  %v3774_v13 = vadd.f32 %v3773_v54, %v3772_v23  ;;  %v3788_v40 = vadd.f32 %v3787_v9, %v3786_v3 }
 0x159   : > { %v3802_v32 = vadd.f32 %v3801_v37, %v3800_v59  ;;  %v3816_v51 = vadd.f32 %v3815_v55, %v3814_v25  ;;  %v3830_v62 = vadd.f32 %v3829_v48, %v3828_v42  ;;  %v3844_v18 = vadd.f32 %v3843_v1, %v3842_v34 }
 0x15a   : > { %v3747_v20 = vrot.slane %v3746_v50, 2  ;;  %v3761_v47 = vrot.slane %v3760_v33, 2  ;;  %v3775_v52 = vrot.slane %v3774_v13, 2  ;;  %v3789_v53 = vrot.slane %v3788_v40, 2 }
 0x15b   : > { %v3803_v7 = vrot.slane %v3802_v32, 2  ;;  %v3817_v29 = vrot.slane %v3816_v51, 2  ;;  %v3831_v8 = vrot.slane %v3830_v62, 2  ;;  %v3845_v12 = vrot.slane %v3844_v18, 2 }
 0x15c   : > { %v3748_v58 = vadd.f32 %v3747_v20, %v3746_v50  ;;  %v3762_v24 = vadd.f32 %v3761_v47, %v3760_v33  ;;  %v3776_v31 = vadd.f32 %v3775_v52, %v3774_v13  ;;  %v3790_v45 = vadd.f32 %v3789_v53, %v3788_v40  ;;  %v6893_v53 = vpop.eup %5326 }
 0x15d   : > { %v3804_v56 = vadd.f32 %v3803_v7, %v3802_v32  ;;  %v3818_v36 = vadd.f32 %v3817_v29, %v3816_v51  ;;  %v3832_v0 = vadd.f32 %v3831_v8, %v3830_v62  ;;  %v3846_v17 = vadd.f32 %v3845_v12, %v3844_v18 }
 0x15e   : > { %v3749_v49 = vrot.slane %v3748_v58, 1  ;;  %v3763_v44 = vrot.slane %v3762_v24, 1  ;;  %v3777_v11 = vrot.slane %v3776_v31, 1  ;;  %v3791_v22 = vrot.slane %v3790_v45, 1 }
 0x15f   : > { %v3805_v23 = vrot.slane %v3804_v56, 1  ;;  %v3819_v3 = vrot.slane %v3818_v36, 1  ;;  %v3833_v59 = vrot.slane %v3832_v0, 1  ;;  %v3847_v25 = vrot.slane %v3846_v17, 1 }
 0x160   : > { %v3750_v42 = vadd.f32 %v3749_v49, %v3748_v58  ;;  %v3764_v34 = vadd.f32 %v3763_v44, %v3762_v24  ;;  %v3778_v27 = vadd.f32 %v3777_v11, %v3776_v31  ;;  %v3792_v4 = vadd.f32 %v3791_v22, %v3790_v45 }
 0x161   : > { %v3806_v54 = vadd.f32 %v3805_v23, %v3804_v56  ;;  %v3820_v9 = vadd.f32 %v3819_v3, %v3818_v36  ;;  %v3834_v37 = vadd.f32 %v3833_v59, %v3832_v0  ;;  %v3037_v55 = vsub.f32 %v6658_v46, %v6842_v41 }
 0x162   : > { %v3872_v48 = vsel %vm734_vm7, %v3764_v34, %v3750_v42  ;;  %v3369_v1 = vsub.f32 1.5, %v6832_v28  ;;  %v3393_v50 = vsub.f32 1.5, %v6835_v35  ;;  %v3848_v33 = vadd.f32 %v3847_v25, %v3846_v17  ;;  %v6940_v42 = vld [vmem:[%s5842_s13 + $0x10] sm:$0xff] }
 0x163   : > { %v3873_v13 = vsel %vm736_vm9, %v3778_v27, %v3872_v48  ;;  %5328 = vrsqrt.f32 %v6839_v6  ;;  %v3039_v40 = vsub.f32 %v6663_v14, %v6842_v41  ;;  %v6879_v62 = vstv %s6860_s7  ;;  %v6944_v27 = vld [vmem:[%s5842_s13 + $0x20] sm:$0xff]  ;;  %v6956_v48 = vld [vmem:[%s5842_s13 + $0x50] sm:$0xff]  ;;  %s8153_s7 = sld [smem:[#allocation5 + $0x104]] }
 0x164   : > { %v3874_v46 = vsel %vm738_vm10, %v3792_v4, %v3873_v13  ;;  %v3370_v32 = vmul.f32 %v6806_v30, %v3369_v1  ;;  %v3394_v51 = vmul.f32 %v6810_v26, %v3393_v50  ;;  %v3399_v35 = vand.u32 2147483648, %v6740_v16  ;;  %v6960_v50 = vld [vmem:[%s5842_s13 + $0x60] sm:$0xff]  ;;  %v6964_v13 = vld [vmem:[%s5842_s13 + $0x70] sm:$0xff] }
 0x165   : > { %v3875_v28 = vsel %vm740_vm11, %v3806_v54, %v3874_v46  ;;  %v3041_v47 = vmul.f32 %v3037_v55, %v3037_v55  ;;  %v3051_v52 = vsub.f32 %v6678_v61, %v6879_v62  ;;  %v6900_v12 = vmul.f32 %v3039_v40, %v3039_v40  ;;  %v6948_v54 = vld [vmem:[%s5842_s13 + $0x30] sm:$0xff]  ;;  %9644 = vst [vmem:[#allocation9_spill] sm:$0xff] %v6964_v13  ;;  %v6968_v46 = vld [vmem:[%s5842_s13 + $0x80] sm:$0xff] }
 0x166   : > { %v3876_v18 = vsel %vm742_vm12, %v3820_v9, %v3875_v28  ;;  %v3371_v14 = vmul.f32 %v3370_v32, %v6738_v10  ;;  %v3395_v20 = vmul.f32 %v3394_v51, %v6740_v16  ;;  %v3378_v31 = vmul.f32 %v6893_v53, %v6837_v39  ;;  %9645 = vst [vmem:[#allocation11_spill] sm:$0xff] %v6968_v46  ;;  %v6972_v51 = vld [vmem:[%s5842_s13 + $0x90] sm:$0xff] }
 0x167   : > { %v3877_v30 = vsel %vm744_vm13, %v3834_v37, %v3876_v18  ;;  %v6911_v45 = vstv %s6865_s21  ;;  %v3053_v0 = vsub.f32 %v6681_v57, %v6879_v62  ;;  %v6952_v37 = vld [vmem:[%s5842_s13 + $0x40] sm:$0xff]  ;;  %9646 = vst [vmem:[#allocation10_spill] sm:$0xff] %v6972_v51  ;;  %vm3386_vm1 = vcmp.eq.f32.partialorder %v6837_v39, 0.0  ;;  %s8362_s21 = sld [smem:[#allocation5 + $0x3]] }
 0x168   : > { %v3878_v7 = vsel %vm746_vm14, %v3848_v33, %v3877_v30  ;;  %v3373_v29 = vsel %vm3372_vm5, %v6738_v10, %v3371_v14  ;;  %v3397_v8 = vsel %vm3396_vm8, %v6740_v16, %v3395_v20  ;;  %v3379_v10 = vmul.f32 %v6893_v53, %v3378_v31  ;;  %v6980_v14 = vld [vmem:[%s5842_s13 + $0xb0] sm:$0xff]  ;;  %v6984_v30 = vld [vmem:[%s5842_s13 + $0xc0] sm:$0xff] }
 0x169   : > { %v6902_v58 = vpop.eup %5328  ;;  %4796 = vmatpush.msra.mxu1 %v3878_v7  ;;  %v3376_v61 = vsel %vm3374_vm6, %v3375_v38, %v3373_v29  ;;  %v3400_v24 = vsel %vm3398_vm15, %v3399_v35, %v3397_v8  ;;  %5241 = vmatpush.msra.mxu3 %v3878_v7  ;;  %v3055_v38 = vmul.f32 %v3051_v52, %v3051_v52  ;;  %v6976_v35 = vld [vmem:[%s5842_s13 + $0xa0] sm:$0xff]  ;;  %v6988_v52 = vld [vmem:[%s5842_s13 + $0xd0] sm:$0xff]  ;;  %vm3408_vm2 = vcmp.eq.f32.partialorder %v6839_v6, inf }
 0x16a   : > { %v3413_v56 = vsub.f32 1.0, %v3376_v61  ;;  %v3415_v16 = vsub.f32 1.0, %v3400_v24  ;;  %v3402_v36 = vmul.f32 %v6902_v58, %v6839_v6  ;;  %v3069_v17 = vsub.f32 %v6691_v60, %v6911_v45  ;;  %9647 = vst [vmem:[#allocation12_spill] sm:$0xff] %v6976_v35  ;;  %v6992_v29 = vld [vmem:[%s5842_s13 + $0xe0] sm:$0xff]  ;;  %v6996_v61 = vld [vmem:[%s5842_s13 + $0xf0] sm:$0xff] }
 0x16b   : > { %v3071_v49 = vsub.f32 %v6694_v21, %v6911_v45  ;;  %v6925_v23 = vmul.f32 %v3053_v0, %v3053_v0  ;;  %v6927_v57 = vmul.f32 0.5, %v3379_v10  ;;  %v6929_v3 = vadd.f32 %v3055_v38, %v3041_v47  ;;  %v6936_v21 = vld [vmem:[%s5842_s13] sm:$0xff]  ;;  %9648 = vst [vmem:[#allocation13_spill] sm:$0xff] %v6980_v14 }
 0x16c   : > { %v3417_v44 = vmax.f32 %v3413_v56, 0.0  ;;  %v3419_v11 = vmax.f32 %v3415_v16, 0.0  ;;  %v6923_v22 = vmul.f32 %v6902_v58, %v3402_v36  ;;  %v6931_v59 = vmul.f32 %v3069_v17, %v3069_v17  ;;  %9649 = vst [vmem:[#allocation14_spill] sm:$0xff] %v6984_v30 }
 0x16d   : > { %v6933_v60 = vmul.f32 %v3071_v49, %v3071_v49  ;;  %9650 = vst [vmem:[#allocation19_spill] sm:$0xff] %v6988_v52  ;;  %vm3410_vm3 = vcmp.eq.f32.partialorder %v6839_v6, 0.0 }
 0x16e   : > { %v3421_v25 = vmul.f32 %v6936_v21, %v3417_v44  ;;  %v3423_v34 = vmul.f32 %v6940_v42, %v3419_v11  ;;  %v3425_v4 = vmul.f32 %v6944_v27, %v3417_v44  ;;  %v3427_v9 = vmul.f32 %v6948_v54, %v3419_v11  ;;  %9651 = vst [vmem:[#allocation15_spill] sm:$0xff] %v6992_v29 }
 0x16f   : > { %v3429_v55 = vmul.f32 %v6952_v37, %v3417_v44  ;;  %v3431_v1 = vmul.f32 %v6956_v48, %v3419_v11  ;;  %v3433_v33 = vmul.f32 %v6960_v50, %v3417_v44  ;;  %v3435_v40 = vmul.f32 %v6964_v13, %v3419_v11 }
 0x170   : > { %v3437_v32 = vmul.f32 %v6968_v46, %v3417_v44  ;;  %v3439_v28 = vmul.f32 %v6972_v51, %v3419_v11  ;;  %v3441_v18 = vmul.f32 %v6976_v35, %v3417_v44  ;;  %v3443_v20 = vmul.f32 %v6980_v14, %v3419_v11 }
 0x171   : > { %v3445_v47 = vmul.f32 %v6984_v30, %v3417_v44  ;;  %v3447_v7 = vmul.f32 %v6988_v52, %v3419_v11  ;;  %v3449_v8 = vmul.f32 %v6992_v29, %v3417_v44  ;;  %v3451_v24 = vmul.f32 %v6996_v61, %v3419_v11 }
 0x172   : > { %v3453_v31 = vadd.f32 %v3423_v34, %v3421_v25  ;;  %v3467_v56 = vadd.f32 %v3427_v9, %v3425_v4  ;;  %v3481_v16 = vadd.f32 %v3431_v1, %v3429_v55  ;;  %v3495_v36 = vadd.f32 %v3435_v40, %v3433_v33 }
 0x173   : > { %v3509_v0 = vadd.f32 %v3439_v28, %v3437_v32  ;;  %v3523_v10 = vadd.f32 %v3443_v20, %v3441_v18  ;;  %v3537_v38 = vadd.f32 %v3447_v7, %v3445_v47  ;;  %v3551_v17 = vadd.f32 %v3451_v24, %v3449_v8 }
 0x174   : > { %v3454_v49 = vrot.slane %v3453_v31, 4  ;;  %v3468_v26 = vrot.slane %v3467_v56, 4  ;;  %v3482_v30 = vrot.slane %v3481_v16, 4  ;;  %v3496_v52 = vrot.slane %v3495_v36, 4 }
 0x175   : > { %v3510_v14 = vrot.slane %v3509_v0, 4  ;;  %v3524_v35 = vrot.slane %v3523_v10, 4  ;;  %v3538_v51 = vrot.slane %v3537_v38, 4  ;;  %v3552_v44 = vrot.slane %v3551_v17, 4 }
 0x176   : > { %v3455_v29 = vadd.f32 %v3454_v49, %v3453_v31  ;;  %v3469_v46 = vadd.f32 %v3468_v26, %v3467_v56  ;;  %v3483_v13 = vadd.f32 %v3482_v30, %v3481_v16  ;;  %v3497_v11 = vadd.f32 %v3496_v52, %v3495_v36 }
 0x177   : > { %v3511_v25 = vadd.f32 %v3510_v14, %v3509_v0  ;;  %v3525_v34 = vadd.f32 %v3524_v35, %v3523_v10  ;;  %v3539_v4 = vadd.f32 %v3538_v51, %v3537_v38  ;;  %v3553_v9 = vadd.f32 %v3552_v44, %v3551_v17 }
 0x178   : > { %v3456_v55 = vrot.slane %v3455_v29, 2  ;;  %v3470_v1 = vrot.slane %v3469_v46, 2  ;;  %v3484_v33 = vrot.slane %v3483_v13, 2  ;;  %v3498_v40 = vrot.slane %v3497_v11, 2 }
 0x179   : > { %v3512_v32 = vrot.slane %v3511_v25, 2  ;;  %v3526_v28 = vrot.slane %v3525_v34, 2  ;;  %v3540_v18 = vrot.slane %v3539_v4, 2  ;;  %v3554_v20 = vrot.slane %v3553_v9, 2 }
 0x17a   : > { %v3457_v47 = vadd.f32 %v3456_v55, %v3455_v29  ;;  %v3471_v7 = vadd.f32 %v3470_v1, %v3469_v46  ;;  %v3485_v8 = vadd.f32 %v3484_v33, %v3483_v13  ;;  %v3499_v24 = vadd.f32 %v3498_v40, %v3497_v11 }
 0x17b   : > { %v3513_v31 = vadd.f32 %v3512_v32, %v3511_v25  ;;  %v3527_v26 = vadd.f32 %v3526_v28, %v3525_v34  ;;  %v3541_v30 = vadd.f32 %v3540_v18, %v3539_v4  ;;  %v3555_v52 = vadd.f32 %v3554_v20, %v3553_v9 }
 0x17c   : > { %v3458_v51 = vrot.slane %v3457_v47, 1  ;;  %v3472_v35 = vrot.slane %v3471_v7, 1  ;;  %v3486_v14 = vrot.slane %v3485_v8, 1  ;;  %v3500_v56 = vrot.slane %v3499_v24, 1 }
 0x17d   : > { %v3514_v16 = vrot.slane %v3513_v31, 1  ;;  %v3528_v36 = vrot.slane %v3527_v26, 1  ;;  %v3542_v0 = vrot.slane %v3541_v30, 1  ;;  %v3556_v10 = vrot.slane %v3555_v52, 1 }
 0x17e   : > { %v3459_v29 = vadd.f32 %v3458_v51, %v3457_v47  ;;  %v3473_v46 = vadd.f32 %v3472_v35, %v3471_v7  ;;  %v3487_v13 = vadd.f32 %v3486_v14, %v3485_v8  ;;  %v3501_v38 = vadd.f32 %v3500_v56, %v3499_v24 }
 0x17f   : > { %v3515_v17 = vadd.f32 %v3514_v16, %v3513_v31  ;;  %v3529_v49 = vadd.f32 %v3528_v36, %v3527_v26  ;;  %v3411_v44 = vand.u32 2147483648, %v6839_v6  ;;  %v3381_v25 = vsub.f32 1.5, %v6927_v57  ;;  %v7071_v36 = vld [vmem:[%s5842_s13 + $0x8] sm:$0xff] }
 0x180   : > { %v3581_v11 = vsel %vm734_vm7, %v3473_v46, %v3459_v29  ;;  %v3404_v34 = vmul.f32 0.5, %v6923_v22  ;;  %v3061_v4 = vadd.f32 %v6925_v23, %v6900_v12  ;;  %v3543_v9 = vadd.f32 %v3542_v0, %v3541_v30  ;;  %v7079_v46 = vld [vmem:[%s5842_s13 + $0x48] sm:$0xff] }
 0x181   : > { %v3557_v55 = vadd.f32 %v3556_v10, %v3555_v52  ;;  %v3582_v1 = vsel %vm736_vm9, %v3487_v13, %v3581_v11  ;;  %v7011_v33 = vadd.f32 %v6931_v59, %v6929_v3  ;;  %v3382_v32 = vmul.f32 %v6893_v53, %v3381_v25  ;;  %v7075_v10 = vld [vmem:[%s5842_s13 + $0x28] sm:$0xff] }
 0x182   : > { %v3583_v40 = vsel %vm738_vm10, %v3501_v38, %v3582_v1  ;;  %v3405_v28 = vsub.f32 1.5, %v3404_v34  ;;  %v7016_v57 = vadd.f32 %v6933_v60, %v3061_v4  ;;  %v3038_v12 = vsub.f32 %v6759_v5, %v6842_v41  ;;  %v7083_v38 = vld [vmem:[%s5842_s13 + $0x68] sm:$0xff]  ;;  %v7103_v1 = vld [vmem:[%s5842_s13 + $0x38] sm:$0xff] }
 0x183   : > { %v3584_v22 = vsel %vm740_vm11, %v3515_v17, %v3583_v40  ;;  %5330 = vrsqrt.f32 %v7011_v33  ;;  %v3040_v23 = vsub.f32 %v6763_v19, %v6842_v41  ;;  %v3383_v59 = vmul.f32 %v3382_v32, %v6837_v39  ;;  %v7091_v11 = vld [vmem:[%s5842_s13 + $0xa8] sm:$0xff]  ;;  %v7107_v32 = vld [vmem:[%s5842_s13 + $0x58] sm:$0xff] }
 0x184   : > { %v3585_v3 = vsel %vm742_vm12, %v3529_v49, %v3584_v22  ;;  %v3406_v53 = vmul.f32 %v6902_v58, %v3405_v28  ;;  %5332 = vrsqrt.f32 %v7016_v57  ;;  %v3052_v18 = vsub.f32 %v6771_v2, %v6879_v62  ;;  %v7087_v49 = vld [vmem:[%s5842_s13 + $0x88] sm:$0xff]  ;;  %9653 = vst [vmem:[#allocation20_spill] sm:$0xff] %v7091_v11  ;;  %v7111_v22 = vld [vmem:[%s5842_s13 + $0x78] sm:$0xff] }
 0x185   : > { %v3586_v60 = vsel %vm744_vm13, %v3543_v9, %v3585_v3  ;;  %v3054_v5 = vsub.f32 %v6774_v63, %v6879_v62  ;;  %v3385_v41 = vsel %vm3384_vm0, %v6837_v39, %v3383_v59  ;;  %v3070_v20 = vsub.f32 %v6793_v43, %v6911_v45  ;;  %v7095_v34 = vld [vmem:[%s5842_s13 + $0xc8] sm:$0xff]  ;;  %v7099_v9 = vld [vmem:[%s5842_s13 + $0x18] sm:$0xff] }
 0x186   : > { %v3587_v19 = vsel %vm746_vm14, %v3557_v55, %v3586_v60  ;;  %v3407_v58 = vmul.f32 %v3406_v53, %v6839_v6  ;;  %v9652_v47 = vand.u32 2147483648, %v6837_v39  ;;  %v3042_v7 = vmul.f32 %v3038_v12, %v3038_v12  ;;  %9654 = vst [vmem:[#allocation16_spill] sm:$0xff] %v7095_v34  ;;  %v7119_v59 = vld [vmem:[%s5842_s13 + $0xb8] sm:$0xff] }
 0x187   : > { %4774 = vmatpush.msra.mxu0 %v3587_v19  ;;  %5227 = vmatpush.msra.mxu2 %v3587_v19  ;;  %v3044_v63 = vmul.f32 %v3040_v23, %v3040_v23  ;;  %v3056_v43 = vmul.f32 %v3052_v18, %v3052_v18  ;;  %v3058_v26 = vmul.f32 %v3054_v5, %v3054_v5  ;;  %v7115_v23 = vld [vmem:[%s5842_s13 + $0x98] sm:$0xff]  ;;  %v7127_v5 = vld [vmem:[%s5842_s13 + $0xe8] sm:$0xff]  ;;  %vm3088_vm4 = vcmp.eq.f32.partialorder %v7011_v33, inf }
 0x188   : > { %v3388_v2 = vsel %vm3386_vm1, %v9652_v47, %v3385_v41  ;;  %v3409_v62 = vsel %vm3408_vm2, %v6839_v6, %v3407_v58  ;;  %v3072_v39 = vsub.f32 %v6799_v15, %v6911_v45  ;;  %v7058_v35 = vmul.f32 %v3070_v20, %v3070_v20  ;;  %9655 = vst [vmem:[#allocation21_spill] sm:$0xff] %v7115_v23  ;;  %v7123_v60 = vld [vmem:[%s5842_s13 + $0xd8] sm:$0xff] }
 0x189   : > { %v3414_v8 = vsub.f32 1.0, %v3388_v2  ;;  %v7048_v24 = vpop.eup %5330  ;;  %v3412_v31 = vsel %vm3410_vm3, %v3411_v44, %v3409_v62  ;;  %v7064_v56 = vadd.f32 %v3056_v43, %v3042_v7  ;;  %v7066_v15 = vadd.f32 %v3058_v26, %v3044_v63  ;;  %9656 = vst [vmem:[#allocation17_spill] sm:$0xff] %v7119_v59  ;;  %v7131_v41 = vld [vmem:[%s5842_s13 + $0xf8] sm:$0xff] }
 0x18a   : > { %v7052_v30 = vpop.eup %5332  ;;  %v3416_v52 = vsub.f32 1.0, %v3412_v31  ;;  %v7056_v6 = vmul.f32 %v7048_v24, %v7011_v33  ;;  %v7068_v45 = vmul.f32 %v3072_v39, %v3072_v39  ;;  %9657 = vst [vmem:[#allocation22_spill] sm:$0xff] %v7123_v60  ;;  %vm3112_vm5 = vcmp.eq.f32.partialorder %v7016_v57, inf }
 0x18b   : > { %v3418_v51 = vmax.f32 %v3414_v8, 0.0  ;;  %v7062_v14 = vmul.f32 %v7052_v30, %v7016_v57  ;;  %9658 = vst [vmem:[#allocation18_spill] sm:$0xff] %v7127_v5  ;;  %vm3090_vm6 = vcmp.eq.f32.partialorder %v7011_v33, 0.0  ;;  %vm3114_vm8 = vcmp.eq.f32.partialorder %v7016_v57, 0.0 }
 0x18c   : > { %v3420_v16 = vmax.f32 %v3416_v52, 0.0 }
 0x18d   : > { %v3422_v0 = vmul.f32 %v7071_v36, %v3418_v51  ;;  %v3426_v29 = vmul.f32 %v7075_v10, %v3418_v51  ;;  %v3430_v13 = vmul.f32 %v7079_v46, %v3418_v51  ;;  %v3434_v17 = vmul.f32 %v7083_v38, %v3418_v51 }
 0x18e   : > { %v3438_v44 = vmul.f32 %v7087_v49, %v3418_v51  ;;  %v3442_v25 = vmul.f32 %v7091_v11, %v3418_v51  ;;  %v3446_v4 = vmul.f32 %v7095_v34, %v3418_v51  ;;  %v3424_v55 = vmul.f32 %v7099_v9, %v3420_v16 }
 0x18f   : > { %v3428_v40 = vmul.f32 %v7103_v1, %v3420_v16  ;;  %v3432_v28 = vmul.f32 %v7107_v32, %v3420_v16  ;;  %v3436_v12 = vmul.f32 %v7111_v22, %v3420_v16  ;;  %v3440_v3 = vmul.f32 %v7115_v23, %v3420_v16 }
 0x190   : > { %v3444_v53 = vmul.f32 %v7119_v59, %v3420_v16  ;;  %v3448_v18 = vmul.f32 %v7123_v60, %v3420_v16  ;;  %v3450_v19 = vmul.f32 %v7127_v5, %v3418_v51  ;;  %v3452_v58 = vmul.f32 %v7131_v41, %v3420_v16 }
 0x191   : > { %v3460_v20 = vadd.f32 %v3424_v55, %v3422_v0  ;;  %v3474_v47 = vadd.f32 %v3428_v40, %v3426_v29  ;;  %v3488_v2 = vadd.f32 %v3432_v28, %v3430_v13  ;;  %v3502_v7 = vadd.f32 %v3436_v12, %v3434_v17 }
 0x192   : > { %v3516_v63 = vadd.f32 %v3440_v3, %v3438_v44  ;;  %v3530_v62 = vadd.f32 %v3444_v53, %v3442_v25  ;;  %v3544_v8 = vadd.f32 %v3448_v18, %v3446_v4  ;;  %v3558_v39 = vadd.f32 %v3452_v58, %v3450_v19 }
 0x193   : > { %v3461_v31 = vrot.slane %v3460_v20, 4  ;;  %v3475_v43 = vrot.slane %v3474_v47, 4  ;;  %v3489_v26 = vrot.slane %v3488_v2, 4  ;;  %v3503_v52 = vrot.slane %v3502_v7, 4 }
 0x194   : > { %v3517_v60 = vrot.slane %v3516_v63, 4  ;;  %v3531_v34 = vrot.slane %v3530_v62, 4  ;;  %v3545_v59 = vrot.slane %v3544_v8, 4  ;;  %v3559_v23 = vrot.slane %v3558_v39, 4 }
 0x195   : > { %v3462_v51 = vadd.f32 %v3461_v31, %v3460_v20  ;;  %v3476_v5 = vadd.f32 %v3475_v43, %v3474_v47  ;;  %v3490_v11 = vadd.f32 %v3489_v26, %v3488_v2  ;;  %v3504_v16 = vadd.f32 %v3503_v52, %v3502_v7 }
 0x196   : > { %v3518_v0 = vadd.f32 %v3517_v60, %v3516_v63  ;;  %v3532_v29 = vadd.f32 %v3531_v34, %v3530_v62  ;;  %v3546_v13 = vadd.f32 %v3545_v59, %v3544_v8  ;;  %v3560_v4 = vadd.f32 %v3559_v23, %v3558_v39 }
 0x197   : > { %v3463_v17 = vrot.slane %v3462_v51, 2  ;;  %v3477_v44 = vrot.slane %v3476_v5, 2  ;;  %v3491_v25 = vrot.slane %v3490_v11, 2  ;;  %v3505_v55 = vrot.slane %v3504_v16, 2 }
 0x198   : > { %v3519_v40 = vrot.slane %v3518_v0, 2  ;;  %v3533_v28 = vrot.slane %v3532_v29, 2  ;;  %v3547_v12 = vrot.slane %v3546_v13, 2  ;;  %v3561_v19 = vrot.slane %v3560_v4, 2 }
 0x199   : > { %v3464_v3 = vadd.f32 %v3463_v17, %v3462_v51  ;;  %v3478_v53 = vadd.f32 %v3477_v44, %v3476_v5  ;;  %v3492_v18 = vadd.f32 %v3491_v25, %v3490_v11  ;;  %v3506_v58 = vadd.f32 %v3505_v55, %v3504_v16 }
 0x19a   : > { %v3520_v20 = vadd.f32 %v3519_v40, %v3518_v0  ;;  %v3534_v47 = vadd.f32 %v3533_v28, %v3532_v29  ;;  %v3548_v60 = vadd.f32 %v3547_v12, %v3546_v13  ;;  %v3562_v23 = vadd.f32 %v3561_v19, %v3560_v4  ;;  %v7144_v13 = vld [vmem:[%s5840_s12] sm:$0xff]  ;;  %v7162_v28 = vld [vmem:[%s5840_s12 + $0x10] sm:$0xff] }
 0x19b   : > { %v3465_v34 = vrot.slane %v3464_v3, 1  ;;  %v3479_v59 = vrot.slane %v3478_v53, 1  ;;  %v3493_v2 = vrot.slane %v3492_v18, 1  ;;  %v3507_v7 = vrot.slane %v3506_v58, 1  ;;  %v7165_v12 = vld [vmem:[%s5840_s12 + $0x20] sm:$0xff] }
 0x19c   : > { %v3521_v63 = vrot.slane %v3520_v20, 1  ;;  %v3535_v62 = vrot.slane %v3534_v47, 1  ;;  %v3549_v8 = vrot.slane %v3548_v60, 1  ;;  %v3563_v43 = vrot.slane %v3562_v23, 1 }
 0x19d   : > { %v3466_v31 = vadd.f32 %v3465_v34, %v3464_v3  ;;  %v3480_v5 = vadd.f32 %v3479_v59, %v3478_v53  ;;  %v3494_v11 = vadd.f32 %v3493_v2, %v3492_v18  ;;  %v3508_v26 = vadd.f32 %v3507_v7, %v3506_v58 }
 0x19e   : > { %v3522_v39 = vadd.f32 %v3521_v63, %v3520_v20  ;;  %v3536_v52 = vadd.f32 %v3535_v62, %v3534_v47  ;;  %v3550_v51 = vadd.f32 %v3549_v8, %v3548_v60  ;;  %v3083_v0 = vmul.f32 %v7048_v24, %v7056_v6  ;;  %v7194_v63 = vld [vmem:[%s5840_s12 + $0x40] sm:$0xff] }
 0x19f   : > { %v3588_v16 = vsel %vm734_vm7, %v3480_v5, %v3466_v31  ;;  %v3107_v29 = vmul.f32 %v7052_v30, %v7062_v14  ;;  %v7149_v44 = vadd.f32 %v7058_v35, %v7064_v56  ;;  %v7153_v25 = vadd.f32 %v7068_v45, %v7066_v15  ;;  %v7172_v15 = vld [vmem:[%s5840_s12 + $0x30] sm:$0xff] }
 0x1a0   : > { %v3589_v17 = vsel %vm736_vm9, %v3494_v11, %v3588_v16  ;;  %v7156_v4 = vstv %s7134_s14  ;;  %v3564_v6 = vadd.f32 %v3563_v43, %v3562_v23  ;;  %v3084_v55 = vmul.f32 0.5, %v3083_v0  ;;  %s8364_s14 = sld [smem:[#allocation5 + $0x83]] }
 0x1a1   : > { %v3590_v14 = vsel %vm738_vm10, %v3508_v26, %v3589_v17  ;;  %v3108_v40 = vmul.f32 0.5, %v3107_v29  ;;  %5334 = vrsqrt.f32 %v7149_v44  ;;  %v2753_v56 = vsub.f32 %v7144_v13, %v7156_v4 }
 0x1a2   : > { %v3591_v35 = vsel %vm740_vm11, %v3522_v39, %v3590_v14  ;;  %v7175_v45 = vstv %s7136_s15  ;;  %v3085_v53 = vsub.f32 1.5, %v3084_v55  ;;  %5336 = vrsqrt.f32 %v7153_v25  ;;  %s8387_s15 = sld [smem:[#allocation5 + $0x103]] }
 0x1a3   : > { %v3592_v3 = vsel %vm742_vm12, %v3536_v52, %v3591_v35  ;;  %v3109_v18 = vsub.f32 1.5, %v3108_v40  ;;  %v2755_v58 = vsub.f32 %v7162_v28, %v7156_v4  ;;  %v2767_v20 = vsub.f32 %v7165_v12, %v7175_v45 }
 0x1a4   : > { %v3593_v19 = vsel %vm744_vm13, %v3550_v51, %v3592_v3  ;;  %v3086_v60 = vmul.f32 %v7048_v24, %v3085_v53  ;;  %v2769_v59 = vsub.f32 %v7172_v15, %v7175_v45  ;;  %v3091_v2 = vand.u32 2147483648, %v7011_v33  ;;  %v7216_v51 = vld [vmem:[%s5840_s12 + $0x50] sm:$0xff] }
 0x1a5   : > { %v3594_v47 = vsel %vm746_vm14, %v3564_v6, %v3593_v19  ;;  %v3110_v34 = vmul.f32 %v7052_v30, %v3109_v18  ;;  %v3115_v23 = vand.u32 2147483648, %v7016_v57  ;;  %v2757_v7 = vmul.f32 %v2753_v56, %v2753_v56  ;;  %9659 = vst [vmem:[#allocation23_spill] sm:$0xff] %v7216_v51 }
 0x1a6   : > { %4797 = vmatpush.msra.mxu1 %v3594_v47  ;;  %5242 = vmatpush.msra.mxu3 %v3594_v47  ;;  %v3087_v24 = vmul.f32 %v3086_v60, %v7011_v33  ;;  %v2759_v8 = vmul.f32 %v2755_v58, %v2755_v58  ;;  %v2771_v31 = vmul.f32 %v2767_v20, %v2767_v20  ;;  %v7203_v11 = vstv %s7158_s16  ;;  %s8646_s16 = sld [smem:[#allocation5 + $0x2]] }
 0x1a7   : > { %v3111_v30 = vmul.f32 %v3110_v34, %v7016_v57  ;;  %v7200_v62 = vpop.eup %5334  ;;  %v2773_v5 = vmul.f32 %v2769_v59, %v2769_v59  ;;  %v2785_v16 = vsub.f32 %v7194_v63, %v7203_v11  ;;  %v2787_v40 = vsub.f32 %v7216_v51, %v7203_v11 }
 0x1a8   : > { %v7205_v43 = vpop.eup %5336  ;;  %v3089_v26 = vsel %vm3088_vm4, %v7011_v33, %v3087_v24  ;;  %v3094_v52 = vmul.f32 %v7200_v62, %v7149_v44  ;;  %v2775_v6 = vadd.f32 %v2771_v31, %v2757_v7  ;;  %v9661_v31 = vld [vmem:[#allocation11_spill] sm:$0xff]  ;;  %vm3100_vm15 = vcmp.eq.f32.partialorder %v7149_v44, inf }
 0x1a9   : > { %v3113_v39 = vsel %vm3112_vm5, %v7016_v57, %v3111_v30  ;;  %v3092_v0 = vsel %vm3090_vm6, %v3091_v2, %v3089_v26  ;;  %v3118_v17 = vmul.f32 %v7205_v43, %v7153_v25  ;;  %v2789_v35 = vmul.f32 %v2785_v16, %v2785_v16  ;;  %v9660_v30 = vld [vmem:[#allocation9_spill] sm:$0xff]  ;;  %v9662_v26 = vld [vmem:[#allocation10_spill] sm:$0xff] }
 0x1aa   : > { %v3116_v29 = vsel %vm3114_vm8, %v3115_v23, %v3113_v39  ;;  %v3129_v14 = vsub.f32 1.0, %v3092_v0  ;;  %v3095_v55 = vmul.f32 %v7200_v62, %v3094_v52  ;;  %v7227_v18 = vadd.f32 %v2773_v5, %v2759_v8  ;;  %v9663_v52 = vld [vmem:[#allocation12_spill] sm:$0xff]  ;;  %v9664_v16 = vld [vmem:[#allocation13_spill] sm:$0xff]  ;;  %v9665_v0 = vld [vmem:[#allocation14_spill] sm:$0xff] }
 0x1ab   : > { %v3131_v33 = vsub.f32 1.0, %v3116_v29  ;;  %v3119_v57 = vmul.f32 %v7205_v43, %v3118_v17  ;;  %v7233_v20 = vmul.f32 %v2787_v40, %v2787_v40  ;;  %v7235_v47 = vadd.f32 %v2789_v35, %v2775_v6  ;;  %v9666_v29 = vld [vmem:[#allocation19_spill] sm:$0xff] }
 0x1ac   : > { %v3133_v56 = vmax.f32 %v3129_v14, 0.0  ;;  %v7229_v19 = vmul.f32 0.5, %v3095_v55  ;;  %v9667_v17 = vld [vmem:[#allocation15_spill] sm:$0xff]  ;;  %vm3124_vm0 = vcmp.eq.f32.partialorder %v7153_v25, inf  ;;  %vm3102_vm1 = vcmp.eq.f32.partialorder %v7149_v44, 0.0 }
 0x1ad   : > { %v3135_v3 = vmax.f32 %v3131_v33, 0.0  ;;  %v7231_v58 = vmul.f32 0.5, %v3119_v57  ;;  %5338 = vrsqrt.f32 %v7235_v47  ;;  %vm3126_vm2 = vcmp.eq.f32.partialorder %v7153_v25, 0.0 }
 0x1ae   : > { %v3137_v60 = vmul.f32 %v6936_v21, %v3133_v56  ;;  %v3141_v59 = vmul.f32 %v6944_v27, %v3133_v56  ;;  %v3145_v23 = vmul.f32 %v6952_v37, %v3133_v56  ;;  %v3149_v24 = vmul.f32 %v6960_v50, %v3133_v56 }
 0x1af   : > { %v3139_v34 = vmul.f32 %v6940_v42, %v3135_v3  ;;  %v3143_v2 = vmul.f32 %v6948_v54, %v3135_v3  ;;  %v3147_v7 = vmul.f32 %v6956_v48, %v3135_v3  ;;  %v3151_v8 = vmul.f32 %v9660_v30, %v3135_v3 }
 0x1b0   : > { %v3153_v5 = vmul.f32 %v9661_v31, %v3133_v56  ;;  %v3155_v39 = vmul.f32 %v9662_v26, %v3135_v3  ;;  %v3157_v21 = vmul.f32 %v9663_v52, %v3133_v56  ;;  %v3159_v42 = vmul.f32 %v9664_v16, %v3135_v3 }
 0x1b1   : > { %v3161_v27 = vmul.f32 %v9665_v0, %v3133_v56  ;;  %v3163_v54 = vmul.f32 %v9666_v29, %v3135_v3  ;;  %v3165_v37 = vmul.f32 %v9667_v17, %v3133_v56  ;;  %v3167_v48 = vmul.f32 %v6996_v61, %v3135_v3 }
 0x1b2   : > { %v3169_v6 = vadd.f32 %v3139_v34, %v3137_v60  ;;  %v3183_v50 = vadd.f32 %v3143_v2, %v3141_v59  ;;  %v3197_v14 = vadd.f32 %v3147_v7, %v3145_v23  ;;  %v3211_v33 = vadd.f32 %v3151_v8, %v3149_v24 }
 0x1b3   : > { %v3225_v55 = vadd.f32 %v3155_v39, %v3153_v5  ;;  %v3239_v57 = vadd.f32 %v3159_v42, %v3157_v21  ;;  %v3253_v40 = vadd.f32 %v3163_v54, %v3161_v27  ;;  %v3267_v35 = vadd.f32 %v3167_v48, %v3165_v37 }
 0x1b4   : > { %v3170_v30 = vrot.slane %v3169_v6, 4  ;;  %v3184_v31 = vrot.slane %v3183_v50, 4  ;;  %v3198_v26 = vrot.slane %v3197_v14, 4  ;;  %v3212_v52 = vrot.slane %v3211_v33, 4 }
 0x1b5   : > { %v3226_v16 = vrot.slane %v3225_v55, 4  ;;  %v3240_v0 = vrot.slane %v3239_v57, 4  ;;  %v3254_v53 = vrot.slane %v3253_v40, 4  ;;  %v3268_v29 = vrot.slane %v3267_v35, 4 }
 0x1b6   : > { %v3171_v51 = vadd.f32 %v3170_v30, %v3169_v6  ;;  %v3185_v56 = vadd.f32 %v3184_v31, %v3183_v50  ;;  %v3199_v17 = vadd.f32 %v3198_v26, %v3197_v14  ;;  %v3213_v61 = vadd.f32 %v3212_v52, %v3211_v33 }
 0x1b7   : > { %v3227_v3 = vadd.f32 %v3226_v16, %v3225_v55  ;;  %v3241_v60 = vadd.f32 %v3240_v0, %v3239_v57  ;;  %v3255_v34 = vadd.f32 %v3254_v53, %v3253_v40  ;;  %v3269_v59 = vadd.f32 %v3268_v29, %v3267_v35  ;;  %v7256_v40 = vld [vmem:[%s5840_s12 + $0x8] sm:$0xff] }
 0x1b8   : > { %v3172_v2 = vrot.slane %v3171_v51, 2  ;;  %v3186_v23 = vrot.slane %v3185_v56, 2  ;;  %v3200_v7 = vrot.slane %v3199_v17, 2  ;;  %v3214_v24 = vrot.slane %v3213_v61, 2 }
 0x1b9   : > { %v3228_v8 = vrot.slane %v3227_v3, 2  ;;  %v3242_v5 = vrot.slane %v3241_v60, 2  ;;  %v3256_v39 = vrot.slane %v3255_v34, 2  ;;  %v3270_v21 = vrot.slane %v3269_v59, 2 }
 0x1ba   : > { %v3173_v42 = vadd.f32 %v3172_v2, %v3171_v51  ;;  %v3187_v27 = vadd.f32 %v3186_v23, %v3185_v56  ;;  %v3201_v54 = vadd.f32 %v3200_v7, %v3199_v17  ;;  %v3215_v37 = vadd.f32 %v3214_v24, %v3213_v61  ;;  %v7269_v2 = vld [vmem:[%s5840_s12 + $0x18] sm:$0xff] }
 0x1bb   : > { %v3229_v48 = vadd.f32 %v3228_v8, %v3227_v3  ;;  %v3243_v6 = vadd.f32 %v3242_v5, %v3241_v60  ;;  %v3257_v50 = vadd.f32 %v3256_v39, %v3255_v34  ;;  %v3271_v14 = vadd.f32 %v3270_v21, %v3269_v59  ;;  %v7274_v8 = vld [vmem:[%s5840_s12 + $0x28] sm:$0xff] }
 0x1bc   : > { %v3174_v53 = vrot.slane %v3173_v42, 1  ;;  %v3188_v33 = vrot.slane %v3187_v27, 1  ;;  %v3202_v55 = vrot.slane %v3201_v54, 1  ;;  %v3216_v57 = vrot.slane %v3215_v37, 1  ;;  %v7289_v21 = vld [vmem:[%s5840_s12 + $0x48] sm:$0xff] }
 0x1bd   : > { %v3230_v35 = vrot.slane %v3229_v48, 1  ;;  %v3244_v51 = vrot.slane %v3243_v6, 1  ;;  %v3258_v30 = vrot.slane %v3257_v50, 1  ;;  %v3272_v31 = vrot.slane %v3271_v14, 1 }
 0x1be   : > { %v3175_v26 = vadd.f32 %v3174_v53, %v3173_v42  ;;  %v3189_v52 = vadd.f32 %v3188_v33, %v3187_v27  ;;  %v3203_v16 = vadd.f32 %v3202_v55, %v3201_v54  ;;  %v3217_v0 = vadd.f32 %v3216_v57, %v3215_v37  ;;  %v7311_v33 = vpop.eup %5338 }
 0x1bf   : > { %v3231_v29 = vadd.f32 %v3230_v35, %v3229_v48  ;;  %v3245_v56 = vadd.f32 %v3244_v51, %v3243_v6  ;;  %v3127_v17 = vand.u32 2147483648, %v7153_v25  ;;  %v2754_v61 = vsub.f32 %v7256_v40, %v7156_v4 }
 0x1c0   : > { %v3297_v3 = vsel %vm734_vm7, %v3189_v52, %v3175_v26  ;;  %v3097_v60 = vsub.f32 1.5, %v7229_v19  ;;  %v3121_v34 = vsub.f32 1.5, %v7231_v58  ;;  %v7266_v59 = vadd.f32 %v7233_v20, %v7227_v18  ;;  %v7281_v18 = vld [vmem:[%s5840_s12 + $0x38] sm:$0xff] }
 0x1c1   : > { %v3259_v23 = vadd.f32 %v3258_v30, %v3257_v50  ;;  %v3273_v7 = vadd.f32 %v3272_v31, %v3271_v14  ;;  %v3298_v24 = vsel %vm736_vm9, %v3203_v16, %v3297_v3  ;;  %v2756_v39 = vsub.f32 %v7269_v2, %v7156_v4  ;;  %v7307_v14 = vld [vmem:[%s5840_s12 + $0x58] sm:$0xff] }
 0x1c2   : > { %v3299_v5 = vsel %vm738_vm10, %v3217_v0, %v3298_v24  ;;  %v3098_v19 = vmul.f32 %v7200_v62, %v3097_v60  ;;  %v3122_v58 = vmul.f32 %v7205_v43, %v3121_v34  ;;  %5340 = vrsqrt.f32 %v7266_v59 }
 0x1c3   : > { %v3300_v20 = vsel %vm740_vm11, %v3231_v29, %v3299_v5  ;;  %v2768_v27 = vsub.f32 %v7274_v8, %v7175_v45  ;;  %v2758_v37 = vmul.f32 %v2754_v61, %v2754_v61  ;;  %v2770_v48 = vsub.f32 %v7281_v18, %v7175_v45 }
 0x1c4   : > { %v3301_v62 = vsel %vm742_vm12, %v3245_v56, %v3300_v20  ;;  %v3099_v43 = vmul.f32 %v3098_v19, %v7149_v44  ;;  %v3123_v42 = vmul.f32 %v3122_v58, %v7153_v25  ;;  %v2786_v53 = vsub.f32 %v7289_v21, %v7203_v11 }
 0x1c5   : > { %v3302_v54 = vsel %vm744_vm13, %v3259_v23, %v3301_v62  ;;  %v9668_v45 = vand.u32 2147483648, %v7149_v44  ;;  %v2760_v35 = vmul.f32 %v2756_v39, %v2756_v39  ;;  %v2798_v26 = vmul.f32 %v7311_v33, %v7235_v47 }
 0x1c6   : > { %v3303_v6 = vsel %vm746_vm14, %v3273_v7, %v3302_v54  ;;  %v3101_v4 = vsel %vm3100_vm15, %v7149_v44, %v3099_v43  ;;  %v3125_v50 = vsel %vm3124_vm0, %v7153_v25, %v3123_v42  ;;  %v2772_v52 = vmul.f32 %v2768_v27, %v2768_v27  ;;  %v9669_v43 = vld [vmem:[#allocation21_spill] sm:$0xff]  ;;  %v9670_v27 = vld [vmem:[#allocation20_spill] sm:$0xff] }
 0x1c7   : > { %4775 = vmatpush.msra.mxu0 %v3303_v6  ;;  %v3104_v55 = vsel %vm3102_vm1, %v9668_v45, %v3101_v4  ;;  %v3128_v57 = vsel %vm3126_vm2, %v3127_v17, %v3125_v50  ;;  %5228 = vmatpush.msra.mxu2 %v3303_v6  ;;  %v2807_v16 = vand.u32 2147483648, %v7235_v47  ;;  %v2774_v44 = vmul.f32 %v2770_v48, %v2770_v48  ;;  %v9671_v54 = vld [vmem:[#allocation17_spill] sm:$0xff]  ;;  %v9673_v48 = vld [vmem:[#allocation22_spill] sm:$0xff] }
 0x1c8   : > { %v7319_v51 = vpop.eup %5340  ;;  %v3130_v30 = vsub.f32 1.0, %v3104_v55  ;;  %v3132_v31 = vsub.f32 1.0, %v3128_v57  ;;  %v2788_v25 = vsub.f32 %v7307_v14, %v7203_v11  ;;  %v7329_v17 = vmul.f32 %v7311_v33, %v2798_v26  ;;  %v9674_v6 = vld [vmem:[#allocation18_spill] sm:$0xff] }
 0x1c9   : > { %v2822_v0 = vmul.f32 %v7319_v51, %v7266_v59  ;;  %v7331_v61 = vmul.f32 %v2786_v53, %v2786_v53  ;;  %v7336_v60 = vadd.f32 %v2772_v52, %v2758_v37  ;;  %v7338_v34 = vadd.f32 %v2774_v44, %v2760_v35  ;;  %v9672_v37 = vld [vmem:[#allocation16_spill] sm:$0xff] }
 0x1ca   : > { %v3134_v29 = vmax.f32 %v3130_v30, 0.0  ;;  %v3136_v56 = vmax.f32 %v3132_v31, 0.0  ;;  %v7340_v23 = vmul.f32 %v2788_v25, %v2788_v25  ;;  %vm2804_vm3 = vcmp.eq.f32.partialorder %v7235_v47, inf }
 0x1cb   : > { %v7334_v3 = vmul.f32 %v7319_v51, %v2822_v0  ;;  %vm2828_vm4 = vcmp.eq.f32.partialorder %v7266_v59, inf  ;;  %vm2806_vm5 = vcmp.eq.f32.partialorder %v7235_v47, 0.0  ;;  %vm2830_vm6 = vcmp.eq.f32.partialorder %v7266_v59, 0.0 }
 0x1cc   : > { %v3138_v7 = vmul.f32 %v7071_v36, %v3134_v29  ;;  %v3140_v11 = vmul.f32 %v7099_v9, %v3136_v56  ;;  %v3142_v24 = vmul.f32 %v7075_v10, %v3134_v29  ;;  %v3144_v5 = vmul.f32 %v7103_v1, %v3136_v56 }
 0x1cd   : > { %v3146_v19 = vmul.f32 %v7079_v46, %v3134_v29  ;;  %v3148_v58 = vmul.f32 %v7107_v32, %v3136_v56  ;;  %v3150_v20 = vmul.f32 %v7083_v38, %v3134_v29  ;;  %v3152_v39 = vmul.f32 %v7111_v22, %v3136_v56 }
 0x1ce   : > { %v3154_v62 = vmul.f32 %v7087_v49, %v3134_v29  ;;  %v3156_v42 = vmul.f32 %v9669_v43, %v3136_v56  ;;  %v3158_v36 = vmul.f32 %v9670_v27, %v3134_v29  ;;  %v3160_v9 = vmul.f32 %v9671_v54, %v3136_v56 }
 0x1cf   : > { %v3162_v10 = vmul.f32 %v9672_v37, %v3134_v29  ;;  %v3164_v1 = vmul.f32 %v9673_v48, %v3136_v56  ;;  %v3166_v46 = vmul.f32 %v9674_v6, %v3134_v29  ;;  %v3168_v32 = vmul.f32 %v7131_v41, %v3136_v56 }
 0x1d0   : > { %v3176_v4 = vadd.f32 %v3140_v11, %v3138_v7  ;;  %v3190_v38 = vadd.f32 %v3144_v5, %v3142_v24  ;;  %v3204_v50 = vadd.f32 %v3148_v58, %v3146_v19  ;;  %v3218_v22 = vadd.f32 %v3152_v39, %v3150_v20 }
 0x1d1   : > { %v3232_v53 = vadd.f32 %v3156_v42, %v3154_v62  ;;  %v3246_v49 = vadd.f32 %v3160_v9, %v3158_v36  ;;  %v3260_v45 = vadd.f32 %v3164_v1, %v3162_v10  ;;  %v3274_v55 = vadd.f32 %v3168_v32, %v3166_v46 }
 0x1d2   : > { %v3177_v57 = vrot.slane %v3176_v4, 4  ;;  %v3191_v35 = vrot.slane %v3190_v38, 4  ;;  %v3205_v30 = vrot.slane %v3204_v50, 4  ;;  %v3219_v31 = vrot.slane %v3218_v22, 4 }
 0x1d3   : > { %v3233_v26 = vrot.slane %v3232_v53, 4  ;;  %v3247_v52 = vrot.slane %v3246_v49, 4  ;;  %v3261_v0 = vrot.slane %v3260_v45, 4  ;;  %v3275_v44 = vrot.slane %v3274_v55, 4 }
 0x1d4   : > { %v3178_v25 = vadd.f32 %v3177_v57, %v3176_v4  ;;  %v3192_v29 = vadd.f32 %v3191_v35, %v3190_v38  ;;  %v3206_v43 = vadd.f32 %v3205_v30, %v3204_v50  ;;  %v3220_v41 = vadd.f32 %v3219_v31, %v3218_v22 }
 0x1d5   : > { %v3234_v56 = vadd.f32 %v3233_v26, %v3232_v53  ;;  %v3248_v7 = vadd.f32 %v3247_v52, %v3246_v49  ;;  %v3262_v11 = vadd.f32 %v3261_v0, %v3260_v45  ;;  %v3276_v24 = vadd.f32 %v3275_v44, %v3274_v55 }
 0x1d6   : > { %v3179_v5 = vrot.slane %v3178_v25, 2  ;;  %v3193_v19 = vrot.slane %v3192_v29, 2  ;;  %v3207_v58 = vrot.slane %v3206_v43, 2  ;;  %v3221_v20 = vrot.slane %v3220_v41, 2 }
 0x1d7   : > { %v3235_v39 = vrot.slane %v3234_v56, 2  ;;  %v3249_v62 = vrot.slane %v3248_v7, 2  ;;  %v3263_v42 = vrot.slane %v3262_v11, 2  ;;  %v3277_v27 = vrot.slane %v3276_v24, 2 }
 0x1d8   : > { %v3180_v36 = vadd.f32 %v3179_v5, %v3178_v25  ;;  %v3194_v54 = vadd.f32 %v3193_v19, %v3192_v29  ;;  %v3208_v9 = vadd.f32 %v3207_v58, %v3206_v43  ;;  %v3222_v37 = vadd.f32 %v3221_v20, %v3220_v41 }
 0x1d9   : > { %v3236_v10 = vadd.f32 %v3235_v39, %v3234_v56  ;;  %v3250_v48 = vadd.f32 %v3249_v62, %v3248_v7  ;;  %v3264_v1 = vadd.f32 %v3263_v42, %v3262_v11  ;;  %v3278_v6 = vadd.f32 %v3277_v27, %v3276_v24 }
 0x1da   : > { %v3181_v46 = vrot.slane %v3180_v36, 1  ;;  %v3195_v32 = vrot.slane %v3194_v54, 1  ;;  %v3209_v4 = vrot.slane %v3208_v9, 1  ;;  %v3223_v38 = vrot.slane %v3222_v37, 1 }
 0x1db   : > { %v3237_v50 = vrot.slane %v3236_v10, 1  ;;  %v3251_v22 = vrot.slane %v3250_v48, 1  ;;  %v3265_v53 = vrot.slane %v3264_v1, 1  ;;  %v3279_v49 = vrot.slane %v3278_v6, 1 }
 0x1dc   : > { %v3182_v45 = vadd.f32 %v3181_v46, %v3180_v36  ;;  %v3196_v55 = vadd.f32 %v3195_v32, %v3194_v54  ;;  %v3210_v57 = vadd.f32 %v3209_v4, %v3208_v9  ;;  %v3224_v35 = vadd.f32 %v3223_v38, %v3222_v37 }
 0x1dd   : > { %v3238_v30 = vadd.f32 %v3237_v50, %v3236_v10  ;;  %v3252_v31 = vadd.f32 %v3251_v22, %v3250_v48  ;;  %v3266_v26 = vadd.f32 %v3265_v53, %v3264_v1  ;;  %v3280_v52 = vadd.f32 %v3279_v49, %v3278_v6  ;;  %v9675_v49 = vld [vmem:[#allocation23_spill] sm:$0xff] }
 0x1de   : > { %v3304_v0 = vsel %vm734_vm7, %v3196_v55, %v3182_v45  ;;  %v2800_v44 = vmul.f32 0.5, %v7329_v17  ;;  %v2824_v25 = vmul.f32 0.5, %v7334_v3  ;;  %v7369_v29 = vadd.f32 %v7331_v61, %v7336_v60  ;;  %v7449_v55 = vld [vmem:[%s5842_s13] sm:$0xff] }
 0x1df   : > { %v3305_v43 = vsel %vm736_vm9, %v3210_v57, %v3304_v0  ;;  %v7374_v41 = vadd.f32 %v7340_v23, %v7338_v34  ;;  %v7377_v56 = vstv %s7358_s17  ;;  %v7380_v7 = vstv %s7360_s18  ;;  %v7465_v0 = vld [vmem:[%s5842_s13 + $0x40] sm:$0xff]  ;;  %s8648_s17 = sld [smem:[#allocation5 + $0x82]] }
 0x1e0   : > { %v3306_v11 = vsel %vm738_vm10, %v3224_v35, %v3305_v43  ;;  %v2801_v24 = vsub.f32 1.5, %v2800_v44  ;;  %v2825_v17 = vsub.f32 1.5, %v2824_v25  ;;  %5342 = vrsqrt.f32 %v7369_v29  ;;  %v7453_v35 = vld [vmem:[%s5842_s13 + $0x10] sm:$0xff]  ;;  %s8653_s18 = sld [smem:[#allocation5 + $0x102]] }
 0x1e1   : > { %v3307_v3 = vsel %vm740_vm11, %v3238_v30, %v3306_v11  ;;  %5344 = vrsqrt.f32 %v7374_v41  ;;  %v2469_v61 = vsub.f32 %v7144_v13, %v7377_v56  ;;  %v2471_v60 = vsub.f32 %v7162_v28, %v7377_v56  ;;  %v7469_v25 = vld [vmem:[%s5842_s13 + $0x50] sm:$0xff]  ;;  %v7473_v11 = vld [vmem:[%s5842_s13 + $0x60] sm:$0xff] }
 0x1e2   : > { %v3308_v34 = vsel %vm742_vm12, %v3252_v31, %v3307_v3  ;;  %v2802_v23 = vmul.f32 %v7311_v33, %v2801_v24  ;;  %v2826_v5 = vmul.f32 %v7319_v51, %v2825_v17  ;;  %v2483_v19 = vsub.f32 %v7165_v12, %v7380_v7  ;;  %v7457_v31 = vld [vmem:[%s5842_s13 + $0x20] sm:$0xff]  ;;  %9677 = vst [vmem:[#allocation11_spill] sm:$0xff] %v7469_v25  ;;  %v7477_v17 = vld [vmem:[%s5842_s13 + $0x70] sm:$0xff] }
 0x1e3   : > { %v3309_v58 = vsel %vm744_vm13, %v3266_v26, %v3308_v34  ;;  %v2831_v13 = vand.u32 2147483648, %v7266_v59  ;;  %v2473_v33 = vmul.f32 %v2469_v61, %v2469_v61  ;;  %v2475_v51 = vmul.f32 %v2471_v60, %v2471_v60  ;;  %v7461_v26 = vld [vmem:[%s5842_s13 + $0x30] sm:$0xff]  ;;  %9678 = vst [vmem:[#allocation10_spill] sm:$0xff] %v7477_v17  ;;  %v7481_v61 = vld [vmem:[%s5842_s13 + $0x80] sm:$0xff] }
 0x1e4   : > { %v3310_v28 = vsel %vm746_vm14, %v3280_v52, %v3309_v58  ;;  %v2803_v20 = vmul.f32 %v2802_v23, %v7235_v47  ;;  %v2827_v39 = vmul.f32 %v2826_v5, %v7266_v59  ;;  %v2485_v12 = vsub.f32 %v7172_v15, %v7380_v7  ;;  %9676 = vst [vmem:[#allocation9_spill] sm:$0xff] %v7461_v26  ;;  %v7485_v34 = vld [vmem:[%s5842_s13 + $0x90] sm:$0xff]  ;;  %v7489_v5 = vld [vmem:[%s5842_s13 + $0xa0] sm:$0xff] }
 0x1e5   : > { %4798 = vmatpush.msra.mxu1 %v3310_v28  ;;  %5243 = vmatpush.msra.mxu3 %v3310_v28  ;;  %v2487_v36 = vmul.f32 %v2483_v19, %v2483_v19  ;;  %9679 = vst [vmem:[#allocation12_spill] sm:$0xff] %v7485_v34  ;;  %v7493_v58 = vld [vmem:[%s5842_s13 + $0xb0] sm:$0xff]  ;;  %v7497_v28 = vld [vmem:[%s5842_s13 + $0xc0] sm:$0xff]  ;;  %vm2816_vm8 = vcmp.eq.f32.partialorder %v7369_v29, inf  ;;  %vm2818_vm15 = vcmp.eq.f32.partialorder %v7369_v29, 0.0  ;;  %vm2840_vm0 = vcmp.eq.f32.partialorder %v7374_v41, inf }
 0x1e6   : > { %v7406_v62 = vpop.eup %5342  ;;  %v2805_v42 = vsel %vm2804_vm3, %v7235_v47, %v2803_v20  ;;  %v2829_v27 = vsel %vm2828_vm4, %v7266_v59, %v2827_v39  ;;  %v2489_v10 = vmul.f32 %v2485_v12, %v2485_v12  ;;  %v7432_v59 = vstv %s7390_s19  ;;  %9680 = vst [vmem:[#allocation13_spill] sm:$0xff] %v7493_v58  ;;  %v7501_v39 = vld [vmem:[%s5842_s13 + $0xd0] sm:$0xff]  ;;  %s8862_s19 = sld [smem:[#allocation5 + $0x1]] }
 0x1e7   : > { %v7414_v54 = vpop.eup %5344  ;;  %v2808_v9 = vsel %vm2806_vm5, %v2807_v16, %v2805_v42  ;;  %v2832_v15 = vsel %vm2830_vm6, %v2831_v13, %v2829_v27  ;;  %v2810_v37 = vmul.f32 %v7406_v62, %v7369_v29  ;;  %v7426_v46 = vadd.f32 %v2487_v36, %v2473_v33  ;;  %9681 = vst [vmem:[#allocation14_spill] sm:$0xff] %v7501_v39  ;;  %v7509_v42 = vld [vmem:[%s5842_s13 + $0xf0] sm:$0xff] }
 0x1e8   : > { %v2845_v48 = vsub.f32 1.0, %v2808_v9  ;;  %v2847_v1 = vsub.f32 1.0, %v2832_v15  ;;  %v2834_v6 = vmul.f32 %v7414_v54, %v7374_v41  ;;  %v7429_v16 = vadd.f32 %v2489_v10, %v2475_v51  ;;  %v7505_v51 = vld [vmem:[%s5842_s13 + $0xe0] sm:$0xff] }
 0x1e9   : > { %v2811_v47 = vmul.f32 %v7406_v62, %v2810_v37  ;;  %v7442_v53 = vsub.f32 %v7194_v63, %v7432_v59  ;;  %v7446_v45 = vsub.f32 %v9675_v49, %v7432_v59  ;;  %9682 = vst [vmem:[#allocation19_spill] sm:$0xff] %v7505_v51  ;;  %vm2842_vm1 = vcmp.eq.f32.partialorder %v7374_v41, 0.0 }
 0x1ea   : > { %v2849_v32 = vmax.f32 %v2845_v48, 0.0  ;;  %v2851_v4 = vmax.f32 %v2847_v1, 0.0  ;;  %v7438_v22 = vmul.f32 %v7414_v54, %v2834_v6 }
 0x1eb   : > { %v7435_v50 = vmul.f32 0.5, %v2811_v47 }
 0x1ec   : > { %v2853_v57 = vmul.f32 %v7449_v55, %v2849_v32  ;;  %v2855_v30 = vmul.f32 %v7453_v35, %v2851_v4  ;;  %v2857_v63 = vmul.f32 %v7457_v31, %v2849_v32  ;;  %v2859_v52 = vmul.f32 %v7461_v26, %v2851_v4 }
 0x1ed   : > { %v2861_v44 = vmul.f32 %v7465_v0, %v2849_v32  ;;  %v2863_v43 = vmul.f32 %v7469_v25, %v2851_v4  ;;  %v2865_v24 = vmul.f32 %v7473_v11, %v2849_v32  ;;  %v2867_v3 = vmul.f32 %v7477_v17, %v2851_v4 }
 0x1ee   : > { %v2869_v60 = vmul.f32 %v7481_v61, %v2849_v32  ;;  %v2871_v23 = vmul.f32 %v7485_v34, %v2851_v4  ;;  %v2873_v19 = vmul.f32 %v7489_v5, %v2849_v32  ;;  %v2875_v13 = vmul.f32 %v7493_v58, %v2851_v4 }
 0x1ef   : > { %v2877_v20 = vmul.f32 %v7497_v28, %v2849_v32  ;;  %v2879_v33 = vmul.f32 %v7501_v39, %v2851_v4  ;;  %v2881_v12 = vmul.f32 %v7505_v51, %v2849_v32  ;;  %v2883_v27 = vmul.f32 %v7509_v42, %v2851_v4 }
 0x1f0   : > { %v2885_v36 = vadd.f32 %v2855_v30, %v2853_v57  ;;  %v2899_v9 = vadd.f32 %v2859_v52, %v2857_v63  ;;  %v2913_v15 = vadd.f32 %v2863_v43, %v2861_v44  ;;  %v2927_v37 = vadd.f32 %v2867_v3, %v2865_v24 }
 0x1f1   : > { %v2941_v10 = vadd.f32 %v2871_v23, %v2869_v60  ;;  %v2955_v48 = vadd.f32 %v2875_v13, %v2873_v19  ;;  %v2969_v1 = vadd.f32 %v2879_v33, %v2877_v20  ;;  %v2983_v6 = vadd.f32 %v2883_v27, %v2881_v12 }
 0x1f2   : > { %v2886_v47 = vrot.slane %v2885_v36, 4  ;;  %v2900_v49 = vrot.slane %v2899_v9, 4  ;;  %v2914_v38 = vrot.slane %v2913_v15, 4  ;;  %v2928_v39 = vrot.slane %v2927_v37, 4 }
 0x1f3   : > { %v2942_v58 = vrot.slane %v2941_v10, 4  ;;  %v2956_v34 = vrot.slane %v2955_v48, 4  ;;  %v2970_v17 = vrot.slane %v2969_v1, 4  ;;  %v2984_v32 = vrot.slane %v2983_v6, 4 }
 0x1f4   : > { %v2887_v51 = vadd.f32 %v2886_v47, %v2885_v36  ;;  %v2901_v25 = vadd.f32 %v2900_v49, %v2899_v9  ;;  %v2915_v26 = vadd.f32 %v2914_v38, %v2913_v15  ;;  %v2929_v4 = vadd.f32 %v2928_v39, %v2927_v37 }
 0x1f5   : > { %v2943_v57 = vadd.f32 %v2942_v58, %v2941_v10  ;;  %v2957_v30 = vadd.f32 %v2956_v34, %v2955_v48  ;;  %v2971_v63 = vadd.f32 %v2970_v17, %v2969_v1  ;;  %v2985_v52 = vadd.f32 %v2984_v32, %v2983_v6 }
 0x1f6   : > { %v2888_v44 = vrot.slane %v2887_v51, 2  ;;  %v2902_v43 = vrot.slane %v2901_v25, 2  ;;  %v2916_v24 = vrot.slane %v2915_v26, 2  ;;  %v2930_v3 = vrot.slane %v2929_v4, 2 }
 0x1f7   : > { %v2944_v60 = vrot.slane %v2943_v57, 2  ;;  %v2958_v23 = vrot.slane %v2957_v30, 2  ;;  %v2972_v19 = vrot.slane %v2971_v63, 2  ;;  %v2986_v13 = vrot.slane %v2985_v52, 2 }
 0x1f8   : > { %v2889_v20 = vadd.f32 %v2888_v44, %v2887_v51  ;;  %v2903_v33 = vadd.f32 %v2902_v43, %v2901_v25  ;;  %v2917_v12 = vadd.f32 %v2916_v24, %v2915_v26  ;;  %v2931_v27 = vadd.f32 %v2930_v3, %v2929_v4 }
 0x1f9   : > { %v2945_v36 = vadd.f32 %v2944_v60, %v2943_v57  ;;  %v2959_v9 = vadd.f32 %v2958_v23, %v2957_v30  ;;  %v2973_v38 = vadd.f32 %v2972_v19, %v2971_v63  ;;  %v2987_v39 = vadd.f32 %v2986_v13, %v2985_v52 }
 0x1fa   : > { %v2890_v17 = vrot.slane %v2889_v20, 1  ;;  %v2904_v34 = vrot.slane %v2903_v33, 1  ;;  %v2918_v58 = vrot.slane %v2917_v12, 1  ;;  %v2932_v15 = vrot.slane %v2931_v27, 1 }
 0x1fb   : > { %v2946_v37 = vrot.slane %v2945_v36, 1  ;;  %v2960_v10 = vrot.slane %v2959_v9, 1  ;;  %v2974_v48 = vrot.slane %v2973_v38, 1  ;;  %v2988_v1 = vrot.slane %v2987_v39, 1 }
 0x1fc   : > { %v2891_v26 = vadd.f32 %v2890_v17, %v2889_v20  ;;  %v2905_v25 = vadd.f32 %v2904_v34, %v2903_v33  ;;  %v2919_v51 = vadd.f32 %v2918_v58, %v2917_v12  ;;  %v2933_v6 = vadd.f32 %v2932_v15, %v2931_v27 }
 0x1fd   : > { %v2947_v47 = vadd.f32 %v2946_v37, %v2945_v36  ;;  %v2961_v49 = vadd.f32 %v2960_v10, %v2959_v9  ;;  %v2975_v32 = vadd.f32 %v2974_v48, %v2973_v38  ;;  %v2989_v4 = vadd.f32 %v2988_v1, %v2987_v39  ;;  %v7581_v48 = vld [vmem:[%s5842_s13 + $0x8] sm:$0xff] }
 0x1fe   : > { %v3013_v57 = vsel %vm734_vm7, %v2905_v25, %v2891_v26  ;;  %v2813_v30 = vsub.f32 1.5, %v7435_v50  ;;  %v2836_v63 = vmul.f32 0.5, %v7438_v22  ;;  %v2505_v52 = vmul.f32 %v7442_v53, %v7442_v53  ;;  %v7585_v26 = vld [vmem:[%s5842_s13 + $0x28] sm:$0xff] }
 0x1ff   : > { %v3014_v44 = vsel %vm736_vm9, %v2919_v51, %v3013_v57  ;;  %v2507_v43 = vmul.f32 %v7446_v45, %v7446_v45  ;;  %v2470_v24 = vsub.f32 %v7256_v40, %v7377_v56  ;;  %v2472_v3 = vsub.f32 %v7269_v2, %v7377_v56  ;;  %v7589_v51 = vld [vmem:[%s5842_s13 + $0x48] sm:$0xff] }
 0x200   : > { %v3015_v60 = vsel %vm738_vm10, %v2933_v6, %v3014_v44  ;;  %v2814_v50 = vmul.f32 %v7406_v62, %v2813_v30  ;;  %v2837_v23 = vsub.f32 1.5, %v2836_v63  ;;  %v7530_v22 = vadd.f32 %v2505_v52, %v7426_v46  ;;  %v7605_v57 = vld [vmem:[%s5842_s13 + $0xc8] sm:$0xff]  ;;  %v7609_v63 = vld [vmem:[%s5842_s13 + $0x18] sm:$0xff] }
 0x201   : > { %v3016_v53 = vsel %vm740_vm11, %v2947_v47, %v3015_v60  ;;  %v2843_v45 = vand.u32 2147483648, %v7374_v41  ;;  %v7536_v19 = vadd.f32 %v2507_v43, %v7429_v16  ;;  %v2474_v46 = vmul.f32 %v2470_v24, %v2470_v24  ;;  %v7597_v47 = vld [vmem:[%s5842_s13 + $0x88] sm:$0xff]  ;;  %v7613_v44 = vld [vmem:[%s5842_s13 + $0x38] sm:$0xff] }
 0x202   : > { %v3017_v40 = vsel %vm742_vm12, %v2961_v49, %v3016_v53  ;;  %v2815_v2 = vmul.f32 %v2814_v50, %v7369_v29  ;;  %v2838_v56 = vmul.f32 %v7414_v54, %v2837_v23  ;;  %5346 = vrsqrt.f32 %v7530_v22  ;;  %v7617_v24 = vld [vmem:[%s5842_s13 + $0x58] sm:$0xff] }
 0x203   : > { %v3018_v62 = vsel %vm744_vm13, %v2975_v32, %v3017_v40  ;;  %v2484_v13 = vsub.f32 %v7274_v8, %v7380_v7  ;;  %v2486_v20 = vsub.f32 %v7281_v18, %v7380_v7  ;;  %v2476_v54 = vmul.f32 %v2472_v3, %v2472_v3  ;;  %v7601_v32 = vld [vmem:[%s5842_s13 + $0xa8] sm:$0xff]  ;;  %v7621_v60 = vld [vmem:[%s5842_s13 + $0x78] sm:$0xff] }
 0x204   : > { %v3019_v16 = vsel %vm746_vm14, %v2989_v4, %v3018_v62  ;;  %v2817_v33 = vsel %vm2816_vm8, %v7369_v29, %v2815_v2  ;;  %v2839_v12 = vmul.f32 %v2838_v56, %v7374_v41  ;;  %v9683_v27 = vand.u32 2147483648, %v7369_v29  ;;  %v7625_v23 = vld [vmem:[%s5842_s13 + $0x98] sm:$0xff]  ;;  %v7637_v62 = vld [vmem:[%s5842_s13 + $0xe8] sm:$0xff] }
 0x205   : > { %4776 = vmatpush.msra.mxu0 %v3019_v16  ;;  %5229 = vmatpush.msra.mxu2 %v3019_v16  ;;  %v2488_v8 = vmul.f32 %v2484_v13, %v2484_v13  ;;  %v2490_v9 = vmul.f32 %v2486_v20, %v2486_v20  ;;  %v2502_v38 = vsub.f32 %v7289_v21, %v7432_v59  ;;  %5348 = vrsqrt.f32 %v7536_v19  ;;  %v7633_v2 = vld [vmem:[%s5842_s13 + $0xd8] sm:$0xff] }
 0x206   : > { %v2820_v36 = vsel %vm2818_vm15, %v9683_v27, %v2817_v33  ;;  %v2841_v18 = vsel %vm2840_vm0, %v7374_v41, %v2839_v12  ;;  %v7576_v21 = vsub.f32 %v7307_v14, %v7432_v59  ;;  %v7593_v59 = vld [vmem:[%s5842_s13 + $0x68] sm:$0xff]  ;;  %9684 = vst [vmem:[#allocation15_spill] sm:$0xff] %v7625_v23  ;;  %v7641_v13 = vld [vmem:[%s5842_s13 + $0xf8] sm:$0xff]  ;;  %vm2520_vm2 = vcmp.eq.f32.partialorder %v7530_v22, inf }
 0x207   : > { %v2846_v7 = vsub.f32 1.0, %v2820_v36  ;;  %v2844_v39 = vsel %vm2842_vm1, %v2843_v45, %v2841_v18  ;;  %v7563_v17 = vadd.f32 %v2488_v8, %v2474_v46  ;;  %v7567_v15 = vadd.f32 %v2490_v9, %v2476_v54  ;;  %v7629_v45 = vld [vmem:[%s5842_s13 + $0xb8] sm:$0xff]  ;;  %9686 = vst [vmem:[#allocation20_spill] sm:$0xff] %v7633_v2 }
 0x208   : > { %v7565_v29 = vpop.eup %5346  ;;  %v2848_v34 = vsub.f32 1.0, %v2844_v39  ;;  %v7578_v41 = vmul.f32 %v2502_v38, %v2502_v38  ;;  %9685 = vst [vmem:[#allocation21_spill] sm:$0xff] %v7629_v45  ;;  %vm2522_vm3 = vcmp.eq.f32.partialorder %v7530_v22, 0.0  ;;  %vm2544_vm4 = vcmp.eq.f32.partialorder %v7536_v19, inf }
 0x209   : > { %v2850_v58 = vmax.f32 %v2846_v7, 0.0  ;;  %v7571_v37 = vmul.f32 %v7565_v29, %v7530_v22  ;;  %9687 = vst [vmem:[#allocation17_spill] sm:$0xff] %v7637_v62  ;;  %vm2546_vm5 = vcmp.eq.f32.partialorder %v7536_v19, 0.0 }
 0x20a   : > { %v2852_v10 = vmax.f32 %v2848_v34, 0.0 }
 0x20b   : > { %v2854_v1 = vmul.f32 %v7581_v48, %v2850_v58  ;;  %v2858_v25 = vmul.f32 %v7585_v26, %v2850_v58  ;;  %v2862_v14 = vmul.f32 %v7589_v51, %v2850_v58  ;;  %v2866_v6 = vmul.f32 %v7593_v59, %v2850_v58  ;;  %v7644_v54 = vpop.eup %5348 }
 0x20c   : > { %v2870_v49 = vmul.f32 %v7597_v47, %v2850_v58  ;;  %v2874_v4 = vmul.f32 %v7601_v32, %v2850_v58  ;;  %v2878_v30 = vmul.f32 %v7605_v57, %v2850_v58  ;;  %v2856_v52 = vmul.f32 %v7609_v63, %v2852_v10 }
 0x20d   : > { %v2860_v43 = vmul.f32 %v7613_v44, %v2852_v10  ;;  %v2864_v3 = vmul.f32 %v7617_v24, %v2852_v10  ;;  %v2868_v50 = vmul.f32 %v7621_v60, %v2852_v10  ;;  %v2872_v53 = vmul.f32 %v7625_v23, %v2852_v10 }
 0x20e   : > { %v2876_v40 = vmul.f32 %v7629_v45, %v2852_v10  ;;  %v2880_v56 = vmul.f32 %v7633_v2, %v2852_v10  ;;  %v2882_v46 = vmul.f32 %v7637_v62, %v2850_v58  ;;  %v2884_v20 = vmul.f32 %v7641_v13, %v2852_v10 }
 0x20f   : > { %v2892_v16 = vadd.f32 %v2856_v52, %v2854_v1  ;;  %v2906_v33 = vadd.f32 %v2860_v43, %v2858_v25  ;;  %v2920_v12 = vadd.f32 %v2864_v3, %v2862_v14  ;;  %v2934_v27 = vadd.f32 %v2868_v50, %v2866_v6 }
 0x210   : > { %v2948_v36 = vadd.f32 %v2872_v53, %v2870_v49  ;;  %v2962_v8 = vadd.f32 %v2876_v40, %v2874_v4  ;;  %v2976_v9 = vadd.f32 %v2880_v56, %v2878_v30  ;;  %v2990_v39 = vadd.f32 %v2884_v20, %v2882_v46 }
 0x211   : > { %v2893_v18 = vrot.slane %v2892_v16, 4  ;;  %v2907_v7 = vrot.slane %v2906_v33, 4  ;;  %v2921_v38 = vrot.slane %v2920_v12, 4  ;;  %v2935_v34 = vrot.slane %v2934_v27, 4 }
 0x212   : > { %v2949_v2 = vrot.slane %v2948_v36, 4  ;;  %v2963_v58 = vrot.slane %v2962_v8, 4  ;;  %v2977_v62 = vrot.slane %v2976_v9, 4  ;;  %v2991_v1 = vrot.slane %v2990_v39, 4 }
 0x213   : > { %v2894_v45 = vadd.f32 %v2893_v18, %v2892_v16  ;;  %v2908_v23 = vadd.f32 %v2907_v7, %v2906_v33  ;;  %v2922_v10 = vadd.f32 %v2921_v38, %v2920_v12  ;;  %v2936_v25 = vadd.f32 %v2935_v34, %v2934_v27 }
 0x214   : > { %v2950_v14 = vadd.f32 %v2949_v2, %v2948_v36  ;;  %v2964_v52 = vadd.f32 %v2963_v58, %v2962_v8  ;;  %v2978_v43 = vadd.f32 %v2977_v62, %v2976_v9  ;;  %v2992_v30 = vadd.f32 %v2991_v1, %v2990_v39 }
 0x215   : > { %v2895_v6 = vrot.slane %v2894_v45, 2  ;;  %v2909_v49 = vrot.slane %v2908_v23, 2  ;;  %v2923_v4 = vrot.slane %v2922_v10, 2  ;;  %v2937_v3 = vrot.slane %v2936_v25, 2 }
 0x216   : > { %v2951_v50 = vrot.slane %v2950_v14, 2  ;;  %v2965_v53 = vrot.slane %v2964_v52, 2  ;;  %v2979_v40 = vrot.slane %v2978_v43, 2  ;;  %v2993_v16 = vrot.slane %v2992_v30, 2 }
 0x217   : > { %v2896_v56 = vadd.f32 %v2895_v6, %v2894_v45  ;;  %v2910_v46 = vadd.f32 %v2909_v49, %v2908_v23  ;;  %v2924_v20 = vadd.f32 %v2923_v4, %v2922_v10  ;;  %v2938_v33 = vadd.f32 %v2937_v3, %v2936_v25 }
 0x218   : > { %v2952_v12 = vadd.f32 %v2951_v50, %v2950_v14  ;;  %v2966_v27 = vadd.f32 %v2965_v53, %v2964_v52  ;;  %v2980_v2 = vadd.f32 %v2979_v40, %v2978_v43  ;;  %v2994_v9 = vadd.f32 %v2993_v16, %v2992_v30  ;;  %v7651_v52 = vld [vmem:[%s5840_s12] sm:$0xff]  ;;  %v7661_v30 = vld [vmem:[%s5840_s12 + $0x10] sm:$0xff] }
 0x219   : > { %v2897_v36 = vrot.slane %v2896_v56, 1  ;;  %v2911_v62 = vrot.slane %v2910_v46, 1  ;;  %v2925_v8 = vrot.slane %v2924_v20, 1  ;;  %v2939_v18 = vrot.slane %v2938_v33, 1 }
 0x21a   : > { %v2953_v7 = vrot.slane %v2952_v12, 1  ;;  %v2967_v38 = vrot.slane %v2966_v27, 1  ;;  %v2981_v39 = vrot.slane %v2980_v2, 1  ;;  %v2995_v58 = vrot.slane %v2994_v9, 1 }
 0x21b   : > { %v2898_v45 = vadd.f32 %v2897_v36, %v2896_v56  ;;  %v2912_v23 = vadd.f32 %v2911_v62, %v2910_v46  ;;  %v2926_v34 = vadd.f32 %v2925_v8, %v2924_v20  ;;  %v2940_v10 = vadd.f32 %v2939_v18, %v2938_v33 }
 0x21c   : > { %v2954_v1 = vadd.f32 %v2953_v7, %v2952_v12  ;;  %v2968_v25 = vadd.f32 %v2967_v38, %v2966_v27  ;;  %v2982_v14 = vadd.f32 %v2981_v39, %v2980_v2  ;;  %v2996_v43 = vadd.f32 %v2995_v58, %v2994_v9  ;;  %v7690_v2 = vld [vmem:[%s5840_s12 + $0x30] sm:$0xff]  ;;  %v7703_v38 = vld [vmem:[%s5840_s12 + $0x40] sm:$0xff] }
 0x21d   : > { %v3020_v6 = vsel %vm734_vm7, %v2912_v23, %v2898_v45  ;;  %v2515_v49 = vmul.f32 %v7565_v29, %v7571_v37  ;;  %v2538_v4 = vmul.f32 %v7644_v54, %v7536_v19  ;;  %v2508_v50 = vmul.f32 %v7576_v21, %v7576_v21  ;;  %9688 = vst [vmem:[#allocation16_spill] sm:$0xff] %v7703_v38 }
 0x21e   : > { %v3021_v3 = vsel %vm736_vm9, %v2926_v34, %v3020_v6  ;;  %v7668_v53 = vadd.f32 %v7578_v41, %v7563_v17  ;;  %v7671_v40 = vstv %s7646_s20  ;;  %v7685_v41 = vld [vmem:[%s5840_s12 + $0x20] sm:$0xff]  ;;  %v2523_v36 = vand.u32 2147483648, %v7530_v22  ;;  %s8864_s20 = sld [smem:[#allocation5 + $0x81]] }
 0x21f   : > { %v3022_v56 = vsel %vm738_vm10, %v2940_v10, %v3021_v3  ;;  %v2516_v37 = vmul.f32 0.5, %v2515_v49  ;;  %v2539_v46 = vmul.f32 %v7644_v54, %v2538_v4  ;;  %v2185_v20 = vsub.f32 %v7651_v52, %v7671_v40 }
 0x220   : > { %v3023_v16 = vsel %vm740_vm11, %v2954_v1, %v3022_v56  ;;  %v7679_v21 = vadd.f32 %v2508_v50, %v7567_v15  ;;  %5350 = vrsqrt.f32 %v7668_v53  ;;  %v2187_v17 = vsub.f32 %v7661_v30, %v7671_v40  ;;  %v7714_v1 = vld [vmem:[%s5840_s12 + $0x50] sm:$0xff] }
 0x221   : > { %v3024_v33 = vsel %vm742_vm12, %v2968_v25, %v3023_v16  ;;  %v2517_v12 = vsub.f32 1.5, %v2516_v37  ;;  %v2540_v27 = vmul.f32 0.5, %v2539_v46  ;;  %v7696_v62 = vstv %s7648_s26  ;;  %9689 = vst [vmem:[#allocation22_spill] sm:$0xff] %v7714_v1  ;;  %s8887_s26 = sld [smem:[#allocation5 + $0x101]] }
 0x222   : > { %v3025_v15 = vsel %vm744_vm13, %v2982_v14, %v3024_v33  ;;  %5352 = vrsqrt.f32 %v7679_v21  ;;  %v2199_v7 = vsub.f32 %v7685_v41, %v7696_v62  ;;  %v2189_v39 = vmul.f32 %v2185_v20, %v2185_v20 }
 0x223   : > { %v3026_v8 = vsel %vm746_vm14, %v2996_v43, %v3025_v15  ;;  %v2518_v9 = vmul.f32 %v7565_v29, %v2517_v12  ;;  %v2541_v18 = vsub.f32 1.5, %v2540_v27  ;;  %v2191_v45 = vmul.f32 %v2187_v17, %v2187_v17 }
 0x224   : > { %4799 = vmatpush.msra.mxu1 %v3026_v8  ;;  %5244 = vmatpush.msra.mxu3 %v3026_v8  ;;  %v2201_v23 = vsub.f32 %v7690_v2, %v7696_v62  ;;  %v7708_v34 = vstv %s7653_s27  ;;  %v2203_v10 = vmul.f32 %v2199_v7, %v2199_v7  ;;  %v2547_v14 = vand.u32 2147483648, %v7536_v19  ;;  %s9146_s27 = sld [smem:[#allocation5]] }
 0x225   : > { %v2519_v58 = vmul.f32 %v2518_v9, %v7530_v22  ;;  %v2542_v29 = vmul.f32 %v7644_v54, %v2541_v18  ;;  %v2217_v6 = vsub.f32 %v7703_v38, %v7708_v34  ;;  %v2219_v46 = vsub.f32 %v7714_v1, %v7708_v34 }
 0x226   : > { %v7716_v25 = vpop.eup %5350  ;;  %v2205_v43 = vmul.f32 %v2201_v23, %v2201_v23  ;;  %v2207_v56 = vadd.f32 %v2203_v10, %v2189_v39  ;;  %vm2532_vm6 = vcmp.eq.f32.partialorder %v7668_v53, inf  ;;  %vm2534_vm8 = vcmp.eq.f32.partialorder %v7668_v53, 0.0 }
 0x227   : > { %v2521_v49 = vsel %vm2520_vm2, %v7530_v22, %v2519_v58  ;;  %v2543_v4 = vmul.f32 %v2542_v29, %v7536_v19  ;;  %v2526_v54 = vmul.f32 %v7716_v25, %v7668_v53  ;;  %v2221_v12 = vmul.f32 %v2217_v6, %v2217_v6 }
 0x228   : > { %v7729_v3 = vpop.eup %5352  ;;  %v2524_v50 = vsel %vm2522_vm3, %v2523_v36, %v2521_v49  ;;  %v2209_v37 = vadd.f32 %v2205_v43, %v2191_v45  ;;  %v2223_v27 = vmul.f32 %v2219_v46, %v2219_v46  ;;  %v9690_v49 = vld [vmem:[#allocation9_spill] sm:$0xff]  ;;  %vm2556_vm15 = vcmp.eq.f32.partialorder %v7679_v21, inf }
 0x229   : > { %v2545_v20 = vsel %vm2544_vm4, %v7536_v19, %v2543_v4  ;;  %v2561_v16 = vsub.f32 1.0, %v2524_v50  ;;  %v2527_v22 = vmul.f32 %v7716_v25, %v2526_v54  ;;  %v2550_v17 = vmul.f32 %v7729_v3, %v7679_v21  ;;  %v9691_v54 = vld [vmem:[#allocation11_spill] sm:$0xff]  ;;  %v9694_v46 = vld [vmem:[#allocation13_spill] sm:$0xff] }
 0x22a   : > { %v2548_v33 = vsel %vm2546_vm5, %v2547_v14, %v2545_v20  ;;  %v7743_v7 = vadd.f32 %v2221_v12, %v2207_v56  ;;  %v7745_v19 = vadd.f32 %v2223_v27, %v2209_v37  ;;  %v9692_v56 = vld [vmem:[#allocation10_spill] sm:$0xff]  ;;  %v9693_v37 = vld [vmem:[#allocation12_spill] sm:$0xff]  ;;  %vm2558_vm0 = vcmp.eq.f32.partialorder %v7679_v21, 0.0 }
 0x22b   : > { %v2563_v15 = vsub.f32 1.0, %v2548_v33  ;;  %v2565_v8 = vmax.f32 %v2561_v16, 0.0  ;;  %v7738_v9 = vmul.f32 0.5, %v2527_v22  ;;  %v7741_v18 = vmul.f32 %v7729_v3, %v2550_v17  ;;  %v9695_v20 = vld [vmem:[#allocation14_spill] sm:$0xff]  ;;  %v9696_v16 = vld [vmem:[#allocation19_spill] sm:$0xff] }
 0x22c   : > { %5354 = vrsqrt.f32 %v7743_v7  ;;  %vm2236_vm1 = vcmp.eq.f32.partialorder %v7743_v7, inf  ;;  %vm2260_vm2 = vcmp.eq.f32.partialorder %v7745_v19, inf  ;;  %vm2238_vm3 = vcmp.eq.f32.partialorder %v7743_v7, 0.0 }
 0x22d   : > { %v2567_v39 = vmax.f32 %v2563_v15, 0.0  ;;  %v2569_v45 = vmul.f32 %v7449_v55, %v2565_v8  ;;  %v2573_v23 = vmul.f32 %v7457_v31, %v2565_v8  ;;  %v2577_v58 = vmul.f32 %v7465_v0, %v2565_v8 }
 0x22e   : > { %v2581_v29 = vmul.f32 %v7473_v11, %v2565_v8  ;;  %v2585_v10 = vmul.f32 %v7481_v61, %v2565_v8  ;;  %v2589_v14 = vmul.f32 %v7489_v5, %v2565_v8  ;;  %v2593_v43 = vmul.f32 %v7497_v28, %v2565_v8 }
 0x22f   : > { %v2571_v6 = vmul.f32 %v7453_v35, %v2567_v39  ;;  %v2575_v4 = vmul.f32 %v9690_v49, %v2567_v39  ;;  %v2579_v50 = vmul.f32 %v9691_v54, %v2567_v39  ;;  %v2583_v55 = vmul.f32 %v9692_v56, %v2567_v39 }
 0x230   : > { %v2587_v31 = vmul.f32 %v9693_v37, %v2567_v39  ;;  %v2591_v0 = vmul.f32 %v9694_v46, %v2567_v39  ;;  %v2595_v11 = vmul.f32 %v9695_v20, %v2567_v39  ;;  %v2597_v61 = vmul.f32 %v9696_v16, %v2565_v8 }
 0x231   : > { %v2599_v5 = vmul.f32 %v7509_v42, %v2567_v39  ;;  %v2601_v22 = vadd.f32 %v2571_v6, %v2569_v45  ;;  %v2615_v28 = vadd.f32 %v2575_v4, %v2573_v23  ;;  %v2629_v17 = vadd.f32 %v2579_v50, %v2577_v58 }
 0x232   : > { %v2643_v35 = vadd.f32 %v2583_v55, %v2581_v29  ;;  %v2657_v33 = vadd.f32 %v2587_v31, %v2585_v10  ;;  %v2671_v12 = vadd.f32 %v2591_v0, %v2589_v14  ;;  %v2685_v27 = vadd.f32 %v2595_v11, %v2593_v43 }
 0x233   : > { %v2602_v15 = vrot.slane %v2601_v22, 4  ;;  %v2616_v49 = vrot.slane %v2615_v28, 4  ;;  %v2630_v54 = vrot.slane %v2629_v17, 4  ;;  %v2699_v56 = vadd.f32 %v2599_v5, %v2597_v61 }
 0x234   : > { %v2644_v37 = vrot.slane %v2643_v35, 4  ;;  %v2658_v36 = vrot.slane %v2657_v33, 4  ;;  %v2672_v46 = vrot.slane %v2671_v12, 4  ;;  %v2686_v1 = vrot.slane %v2685_v27, 4 }
 0x235   : > { %v2603_v20 = vadd.f32 %v2602_v15, %v2601_v22  ;;  %v2617_v38 = vadd.f32 %v2616_v49, %v2615_v28  ;;  %v2631_v8 = vadd.f32 %v2630_v54, %v2629_v17  ;;  %v2700_v16 = vrot.slane %v2699_v56, 4 }
 0x236   : > { %v2645_v42 = vadd.f32 %v2644_v37, %v2643_v35  ;;  %v2659_v39 = vadd.f32 %v2658_v36, %v2657_v33  ;;  %v2673_v45 = vadd.f32 %v2672_v46, %v2671_v12  ;;  %v2687_v23 = vadd.f32 %v2686_v1, %v2685_v27  ;;  %v7766_v33 = vld [vmem:[%s5840_s12 + $0x8] sm:$0xff]  ;;  %v7769_v12 = vld [vmem:[%s5840_s12 + $0x18] sm:$0xff] }
 0x237   : > { %v2604_v58 = vrot.slane %v2603_v20, 2  ;;  %v2618_v29 = vrot.slane %v2617_v38, 2  ;;  %v2632_v10 = vrot.slane %v2631_v8, 2  ;;  %v2701_v14 = vadd.f32 %v2700_v16, %v2699_v56 }
 0x238   : > { %v2646_v43 = vrot.slane %v2645_v42, 2  ;;  %v2660_v6 = vrot.slane %v2659_v39, 2  ;;  %v2674_v4 = vrot.slane %v2673_v45, 2  ;;  %v2688_v50 = vrot.slane %v2687_v23, 2 }
 0x239   : > { %v2605_v55 = vadd.f32 %v2604_v58, %v2603_v20  ;;  %v2619_v31 = vadd.f32 %v2618_v29, %v2617_v38  ;;  %v2633_v0 = vadd.f32 %v2632_v10, %v2631_v8  ;;  %v2702_v11 = vrot.slane %v2701_v14, 2  ;;  %v7779_v29 = vld [vmem:[%s5840_s12 + $0x28] sm:$0xff] }
 0x23a   : > { %v2647_v61 = vadd.f32 %v2646_v43, %v2645_v42  ;;  %v2661_v5 = vadd.f32 %v2660_v6, %v2659_v39  ;;  %v2675_v22 = vadd.f32 %v2674_v4, %v2673_v45  ;;  %v2689_v36 = vadd.f32 %v2688_v50, %v2687_v23  ;;  %v7784_v6 = vld [vmem:[%s5840_s12 + $0x38] sm:$0xff] }
 0x23b   : > { %v2606_v1 = vrot.slane %v2605_v55, 1  ;;  %v2620_v28 = vrot.slane %v2619_v31, 1  ;;  %v2634_v17 = vrot.slane %v2633_v0, 1  ;;  %v2703_v35 = vadd.f32 %v2702_v11, %v2701_v14 }
 0x23c   : > { %v2648_v27 = vrot.slane %v2647_v61, 1  ;;  %v2662_v38 = vrot.slane %v2661_v5, 1  ;;  %v2676_v15 = vrot.slane %v2675_v22, 1  ;;  %v2690_v49 = vrot.slane %v2689_v36, 1 }
 0x23d   : > { %v2607_v54 = vadd.f32 %v2606_v1, %v2605_v55  ;;  %v2621_v56 = vadd.f32 %v2620_v28, %v2619_v31  ;;  %v2635_v37 = vadd.f32 %v2634_v17, %v2633_v0  ;;  %v2704_v46 = vrot.slane %v2703_v35, 1 }
 0x23e   : > { %v2649_v20 = vadd.f32 %v2648_v27, %v2647_v61  ;;  %v2663_v8 = vadd.f32 %v2662_v38, %v2661_v5  ;;  %v2186_v16 = vsub.f32 %v7766_v33, %v7671_v40  ;;  %v2188_v42 = vsub.f32 %v7769_v12, %v7671_v40  ;;  %v7803_v5 = vld [vmem:[%s5840_s12 + $0x58] sm:$0xff] }
 0x23f   : > { %v2677_v39 = vadd.f32 %v2676_v15, %v2675_v22  ;;  %v2729_v45 = vsel %vm734_vm7, %v2621_v56, %v2607_v54  ;;  %v2529_v23 = vsub.f32 1.5, %v7738_v9  ;;  %v2552_v58 = vmul.f32 0.5, %v7741_v18  ;;  %v7790_v9 = vld [vmem:[%s5840_s12 + $0x48] sm:$0xff] }
 0x240   : > { %v2691_v10 = vadd.f32 %v2690_v49, %v2689_v36  ;;  %v2705_v14 = vadd.f32 %v2704_v46, %v2703_v35  ;;  %v2730_v43 = vsel %vm736_vm9, %v2635_v37, %v2729_v45  ;;  %5356 = vrsqrt.f32 %v7745_v19 }
 0x241   : > { %v2731_v40 = vsel %vm738_vm10, %v2649_v20, %v2730_v43  ;;  %v2530_v4 = vmul.f32 %v7716_v25, %v2529_v23  ;;  %v2553_v50 = vsub.f32 1.5, %v2552_v58  ;;  %v2559_v55 = vand.u32 2147483648, %v7679_v21 }
 0x242   : > { %v2732_v18 = vsel %vm740_vm11, %v2663_v8, %v2731_v40  ;;  %v2200_v31 = vsub.f32 %v7779_v29, %v7696_v62  ;;  %v2202_v61 = vsub.f32 %v7784_v6, %v7696_v62  ;;  %v2190_v36 = vmul.f32 %v2186_v16, %v2186_v16  ;;  %v7814_v62 = vpop.eup %5354 }
 0x243   : > { %v2733_v0 = vsel %vm742_vm12, %v2677_v39, %v2732_v18  ;;  %v2531_v11 = vmul.f32 %v2530_v4, %v7668_v53  ;;  %v2554_v25 = vmul.f32 %v7729_v3, %v2553_v50  ;;  %v2218_v1 = vsub.f32 %v7790_v9, %v7708_v34 }
 0x244   : > { %v2734_v22 = vsel %vm744_vm13, %v2691_v10, %v2733_v0  ;;  %v2192_v35 = vmul.f32 %v2188_v42, %v2188_v42  ;;  %v9697_v27 = vand.u32 2147483648, %v7668_v53  ;;  %v2204_v15 = vmul.f32 %v2200_v31, %v2200_v31 }
 0x245   : > { %v2735_v28 = vsel %vm746_vm14, %v2705_v14, %v2734_v22  ;;  %v2533_v17 = vsel %vm2532_vm6, %v7668_v53, %v2531_v11  ;;  %v2555_v3 = vmul.f32 %v2554_v25, %v7679_v21  ;;  %v2220_v49 = vsub.f32 %v7803_v5, %v7708_v34  ;;  %v9698_v22 = vld [vmem:[#allocation15_spill] sm:$0xff] }
 0x246   : > { %4777 = vmatpush.msra.mxu0 %v2735_v28  ;;  %v2536_v38 = vsel %vm2534_vm8, %v9697_v27, %v2533_v17  ;;  %5230 = vmatpush.msra.mxu2 %v2735_v28  ;;  %v7822_v54 = vpop.eup %5356  ;;  %v2230_v46 = vmul.f32 %v7814_v62, %v7743_v7  ;;  %v2206_v20 = vmul.f32 %v2202_v61, %v2202_v61  ;;  %v2239_v23 = vand.u32 2147483648, %v7743_v7  ;;  %v9701_v28 = vld [vmem:[#allocation17_spill] sm:$0xff] }
 0x247   : > { %v2557_v56 = vsel %vm2556_vm15, %v7679_v21, %v2555_v3  ;;  %v2562_v37 = vsub.f32 1.0, %v2536_v38  ;;  %v2254_v8 = vmul.f32 %v7822_v54, %v7745_v19  ;;  %v2208_v16 = vadd.f32 %v2204_v15, %v2190_v36  ;;  %v9699_v36 = vld [vmem:[#allocation21_spill] sm:$0xff] }
 0x248   : > { %v2560_v53 = vsel %vm2558_vm0, %v2559_v55, %v2557_v56  ;;  %v2222_v42 = vmul.f32 %v2218_v1, %v2218_v1  ;;  %v7834_v45 = vmul.f32 %v7814_v62, %v2230_v46  ;;  %v7840_v10 = vadd.f32 %v2206_v20, %v2192_v35  ;;  %v9700_v1 = vld [vmem:[#allocation20_spill] sm:$0xff] }
 0x249   : > { %v2564_v34 = vsub.f32 1.0, %v2560_v53  ;;  %v2566_v39 = vmax.f32 %v2562_v37, 0.0  ;;  %v7838_v58 = vmul.f32 %v7822_v54, %v2254_v8  ;;  %v7842_v14 = vmul.f32 %v2220_v49, %v2220_v49 }
 0x24a   : > { %v7844_v21 = vadd.f32 %v2222_v42, %v2208_v16  ;;  %vm2262_vm4 = vcmp.eq.f32.partialorder %v7745_v19, 0.0 }
 0x24b   : > { %v2568_v43 = vmax.f32 %v2564_v34, 0.0  ;;  %v2570_v40 = vmul.f32 %v7581_v48, %v2566_v39  ;;  %v2574_v4 = vmul.f32 %v7585_v26, %v2566_v39  ;;  %v2578_v50 = vmul.f32 %v7589_v51, %v2566_v39 }
 0x24c   : > { %v2582_v18 = vmul.f32 %v7593_v59, %v2566_v39  ;;  %v2586_v55 = vmul.f32 %v7597_v47, %v2566_v39  ;;  %v2590_v31 = vmul.f32 %v7601_v32, %v2566_v39  ;;  %v2594_v0 = vmul.f32 %v7605_v57, %v2566_v39 }
 0x24d   : > { %v2572_v11 = vmul.f32 %v7609_v63, %v2568_v43  ;;  %v2576_v25 = vmul.f32 %v7613_v44, %v2568_v43  ;;  %v2580_v61 = vmul.f32 %v7617_v24, %v2568_v43  ;;  %v2584_v48 = vmul.f32 %v7621_v60, %v2568_v43 }
 0x24e   : > { %v2588_v26 = vmul.f32 %v9698_v22, %v2568_v43  ;;  %v2592_v51 = vmul.f32 %v9699_v36, %v2568_v43  ;;  %v2596_v59 = vmul.f32 %v9700_v1, %v2568_v43  ;;  %v2598_v47 = vmul.f32 %v9701_v28, %v2566_v39 }
 0x24f   : > { %v2600_v32 = vmul.f32 %v7641_v13, %v2568_v43  ;;  %v2608_v17 = vadd.f32 %v2572_v11, %v2570_v40  ;;  %v2622_v57 = vadd.f32 %v2576_v25, %v2574_v4  ;;  %v2636_v3 = vadd.f32 %v2580_v61, %v2578_v50 }
 0x250   : > { %v2650_v63 = vadd.f32 %v2584_v48, %v2582_v18  ;;  %v2664_v35 = vadd.f32 %v2588_v26, %v2586_v55  ;;  %v2678_v44 = vadd.f32 %v2592_v51, %v2590_v31  ;;  %v2692_v27 = vadd.f32 %v2596_v59, %v2594_v0 }
 0x251   : > { %v2609_v24 = vrot.slane %v2608_v17, 4  ;;  %v2623_v38 = vrot.slane %v2622_v57, 4  ;;  %v2637_v60 = vrot.slane %v2636_v3, 4  ;;  %v2706_v15 = vadd.f32 %v2600_v32, %v2598_v47 }
 0x252   : > { %v2651_v49 = vrot.slane %v2650_v63, 4  ;;  %v2665_v56 = vrot.slane %v2664_v35, 4  ;;  %v2679_v37 = vrot.slane %v2678_v44, 4  ;;  %v2693_v46 = vrot.slane %v2692_v27, 4 }
 0x253   : > { %v2610_v20 = vadd.f32 %v2609_v24, %v2608_v17  ;;  %v2624_v53 = vadd.f32 %v2623_v38, %v2622_v57  ;;  %v2638_v8 = vadd.f32 %v2637_v60, %v2636_v3  ;;  %v2707_v16 = vrot.slane %v2706_v15, 4 }
 0x254   : > { %v2652_v13 = vadd.f32 %v2651_v49, %v2650_v63  ;;  %v2666_v42 = vadd.f32 %v2665_v56, %v2664_v35  ;;  %v2680_v34 = vadd.f32 %v2679_v37, %v2678_v44  ;;  %v2694_v39 = vadd.f32 %v2693_v46, %v2692_v27 }
 0x255   : > { %v2611_v43 = vrot.slane %v2610_v20, 2  ;;  %v2625_v40 = vrot.slane %v2624_v53, 2  ;;  %v2639_v4 = vrot.slane %v2638_v8, 2  ;;  %v2708_v50 = vadd.f32 %v2707_v16, %v2706_v15 }
 0x256   : > { %v2653_v18 = vrot.slane %v2652_v13, 2  ;;  %v2667_v55 = vrot.slane %v2666_v42, 2  ;;  %v2681_v31 = vrot.slane %v2680_v34, 2  ;;  %v2695_v0 = vrot.slane %v2694_v39, 2 }
 0x257   : > { %v2612_v11 = vadd.f32 %v2611_v43, %v2610_v20  ;;  %v2626_v25 = vadd.f32 %v2625_v40, %v2624_v53  ;;  %v2640_v61 = vadd.f32 %v2639_v4, %v2638_v8  ;;  %v2709_v48 = vrot.slane %v2708_v50, 2 }
 0x258   : > { %v2654_v22 = vadd.f32 %v2653_v18, %v2652_v13  ;;  %v2668_v26 = vadd.f32 %v2667_v55, %v2666_v42  ;;  %v2682_v36 = vadd.f32 %v2681_v31, %v2680_v34  ;;  %v2696_v51 = vadd.f32 %v2695_v0, %v2694_v39 }
 0x259   : > { %v2613_v1 = vrot.slane %v2612_v11, 1  ;;  %v2627_v59 = vrot.slane %v2626_v25, 1  ;;  %v2641_v28 = vrot.slane %v2640_v61, 1  ;;  %v2710_v47 = vadd.f32 %v2709_v48, %v2708_v50 }
 0x25a   : > { %v2655_v32 = vrot.slane %v2654_v22, 1  ;;  %v2669_v17 = vrot.slane %v2668_v26, 1  ;;  %v2683_v57 = vrot.slane %v2682_v36, 1  ;;  %v2697_v3 = vrot.slane %v2696_v51, 1 }
 0x25b   : > { %v2614_v63 = vadd.f32 %v2613_v1, %v2612_v11  ;;  %v2628_v35 = vadd.f32 %v2627_v59, %v2626_v25  ;;  %v2642_v44 = vadd.f32 %v2641_v28, %v2640_v61  ;;  %v2711_v27 = vrot.slane %v2710_v47, 1 }
 0x25c   : > { %v2656_v24 = vadd.f32 %v2655_v32, %v2654_v22  ;;  %v2670_v38 = vadd.f32 %v2669_v17, %v2668_v26  ;;  %v2684_v60 = vadd.f32 %v2683_v57, %v2682_v36  ;;  %v2698_v15 = vadd.f32 %v2697_v3, %v2696_v51  ;;  %v9702_v57 = vld [vmem:[#allocation16_spill] sm:$0xff] }
 0x25d   : > { %v2712_v49 = vadd.f32 %v2711_v27, %v2710_v47  ;;  %v2736_v56 = vsel %vm734_vm7, %v2628_v35, %v2614_v63  ;;  %v2232_v37 = vmul.f32 0.5, %v7834_v45  ;;  %v2256_v46 = vmul.f32 0.5, %v7838_v58  ;;  %v9703_v63 = vld [vmem:[#allocation22_spill] sm:$0xff] }
 0x25e   : > { %v2737_v20 = vsel %vm736_vm9, %v2642_v44, %v2736_v56  ;;  %v7873_v53 = vadd.f32 %v7842_v14, %v7840_v10  ;;  %5358 = vrsqrt.f32 %v7844_v21  ;;  %v7877_v8 = vstv %s7862_s8  ;;  %v7949_v44 = vld [vmem:[%s5842_s13] sm:$0xff]  ;;  %s9148_s8 = sld [smem:[#allocation5 + $0x80]] }
 0x25f   : > { %v2738_v16 = vsel %vm738_vm10, %v2656_v24, %v2737_v20  ;;  %v2233_v13 = vsub.f32 1.5, %v2232_v37  ;;  %v2257_v42 = vsub.f32 1.5, %v2256_v46  ;;  %v1901_v45 = vsub.f32 %v7651_v52, %v7877_v8  ;;  %v7953_v24 = vld [vmem:[%s5842_s13 + $0x10] sm:$0xff]  ;;  %v7965_v37 = vld [vmem:[%s5842_s13 + $0x40] sm:$0xff] }
 0x260   : > { %v2739_v58 = vsel %vm740_vm11, %v2670_v38, %v2738_v16  ;;  %5360 = vrsqrt.f32 %v7873_v53  ;;  %v1903_v10 = vsub.f32 %v7661_v30, %v7877_v8  ;;  %v7893_v43 = vstv %s7864_s9  ;;  %v7969_v20 = vld [vmem:[%s5842_s13 + $0x50] sm:$0xff]  ;;  %s9151_s9 = sld [smem:[#allocation5 + $0x100]] }
 0x261   : > { %v2740_v14 = vsel %vm742_vm12, %v2684_v60, %v2739_v58  ;;  %v2234_v34 = vmul.f32 %v7814_v62, %v2233_v13  ;;  %v2258_v39 = vmul.f32 %v7822_v54, %v2257_v42  ;;  %v2263_v40 = vand.u32 2147483648, %v7745_v19  ;;  %v7957_v60 = vld [vmem:[%s5842_s13 + $0x20] sm:$0xff]  ;;  %9705 = vst [vmem:[#allocation23_spill] sm:$0xff] %v7969_v20 }
 0x262   : > { %v2741_v52 = vsel %vm744_vm13, %v2698_v15, %v2740_v14  ;;  %v1905_v18 = vmul.f32 %v1901_v45, %v1901_v45  ;;  %v1907_v54 = vmul.f32 %v1903_v10, %v1903_v10  ;;  %v1915_v55 = vsub.f32 %v7685_v41, %v7893_v43  ;;  %v7973_v13 = vld [vmem:[%s5842_s13 + $0x60] sm:$0xff]  ;;  %v7977_v45 = vld [vmem:[%s5842_s13 + $0x70] sm:$0xff] }
 0x263   : > { %v2742_v30 = vsel %vm746_vm14, %v2712_v49, %v2741_v52  ;;  %v2235_v4 = vmul.f32 %v2234_v34, %v7743_v7  ;;  %v2259_v50 = vmul.f32 %v2258_v39, %v7745_v19  ;;  %v1917_v31 = vsub.f32 %v7690_v2, %v7893_v43  ;;  %v7961_v49 = vld [vmem:[%s5842_s13 + $0x30] sm:$0xff]  ;;  %9706 = vst [vmem:[#allocation9_spill] sm:$0xff] %v7977_v45  ;;  %v7981_v10 = vld [vmem:[%s5842_s13 + $0x80] sm:$0xff] }
 0x264   : > { %v7902_v62 = vpop.eup %5358  ;;  %4800 = vmatpush.msra.mxu1 %v2742_v30  ;;  %5245 = vmatpush.msra.mxu3 %v2742_v30  ;;  %v1919_v48 = vmul.f32 %v1915_v55, %v1915_v55  ;;  %9704 = vst [vmem:[#allocation18_spill] sm:$0xff] %v7961_v49  ;;  %v7985_v34 = vld [vmem:[%s5842_s13 + $0x90] sm:$0xff]  ;;  %v7989_v52 = vld [vmem:[%s5842_s13 + $0xa0] sm:$0xff]  ;;  %vm2248_vm5 = vcmp.eq.f32.partialorder %v7844_v21, inf  ;;  %vm2250_vm6 = vcmp.eq.f32.partialorder %v7844_v21, 0.0  ;;  %vm2272_vm8 = vcmp.eq.f32.partialorder %v7873_v53, inf }
 0x265   : > { %v2237_v0 = vsel %vm2236_vm1, %v7743_v7, %v2235_v4  ;;  %v2261_v11 = vsel %vm2260_vm2, %v7745_v19, %v2259_v50  ;;  %v2242_v25 = vmul.f32 %v7902_v62, %v7844_v21  ;;  %v1921_v22 = vmul.f32 %v1917_v31, %v1917_v31  ;;  %9707 = vst [vmem:[#allocation11_spill] sm:$0xff] %v7985_v34  ;;  %v7993_v30 = vld [vmem:[%s5842_s13 + $0xb0] sm:$0xff]  ;;  %v7997_v50 = vld [vmem:[%s5842_s13 + $0xc0] sm:$0xff] }
 0x266   : > { %v7916_v61 = vpop.eup %5360  ;;  %v2240_v41 = vsel %vm2238_vm3, %v2239_v23, %v2237_v0  ;;  %v2264_v2 = vsel %vm2262_vm4, %v2263_v40, %v2261_v11  ;;  %v7927_v59 = vadd.f32 %v1919_v48, %v1905_v18  ;;  %v7932_v23 = vstv %s7887_s23  ;;  %9708 = vst [vmem:[#allocation10_spill] sm:$0xff] %v7993_v30  ;;  %v8005_v31 = vld [vmem:[%s5842_s13 + $0xe0] sm:$0xff]  ;;  %v8009_v11 = vld [vmem:[%s5842_s13 + $0xf0] sm:$0xff] }
 0x267   : > { %v2277_v26 = vsub.f32 1.0, %v2240_v41  ;;  %v2279_v36 = vsub.f32 1.0, %v2264_v2  ;;  %v2243_v51 = vmul.f32 %v7902_v62, %v2242_v25  ;;  %v2266_v1 = vmul.f32 %v7916_v61, %v7873_v53  ;;  %9710 = vst [vmem:[#allocation13_spill] sm:$0xff] %v8005_v31 }
 0x268   : > { %v7929_v7 = vadd.f32 %v1921_v22, %v1907_v54  ;;  %v7942_v3 = vsub.f32 %v9702_v57, %v7932_v23  ;;  %v7946_v35 = vsub.f32 %v9703_v63, %v7932_v23  ;;  %v8001_v54 = vld [vmem:[%s5842_s13 + $0xd0] sm:$0xff]  ;;  %vm2274_vm15 = vcmp.eq.f32.partialorder %v7873_v53, 0.0 }
 0x269   : > { %v2281_v19 = vmax.f32 %v2277_v26, 0.0  ;;  %v2283_v28 = vmax.f32 %v2279_v36, 0.0  ;;  %v7935_v32 = vmul.f32 0.5, %v2243_v51  ;;  %v7938_v17 = vmul.f32 %v7916_v61, %v2266_v1  ;;  %9709 = vst [vmem:[#allocation12_spill] sm:$0xff] %v8001_v54 }
 0x26b   : > { %v2285_v27 = vmul.f32 %v7949_v44, %v2281_v19  ;;  %v2287_v38 = vmul.f32 %v7953_v24, %v2283_v28  ;;  %v2289_v15 = vmul.f32 %v7957_v60, %v2281_v19  ;;  %v2291_v56 = vmul.f32 %v7961_v49, %v2283_v28 }
 0x26c   : > { %v2293_v46 = vmul.f32 %v7965_v37, %v2281_v19  ;;  %v2295_v16 = vmul.f32 %v7969_v20, %v2283_v28  ;;  %v2297_v42 = vmul.f32 %v7973_v13, %v2281_v19  ;;  %v2299_v58 = vmul.f32 %v7977_v45, %v2283_v28 }
 0x26d   : > { %v2301_v14 = vmul.f32 %v7981_v10, %v2281_v19  ;;  %v2303_v39 = vmul.f32 %v7985_v34, %v2283_v28  ;;  %v2305_v40 = vmul.f32 %v7989_v52, %v2281_v19  ;;  %v2307_v4 = vmul.f32 %v7993_v30, %v2283_v28 }
 0x26e   : > { %v2309_v18 = vmul.f32 %v7997_v50, %v2281_v19  ;;  %v2311_v55 = vmul.f32 %v8001_v54, %v2283_v28  ;;  %v2313_v0 = vmul.f32 %v8005_v31, %v2281_v19  ;;  %v2315_v25 = vmul.f32 %v8009_v11, %v2283_v28 }
 0x26f   : > { %v2317_v41 = vadd.f32 %v2287_v38, %v2285_v27  ;;  %v2331_v2 = vadd.f32 %v2291_v56, %v2289_v15  ;;  %v2345_v48 = vadd.f32 %v2295_v16, %v2293_v46  ;;  %v2359_v22 = vadd.f32 %v2299_v58, %v2297_v42 }
 0x270   : > { %v2373_v26 = vadd.f32 %v2303_v39, %v2301_v14  ;;  %v2387_v36 = vadd.f32 %v2307_v4, %v2305_v40  ;;  %v2401_v51 = vadd.f32 %v2311_v55, %v2309_v18  ;;  %v2415_v1 = vadd.f32 %v2315_v25, %v2313_v0 }
 0x271   : > { %v2318_v57 = vrot.slane %v2317_v41, 4  ;;  %v2332_v63 = vrot.slane %v2331_v2, 4  ;;  %v2346_v47 = vrot.slane %v2345_v48, 4  ;;  %v2360_v54 = vrot.slane %v2359_v22, 4 }
 0x272   : > { %v2374_v30 = vrot.slane %v2373_v26, 4  ;;  %v2388_v34 = vrot.slane %v2387_v36, 4  ;;  %v2402_v45 = vrot.slane %v2401_v51, 4  ;;  %v2416_v19 = vrot.slane %v2415_v1, 4 }
 0x273   : > { %v2319_v31 = vadd.f32 %v2318_v57, %v2317_v41  ;;  %v2333_v20 = vadd.f32 %v2332_v63, %v2331_v2  ;;  %v2347_v49 = vadd.f32 %v2346_v47, %v2345_v48  ;;  %v2361_v28 = vadd.f32 %v2360_v54, %v2359_v22 }
 0x274   : > { %v2375_v27 = vadd.f32 %v2374_v30, %v2373_v26  ;;  %v2389_v38 = vadd.f32 %v2388_v34, %v2387_v36  ;;  %v2403_v15 = vadd.f32 %v2402_v45, %v2401_v51  ;;  %v2417_v56 = vadd.f32 %v2416_v19, %v2415_v1 }
 0x275   : > { %v2320_v46 = vrot.slane %v2319_v31, 2  ;;  %v2334_v16 = vrot.slane %v2333_v20, 2  ;;  %v2348_v42 = vrot.slane %v2347_v49, 2  ;;  %v2362_v58 = vrot.slane %v2361_v28, 2 }
 0x276   : > { %v2376_v14 = vrot.slane %v2375_v27, 2  ;;  %v2390_v39 = vrot.slane %v2389_v38, 2  ;;  %v2404_v40 = vrot.slane %v2403_v15, 2  ;;  %v2418_v4 = vrot.slane %v2417_v56, 2 }
 0x277   : > { %v2321_v18 = vadd.f32 %v2320_v46, %v2319_v31  ;;  %v2335_v55 = vadd.f32 %v2334_v16, %v2333_v20  ;;  %v2349_v0 = vadd.f32 %v2348_v42, %v2347_v49  ;;  %v2363_v25 = vadd.f32 %v2362_v58, %v2361_v28 }
 0x278   : > { %v2377_v41 = vadd.f32 %v2376_v14, %v2375_v27  ;;  %v2391_v2 = vadd.f32 %v2390_v39, %v2389_v38  ;;  %v2405_v47 = vadd.f32 %v2404_v40, %v2403_v15  ;;  %v2419_v54 = vadd.f32 %v2418_v4, %v2417_v56 }
 0x279   : > { %v2322_v45 = vrot.slane %v2321_v18, 1  ;;  %v2336_v34 = vrot.slane %v2335_v55, 1  ;;  %v2350_v30 = vrot.slane %v2349_v0, 1  ;;  %v2364_v48 = vrot.slane %v2363_v25, 1 }
 0x27a   : > { %v2378_v22 = vrot.slane %v2377_v41, 1  ;;  %v2392_v26 = vrot.slane %v2391_v2, 1  ;;  %v2406_v36 = vrot.slane %v2405_v47, 1  ;;  %v2420_v51 = vrot.slane %v2419_v54, 1 }
 0x27b   : > { %v2323_v49 = vadd.f32 %v2322_v45, %v2321_v18  ;;  %v2337_v20 = vadd.f32 %v2336_v34, %v2335_v55  ;;  %v2351_v31 = vadd.f32 %v2350_v30, %v2349_v0  ;;  %v2365_v1 = vadd.f32 %v2364_v48, %v2363_v25 }
 0x27c   : > { %v2379_v57 = vadd.f32 %v2378_v22, %v2377_v41  ;;  %v2393_v63 = vadd.f32 %v2392_v26, %v2391_v2  ;;  %v2407_v19 = vadd.f32 %v2406_v36, %v2405_v47  ;;  %v2421_v28 = vadd.f32 %v2420_v51, %v2419_v54  ;;  %v8081_v36 = vld [vmem:[%s5842_s13 + $0x8] sm:$0xff] }
 0x27d   : > { %v2445_v27 = vsel %vm734_vm7, %v2337_v20, %v2323_v49  ;;  %v2245_v38 = vsub.f32 1.5, %v7935_v32  ;;  %v2268_v15 = vmul.f32 0.5, %v7938_v17  ;;  %v1937_v56 = vmul.f32 %v7942_v3, %v7942_v3  ;;  %v8085_v49 = vld [vmem:[%s5842_s13 + $0x28] sm:$0xff] }
 0x27e   : > { %v2446_v46 = vsel %vm736_vm9, %v2351_v31, %v2445_v27  ;;  %v1939_v16 = vmul.f32 %v7946_v35, %v7946_v35  ;;  %v1902_v42 = vsub.f32 %v7766_v33, %v7877_v8  ;;  %v1904_v58 = vsub.f32 %v7769_v12, %v7877_v8  ;;  %v8089_v31 = vld [vmem:[%s5842_s13 + $0x48] sm:$0xff] }
 0x27f   : > { %v2447_v14 = vsel %vm738_vm10, %v2365_v1, %v2446_v46  ;;  %v2246_v32 = vmul.f32 %v7902_v62, %v2245_v38  ;;  %v2269_v39 = vsub.f32 1.5, %v2268_v15  ;;  %v8030_v17 = vadd.f32 %v1937_v56, %v7927_v59  ;;  %v8105_v27 = vld [vmem:[%s5842_s13 + $0xc8] sm:$0xff]  ;;  %v8109_v15 = vld [vmem:[%s5842_s13 + $0x18] sm:$0xff] }
 0x280   : > { %v2448_v3 = vsel %vm740_vm11, %v2379_v57, %v2447_v14  ;;  %v2275_v35 = vand.u32 2147483648, %v7873_v53  ;;  %v8036_v40 = vadd.f32 %v1939_v16, %v7929_v7  ;;  %v1906_v59 = vmul.f32 %v1902_v42, %v1902_v42  ;;  %v8097_v57 = vld [vmem:[%s5842_s13 + $0x88] sm:$0xff]  ;;  %v8113_v46 = vld [vmem:[%s5842_s13 + $0x38] sm:$0xff] }
 0x281   : > { %v2449_v33 = vsel %vm742_vm12, %v2393_v63, %v2448_v3  ;;  %v2247_v12 = vmul.f32 %v2246_v32, %v7844_v21  ;;  %v2270_v8 = vmul.f32 %v7916_v61, %v2269_v39  ;;  %5362 = vrsqrt.f32 %v8030_v17  ;;  %v8117_v42 = vld [vmem:[%s5842_s13 + $0x58] sm:$0xff] }
 0x282   : > { %v2450_v62 = vsel %vm744_vm13, %v2407_v19, %v2449_v33  ;;  %v1916_v4 = vsub.f32 %v7779_v29, %v7893_v43  ;;  %v1918_v18 = vsub.f32 %v7784_v6, %v7893_v43  ;;  %v1908_v61 = vmul.f32 %v1904_v58, %v1904_v58  ;;  %v8101_v19 = vld [vmem:[%s5842_s13 + $0xa8] sm:$0xff]  ;;  %v8121_v14 = vld [vmem:[%s5842_s13 + $0x78] sm:$0xff] }
 0x283   : > { %v2451_v7 = vsel %vm746_vm14, %v2421_v28, %v2450_v62  ;;  %v2249_v55 = vsel %vm2248_vm5, %v7844_v21, %v2247_v12  ;;  %v2271_v0 = vmul.f32 %v2270_v8, %v7873_v53  ;;  %v9711_v25 = vand.u32 2147483648, %v7844_v21  ;;  %v8125_v39 = vld [vmem:[%s5842_s13 + $0x98] sm:$0xff]  ;;  %v8137_v62 = vld [vmem:[%s5842_s13 + $0xe8] sm:$0xff] }
 0x284   : > { %4778 = vmatpush.msra.mxu0 %v2451_v7  ;;  %5231 = vmatpush.msra.mxu2 %v2451_v7  ;;  %v1920_v29 = vmul.f32 %v1916_v4, %v1916_v4  ;;  %v1922_v2 = vmul.f32 %v1918_v18, %v1918_v18  ;;  %v1934_v47 = vsub.f32 %v7790_v9, %v7932_v23  ;;  %5364 = vrsqrt.f32 %v8036_v40  ;;  %v8133_v12 = vld [vmem:[%s5842_s13 + $0xd8] sm:$0xff] }
 0x285   : > { %v2252_v41 = vsel %vm2250_vm6, %v9711_v25, %v2249_v55  ;;  %v2273_v6 = vsel %vm2272_vm8, %v7873_v53, %v2271_v0  ;;  %v8076_v9 = vsub.f32 %v7803_v5, %v7932_v23  ;;  %v8093_v23 = vld [vmem:[%s5842_s13 + $0x68] sm:$0xff]  ;;  %9712 = vst [vmem:[#allocation14_spill] sm:$0xff] %v8125_v39  ;;  %v8141_v4 = vld [vmem:[%s5842_s13 + $0xf8] sm:$0xff]  ;;  %vm1952_vm0 = vcmp.eq.f32.partialorder %v8030_v17, inf }
 0x286   : > { %v2278_v43 = vsub.f32 1.0, %v2252_v41  ;;  %v2276_v54 = vsel %vm2274_vm15, %v2275_v35, %v2273_v6  ;;  %v8063_v45 = vadd.f32 %v1920_v29, %v1906_v59  ;;  %v8067_v48 = vadd.f32 %v1922_v2, %v1908_v61  ;;  %v8129_v35 = vld [vmem:[%s5842_s13 + $0xb8] sm:$0xff]  ;;  %9714 = vst [vmem:[#allocation15_spill] sm:$0xff] %v8133_v12 }
 0x287   : > { %v8065_v21 = vpop.eup %5362  ;;  %v2280_v34 = vsub.f32 1.0, %v2276_v54  ;;  %v8078_v53 = vmul.f32 %v1934_v47, %v1934_v47  ;;  %9713 = vst [vmem:[#allocation19_spill] sm:$0xff] %v8129_v35  ;;  %vm1954_vm1 = vcmp.eq.f32.partialorder %v8030_v17, 0.0  ;;  %vm1976_vm2 = vcmp.eq.f32.partialorder %v8036_v40, inf }
 0x288   : > { %v2282_v30 = vmax.f32 %v2278_v43, 0.0  ;;  %v8071_v22 = vmul.f32 %v8065_v21, %v8030_v17  ;;  %9715 = vst [vmem:[#allocation21_spill] sm:$0xff] %v8137_v62  ;;  %vm1978_vm3 = vcmp.eq.f32.partialorder %v8036_v40, 0.0 }
 0x289   : > { %v2284_v26 = vmax.f32 %v2280_v34, 0.0 }
 0x28a   : > { %v2286_v51 = vmul.f32 %v8081_v36, %v2282_v30  ;;  %v2290_v20 = vmul.f32 %v8085_v49, %v2282_v30  ;;  %v2294_v5 = vmul.f32 %v8089_v31, %v2282_v30  ;;  %v2298_v1 = vmul.f32 %v8093_v23, %v2282_v30  ;;  %v8144_v61 = vpop.eup %5364 }
 0x28b   : > { %v2302_v63 = vmul.f32 %v8097_v57, %v2282_v30  ;;  %v2306_v28 = vmul.f32 %v8101_v19, %v2282_v30  ;;  %v2310_v38 = vmul.f32 %v8105_v27, %v2282_v30  ;;  %v2288_v56 = vmul.f32 %v8109_v15, %v2284_v26 }
 0x28c   : > { %v2292_v16 = vmul.f32 %v8113_v46, %v2284_v26  ;;  %v2296_v58 = vmul.f32 %v8117_v42, %v2284_v26  ;;  %v2300_v32 = vmul.f32 %v8121_v14, %v2284_v26  ;;  %v2304_v3 = vmul.f32 %v8125_v39, %v2284_v26 }
 0x28d   : > { %v2308_v33 = vmul.f32 %v8129_v35, %v2284_v26  ;;  %v2312_v8 = vmul.f32 %v8133_v12, %v2284_v26  ;;  %v2314_v59 = vmul.f32 %v8137_v62, %v2282_v30  ;;  %v2316_v18 = vmul.f32 %v8141_v4, %v2284_v26 }
 0x28e   : > { %v2324_v7 = vadd.f32 %v2288_v56, %v2286_v51  ;;  %v2338_v55 = vadd.f32 %v2292_v16, %v2290_v20  ;;  %v2352_v0 = vadd.f32 %v2296_v58, %v2294_v5  ;;  %v2366_v25 = vadd.f32 %v2300_v32, %v2298_v1 }
 0x28f   : > { %v2380_v41 = vadd.f32 %v2304_v3, %v2302_v63  ;;  %v2394_v29 = vadd.f32 %v2308_v33, %v2306_v28  ;;  %v2408_v2 = vadd.f32 %v2312_v8, %v2310_v38  ;;  %v2422_v54 = vadd.f32 %v2316_v18, %v2314_v59 }
 0x290   : > { %v2325_v6 = vrot.slane %v2324_v7, 4  ;;  %v2339_v43 = vrot.slane %v2338_v55, 4  ;;  %v2353_v47 = vrot.slane %v2352_v0, 4  ;;  %v2367_v34 = vrot.slane %v2366_v25, 4 }
 0x291   : > { %v2381_v12 = vrot.slane %v2380_v41, 4  ;;  %v2395_v30 = vrot.slane %v2394_v29, 4  ;;  %v2409_v62 = vrot.slane %v2408_v2, 4  ;;  %v2423_v51 = vrot.slane %v2422_v54, 4 }
 0x292   : > { %v2326_v35 = vadd.f32 %v2325_v6, %v2324_v7  ;;  %v2340_v39 = vadd.f32 %v2339_v43, %v2338_v55  ;;  %v2354_v26 = vadd.f32 %v2353_v47, %v2352_v0  ;;  %v2368_v20 = vadd.f32 %v2367_v34, %v2366_v25 }
 0x293   : > { %v2382_v5 = vadd.f32 %v2381_v12, %v2380_v41  ;;  %v2396_v56 = vadd.f32 %v2395_v30, %v2394_v29  ;;  %v2410_v16 = vadd.f32 %v2409_v62, %v2408_v2  ;;  %v2424_v38 = vadd.f32 %v2423_v51, %v2422_v54 }
 0x294   : > { %v2327_v1 = vrot.slane %v2326_v35, 2  ;;  %v2341_v63 = vrot.slane %v2340_v39, 2  ;;  %v2355_v28 = vrot.slane %v2354_v26, 2  ;;  %v2369_v58 = vrot.slane %v2368_v20, 2 }
 0x295   : > { %v2383_v32 = vrot.slane %v2382_v5, 2  ;;  %v2397_v3 = vrot.slane %v2396_v56, 2  ;;  %v2411_v33 = vrot.slane %v2410_v16, 2  ;;  %v2425_v7 = vrot.slane %v2424_v38, 2 }
 0x296   : > { %v2328_v8 = vadd.f32 %v2327_v1, %v2326_v35  ;;  %v2342_v59 = vadd.f32 %v2341_v63, %v2340_v39  ;;  %v2356_v18 = vadd.f32 %v2355_v28, %v2354_v26  ;;  %v2370_v55 = vadd.f32 %v2369_v58, %v2368_v20 }
 0x297   : > { %v2384_v0 = vadd.f32 %v2383_v32, %v2382_v5  ;;  %v2398_v25 = vadd.f32 %v2397_v3, %v2396_v56  ;;  %v2412_v12 = vadd.f32 %v2411_v33, %v2410_v16  ;;  %v2426_v2 = vadd.f32 %v2425_v7, %v2424_v38  ;;  %v8151_v56 = vld [vmem:[%s5840_s12] sm:$0xff]  ;;  %v8161_v38 = vld [vmem:[%s5840_s12 + $0x10] sm:$0xff] }
 0x298   : > { %v2329_v41 = vrot.slane %v2328_v8, 1  ;;  %v2343_v62 = vrot.slane %v2342_v59, 1  ;;  %v2357_v29 = vrot.slane %v2356_v18, 1  ;;  %v2371_v6 = vrot.slane %v2370_v55, 1 }
 0x299   : > { %v2385_v43 = vrot.slane %v2384_v0, 1  ;;  %v2399_v47 = vrot.slane %v2398_v25, 1  ;;  %v2413_v54 = vrot.slane %v2412_v12, 1  ;;  %v2427_v30 = vrot.slane %v2426_v2, 1 }
 0x29a   : > { %v2330_v35 = vadd.f32 %v2329_v41, %v2328_v8  ;;  %v2344_v39 = vadd.f32 %v2343_v62, %v2342_v59  ;;  %v2358_v34 = vadd.f32 %v2357_v29, %v2356_v18  ;;  %v2372_v26 = vadd.f32 %v2371_v6, %v2370_v55 }
 0x29b   : > { %v2386_v51 = vadd.f32 %v2385_v43, %v2384_v0  ;;  %v2400_v20 = vadd.f32 %v2399_v47, %v2398_v25  ;;  %v2414_v5 = vadd.f32 %v2413_v54, %v2412_v12  ;;  %v2428_v16 = vadd.f32 %v2427_v30, %v2426_v2  ;;  %v8190_v12 = vld [vmem:[%s5840_s12 + $0x30] sm:$0xff]  ;;  %v8203_v47 = vld [vmem:[%s5840_s12 + $0x40] sm:$0xff] }
 0x29c   : > { %v2452_v1 = vsel %vm734_vm7, %v2344_v39, %v2330_v35  ;;  %v1947_v63 = vmul.f32 %v8065_v21, %v8071_v22  ;;  %v1970_v28 = vmul.f32 %v8144_v61, %v8036_v40  ;;  %v1940_v32 = vmul.f32 %v8076_v9, %v8076_v9  ;;  %9716 = vst [vmem:[#allocation20_spill] sm:$0xff] %v8203_v47 }
 0x29d   : > { %v2453_v58 = vsel %vm736_vm9, %v2358_v34, %v2452_v1  ;;  %v8168_v3 = vadd.f32 %v8078_v53, %v8063_v45  ;;  %v8171_v33 = vstv %s8146_s10  ;;  %v8185_v53 = vld [vmem:[%s5840_s12 + $0x20] sm:$0xff]  ;;  %v1955_v41 = vand.u32 2147483648, %v8030_v17 }
 0x29e   : > { %v2454_v8 = vsel %vm738_vm10, %v2372_v26, %v2453_v58  ;;  %v1948_v22 = vmul.f32 0.5, %v1947_v63  ;;  %v1971_v59 = vmul.f32 %v8144_v61, %v1970_v28  ;;  %v1617_v18 = vsub.f32 %v8151_v56, %v8171_v33 }
 0x29f   : > { %v2455_v7 = vsel %vm740_vm11, %v2386_v51, %v2454_v8  ;;  %v8179_v9 = vadd.f32 %v1940_v32, %v8067_v48  ;;  %5366 = vrsqrt.f32 %v8168_v3  ;;  %v1619_v45 = vsub.f32 %v8161_v38, %v8171_v33  ;;  %v8214_v51 = vld [vmem:[%s5840_s12 + $0x50] sm:$0xff] }
 0x2a0   : > { %v2456_v55 = vsel %vm742_vm12, %v2400_v20, %v2455_v7  ;;  %v1949_v0 = vsub.f32 1.5, %v1948_v22  ;;  %v1972_v25 = vmul.f32 0.5, %v1971_v59  ;;  %v8196_v62 = vstv %s8148_s11  ;;  %9717 = vst [vmem:[#allocation17_spill] sm:$0xff] %v8214_v51  ;;  %s5044_s11 = sshll.u32 %s5836_s29, 5 }
 0x2a1   : > { %v2457_v48 = vsel %vm744_vm13, %v2414_v5, %v2456_v55  ;;  %5368 = vrsqrt.f32 %v8179_v9  ;;  %v1631_v43 = vsub.f32 %v8185_v53, %v8196_v62  ;;  %v1621_v54 = vmul.f32 %v1617_v18, %v1617_v18  ;;  %s423_s29 = scalar_select %p422_p13, %s5713_s24, 1 }
 0x2a2   : > { %v2458_v29 = vsel %vm746_vm14, %v2428_v16, %v2457_v48  ;;  %v1950_v2 = vmul.f32 %v8065_v21, %v1949_v0  ;;  %v1973_v6 = vsub.f32 1.5, %v1972_v25  ;;  %v1623_v35 = vmul.f32 %v1619_v45, %v1619_v45 }
 0x2a3   : > { %4801 = vmatpush.msra.mxu1 %v2458_v29  ;;  %5246 = vmatpush.msra.mxu3 %v2458_v29  ;;  %v1633_v39 = vsub.f32 %v8190_v12, %v8196_v62  ;;  %v8208_v34 = vstv %s8153_s7  ;;  %v1635_v26 = vmul.f32 %v1631_v43, %v1631_v43  ;;  %v1979_v5 = vand.u32 2147483648, %v8036_v40  ;;  %s9443_s7 = scalar_lea.vmem [#allocation7], %s5044_s11 }
 0x2a4   : > { %v1951_v30 = vmul.f32 %v1950_v2, %v8030_v17  ;;  %v1974_v21 = vmul.f32 %v8144_v61, %v1973_v6  ;;  %v1649_v1 = vsub.f32 %v8203_v47, %v8208_v34  ;;  %v1651_v59 = vsub.f32 %v8214_v51, %v8208_v34 }
 0x2a5   : > { %v8216_v20 = vpop.eup %5366  ;;  %v1637_v16 = vmul.f32 %v1633_v39, %v1633_v39  ;;  %v1639_v8 = vadd.f32 %v1635_v26, %v1621_v54  ;;  %vm1964_vm4 = vcmp.eq.f32.partialorder %v8168_v3, inf  ;;  %vm1966_vm5 = vcmp.eq.f32.partialorder %v8168_v3, 0.0 }
 0x2a6   : > { %v1953_v63 = vsel %vm1952_vm0, %v8030_v17, %v1951_v30  ;;  %v1975_v28 = vmul.f32 %v1974_v21, %v8036_v40  ;;  %v1958_v61 = vmul.f32 %v8216_v20, %v8168_v3  ;;  %v1653_v0 = vmul.f32 %v1649_v1, %v1649_v1 }
 0x2a7   : > { %v8229_v58 = vpop.eup %5368  ;;  %v1956_v32 = vsel %vm1954_vm1, %v1955_v41, %v1953_v63  ;;  %v1641_v22 = vadd.f32 %v1637_v16, %v1623_v35  ;;  %v1655_v25 = vmul.f32 %v1651_v59, %v1651_v59  ;;  %v9718_v63 = vld [vmem:[#allocation18_spill] sm:$0xff]  ;;  %vm1988_vm6 = vcmp.eq.f32.partialorder %v8179_v9, inf }
 0x2a8   : > { %v1977_v18 = vsel %vm1976_vm2, %v8036_v40, %v1975_v28  ;;  %v1993_v7 = vsub.f32 1.0, %v1956_v32  ;;  %v1959_v17 = vmul.f32 %v8216_v20, %v1958_v61  ;;  %v1982_v45 = vmul.f32 %v8229_v58, %v8179_v9  ;;  %v9719_v61 = vld [vmem:[#allocation23_spill] sm:$0xff]  ;;  %v9722_v59 = vld [vmem:[#allocation10_spill] sm:$0xff] }
 0x2a9   : > { %v1980_v55 = vsel %vm1978_vm3, %v1979_v5, %v1977_v18  ;;  %v8243_v43 = vadd.f32 %v1653_v0, %v1639_v8  ;;  %v8245_v40 = vadd.f32 %v1655_v25, %v1641_v22  ;;  %v9720_v8 = vld [vmem:[#allocation9_spill] sm:$0xff]  ;;  %v9721_v22 = vld [vmem:[#allocation11_spill] sm:$0xff]  ;;  %v9723_v18 = vld [vmem:[#allocation12_spill] sm:$0xff]  ;;  %vm1990_vm8 = vcmp.eq.f32.partialorder %v8179_v9, 0.0 }
 0x2aa   : > { %v1995_v48 = vsub.f32 1.0, %v1980_v55  ;;  %v1997_v29 = vmax.f32 %v1993_v7, 0.0  ;;  %v8238_v2 = vmul.f32 0.5, %v1959_v17  ;;  %v8241_v6 = vmul.f32 %v8229_v58, %v1982_v45  ;;  %v9724_v7 = vld [vmem:[#allocation13_spill] sm:$0xff] }
 0x2ab   : > { %5370 = vrsqrt.f32 %v8243_v43  ;;  %vm1668_vm15 = vcmp.eq.f32.partialorder %v8243_v43, inf  ;;  %vm1692_vm0 = vcmp.eq.f32.partialorder %v8245_v40, inf  ;;  %vm1670_vm1 = vcmp.eq.f32.partialorder %v8243_v43, 0.0 }
 0x2ac   : > { %v1999_v54 = vmax.f32 %v1995_v48, 0.0  ;;  %v2001_v35 = vmul.f32 %v7949_v44, %v1997_v29  ;;  %v2005_v39 = vmul.f32 %v7957_v60, %v1997_v29  ;;  %v2009_v30 = vmul.f32 %v7965_v37, %v1997_v29 }
 0x2ad   : > { %v2013_v21 = vmul.f32 %v7973_v13, %v1997_v29  ;;  %v2017_v26 = vmul.f32 %v7981_v10, %v1997_v29  ;;  %v2021_v5 = vmul.f32 %v7989_v52, %v1997_v29  ;;  %v2025_v16 = vmul.f32 %v7997_v50, %v1997_v29 }
 0x2ae   : > { %v2003_v1 = vmul.f32 %v7953_v24, %v1999_v54  ;;  %v2007_v28 = vmul.f32 %v9718_v63, %v1999_v54  ;;  %v2011_v32 = vmul.f32 %v9719_v61, %v1999_v54  ;;  %v2015_v44 = vmul.f32 %v9720_v8, %v1999_v54 }
 0x2af   : > { %v2019_v60 = vmul.f32 %v9721_v22, %v1999_v54  ;;  %v2023_v37 = vmul.f32 %v9722_v59, %v1999_v54  ;;  %v2027_v13 = vmul.f32 %v9723_v18, %v1999_v54  ;;  %v2029_v10 = vmul.f32 %v9724_v7, %v1997_v29 }
 0x2b0   : > { %v2031_v52 = vmul.f32 %v8009_v11, %v1999_v54  ;;  %v2033_v17 = vadd.f32 %v2003_v1, %v2001_v35  ;;  %v2047_v50 = vadd.f32 %v2007_v28, %v2005_v39  ;;  %v2061_v45 = vadd.f32 %v2011_v32, %v2009_v30 }
 0x2b1   : > { %v2075_v24 = vadd.f32 %v2015_v44, %v2013_v21  ;;  %v2089_v55 = vadd.f32 %v2019_v60, %v2017_v26  ;;  %v2103_v0 = vadd.f32 %v2023_v37, %v2021_v5  ;;  %v2117_v25 = vadd.f32 %v2027_v13, %v2025_v16 }
 0x2b2   : > { %v2034_v48 = vrot.slane %v2033_v17, 4  ;;  %v2048_v63 = vrot.slane %v2047_v50, 4  ;;  %v2062_v61 = vrot.slane %v2061_v45, 4  ;;  %v2131_v8 = vadd.f32 %v2031_v52, %v2029_v10 }
 0x2b3   : > { %v2076_v22 = vrot.slane %v2075_v24, 4  ;;  %v2090_v41 = vrot.slane %v2089_v55, 4  ;;  %v2104_v59 = vrot.slane %v2103_v0, 4  ;;  %v2118_v51 = vrot.slane %v2117_v25, 4 }
 0x2b4   : > { %v2035_v18 = vadd.f32 %v2034_v48, %v2033_v17  ;;  %v2049_v47 = vadd.f32 %v2048_v63, %v2047_v50  ;;  %v2063_v29 = vadd.f32 %v2062_v61, %v2061_v45  ;;  %v2132_v7 = vrot.slane %v2131_v8, 4 }
 0x2b5   : > { %v2077_v11 = vadd.f32 %v2076_v22, %v2075_v24  ;;  %v2091_v54 = vadd.f32 %v2090_v41, %v2089_v55  ;;  %v2105_v35 = vadd.f32 %v2104_v59, %v2103_v0  ;;  %v2119_v39 = vadd.f32 %v2118_v51, %v2117_v25  ;;  %v8266_v55 = vld [vmem:[%s5840_s12 + $0x8] sm:$0xff]  ;;  %v8269_v0 = vld [vmem:[%s5840_s12 + $0x18] sm:$0xff] }
 0x2b6   : > { %v2036_v30 = vrot.slane %v2035_v18, 2  ;;  %v2050_v21 = vrot.slane %v2049_v47, 2  ;;  %v2064_v26 = vrot.slane %v2063_v29, 2  ;;  %v2133_v5 = vadd.f32 %v2132_v7, %v2131_v8 }
 0x2b7   : > { %v2078_v16 = vrot.slane %v2077_v11, 2  ;;  %v2092_v1 = vrot.slane %v2091_v54, 2  ;;  %v2106_v28 = vrot.slane %v2105_v35, 2  ;;  %v2120_v32 = vrot.slane %v2119_v39, 2 }
 0x2b8   : > { %v2037_v44 = vadd.f32 %v2036_v30, %v2035_v18  ;;  %v2051_v60 = vadd.f32 %v2050_v21, %v2049_v47  ;;  %v2065_v37 = vadd.f32 %v2064_v26, %v2063_v29  ;;  %v2134_v13 = vrot.slane %v2133_v5, 2  ;;  %v8279_v21 = vld [vmem:[%s5840_s12 + $0x28] sm:$0xff] }
 0x2b9   : > { %v2079_v10 = vadd.f32 %v2078_v16, %v2077_v11  ;;  %v2093_v52 = vadd.f32 %v2092_v1, %v2091_v54  ;;  %v2107_v17 = vadd.f32 %v2106_v28, %v2105_v35  ;;  %v2121_v41 = vadd.f32 %v2120_v32, %v2119_v39  ;;  %v8284_v1 = vld [vmem:[%s5840_s12 + $0x38] sm:$0xff] }
 0x2ba   : > { %v2038_v51 = vrot.slane %v2037_v44, 1  ;;  %v2052_v50 = vrot.slane %v2051_v60, 1  ;;  %v2066_v45 = vrot.slane %v2065_v37, 1  ;;  %v2135_v24 = vadd.f32 %v2134_v13, %v2133_v5 }
 0x2bb   : > { %v2080_v25 = vrot.slane %v2079_v10, 1  ;;  %v2094_v47 = vrot.slane %v2093_v52, 1  ;;  %v2108_v48 = vrot.slane %v2107_v17, 1  ;;  %v2122_v63 = vrot.slane %v2121_v41, 1 }
 0x2bc   : > { %v2039_v61 = vadd.f32 %v2038_v51, %v2037_v44  ;;  %v2053_v8 = vadd.f32 %v2052_v50, %v2051_v60  ;;  %v2067_v22 = vadd.f32 %v2066_v45, %v2065_v37  ;;  %v2136_v59 = vrot.slane %v2135_v24, 1 }
 0x2bd   : > { %v2081_v18 = vadd.f32 %v2080_v25, %v2079_v10  ;;  %v2095_v29 = vadd.f32 %v2094_v47, %v2093_v52  ;;  %v1618_v7 = vsub.f32 %v8266_v55, %v8171_v33  ;;  %v1620_v11 = vsub.f32 %v8269_v0, %v8171_v33  ;;  %v8303_v52 = vld [vmem:[%s5840_s12 + $0x58] sm:$0xff] }
 0x2be   : > { %v2109_v54 = vadd.f32 %v2108_v48, %v2107_v17  ;;  %v2161_v35 = vsel %vm734_vm7, %v2053_v8, %v2039_v61  ;;  %v1961_v39 = vsub.f32 1.5, %v8238_v2  ;;  %v1984_v30 = vmul.f32 0.5, %v8241_v6  ;;  %v8290_v2 = vld [vmem:[%s5840_s12 + $0x48] sm:$0xff] }
 0x2bf   : > { %v2123_v26 = vadd.f32 %v2122_v63, %v2121_v41  ;;  %v2137_v5 = vadd.f32 %v2136_v59, %v2135_v24  ;;  %v2162_v16 = vsel %vm736_vm9, %v2067_v22, %v2161_v35  ;;  %5372 = vrsqrt.f32 %v8245_v40 }
 0x2c0   : > { %v2163_v33 = vsel %vm738_vm10, %v2081_v18, %v2162_v16  ;;  %v1962_v28 = vmul.f32 %v8216_v20, %v1961_v39  ;;  %v1985_v32 = vsub.f32 1.5, %v1984_v30  ;;  %v1991_v44 = vand.u32 2147483648, %v8179_v9 }
 0x2c1   : > { %v2164_v6 = vsel %vm740_vm11, %v2095_v29, %v2163_v33  ;;  %v1632_v60 = vsub.f32 %v8279_v21, %v8196_v62  ;;  %v1634_v10 = vsub.f32 %v8284_v1, %v8196_v62  ;;  %v1622_v41 = vmul.f32 %v1618_v7, %v1618_v7  ;;  %v8314_v62 = vpop.eup %5370 }
 0x2c2   : > { %v2165_v37 = vsel %vm742_vm12, %v2109_v54, %v2164_v6  ;;  %v1963_v13 = vmul.f32 %v1962_v28, %v8168_v3  ;;  %v1986_v20 = vmul.f32 %v8229_v58, %v1985_v32  ;;  %v1650_v51 = vsub.f32 %v8290_v2, %v8208_v34 }
 0x2c3   : > { %v2166_v17 = vsel %vm744_vm13, %v2123_v26, %v2165_v37  ;;  %v1624_v24 = vmul.f32 %v1620_v11, %v1620_v11  ;;  %v9725_v25 = vand.u32 2147483648, %v8168_v3  ;;  %v1636_v48 = vmul.f32 %v1632_v60, %v1632_v60 }
 0x2c4   : > { %v2167_v50 = vsel %vm746_vm14, %v2137_v5, %v2166_v17  ;;  %v1965_v45 = vsel %vm1964_vm4, %v8168_v3, %v1963_v13  ;;  %v1987_v58 = vmul.f32 %v1986_v20, %v8179_v9  ;;  %v1652_v63 = vsub.f32 %v8303_v52, %v8208_v34  ;;  %v9726_v17 = vld [vmem:[#allocation14_spill] sm:$0xff] }
 0x2c5   : > { %4779 = vmatpush.msra.mxu0 %v2167_v50  ;;  %v1968_v47 = vsel %vm1966_vm5, %v9725_v25, %v1965_v45  ;;  %5232 = vmatpush.msra.mxu2 %v2167_v50  ;;  %v8322_v61 = vpop.eup %5372  ;;  %v1662_v59 = vmul.f32 %v8314_v62, %v8243_v43  ;;  %v1638_v18 = vmul.f32 %v1634_v10, %v1634_v10  ;;  %v1671_v39 = vand.u32 2147483648, %v8243_v43  ;;  %v9729_v50 = vld [vmem:[#allocation21_spill] sm:$0xff] }
 0x2c6   : > { %v1989_v8 = vsel %vm1988_vm6, %v8179_v9, %v1987_v58  ;;  %v1994_v22 = vsub.f32 1.0, %v1968_v47  ;;  %v1686_v29 = vmul.f32 %v8322_v61, %v8245_v40  ;;  %v1640_v7 = vadd.f32 %v1636_v48, %v1622_v41  ;;  %v9727_v41 = vld [vmem:[#allocation19_spill] sm:$0xff] }
 0x2c7   : > { %v1992_v3 = vsel %vm1990_vm8, %v1991_v44, %v1989_v8  ;;  %v1654_v11 = vmul.f32 %v1650_v51, %v1650_v51  ;;  %v8334_v35 = vmul.f32 %v8314_v62, %v1662_v59  ;;  %v8340_v26 = vadd.f32 %v1638_v18, %v1624_v24  ;;  %v9728_v51 = vld [vmem:[#allocation15_spill] sm:$0xff] }
 0x2c8   : > { %v1996_v34 = vsub.f32 1.0, %v1992_v3  ;;  %v1998_v54 = vmax.f32 %v1994_v22, 0.0  ;;  %v8338_v30 = vmul.f32 %v8322_v61, %v1686_v29  ;;  %v8342_v5 = vmul.f32 %v1652_v63, %v1652_v63 }
 0x2c9   : > { %v8344_v9 = vadd.f32 %v1654_v11, %v1640_v7  ;;  %vm1694_vm2 = vcmp.eq.f32.partialorder %v8245_v40, 0.0 }
 0x2ca   : > { %v2000_v16 = vmax.f32 %v1996_v34, 0.0  ;;  %v2002_v33 = vmul.f32 %v8081_v36, %v1998_v54  ;;  %v2006_v28 = vmul.f32 %v8085_v49, %v1998_v54  ;;  %v2010_v32 = vmul.f32 %v8089_v31, %v1998_v54 }
 0x2cb   : > { %v2014_v6 = vmul.f32 %v8093_v23, %v1998_v54  ;;  %v2018_v44 = vmul.f32 %v8097_v57, %v1998_v54  ;;  %v2022_v60 = vmul.f32 %v8101_v19, %v1998_v54  ;;  %v2026_v37 = vmul.f32 %v8105_v27, %v1998_v54 }
 0x2cc   : > { %v2004_v13 = vmul.f32 %v8109_v15, %v2000_v16  ;;  %v2008_v20 = vmul.f32 %v8113_v46, %v2000_v16  ;;  %v2012_v10 = vmul.f32 %v8117_v42, %v2000_v16  ;;  %v2016_v36 = vmul.f32 %v8121_v14, %v2000_v16 }
 0x2cd   : > { %v2020_v49 = vmul.f32 %v9726_v17, %v2000_v16  ;;  %v2024_v31 = vmul.f32 %v9727_v41, %v2000_v16  ;;  %v2028_v23 = vmul.f32 %v9728_v51, %v2000_v16  ;;  %v2030_v57 = vmul.f32 %v9729_v50, %v1998_v54 }
 0x2ce   : > { %v2032_v19 = vmul.f32 %v8141_v4, %v2000_v16  ;;  %v2040_v45 = vadd.f32 %v2004_v13, %v2002_v33  ;;  %v2054_v27 = vadd.f32 %v2008_v20, %v2006_v28  ;;  %v2068_v58 = vadd.f32 %v2012_v10, %v2010_v32 }
 0x2cf   : > { %v2082_v15 = vadd.f32 %v2016_v36, %v2014_v6  ;;  %v2096_v24 = vadd.f32 %v2020_v49, %v2018_v44  ;;  %v2110_v46 = vadd.f32 %v2024_v31, %v2022_v60  ;;  %v2124_v25 = vadd.f32 %v2028_v23, %v2026_v37 }
 0x2d0   : > { %v2041_v42 = vrot.slane %v2040_v45, 4  ;;  %v2055_v47 = vrot.slane %v2054_v27, 4  ;;  %v2069_v14 = vrot.slane %v2068_v58, 4  ;;  %v2138_v48 = vadd.f32 %v2032_v19, %v2030_v57 }
 0x2d1   : > { %v2083_v63 = vrot.slane %v2082_v15, 4  ;;  %v2097_v8 = vrot.slane %v2096_v24, 4  ;;  %v2111_v22 = vrot.slane %v2110_v46, 4  ;;  %v2125_v59 = vrot.slane %v2124_v25, 4 }
 0x2d2   : > { %v2042_v18 = vadd.f32 %v2041_v42, %v2040_v45  ;;  %v2056_v3 = vadd.f32 %v2055_v47, %v2054_v27  ;;  %v2070_v29 = vadd.f32 %v2069_v14, %v2068_v58  ;;  %v2139_v7 = vrot.slane %v2138_v48, 4 }
 0x2d3   : > { %v2084_v4 = vadd.f32 %v2083_v63, %v2082_v15  ;;  %v2098_v11 = vadd.f32 %v2097_v8, %v2096_v24  ;;  %v2112_v34 = vadd.f32 %v2111_v22, %v2110_v46  ;;  %v2126_v54 = vadd.f32 %v2125_v59, %v2124_v25 }
 0x2d4   : > { %v2043_v16 = vrot.slane %v2042_v18, 2  ;;  %v2057_v33 = vrot.slane %v2056_v3, 2  ;;  %v2071_v28 = vrot.slane %v2070_v29, 2  ;;  %v2140_v32 = vadd.f32 %v2139_v7, %v2138_v48 }
 0x2d5   : > { %v2085_v6 = vrot.slane %v2084_v4, 2  ;;  %v2099_v44 = vrot.slane %v2098_v11, 2  ;;  %v2113_v60 = vrot.slane %v2112_v34, 2  ;;  %v2127_v37 = vrot.slane %v2126_v54, 2 }
 0x2d6   : > { %v2044_v13 = vadd.f32 %v2043_v16, %v2042_v18  ;;  %v2058_v20 = vadd.f32 %v2057_v33, %v2056_v3  ;;  %v2072_v10 = vadd.f32 %v2071_v28, %v2070_v29  ;;  %v2141_v36 = vrot.slane %v2140_v32, 2 }
 0x2d7   : > { %v2086_v17 = vadd.f32 %v2085_v6, %v2084_v4  ;;  %v2100_v49 = vadd.f32 %v2099_v44, %v2098_v11  ;;  %v2114_v41 = vadd.f32 %v2113_v60, %v2112_v34  ;;  %v2128_v31 = vadd.f32 %v2127_v37, %v2126_v54 }
 0x2d8   : > { %v2045_v51 = vrot.slane %v2044_v13, 1  ;;  %v2059_v23 = vrot.slane %v2058_v20, 1  ;;  %v2073_v50 = vrot.slane %v2072_v10, 1  ;;  %v2142_v57 = vadd.f32 %v2141_v36, %v2140_v32 }
 0x2d9   : > { %v2087_v19 = vrot.slane %v2086_v17, 1  ;;  %v2101_v45 = vrot.slane %v2100_v49, 1  ;;  %v2115_v27 = vrot.slane %v2114_v41, 1  ;;  %v2129_v58 = vrot.slane %v2128_v31, 1 }
 0x2da   : > { %v2046_v15 = vadd.f32 %v2045_v51, %v2044_v13  ;;  %v2060_v24 = vadd.f32 %v2059_v23, %v2058_v20  ;;  %v2074_v46 = vadd.f32 %v2073_v50, %v2072_v10  ;;  %v2143_v25 = vrot.slane %v2142_v57, 1 }
 0x2db   : > { %v2088_v42 = vadd.f32 %v2087_v19, %v2086_v17  ;;  %v2102_v47 = vadd.f32 %v2101_v45, %v2100_v49  ;;  %v2116_v14 = vadd.f32 %v2115_v27, %v2114_v41  ;;  %v2130_v48 = vadd.f32 %v2129_v58, %v2128_v31  ;;  %v9730_v27 = vld [vmem:[#allocation20_spill] sm:$0xff] }
 0x2dc   : > { %v2144_v63 = vadd.f32 %v2143_v25, %v2142_v57  ;;  %v2168_v8 = vsel %vm734_vm7, %v2060_v24, %v2046_v15  ;;  %v1664_v22 = vmul.f32 0.5, %v8334_v35  ;;  %v1688_v59 = vmul.f32 0.5, %v8338_v30  ;;  %v9731_v15 = vld [vmem:[#allocation17_spill] sm:$0xff] }
 0x2dd   : > { %v2169_v18 = vsel %vm736_vm9, %v2074_v46, %v2168_v8  ;;  %v8373_v3 = vadd.f32 %v8342_v5, %v8340_v26  ;;  %5374 = vrsqrt.f32 %v8344_v9  ;;  %v8377_v29 = vstv %s8362_s21  ;;  %v8449_v46 = vld [vmem:[%s5842_s13] sm:$0xff]  ;;  %s5220_s21 = sshll.u32 %s423_s29, 4 }
 0x2de   : > { %v2170_v7 = vsel %vm738_vm10, %v2088_v42, %v2169_v18  ;;  %v1665_v4 = vsub.f32 1.5, %v1664_v22  ;;  %v1689_v11 = vsub.f32 1.5, %v1688_v59  ;;  %v1333_v35 = vsub.f32 %v8151_v56, %v8377_v29  ;;  %v8453_v42 = vld [vmem:[%s5842_s13 + $0x10] sm:$0xff]  ;;  %v8465_v22 = vld [vmem:[%s5842_s13 + $0x40] sm:$0xff] }
 0x2df   : > { %v2171_v30 = vsel %vm740_vm11, %v2102_v47, %v2170_v7  ;;  %5376 = vrsqrt.f32 %v8373_v3  ;;  %v1335_v26 = vsub.f32 %v8161_v38, %v8377_v29  ;;  %v8393_v16 = vstv %s8364_s14  ;;  %v8469_v18 = vld [vmem:[%s5842_s13 + $0x50] sm:$0xff] }
 0x2e0   : > { %v2172_v5 = vsel %vm742_vm12, %v2116_v14, %v2171_v30  ;;  %v1666_v34 = vmul.f32 %v8314_v62, %v1665_v4  ;;  %v1690_v54 = vmul.f32 %v8322_v61, %v1689_v11  ;;  %v1695_v33 = vand.u32 2147483648, %v8245_v40  ;;  %v8457_v14 = vld [vmem:[%s5842_s13 + $0x20] sm:$0xff]  ;;  %9733 = vst [vmem:[#allocation22_spill] sm:$0xff] %v8469_v18 }
 0x2e1   : > { %v2173_v56 = vsel %vm744_vm13, %v2130_v48, %v2172_v5  ;;  %v1337_v6 = vmul.f32 %v1333_v35, %v1333_v35  ;;  %v1339_v61 = vmul.f32 %v1335_v26, %v1335_v26  ;;  %v1347_v44 = vsub.f32 %v8185_v53, %v8393_v16  ;;  %v8473_v4 = vld [vmem:[%s5842_s13 + $0x60] sm:$0xff]  ;;  %v8477_v35 = vld [vmem:[%s5842_s13 + $0x70] sm:$0xff] }
 0x2e2   : > { %v2174_v38 = vsel %vm746_vm14, %v2144_v63, %v2173_v56  ;;  %v1667_v28 = vmul.f32 %v1666_v34, %v8243_v43  ;;  %v1691_v32 = vmul.f32 %v1690_v54, %v8245_v40  ;;  %v1349_v60 = vsub.f32 %v8190_v12, %v8393_v16  ;;  %v8461_v63 = vld [vmem:[%s5842_s13 + $0x30] sm:$0xff]  ;;  %9734 = vst [vmem:[#allocation18_spill] sm:$0xff] %v8477_v35  ;;  %v8481_v26 = vld [vmem:[%s5842_s13 + $0x80] sm:$0xff] }
 0x2e3   : > { %v8402_v62 = vpop.eup %5374  ;;  %4802 = vmatpush.msra.mxu1 %v2174_v38  ;;  %5247 = vmatpush.msra.mxu3 %v2174_v38  ;;  %v1351_v36 = vmul.f32 %v1347_v44, %v1347_v44  ;;  %9732 = vst [vmem:[#allocation16_spill] sm:$0xff] %v8461_v63  ;;  %v8485_v34 = vld [vmem:[%s5842_s13 + $0x90] sm:$0xff]  ;;  %v8489_v56 = vld [vmem:[%s5842_s13 + $0xa0] sm:$0xff]  ;;  %vm1680_vm3 = vcmp.eq.f32.partialorder %v8344_v9, inf  ;;  %vm1682_vm4 = vcmp.eq.f32.partialorder %v8344_v9, 0.0  ;;  %vm1704_vm5 = vcmp.eq.f32.partialorder %v8373_v3, inf }
 0x2e4   : > { %v1669_v37 = vsel %vm1668_vm15, %v8243_v43, %v1667_v28  ;;  %v1693_v13 = vsel %vm1692_vm0, %v8245_v40, %v1691_v32  ;;  %v1674_v20 = vmul.f32 %v8402_v62, %v8344_v9  ;;  %v1353_v17 = vmul.f32 %v1349_v60, %v1349_v60  ;;  %9735 = vst [vmem:[#allocation23_spill] sm:$0xff] %v8485_v34  ;;  %v8493_v38 = vld [vmem:[%s5842_s13 + $0xb0] sm:$0xff]  ;;  %v8497_v32 = vld [vmem:[%s5842_s13 + $0xc0] sm:$0xff] }
 0x2e5   : > { %v8416_v10 = vpop.eup %5376  ;;  %v1672_v53 = vsel %vm1670_vm1, %v1671_v39, %v1669_v37  ;;  %v1696_v12 = vsel %vm1694_vm2, %v1695_v33, %v1693_v13  ;;  %v8427_v23 = vadd.f32 %v1351_v36, %v1337_v6  ;;  %v8432_v39 = vstv %s8387_s15  ;;  %9736 = vst [vmem:[#allocation9_spill] sm:$0xff] %v8493_v38  ;;  %v8505_v60 = vld [vmem:[%s5842_s13 + $0xe0] sm:$0xff]  ;;  %v8509_v13 = vld [vmem:[%s5842_s13 + $0xf0] sm:$0xff] }
 0x2e6   : > { %v1709_v49 = vsub.f32 1.0, %v1672_v53  ;;  %v1711_v41 = vsub.f32 1.0, %v1696_v12  ;;  %v1675_v31 = vmul.f32 %v8402_v62, %v1674_v20  ;;  %v1698_v51 = vmul.f32 %v8416_v10, %v8373_v3  ;;  %9738 = vst [vmem:[#allocation10_spill] sm:$0xff] %v8505_v60 }
 0x2e7   : > { %v8429_v43 = vadd.f32 %v1353_v17, %v1339_v61  ;;  %v8442_v58 = vsub.f32 %v9730_v27, %v8432_v39  ;;  %v8446_v24 = vsub.f32 %v9731_v15, %v8432_v39  ;;  %v8501_v61 = vld [vmem:[%s5842_s13 + $0xd0] sm:$0xff]  ;;  %vm1706_vm6 = vcmp.eq.f32.partialorder %v8373_v3, 0.0 }
 0x2e8   : > { %v1713_v40 = vmax.f32 %v1709_v49, 0.0  ;;  %v1715_v50 = vmax.f32 %v1711_v41, 0.0  ;;  %v8435_v19 = vmul.f32 0.5, %v1675_v31  ;;  %v8438_v45 = vmul.f32 %v8416_v10, %v1698_v51  ;;  %9737 = vst [vmem:[#allocation11_spill] sm:$0xff] %v8501_v61 }
 0x2ea   : > { %v1717_v25 = vmul.f32 %v8449_v46, %v1713_v40  ;;  %v1719_v47 = vmul.f32 %v8453_v42, %v1715_v50  ;;  %v1721_v48 = vmul.f32 %v8457_v14, %v1713_v40  ;;  %v1723_v8 = vmul.f32 %v8461_v63, %v1715_v50 }
 0x2eb   : > { %v1725_v59 = vmul.f32 %v8465_v22, %v1713_v40  ;;  %v1727_v7 = vmul.f32 %v8469_v18, %v1715_v50  ;;  %v1729_v11 = vmul.f32 %v8473_v4, %v1713_v40  ;;  %v1731_v30 = vmul.f32 %v8477_v35, %v1715_v50 }
 0x2ec   : > { %v1733_v5 = vmul.f32 %v8481_v26, %v1713_v40  ;;  %v1735_v54 = vmul.f32 %v8485_v34, %v1715_v50  ;;  %v1737_v33 = vmul.f32 %v8489_v56, %v1713_v40  ;;  %v1739_v28 = vmul.f32 %v8493_v38, %v1715_v50 }
 0x2ed   : > { %v1741_v6 = vmul.f32 %v8497_v32, %v1713_v40  ;;  %v1743_v44 = vmul.f32 %v8501_v61, %v1715_v50  ;;  %v1745_v37 = vmul.f32 %v8505_v60, %v1713_v40  ;;  %v1747_v20 = vmul.f32 %v8509_v13, %v1715_v50 }
 0x2ee   : > { %v1749_v53 = vadd.f32 %v1719_v47, %v1717_v25  ;;  %v1763_v12 = vadd.f32 %v1723_v8, %v1721_v48  ;;  %v1777_v36 = vadd.f32 %v1727_v7, %v1725_v59  ;;  %v1791_v17 = vadd.f32 %v1731_v30, %v1729_v11 }
 0x2ef   : > { %v1805_v49 = vadd.f32 %v1735_v54, %v1733_v5  ;;  %v1819_v41 = vadd.f32 %v1739_v28, %v1737_v33  ;;  %v1833_v31 = vadd.f32 %v1743_v44, %v1741_v6  ;;  %v1847_v51 = vadd.f32 %v1747_v20, %v1745_v37 }
 0x2f0   : > { %v1750_v27 = vrot.slane %v1749_v53, 4  ;;  %v1764_v15 = vrot.slane %v1763_v12, 4  ;;  %v1778_v57 = vrot.slane %v1777_v36, 4  ;;  %v1792_v61 = vrot.slane %v1791_v17, 4 }
 0x2f1   : > { %v1806_v38 = vrot.slane %v1805_v49, 4  ;;  %v1820_v34 = vrot.slane %v1819_v41, 4  ;;  %v1834_v35 = vrot.slane %v1833_v31, 4  ;;  %v1848_v40 = vrot.slane %v1847_v51, 4 }
 0x2f2   : > { %v1751_v60 = vadd.f32 %v1750_v27, %v1749_v53  ;;  %v1765_v18 = vadd.f32 %v1764_v15, %v1763_v12  ;;  %v1779_v63 = vadd.f32 %v1778_v57, %v1777_v36  ;;  %v1793_v50 = vadd.f32 %v1792_v61, %v1791_v17 }
 0x2f3   : > { %v1807_v25 = vadd.f32 %v1806_v38, %v1805_v49  ;;  %v1821_v47 = vadd.f32 %v1820_v34, %v1819_v41  ;;  %v1835_v48 = vadd.f32 %v1834_v35, %v1833_v31  ;;  %v1849_v8 = vadd.f32 %v1848_v40, %v1847_v51 }
 0x2f4   : > { %v1752_v59 = vrot.slane %v1751_v60, 2  ;;  %v1766_v7 = vrot.slane %v1765_v18, 2  ;;  %v1780_v11 = vrot.slane %v1779_v63, 2  ;;  %v1794_v30 = vrot.slane %v1793_v50, 2 }
 0x2f5   : > { %v1808_v5 = vrot.slane %v1807_v25, 2  ;;  %v1822_v54 = vrot.slane %v1821_v47, 2  ;;  %v1836_v33 = vrot.slane %v1835_v48, 2  ;;  %v1850_v28 = vrot.slane %v1849_v8, 2 }
 0x2f6   : > { %v1753_v6 = vadd.f32 %v1752_v59, %v1751_v60  ;;  %v1767_v44 = vadd.f32 %v1766_v7, %v1765_v18  ;;  %v1781_v37 = vadd.f32 %v1780_v11, %v1779_v63  ;;  %v1795_v20 = vadd.f32 %v1794_v30, %v1793_v50 }
 0x2f7   : > { %v1809_v53 = vadd.f32 %v1808_v5, %v1807_v25  ;;  %v1823_v12 = vadd.f32 %v1822_v54, %v1821_v47  ;;  %v1837_v57 = vadd.f32 %v1836_v33, %v1835_v48  ;;  %v1851_v61 = vadd.f32 %v1850_v28, %v1849_v8 }
 0x2f8   : > { %v1754_v35 = vrot.slane %v1753_v6, 1  ;;  %v1768_v34 = vrot.slane %v1767_v44, 1  ;;  %v1782_v38 = vrot.slane %v1781_v37, 1  ;;  %v1796_v36 = vrot.slane %v1795_v20, 1 }
 0x2f9   : > { %v1810_v17 = vrot.slane %v1809_v53, 1  ;;  %v1824_v49 = vrot.slane %v1823_v12, 1  ;;  %v1838_v41 = vrot.slane %v1837_v57, 1  ;;  %v1852_v31 = vrot.slane %v1851_v61, 1 }
 0x2fa   : > { %v1755_v63 = vadd.f32 %v1754_v35, %v1753_v6  ;;  %v1769_v18 = vadd.f32 %v1768_v34, %v1767_v44  ;;  %v1783_v60 = vadd.f32 %v1782_v38, %v1781_v37  ;;  %v1797_v51 = vadd.f32 %v1796_v36, %v1795_v20 }
 0x2fb   : > { %v1811_v27 = vadd.f32 %v1810_v17, %v1809_v53  ;;  %v1825_v15 = vadd.f32 %v1824_v49, %v1823_v12  ;;  %v1839_v40 = vadd.f32 %v1838_v41, %v1837_v57  ;;  %v1853_v50 = vadd.f32 %v1852_v31, %v1851_v61  ;;  %v8581_v41 = vld [vmem:[%s5842_s13 + $0x8] sm:$0xff] }
 0x2fc   : > { %v1877_v25 = vsel %vm734_vm7, %v1769_v18, %v1755_v63  ;;  %v1677_v47 = vsub.f32 1.5, %v8435_v19  ;;  %v1700_v48 = vmul.f32 0.5, %v8438_v45  ;;  %v1369_v8 = vmul.f32 %v8442_v58, %v8442_v58  ;;  %v8585_v63 = vld [vmem:[%s5842_s13 + $0x28] sm:$0xff] }
 0x2fd   : > { %v1878_v59 = vsel %vm736_vm9, %v1783_v60, %v1877_v25  ;;  %v1371_v7 = vmul.f32 %v8446_v24, %v8446_v24  ;;  %v1334_v11 = vsub.f32 %v8266_v55, %v8377_v29  ;;  %v1336_v30 = vsub.f32 %v8269_v0, %v8377_v29  ;;  %v8589_v60 = vld [vmem:[%s5842_s13 + $0x48] sm:$0xff] }
 0x2fe   : > { %v1879_v5 = vsel %vm738_vm10, %v1797_v51, %v1878_v59  ;;  %v1678_v19 = vmul.f32 %v8402_v62, %v1677_v47  ;;  %v1701_v54 = vsub.f32 1.5, %v1700_v48  ;;  %v8530_v45 = vadd.f32 %v1369_v8, %v8427_v23  ;;  %v8605_v25 = vld [vmem:[%s5842_s13 + $0xc8] sm:$0xff]  ;;  %v8609_v48 = vld [vmem:[%s5842_s13 + $0x18] sm:$0xff] }
 0x2ff   : > { %v1880_v58 = vsel %vm740_vm11, %v1811_v27, %v1879_v5  ;;  %v1707_v24 = vand.u32 2147483648, %v8373_v3  ;;  %v8536_v33 = vadd.f32 %v1371_v7, %v8429_v43  ;;  %v1338_v23 = vmul.f32 %v1334_v11, %v1334_v11  ;;  %v8597_v27 = vld [vmem:[%s5842_s13 + $0x88] sm:$0xff]  ;;  %v8613_v59 = vld [vmem:[%s5842_s13 + $0x38] sm:$0xff] }
 0x300   : > { %v1881_v55 = vsel %vm742_vm12, %v1825_v15, %v1880_v58  ;;  %v1679_v0 = vmul.f32 %v1678_v19, %v8344_v9  ;;  %v1702_v29 = vmul.f32 %v8416_v10, %v1701_v54  ;;  %5378 = vrsqrt.f32 %v8530_v45  ;;  %v8617_v11 = vld [vmem:[%s5842_s13 + $0x58] sm:$0xff] }
 0x301   : > { %v1882_v62 = vsel %vm744_vm13, %v1839_v40, %v1881_v55  ;;  %v1348_v28 = vsub.f32 %v8279_v21, %v8393_v16  ;;  %v1350_v6 = vsub.f32 %v8284_v1, %v8393_v16  ;;  %v1340_v10 = vmul.f32 %v1336_v30, %v1336_v30  ;;  %v8601_v40 = vld [vmem:[%s5842_s13 + $0xa8] sm:$0xff]  ;;  %v8621_v5 = vld [vmem:[%s5842_s13 + $0x78] sm:$0xff] }
 0x302   : > { %v1883_v43 = vsel %vm746_vm14, %v1853_v50, %v1882_v62  ;;  %v1681_v44 = vsel %vm1680_vm3, %v8344_v9, %v1679_v0  ;;  %v1703_v37 = vmul.f32 %v1702_v29, %v8373_v3  ;;  %v9739_v20 = vand.u32 2147483648, %v8344_v9  ;;  %v8625_v54 = vld [vmem:[%s5842_s13 + $0x98] sm:$0xff]  ;;  %v8637_v62 = vld [vmem:[%s5842_s13 + $0xe8] sm:$0xff] }
 0x303   : > { %4780 = vmatpush.msra.mxu0 %v1883_v43  ;;  %5233 = vmatpush.msra.mxu2 %v1883_v43  ;;  %v1352_v21 = vmul.f32 %v1348_v28, %v1348_v28  ;;  %v1354_v12 = vmul.f32 %v1350_v6, %v1350_v6  ;;  %v1366_v57 = vsub.f32 %v8290_v2, %v8432_v39  ;;  %5380 = vrsqrt.f32 %v8536_v33  ;;  %v8633_v0 = vld [vmem:[%s5842_s13 + $0xd8] sm:$0xff] }
 0x304   : > { %v1684_v53 = vsel %vm1682_vm4, %v9739_v20, %v1681_v44  ;;  %v1705_v1 = vsel %vm1704_vm5, %v8373_v3, %v1703_v37  ;;  %v8576_v2 = vsub.f32 %v8303_v52, %v8432_v39  ;;  %v8593_v39 = vld [vmem:[%s5842_s13 + $0x68] sm:$0xff]  ;;  %9740 = vst [vmem:[#allocation12_spill] sm:$0xff] %v8625_v54  ;;  %v8641_v28 = vld [vmem:[%s5842_s13 + $0xf8] sm:$0xff]  ;;  %vm1384_vm8 = vcmp.eq.f32.partialorder %v8530_v45, inf }
 0x305   : > { %v1710_v16 = vsub.f32 1.0, %v1684_v53  ;;  %v1708_v61 = vsel %vm1706_vm6, %v1707_v24, %v1705_v1  ;;  %v8563_v35 = vadd.f32 %v1352_v21, %v1338_v23  ;;  %v8567_v36 = vadd.f32 %v1354_v12, %v1340_v10  ;;  %v8629_v24 = vld [vmem:[%s5842_s13 + $0xb8] sm:$0xff]  ;;  %9742 = vst [vmem:[#allocation14_spill] sm:$0xff] %v8633_v0 }
 0x306   : > { %v8565_v9 = vpop.eup %5378  ;;  %v1712_v34 = vsub.f32 1.0, %v1708_v61  ;;  %v8578_v3 = vmul.f32 %v1366_v57, %v1366_v57  ;;  %9741 = vst [vmem:[#allocation13_spill] sm:$0xff] %v8629_v24  ;;  %vm1386_vm15 = vcmp.eq.f32.partialorder %v8530_v45, 0.0  ;;  %vm1408_vm0 = vcmp.eq.f32.partialorder %v8536_v33, inf }
 0x307   : > { %v1714_v38 = vmax.f32 %v1710_v16, 0.0  ;;  %v8571_v17 = vmul.f32 %v8565_v9, %v8530_v45  ;;  %9743 = vst [vmem:[#allocation19_spill] sm:$0xff] %v8637_v62  ;;  %vm1410_vm1 = vcmp.eq.f32.partialorder %v8536_v33, 0.0 }
 0x308   : > { %v1716_v49 = vmax.f32 %v1712_v34, 0.0 }
 0x309   : > { %v1718_v31 = vmul.f32 %v8581_v41, %v1714_v38  ;;  %v1722_v18 = vmul.f32 %v8585_v63, %v1714_v38  ;;  %v1726_v52 = vmul.f32 %v8589_v60, %v1714_v38  ;;  %v1730_v51 = vmul.f32 %v8593_v39, %v1714_v38  ;;  %v8644_v10 = vpop.eup %5380 }
 0x30a   : > { %v1734_v15 = vmul.f32 %v8597_v27, %v1714_v38  ;;  %v1738_v50 = vmul.f32 %v8601_v40, %v1714_v38  ;;  %v1742_v47 = vmul.f32 %v8605_v25, %v1714_v38  ;;  %v1720_v8 = vmul.f32 %v8609_v48, %v1716_v49 }
 0x30b   : > { %v1724_v7 = vmul.f32 %v8613_v59, %v1716_v49  ;;  %v1728_v30 = vmul.f32 %v8617_v11, %v1716_v49  ;;  %v1732_v19 = vmul.f32 %v8621_v5, %v1716_v49  ;;  %v1736_v58 = vmul.f32 %v8625_v54, %v1716_v49 }
 0x30c   : > { %v1740_v55 = vmul.f32 %v8629_v24, %v1716_v49  ;;  %v1744_v29 = vmul.f32 %v8633_v0, %v1716_v49  ;;  %v1746_v23 = vmul.f32 %v8637_v62, %v1714_v38  ;;  %v1748_v6 = vmul.f32 %v8641_v28, %v1716_v49 }
 0x30d   : > { %v1756_v43 = vadd.f32 %v1720_v8, %v1718_v31  ;;  %v1770_v44 = vadd.f32 %v1724_v7, %v1722_v18  ;;  %v1784_v37 = vadd.f32 %v1728_v30, %v1726_v52  ;;  %v1798_v20 = vadd.f32 %v1732_v19, %v1730_v51 }
 0x30e   : > { %v1812_v53 = vadd.f32 %v1736_v58, %v1734_v15  ;;  %v1826_v21 = vadd.f32 %v1740_v55, %v1738_v50  ;;  %v1840_v12 = vadd.f32 %v1744_v29, %v1742_v47  ;;  %v1854_v61 = vadd.f32 %v1748_v6, %v1746_v23 }
 0x30f   : > { %v1757_v1 = vrot.slane %v1756_v43, 4  ;;  %v1771_v16 = vrot.slane %v1770_v44, 4  ;;  %v1785_v57 = vrot.slane %v1784_v37, 4  ;;  %v1799_v34 = vrot.slane %v1798_v20, 4 }
 0x310   : > { %v1813_v0 = vrot.slane %v1812_v53, 4  ;;  %v1827_v38 = vrot.slane %v1826_v21, 4  ;;  %v1841_v62 = vrot.slane %v1840_v12, 4  ;;  %v1855_v31 = vrot.slane %v1854_v61, 4 }
 0x311   : > { %v1758_v24 = vadd.f32 %v1757_v1, %v1756_v43  ;;  %v1772_v54 = vadd.f32 %v1771_v16, %v1770_v44  ;;  %v1786_v49 = vadd.f32 %v1785_v57, %v1784_v37  ;;  %v1800_v18 = vadd.f32 %v1799_v34, %v1798_v20 }
 0x312   : > { %v1814_v52 = vadd.f32 %v1813_v0, %v1812_v53  ;;  %v1828_v8 = vadd.f32 %v1827_v38, %v1826_v21  ;;  %v1842_v7 = vadd.f32 %v1841_v62, %v1840_v12  ;;  %v1856_v47 = vadd.f32 %v1855_v31, %v1854_v61 }
 0x313   : > { %v1759_v51 = vrot.slane %v1758_v24, 2  ;;  %v1773_v15 = vrot.slane %v1772_v54, 2  ;;  %v1787_v50 = vrot.slane %v1786_v49, 2  ;;  %v1801_v30 = vrot.slane %v1800_v18, 2 }
 0x314   : > { %v1815_v19 = vrot.slane %v1814_v52, 2  ;;  %v1829_v58 = vrot.slane %v1828_v8, 2  ;;  %v1843_v55 = vrot.slane %v1842_v7, 2  ;;  %v1857_v43 = vrot.slane %v1856_v47, 2 }
 0x315   : > { %v1760_v29 = vadd.f32 %v1759_v51, %v1758_v24  ;;  %v1774_v23 = vadd.f32 %v1773_v15, %v1772_v54  ;;  %v1788_v6 = vadd.f32 %v1787_v50, %v1786_v49  ;;  %v1802_v44 = vadd.f32 %v1801_v30, %v1800_v18 }
 0x316   : > { %v1816_v37 = vadd.f32 %v1815_v19, %v1814_v52  ;;  %v1830_v20 = vadd.f32 %v1829_v58, %v1828_v8  ;;  %v1844_v0 = vadd.f32 %v1843_v55, %v1842_v7  ;;  %v1858_v12 = vadd.f32 %v1857_v43, %v1856_v47  ;;  %v8651_v8 = vld [vmem:[%s5840_s12] sm:$0xff]  ;;  %v8661_v47 = vld [vmem:[%s5840_s12 + $0x10] sm:$0xff] }
 0x317   : > { %v1761_v53 = vrot.slane %v1760_v29, 1  ;;  %v1775_v62 = vrot.slane %v1774_v23, 1  ;;  %v1789_v21 = vrot.slane %v1788_v6, 1  ;;  %v1803_v1 = vrot.slane %v1802_v44, 1 }
 0x318   : > { %v1817_v16 = vrot.slane %v1816_v37, 1  ;;  %v1831_v57 = vrot.slane %v1830_v20, 1  ;;  %v1845_v61 = vrot.slane %v1844_v0, 1  ;;  %v1859_v38 = vrot.slane %v1858_v12, 1 }
 0x319   : > { %v1762_v24 = vadd.f32 %v1761_v53, %v1760_v29  ;;  %v1776_v54 = vadd.f32 %v1775_v62, %v1774_v23  ;;  %v1790_v34 = vadd.f32 %v1789_v21, %v1788_v6  ;;  %v1804_v49 = vadd.f32 %v1803_v1, %v1802_v44 }
 0x31a   : > { %v1818_v31 = vadd.f32 %v1817_v16, %v1816_v37  ;;  %v1832_v18 = vadd.f32 %v1831_v57, %v1830_v20  ;;  %v1846_v52 = vadd.f32 %v1845_v61, %v1844_v0  ;;  %v1860_v7 = vadd.f32 %v1859_v38, %v1858_v12  ;;  %v8690_v0 = vld [vmem:[%s5840_s12 + $0x30] sm:$0xff]  ;;  %v8703_v57 = vld [vmem:[%s5840_s12 + $0x40] sm:$0xff] }
 0x31b   : > { %v1884_v51 = vsel %vm734_vm7, %v1776_v54, %v1762_v24  ;;  %v1379_v15 = vmul.f32 %v8565_v9, %v8571_v17  ;;  %v1402_v50 = vmul.f32 %v8644_v10, %v8536_v33  ;;  %v1372_v19 = vmul.f32 %v8576_v2, %v8576_v2  ;;  %9744 = vst [vmem:[#allocation15_spill] sm:$0xff] %v8703_v57 }
 0x31c   : > { %v1885_v30 = vsel %vm736_vm9, %v1790_v34, %v1884_v51  ;;  %v8668_v58 = vadd.f32 %v8578_v3, %v8563_v35  ;;  %v8671_v55 = vstv %s8646_s16  ;;  %v8685_v3 = vld [vmem:[%s5840_s12 + $0x20] sm:$0xff]  ;;  %v1387_v53 = vand.u32 2147483648, %v8530_v45  ;;  %s426_s16 = scalar_lea.vmem %s9486_s5, %s5220_s21 }
 0x31d   : > { %v1886_v29 = vsel %vm738_vm10, %v1804_v49, %v1885_v30  ;;  %v1380_v17 = vmul.f32 0.5, %v1379_v15  ;;  %v1403_v23 = vmul.f32 %v8644_v10, %v1402_v50  ;;  %v1049_v6 = vsub.f32 %v8651_v8, %v8671_v55 }
 0x31e   : > { %v1887_v43 = vsel %vm740_vm11, %v1818_v31, %v1886_v29  ;;  %v8679_v2 = vadd.f32 %v1372_v19, %v8567_v36  ;;  %5382 = vrsqrt.f32 %v8668_v58  ;;  %v1051_v35 = vsub.f32 %v8661_v47, %v8671_v55  ;;  %v8714_v31 = vld [vmem:[%s5840_s12 + $0x50] sm:$0xff] }
 0x31f   : > { %v1888_v44 = vsel %vm742_vm12, %v1832_v18, %v1887_v43  ;;  %v1381_v37 = vsub.f32 1.5, %v1380_v17  ;;  %v1404_v20 = vmul.f32 0.5, %v1403_v23  ;;  %v8696_v62 = vstv %s8648_s17  ;;  %9745 = vst [vmem:[#allocation21_spill] sm:$0xff] %v8714_v31 }
 0x320   : > { %v1889_v36 = vsel %vm744_vm13, %v1846_v52, %v1888_v44  ;;  %5384 = vrsqrt.f32 %v8679_v2  ;;  %v1063_v16 = vsub.f32 %v8685_v3, %v8696_v62  ;;  %v1053_v61 = vmul.f32 %v1049_v6, %v1049_v6 }
 0x321   : > { %v1890_v21 = vsel %vm746_vm14, %v1860_v7, %v1889_v36  ;;  %v1382_v12 = vmul.f32 %v8565_v9, %v1381_v37  ;;  %v1405_v1 = vsub.f32 1.5, %v1404_v20  ;;  %v1055_v24 = vmul.f32 %v1051_v35, %v1051_v35 }
 0x322   : > { %4803 = vmatpush.msra.mxu1 %v1890_v21  ;;  %5248 = vmatpush.msra.mxu3 %v1890_v21  ;;  %v1065_v54 = vsub.f32 %v8690_v0, %v8696_v62  ;;  %v8708_v34 = vstv %s8653_s18  ;;  %v1067_v49 = vmul.f32 %v1063_v16, %v1063_v16  ;;  %v1411_v52 = vand.u32 2147483648, %v8536_v33 }
 0x323   : > { %v1383_v38 = vmul.f32 %v1382_v12, %v8530_v45  ;;  %v1406_v9 = vmul.f32 %v8644_v10, %v1405_v1  ;;  %v1081_v51 = vsub.f32 %v8703_v57, %v8708_v34  ;;  %v1083_v23 = vsub.f32 %v8714_v31, %v8708_v34 }
 0x324   : > { %v8716_v18 = vpop.eup %5382  ;;  %v1069_v7 = vmul.f32 %v1065_v54, %v1065_v54  ;;  %v1071_v29 = vadd.f32 %v1067_v49, %v1053_v61  ;;  %vm1396_vm2 = vcmp.eq.f32.partialorder %v8668_v58, inf  ;;  %vm1398_vm3 = vcmp.eq.f32.partialorder %v8668_v58, 0.0 }
 0x325   : > { %v1385_v15 = vsel %vm1384_vm8, %v8530_v45, %v1383_v38  ;;  %v1407_v50 = vmul.f32 %v1406_v9, %v8536_v33  ;;  %v1390_v10 = vmul.f32 %v8716_v18, %v8668_v58  ;;  %v1085_v37 = vmul.f32 %v1081_v51, %v1081_v51 }
 0x326   : > { %v8729_v30 = vpop.eup %5384  ;;  %v1388_v19 = vsel %vm1386_vm15, %v1387_v53, %v1385_v15  ;;  %v1073_v17 = vadd.f32 %v1069_v7, %v1055_v24  ;;  %v1087_v20 = vmul.f32 %v1083_v23, %v1083_v23  ;;  %v9746_v15 = vld [vmem:[#allocation16_spill] sm:$0xff]  ;;  %v9750_v23 = vld [vmem:[#allocation9_spill] sm:$0xff]  ;;  %vm1420_vm4 = vcmp.eq.f32.partialorder %v8679_v2, inf }
 0x327   : > { %v1409_v6 = vsel %vm1408_vm0, %v8536_v33, %v1407_v50  ;;  %v1425_v43 = vsub.f32 1.0, %v1388_v19  ;;  %v1391_v45 = vmul.f32 %v8716_v18, %v1390_v10  ;;  %v1414_v35 = vmul.f32 %v8729_v30, %v8679_v2  ;;  %v9747_v10 = vld [vmem:[#allocation22_spill] sm:$0xff] }
 0x328   : > { %v1412_v44 = vsel %vm1410_vm1, %v1411_v52, %v1409_v6  ;;  %v8743_v16 = vadd.f32 %v1085_v37, %v1071_v29  ;;  %v8745_v33 = vadd.f32 %v1087_v20, %v1073_v17  ;;  %v9748_v29 = vld [vmem:[#allocation18_spill] sm:$0xff]  ;;  %v9749_v17 = vld [vmem:[#allocation23_spill] sm:$0xff]  ;;  %vm1422_vm5 = vcmp.eq.f32.partialorder %v8679_v2, 0.0 }
 0x329   : > { %v1427_v36 = vsub.f32 1.0, %v1412_v44  ;;  %v1429_v21 = vmax.f32 %v1425_v43, 0.0  ;;  %v8738_v12 = vmul.f32 0.5, %v1391_v45  ;;  %v8741_v1 = vmul.f32 %v8729_v30, %v1414_v35  ;;  %v9751_v6 = vld [vmem:[#allocation11_spill] sm:$0xff]  ;;  %v9752_v43 = vld [vmem:[#allocation10_spill] sm:$0xff] }
 0x32a   : > { %5386 = vrsqrt.f32 %v8743_v16  ;;  %vm1100_vm6 = vcmp.eq.f32.partialorder %v8743_v16, inf  ;;  %vm1124_vm8 = vcmp.eq.f32.partialorder %v8745_v33, inf  ;;  %vm1102_vm15 = vcmp.eq.f32.partialorder %v8743_v16, 0.0 }
 0x32b   : > { %v1431_v61 = vmax.f32 %v1427_v36, 0.0  ;;  %v1433_v24 = vmul.f32 %v8449_v46, %v1429_v21  ;;  %v1437_v54 = vmul.f32 %v8457_v14, %v1429_v21  ;;  %v1441_v38 = vmul.f32 %v8465_v22, %v1429_v21 }
 0x32c   : > { %v1445_v9 = vmul.f32 %v8473_v4, %v1429_v21  ;;  %v1449_v49 = vmul.f32 %v8481_v26, %v1429_v21  ;;  %v1453_v52 = vmul.f32 %v8489_v56, %v1429_v21  ;;  %v1457_v7 = vmul.f32 %v8497_v32, %v1429_v21 }
 0x32d   : > { %v1435_v51 = vmul.f32 %v8453_v42, %v1431_v61  ;;  %v1439_v50 = vmul.f32 %v9746_v15, %v1431_v61  ;;  %v1443_v19 = vmul.f32 %v9747_v10, %v1431_v61  ;;  %v1447_v46 = vmul.f32 %v9748_v29, %v1431_v61 }
 0x32e   : > { %v1451_v14 = vmul.f32 %v9749_v17, %v1431_v61  ;;  %v1455_v22 = vmul.f32 %v9750_v23, %v1431_v61  ;;  %v1459_v4 = vmul.f32 %v9751_v6, %v1431_v61  ;;  %v1461_v26 = vmul.f32 %v9752_v43, %v1429_v21 }
 0x32f   : > { %v1463_v56 = vmul.f32 %v8509_v13, %v1431_v61  ;;  %v1465_v45 = vadd.f32 %v1435_v51, %v1433_v24  ;;  %v1479_v32 = vadd.f32 %v1439_v50, %v1437_v54  ;;  %v1493_v35 = vadd.f32 %v1443_v19, %v1441_v38 }
 0x330   : > { %v1507_v42 = vadd.f32 %v1447_v46, %v1445_v9  ;;  %v1521_v44 = vadd.f32 %v1451_v14, %v1449_v49  ;;  %v1535_v37 = vadd.f32 %v1455_v22, %v1453_v52  ;;  %v1549_v20 = vadd.f32 %v1459_v4, %v1457_v7 }
 0x331   : > { %v1466_v36 = vrot.slane %v1465_v45, 4  ;;  %v1480_v15 = vrot.slane %v1479_v32, 4  ;;  %v1494_v10 = vrot.slane %v1493_v35, 4  ;;  %v1563_v29 = vadd.f32 %v1463_v56, %v1461_v26 }
 0x332   : > { %v1508_v17 = vrot.slane %v1507_v42, 4  ;;  %v1522_v53 = vrot.slane %v1521_v44, 4  ;;  %v1536_v23 = vrot.slane %v1535_v37, 4  ;;  %v1550_v31 = vrot.slane %v1549_v20, 4 }
 0x333   : > { %v1467_v6 = vadd.f32 %v1466_v36, %v1465_v45  ;;  %v1481_v57 = vadd.f32 %v1480_v15, %v1479_v32  ;;  %v1495_v21 = vadd.f32 %v1494_v10, %v1493_v35  ;;  %v1564_v43 = vrot.slane %v1563_v29, 4 }
 0x334   : > { %v1509_v13 = vadd.f32 %v1508_v17, %v1507_v42  ;;  %v1523_v61 = vadd.f32 %v1522_v53, %v1521_v44  ;;  %v1537_v24 = vadd.f32 %v1536_v23, %v1535_v37  ;;  %v1551_v54 = vadd.f32 %v1550_v31, %v1549_v20  ;;  %v8766_v44 = vld [vmem:[%s5840_s12 + $0x8] sm:$0xff]  ;;  %v8769_v37 = vld [vmem:[%s5840_s12 + $0x18] sm:$0xff] }
 0x335   : > { %v1468_v38 = vrot.slane %v1467_v6, 2  ;;  %v1482_v9 = vrot.slane %v1481_v57, 2  ;;  %v1496_v49 = vrot.slane %v1495_v21, 2  ;;  %v1565_v52 = vadd.f32 %v1564_v43, %v1563_v29 }
 0x336   : > { %v1510_v7 = vrot.slane %v1509_v13, 2  ;;  %v1524_v51 = vrot.slane %v1523_v61, 2  ;;  %v1538_v50 = vrot.slane %v1537_v24, 2  ;;  %v1552_v19 = vrot.slane %v1551_v54, 2 }
 0x337   : > { %v1469_v46 = vadd.f32 %v1468_v38, %v1467_v6  ;;  %v1483_v14 = vadd.f32 %v1482_v9, %v1481_v57  ;;  %v1497_v22 = vadd.f32 %v1496_v49, %v1495_v21  ;;  %v1566_v4 = vrot.slane %v1565_v52, 2  ;;  %v8779_v9 = vld [vmem:[%s5840_s12 + $0x28] sm:$0xff] }
 0x338   : > { %v1511_v26 = vadd.f32 %v1510_v7, %v1509_v13  ;;  %v1525_v56 = vadd.f32 %v1524_v51, %v1523_v61  ;;  %v1539_v45 = vadd.f32 %v1538_v50, %v1537_v24  ;;  %v1553_v53 = vadd.f32 %v1552_v19, %v1551_v54  ;;  %v8784_v51 = vld [vmem:[%s5840_s12 + $0x38] sm:$0xff] }
 0x339   : > { %v1470_v31 = vrot.slane %v1469_v46, 1  ;;  %v1484_v32 = vrot.slane %v1483_v14, 1  ;;  %v1498_v35 = vrot.slane %v1497_v22, 1  ;;  %v1567_v42 = vadd.f32 %v1566_v4, %v1565_v52 }
 0x33a   : > { %v1512_v20 = vrot.slane %v1511_v26, 1  ;;  %v1526_v57 = vrot.slane %v1525_v56, 1  ;;  %v1540_v36 = vrot.slane %v1539_v45, 1  ;;  %v1554_v15 = vrot.slane %v1553_v53, 1 }
 0x33b   : > { %v1471_v10 = vadd.f32 %v1470_v31, %v1469_v46  ;;  %v1485_v29 = vadd.f32 %v1484_v32, %v1483_v14  ;;  %v1499_v17 = vadd.f32 %v1498_v35, %v1497_v22  ;;  %v1568_v23 = vrot.slane %v1567_v42, 1 }
 0x33c   : > { %v1513_v6 = vadd.f32 %v1512_v20, %v1511_v26  ;;  %v1527_v21 = vadd.f32 %v1526_v57, %v1525_v56  ;;  %v1050_v43 = vsub.f32 %v8766_v44, %v8671_v55  ;;  %v1052_v13 = vsub.f32 %v8769_v37, %v8671_v55  ;;  %v8803_v56 = vld [vmem:[%s5840_s12 + $0x58] sm:$0xff] }
 0x33d   : > { %v1541_v61 = vadd.f32 %v1540_v36, %v1539_v45  ;;  %v1593_v24 = vsel %vm734_vm7, %v1485_v29, %v1471_v10  ;;  %v1393_v54 = vsub.f32 1.5, %v8738_v12  ;;  %v1416_v38 = vmul.f32 0.5, %v8741_v1  ;;  %v8790_v12 = vld [vmem:[%s5840_s12 + $0x48] sm:$0xff] }
 0x33e   : > { %v1555_v49 = vadd.f32 %v1554_v15, %v1553_v53  ;;  %v1569_v52 = vadd.f32 %v1568_v23, %v1567_v42  ;;  %v1594_v7 = vsel %vm736_vm9, %v1499_v17, %v1593_v24  ;;  %5388 = vrsqrt.f32 %v8745_v33 }
 0x33f   : > { %v1595_v55 = vsel %vm738_vm10, %v1513_v6, %v1594_v7  ;;  %v1394_v50 = vmul.f32 %v8716_v18, %v1393_v54  ;;  %v1417_v19 = vsub.f32 1.5, %v1416_v38  ;;  %v1423_v46 = vand.u32 2147483648, %v8679_v2 }
 0x340   : > { %v1596_v1 = vsel %vm740_vm11, %v1527_v21, %v1595_v55  ;;  %v1064_v14 = vsub.f32 %v8779_v9, %v8696_v62  ;;  %v1066_v26 = vsub.f32 %v8784_v51, %v8696_v62  ;;  %v1054_v53 = vmul.f32 %v1050_v43, %v1050_v43  ;;  %v8814_v62 = vpop.eup %5386 }
 0x341   : > { %v1597_v22 = vsel %vm742_vm12, %v1541_v61, %v1596_v1  ;;  %v1395_v4 = vmul.f32 %v1394_v50, %v8668_v58  ;;  %v1418_v18 = vmul.f32 %v8729_v30, %v1417_v19  ;;  %v1082_v31 = vsub.f32 %v8790_v12, %v8708_v34 }
 0x342   : > { %v1598_v45 = vsel %vm744_vm13, %v1555_v49, %v1597_v22  ;;  %v1056_v42 = vmul.f32 %v1052_v13, %v1052_v13  ;;  %v9753_v20 = vand.u32 2147483648, %v8668_v58  ;;  %v1068_v36 = vmul.f32 %v1064_v14, %v1064_v14 }
 0x343   : > { %v1599_v32 = vsel %vm746_vm14, %v1569_v52, %v1598_v45  ;;  %v1397_v35 = vsel %vm1396_vm2, %v8668_v58, %v1395_v4  ;;  %v1419_v30 = vmul.f32 %v1418_v18, %v8679_v2  ;;  %v1084_v15 = vsub.f32 %v8803_v56, %v8708_v34  ;;  %v9754_v45 = vld [vmem:[#allocation12_spill] sm:$0xff] }
 0x344   : > { %4781 = vmatpush.msra.mxu0 %v1599_v32  ;;  %v1400_v57 = vsel %vm1398_vm3, %v9753_v20, %v1397_v35  ;;  %5234 = vmatpush.msra.mxu2 %v1599_v32  ;;  %v8822_v10 = vpop.eup %5388  ;;  %v1094_v23 = vmul.f32 %v8814_v62, %v8743_v16  ;;  %v1070_v6 = vmul.f32 %v1066_v26, %v1066_v26  ;;  %v1103_v54 = vand.u32 2147483648, %v8743_v16  ;;  %v9757_v32 = vld [vmem:[#allocation19_spill] sm:$0xff] }
 0x345   : > { %v1421_v29 = vsel %vm1420_vm4, %v8679_v2, %v1419_v30  ;;  %v1426_v17 = vsub.f32 1.0, %v1400_v57  ;;  %v1118_v21 = vmul.f32 %v8822_v10, %v8745_v33  ;;  %v1072_v43 = vadd.f32 %v1068_v36, %v1054_v53  ;;  %v9755_v53 = vld [vmem:[#allocation13_spill] sm:$0xff] }
 0x346   : > { %v1424_v58 = vsel %vm1422_vm5, %v1423_v46, %v1421_v29  ;;  %v1086_v13 = vmul.f32 %v1082_v31, %v1082_v31  ;;  %v8834_v24 = vmul.f32 %v8814_v62, %v1094_v23  ;;  %v8840_v49 = vadd.f32 %v1070_v6, %v1056_v42  ;;  %v9756_v31 = vld [vmem:[#allocation14_spill] sm:$0xff] }
 0x347   : > { %v1428_v34 = vsub.f32 1.0, %v1424_v58  ;;  %v1430_v61 = vmax.f32 %v1426_v17, 0.0  ;;  %v8838_v38 = vmul.f32 %v8822_v10, %v1118_v21  ;;  %v8842_v52 = vmul.f32 %v1084_v15, %v1084_v15 }
 0x348   : > { %v8844_v2 = vadd.f32 %v1086_v13, %v1072_v43  ;;  %vm1126_vm0 = vcmp.eq.f32.partialorder %v8745_v33, 0.0 }
 0x349   : > { %v1432_v7 = vmax.f32 %v1428_v34, 0.0  ;;  %v1434_v55 = vmul.f32 %v8581_v41, %v1430_v61  ;;  %v1438_v50 = vmul.f32 %v8585_v63, %v1430_v61  ;;  %v1442_v19 = vmul.f32 %v8589_v60, %v1430_v61 }
 0x34a   : > { %v1446_v1 = vmul.f32 %v8593_v39, %v1430_v61  ;;  %v1450_v46 = vmul.f32 %v8597_v27, %v1430_v61  ;;  %v1454_v14 = vmul.f32 %v8601_v40, %v1430_v61  ;;  %v1458_v22 = vmul.f32 %v8605_v25, %v1430_v61 }
 0x34b   : > { %v1436_v4 = vmul.f32 %v8609_v48, %v1432_v7  ;;  %v1440_v18 = vmul.f32 %v8613_v59, %v1432_v7  ;;  %v1444_v26 = vmul.f32 %v8617_v11, %v1432_v7  ;;  %v1448_v41 = vmul.f32 %v8621_v5, %v1432_v7 }
 0x34c   : > { %v1452_v63 = vmul.f32 %v9754_v45, %v1432_v7  ;;  %v1456_v60 = vmul.f32 %v9755_v53, %v1432_v7  ;;  %v1460_v39 = vmul.f32 %v9756_v31, %v1432_v7  ;;  %v1462_v27 = vmul.f32 %v9757_v32, %v1430_v61 }
 0x34d   : > { %v1464_v40 = vmul.f32 %v8641_v28, %v1432_v7  ;;  %v1472_v35 = vadd.f32 %v1436_v4, %v1434_v55  ;;  %v1486_v25 = vadd.f32 %v1440_v18, %v1438_v50  ;;  %v1500_v30 = vadd.f32 %v1444_v26, %v1442_v19 }
 0x34e   : > { %v1514_v48 = vadd.f32 %v1448_v41, %v1446_v1  ;;  %v1528_v42 = vadd.f32 %v1452_v63, %v1450_v46  ;;  %v1542_v59 = vadd.f32 %v1456_v60, %v1454_v14  ;;  %v1556_v20 = vadd.f32 %v1460_v39, %v1458_v22 }
 0x34f   : > { %v1473_v11 = vrot.slane %v1472_v35, 4  ;;  %v1487_v57 = vrot.slane %v1486_v25, 4  ;;  %v1501_v5 = vrot.slane %v1500_v30, 4  ;;  %v1570_v36 = vadd.f32 %v1464_v40, %v1462_v27 }
 0x350   : > { %v1515_v15 = vrot.slane %v1514_v48, 4  ;;  %v1529_v29 = vrot.slane %v1528_v42, 4  ;;  %v1543_v17 = vrot.slane %v1542_v59, 4  ;;  %v1557_v23 = vrot.slane %v1556_v20, 4 }
 0x351   : > { %v1474_v6 = vadd.f32 %v1473_v11, %v1472_v35  ;;  %v1488_v58 = vadd.f32 %v1487_v57, %v1486_v25  ;;  %v1502_v21 = vadd.f32 %v1501_v5, %v1500_v30  ;;  %v1571_v43 = vrot.slane %v1570_v36, 4 }
 0x352   : > { %v1516_v28 = vadd.f32 %v1515_v15, %v1514_v48  ;;  %v1530_v13 = vadd.f32 %v1529_v29, %v1528_v42  ;;  %v1544_v34 = vadd.f32 %v1543_v17, %v1542_v59  ;;  %v1558_v61 = vadd.f32 %v1557_v23, %v1556_v20 }
 0x353   : > { %v1475_v7 = vrot.slane %v1474_v6, 2  ;;  %v1489_v55 = vrot.slane %v1488_v58, 2  ;;  %v1503_v50 = vrot.slane %v1502_v21, 2  ;;  %v1572_v19 = vadd.f32 %v1571_v43, %v1570_v36 }
 0x354   : > { %v1517_v1 = vrot.slane %v1516_v28, 2  ;;  %v1531_v46 = vrot.slane %v1530_v13, 2  ;;  %v1545_v14 = vrot.slane %v1544_v34, 2  ;;  %v1559_v22 = vrot.slane %v1558_v61, 2 }
 0x355   : > { %v1476_v4 = vadd.f32 %v1475_v7, %v1474_v6  ;;  %v1490_v18 = vadd.f32 %v1489_v55, %v1488_v58  ;;  %v1504_v26 = vadd.f32 %v1503_v50, %v1502_v21  ;;  %v1573_v41 = vrot.slane %v1572_v19, 2 }
 0x356   : > { %v1518_v45 = vadd.f32 %v1517_v1, %v1516_v28  ;;  %v1532_v63 = vadd.f32 %v1531_v46, %v1530_v13  ;;  %v1546_v53 = vadd.f32 %v1545_v14, %v1544_v34  ;;  %v1560_v60 = vadd.f32 %v1559_v22, %v1558_v61 }
 0x357   : > { %v1477_v31 = vrot.slane %v1476_v4, 1  ;;  %v1491_v39 = vrot.slane %v1490_v18, 1  ;;  %v1505_v32 = vrot.slane %v1504_v26, 1  ;;  %v1574_v27 = vadd.f32 %v1573_v41, %v1572_v19 }
 0x358   : > { %v1519_v40 = vrot.slane %v1518_v45, 1  ;;  %v1533_v35 = vrot.slane %v1532_v63, 1  ;;  %v1547_v25 = vrot.slane %v1546_v53, 1  ;;  %v1561_v30 = vrot.slane %v1560_v60, 1 }
 0x359   : > { %v1478_v48 = vadd.f32 %v1477_v31, %v1476_v4  ;;  %v1492_v42 = vadd.f32 %v1491_v39, %v1490_v18  ;;  %v1506_v59 = vadd.f32 %v1505_v32, %v1504_v26  ;;  %v1575_v20 = vrot.slane %v1574_v27, 1 }
 0x35a   : > { %v1520_v11 = vadd.f32 %v1519_v40, %v1518_v45  ;;  %v1534_v57 = vadd.f32 %v1533_v35, %v1532_v63  ;;  %v1548_v5 = vadd.f32 %v1547_v25, %v1546_v53  ;;  %v1562_v36 = vadd.f32 %v1561_v30, %v1560_v60  ;;  %v9758_v25 = vld [vmem:[#allocation15_spill] sm:$0xff] }
 0x35b   : > { %v1576_v15 = vadd.f32 %v1575_v20, %v1574_v27  ;;  %v1600_v29 = vsel %vm734_vm7, %v1492_v42, %v1478_v48  ;;  %v1096_v17 = vmul.f32 0.5, %v8834_v24  ;;  %v1120_v23 = vmul.f32 0.5, %v8838_v38  ;;  %v9759_v48 = vld [vmem:[#allocation21_spill] sm:$0xff] }
 0x35c   : > { %v1601_v6 = vsel %vm736_vm9, %v1506_v59, %v1600_v29  ;;  %v8873_v58 = vadd.f32 %v8842_v52, %v8840_v49  ;;  %5390 = vrsqrt.f32 %v8844_v2  ;;  %v8877_v21 = vstv %s8862_s19  ;;  %v8949_v59 = vld [vmem:[%s5842_s13] sm:$0xff]  ;;  %s431_s19 = scalar_lea.vmem %s9487_s6, %s5220_s21 }
 0x35d   : > { %v1602_v43 = vsel %vm738_vm10, %v1520_v11, %v1601_v6  ;;  %v1097_v28 = vsub.f32 1.5, %v1096_v17  ;;  %v1121_v13 = vsub.f32 1.5, %v1120_v23  ;;  %v765_v24 = vsub.f32 %v8651_v8, %v8877_v21  ;;  %v8953_v11 = vld [vmem:[%s5842_s13 + $0x10] sm:$0xff]  ;;  %v8965_v17 = vld [vmem:[%s5842_s13 + $0x40] sm:$0xff] }
 0x35e   : > { %v1603_v38 = vsel %vm740_vm11, %v1534_v57, %v1602_v43  ;;  %5392 = vrsqrt.f32 %v8873_v58  ;;  %v767_v49 = vsub.f32 %v8661_v47, %v8877_v21  ;;  %v8893_v7 = vstv %s8864_s20  ;;  %v8969_v6 = vld [vmem:[%s5842_s13 + $0x50] sm:$0xff]  ;;  %s5222_s20 = sshll.u32 (%p5732_p5), %s5713_s24, 4 }
 0x35f   : > { %v1604_v52 = vsel %vm742_vm12, %v1548_v5, %v1603_v38  ;;  %v1098_v34 = vmul.f32 %v8814_v62, %v1097_v28  ;;  %v1122_v61 = vmul.f32 %v8822_v10, %v1121_v13  ;;  %v1127_v55 = vand.u32 2147483648, %v8745_v33  ;;  %v8957_v5 = vld [vmem:[%s5842_s13 + $0x20] sm:$0xff]  ;;  %9761 = vst [vmem:[#allocation17_spill] sm:$0xff] %v8969_v6 }
 0x360   : > { %v1605_v8 = vsel %vm744_vm13, %v1562_v36, %v1604_v52  ;;  %v769_v1 = vmul.f32 %v765_v24, %v765_v24  ;;  %v771_v10 = vmul.f32 %v767_v49, %v767_v49  ;;  %v779_v46 = vsub.f32 %v8685_v3, %v8893_v7  ;;  %v8973_v28 = vld [vmem:[%s5842_s13 + $0x60] sm:$0xff]  ;;  %v8977_v24 = vld [vmem:[%s5842_s13 + $0x70] sm:$0xff] }
 0x361   : > { %v1606_v47 = vsel %vm746_vm14, %v1576_v15, %v1605_v8  ;;  %v1099_v50 = vmul.f32 %v1098_v34, %v8743_v16  ;;  %v1123_v19 = vmul.f32 %v1122_v61, %v8745_v33  ;;  %v781_v14 = vsub.f32 %v8690_v0, %v8893_v7  ;;  %v8961_v15 = vld [vmem:[%s5842_s13 + $0x30] sm:$0xff]  ;;  %9762 = vst [vmem:[#allocation16_spill] sm:$0xff] %v8977_v24  ;;  %v8981_v49 = vld [vmem:[%s5842_s13 + $0x80] sm:$0xff] }
 0x362   : > { %v8902_v62 = vpop.eup %5390  ;;  %4804 = vmatpush.msra.mxu1 %v1606_v47  ;;  %5249 = vmatpush.msra.mxu3 %v1606_v47  ;;  %v783_v41 = vmul.f32 %v779_v46, %v779_v46  ;;  %9760 = vst [vmem:[#allocation20_spill] sm:$0xff] %v8961_v15  ;;  %v8985_v34 = vld [vmem:[%s5842_s13 + $0x90] sm:$0xff]  ;;  %v8989_v8 = vld [vmem:[%s5842_s13 + $0xa0] sm:$0xff]  ;;  %vm1112_vm1 = vcmp.eq.f32.partialorder %v8844_v2, inf  ;;  %vm1114_vm2 = vcmp.eq.f32.partialorder %v8844_v2, 0.0  ;;  %vm1136_vm3 = vcmp.eq.f32.partialorder %v8873_v58, inf }
 0x363   : > { %v1101_v22 = vsel %vm1100_vm6, %v8743_v16, %v1099_v50  ;;  %v1125_v4 = vsel %vm1124_vm8, %v8745_v33, %v1123_v19  ;;  %v1106_v18 = vmul.f32 %v8902_v62, %v8844_v2  ;;  %v785_v45 = vmul.f32 %v781_v14, %v781_v14  ;;  %9763 = vst [vmem:[#allocation22_spill] sm:$0xff] %v8985_v34  ;;  %v8993_v47 = vld [vmem:[%s5842_s13 + $0xb0] sm:$0xff]  ;;  %v8997_v19 = vld [vmem:[%s5842_s13 + $0xc0] sm:$0xff] }
 0x364   : > { %v8916_v26 = vpop.eup %5392  ;;  %v1104_v3 = vsel %vm1102_vm15, %v1103_v54, %v1101_v22  ;;  %v1128_v0 = vsel %vm1126_vm0, %v1127_v55, %v1125_v4  ;;  %v8927_v39 = vadd.f32 %v783_v41, %v769_v1  ;;  %v8932_v54 = vstv %s8887_s26  ;;  %9764 = vst [vmem:[#allocation18_spill] sm:$0xff] %v8993_v47  ;;  %v9005_v14 = vld [vmem:[%s5842_s13 + $0xe0] sm:$0xff]  ;;  %v9009_v4 = vld [vmem:[%s5842_s13 + $0xf0] sm:$0xff] }
 0x365   : > { %v1141_v63 = vsub.f32 1.0, %v1104_v3  ;;  %v1143_v53 = vsub.f32 1.0, %v1128_v0  ;;  %v1107_v60 = vmul.f32 %v8902_v62, %v1106_v18  ;;  %v1130_v31 = vmul.f32 %v8916_v26, %v8873_v58  ;;  %9766 = vst [vmem:[#allocation9_spill] sm:$0xff] %v9005_v14 }
 0x366   : > { %v8929_v16 = vadd.f32 %v785_v45, %v771_v10  ;;  %v8942_v30 = vsub.f32 %v9758_v25, %v8932_v54  ;;  %v8946_v42 = vsub.f32 %v9759_v48, %v8932_v54  ;;  %v9001_v10 = vld [vmem:[%s5842_s13 + $0xd0] sm:$0xff]  ;;  %vm1138_vm4 = vcmp.eq.f32.partialorder %v8873_v58, 0.0 }
 0x367   : > { %v1145_v33 = vmax.f32 %v1141_v63, 0.0  ;;  %v1147_v32 = vmax.f32 %v1143_v53, 0.0  ;;  %v8935_v40 = vmul.f32 0.5, %v1107_v60  ;;  %v8938_v35 = vmul.f32 %v8916_v26, %v1130_v31  ;;  %9765 = vst [vmem:[#allocation23_spill] sm:$0xff] %v9001_v10 }
 0x369   : > { %v1149_v20 = vmul.f32 %v8949_v59, %v1145_v33  ;;  %v1151_v57 = vmul.f32 %v8953_v11, %v1147_v32  ;;  %v1153_v36 = vmul.f32 %v8957_v5, %v1145_v33  ;;  %v1155_v29 = vmul.f32 %v8961_v15, %v1147_v32 }
 0x36a   : > { %v1157_v23 = vmul.f32 %v8965_v17, %v1145_v33  ;;  %v1159_v43 = vmul.f32 %v8969_v6, %v1147_v32  ;;  %v1161_v13 = vmul.f32 %v8973_v28, %v1145_v33  ;;  %v1163_v38 = vmul.f32 %v8977_v24, %v1147_v32 }
 0x36b   : > { %v1165_v52 = vmul.f32 %v8981_v49, %v1145_v33  ;;  %v1167_v61 = vmul.f32 %v8985_v34, %v1147_v32  ;;  %v1169_v55 = vmul.f32 %v8989_v8, %v1145_v33  ;;  %v1171_v50 = vmul.f32 %v8993_v47, %v1147_v32 }
 0x36c   : > { %v1173_v1 = vmul.f32 %v8997_v19, %v1145_v33  ;;  %v1175_v46 = vmul.f32 %v9001_v10, %v1147_v32  ;;  %v1177_v22 = vmul.f32 %v9005_v14, %v1145_v33  ;;  %v1179_v18 = vmul.f32 %v9009_v4, %v1147_v32 }
 0x36d   : > { %v1181_v3 = vadd.f32 %v1151_v57, %v1149_v20  ;;  %v1195_v0 = vadd.f32 %v1155_v29, %v1153_v36  ;;  %v1209_v41 = vadd.f32 %v1159_v43, %v1157_v23  ;;  %v1223_v45 = vadd.f32 %v1163_v38, %v1161_v13 }
 0x36e   : > { %v1237_v63 = vadd.f32 %v1167_v61, %v1165_v52  ;;  %v1251_v53 = vadd.f32 %v1171_v50, %v1169_v55  ;;  %v1265_v60 = vadd.f32 %v1175_v46, %v1173_v1  ;;  %v1279_v31 = vadd.f32 %v1179_v18, %v1177_v22 }
 0x36f   : > { %v1182_v25 = vrot.slane %v1181_v3, 4  ;;  %v1196_v48 = vrot.slane %v1195_v0, 4  ;;  %v1210_v27 = vrot.slane %v1209_v41, 4  ;;  %v1224_v10 = vrot.slane %v1223_v45, 4 }
 0x370   : > { %v1238_v47 = vrot.slane %v1237_v63, 4  ;;  %v1252_v34 = vrot.slane %v1251_v53, 4  ;;  %v1266_v24 = vrot.slane %v1265_v60, 4  ;;  %v1280_v33 = vrot.slane %v1279_v31, 4 }
 0x371   : > { %v1183_v14 = vadd.f32 %v1182_v25, %v1181_v3  ;;  %v1197_v6 = vadd.f32 %v1196_v48, %v1195_v0  ;;  %v1211_v15 = vadd.f32 %v1210_v27, %v1209_v41  ;;  %v1225_v32 = vadd.f32 %v1224_v10, %v1223_v45 }
 0x372   : > { %v1239_v20 = vadd.f32 %v1238_v47, %v1237_v63  ;;  %v1253_v57 = vadd.f32 %v1252_v34, %v1251_v53  ;;  %v1267_v36 = vadd.f32 %v1266_v24, %v1265_v60  ;;  %v1281_v29 = vadd.f32 %v1280_v33, %v1279_v31 }
 0x373   : > { %v1184_v23 = vrot.slane %v1183_v14, 2  ;;  %v1198_v43 = vrot.slane %v1197_v6, 2  ;;  %v1212_v13 = vrot.slane %v1211_v15, 2  ;;  %v1226_v38 = vrot.slane %v1225_v32, 2 }
 0x374   : > { %v1240_v52 = vrot.slane %v1239_v20, 2  ;;  %v1254_v61 = vrot.slane %v1253_v57, 2  ;;  %v1268_v55 = vrot.slane %v1267_v36, 2  ;;  %v1282_v50 = vrot.slane %v1281_v29, 2 }
 0x375   : > { %v1185_v1 = vadd.f32 %v1184_v23, %v1183_v14  ;;  %v1199_v46 = vadd.f32 %v1198_v43, %v1197_v6  ;;  %v1213_v22 = vadd.f32 %v1212_v13, %v1211_v15  ;;  %v1227_v18 = vadd.f32 %v1226_v38, %v1225_v32 }
 0x376   : > { %v1241_v3 = vadd.f32 %v1240_v52, %v1239_v20  ;;  %v1255_v0 = vadd.f32 %v1254_v61, %v1253_v57  ;;  %v1269_v27 = vadd.f32 %v1268_v55, %v1267_v36  ;;  %v1283_v10 = vadd.f32 %v1282_v50, %v1281_v29 }
 0x377   : > { %v1186_v24 = vrot.slane %v1185_v1, 1  ;;  %v1200_v34 = vrot.slane %v1199_v46, 1  ;;  %v1214_v47 = vrot.slane %v1213_v22, 1  ;;  %v1228_v41 = vrot.slane %v1227_v18, 1 }
 0x378   : > { %v1242_v45 = vrot.slane %v1241_v3, 1  ;;  %v1256_v63 = vrot.slane %v1255_v0, 1  ;;  %v1270_v53 = vrot.slane %v1269_v27, 1  ;;  %v1284_v60 = vrot.slane %v1283_v10, 1 }
 0x379   : > { %v1187_v15 = vadd.f32 %v1186_v24, %v1185_v1  ;;  %v1201_v6 = vadd.f32 %v1200_v34, %v1199_v46  ;;  %v1215_v14 = vadd.f32 %v1214_v47, %v1213_v22  ;;  %v1229_v31 = vadd.f32 %v1228_v41, %v1227_v18 }
 0x37a   : > { %v1243_v25 = vadd.f32 %v1242_v45, %v1241_v3  ;;  %v1257_v48 = vadd.f32 %v1256_v63, %v1255_v0  ;;  %v1271_v33 = vadd.f32 %v1270_v53, %v1269_v27  ;;  %v1285_v32 = vadd.f32 %v1284_v60, %v1283_v10  ;;  %v9081_v53 = vld [vmem:[%s5842_s13 + $0x8] sm:$0xff] }
 0x37b   : > { %v1309_v20 = vsel %vm734_vm7, %v1201_v6, %v1187_v15  ;;  %v1109_v57 = vsub.f32 1.5, %v8935_v40  ;;  %v1132_v36 = vmul.f32 0.5, %v8938_v35  ;;  %v801_v29 = vmul.f32 %v8942_v30, %v8942_v30  ;;  %v9085_v15 = vld [vmem:[%s5842_s13 + $0x28] sm:$0xff] }
 0x37c   : > { %v1310_v23 = vsel %vm736_vm9, %v1215_v14, %v1309_v20  ;;  %v803_v43 = vmul.f32 %v8946_v42, %v8946_v42  ;;  %v766_v13 = vsub.f32 %v8766_v44, %v8877_v21  ;;  %v768_v38 = vsub.f32 %v8769_v37, %v8877_v21  ;;  %v9089_v14 = vld [vmem:[%s5842_s13 + $0x48] sm:$0xff] }
 0x37d   : > { %v1311_v52 = vsel %vm738_vm10, %v1229_v31, %v1310_v23  ;;  %v1110_v40 = vmul.f32 %v8902_v62, %v1109_v57  ;;  %v1133_v61 = vsub.f32 1.5, %v1132_v36  ;;  %v9030_v35 = vadd.f32 %v801_v29, %v8927_v39  ;;  %v9105_v20 = vld [vmem:[%s5842_s13 + $0xc8] sm:$0xff]  ;;  %v9109_v36 = vld [vmem:[%s5842_s13 + $0x18] sm:$0xff] }
 0x37e   : > { %v1312_v30 = vsel %vm740_vm11, %v1243_v25, %v1311_v52  ;;  %v1139_v42 = vand.u32 2147483648, %v8873_v58  ;;  %v9036_v55 = vadd.f32 %v803_v43, %v8929_v16  ;;  %v770_v39 = vmul.f32 %v766_v13, %v766_v13  ;;  %v9097_v25 = vld [vmem:[%s5842_s13 + $0x88] sm:$0xff]  ;;  %v9113_v23 = vld [vmem:[%s5842_s13 + $0x38] sm:$0xff] }
 0x37f   : > { %v1313_v44 = vsel %vm742_vm12, %v1257_v48, %v1312_v30  ;;  %v1111_v37 = vmul.f32 %v1110_v40, %v8844_v2  ;;  %v1134_v21 = vmul.f32 %v8916_v26, %v1133_v61  ;;  %5394 = vrsqrt.f32 %v9030_v35  ;;  %v9117_v13 = vld [vmem:[%s5842_s13 + $0x58] sm:$0xff] }
 0x380   : > { %v1314_v62 = vsel %vm744_vm13, %v1271_v33, %v1313_v44  ;;  %v780_v50 = vsub.f32 %v8779_v9, %v8893_v7  ;;  %v782_v1 = vsub.f32 %v8784_v51, %v8893_v7  ;;  %v772_v26 = vmul.f32 %v768_v38, %v768_v38  ;;  %v9101_v33 = vld [vmem:[%s5842_s13 + $0xa8] sm:$0xff]  ;;  %v9121_v52 = vld [vmem:[%s5842_s13 + $0x78] sm:$0xff] }
 0x381   : > { %v1315_v16 = vsel %vm746_vm14, %v1285_v32, %v1314_v62  ;;  %v1113_v46 = vsel %vm1112_vm1, %v8844_v2, %v1111_v37  ;;  %v1135_v22 = vmul.f32 %v1134_v21, %v8873_v58  ;;  %v9767_v18 = vand.u32 2147483648, %v8844_v2  ;;  %v9125_v61 = vld [vmem:[%s5842_s13 + $0x98] sm:$0xff]  ;;  %v9137_v62 = vld [vmem:[%s5842_s13 + $0xe8] sm:$0xff] }
 0x382   : > { %4782 = vmatpush.msra.mxu0 %v1315_v16  ;;  %5235 = vmatpush.msra.mxu2 %v1315_v16  ;;  %v784_v9 = vmul.f32 %v780_v50, %v780_v50  ;;  %v786_v0 = vmul.f32 %v782_v1, %v782_v1  ;;  %v798_v27 = vsub.f32 %v8790_v12, %v8932_v54  ;;  %5396 = vrsqrt.f32 %v9036_v55  ;;  %v9133_v37 = vld [vmem:[%s5842_s13 + $0xd8] sm:$0xff] }
 0x383   : > { %v1116_v3 = vsel %vm1114_vm2, %v9767_v18, %v1113_v46  ;;  %v1137_v51 = vsel %vm1136_vm3, %v8873_v58, %v1135_v22  ;;  %v9076_v12 = vsub.f32 %v8803_v56, %v8932_v54  ;;  %v9093_v54 = vld [vmem:[%s5842_s13 + $0x68] sm:$0xff]  ;;  %9768 = vst [vmem:[#allocation11_spill] sm:$0xff] %v9125_v61  ;;  %v9141_v50 = vld [vmem:[%s5842_s13 + $0xf8] sm:$0xff]  ;;  %vm816_vm5 = vcmp.eq.f32.partialorder %v9030_v35, inf }
 0x384   : > { %v1142_v7 = vsub.f32 1.0, %v1116_v3  ;;  %v1140_v10 = vsel %vm1138_vm4, %v1139_v42, %v1137_v51  ;;  %v9063_v24 = vadd.f32 %v784_v9, %v770_v39  ;;  %v9067_v41 = vadd.f32 %v786_v0, %v772_v26  ;;  %v9129_v42 = vld [vmem:[%s5842_s13 + $0xb8] sm:$0xff]  ;;  %9770 = vst [vmem:[#allocation12_spill] sm:$0xff] %v9133_v37 }
 0x385   : > { %v9065_v2 = vpop.eup %5394  ;;  %v1144_v34 = vsub.f32 1.0, %v1140_v10  ;;  %v9078_v58 = vmul.f32 %v798_v27, %v798_v27  ;;  %9769 = vst [vmem:[#allocation10_spill] sm:$0xff] %v9129_v42  ;;  %vm818_vm6 = vcmp.eq.f32.partialorder %v9030_v35, 0.0  ;;  %vm840_vm8 = vcmp.eq.f32.partialorder %v9036_v55, inf }
 0x386   : > { %v1146_v47 = vmax.f32 %v1142_v7, 0.0  ;;  %v9071_v45 = vmul.f32 %v9065_v2, %v9030_v35  ;;  %9771 = vst [vmem:[#allocation13_spill] sm:$0xff] %v9137_v62  ;;  %vm842_vm15 = vcmp.eq.f32.partialorder %v9036_v55, 0.0 }
 0x387   : > { %v1148_v63 = vmax.f32 %v1144_v34, 0.0 }
 0x388   : > { %v1150_v60 = vmul.f32 %v9081_v53, %v1146_v47  ;;  %v1154_v6 = vmul.f32 %v9085_v15, %v1146_v47  ;;  %v1158_v56 = vmul.f32 %v9089_v14, %v1146_v47  ;;  %v1162_v31 = vmul.f32 %v9093_v54, %v1146_v47  ;;  %v9144_v26 = vpop.eup %5396 }
 0x389   : > { %v1166_v48 = vmul.f32 %v9097_v25, %v1146_v47  ;;  %v1170_v32 = vmul.f32 %v9101_v33, %v1146_v47  ;;  %v1174_v57 = vmul.f32 %v9105_v20, %v1146_v47  ;;  %v1152_v29 = vmul.f32 %v9109_v36, %v1148_v63 }
 0x38a   : > { %v1156_v43 = vmul.f32 %v9113_v23, %v1148_v63  ;;  %v1160_v38 = vmul.f32 %v9117_v13, %v1148_v63  ;;  %v1164_v40 = vmul.f32 %v9121_v52, %v1148_v63  ;;  %v1168_v30 = vmul.f32 %v9125_v61, %v1148_v63 }
 0x38b   : > { %v1172_v44 = vmul.f32 %v9129_v42, %v1148_v63  ;;  %v1176_v21 = vmul.f32 %v9133_v37, %v1148_v63  ;;  %v1178_v39 = vmul.f32 %v9137_v62, %v1146_v47  ;;  %v1180_v1 = vmul.f32 %v9141_v50, %v1148_v63 }
 0x38c   : > { %v1188_v16 = vadd.f32 %v1152_v29, %v1150_v60  ;;  %v1202_v46 = vadd.f32 %v1156_v43, %v1154_v6  ;;  %v1216_v22 = vadd.f32 %v1160_v38, %v1158_v56  ;;  %v1230_v18 = vadd.f32 %v1164_v40, %v1162_v31 }
 0x38d   : > { %v1244_v3 = vadd.f32 %v1168_v30, %v1166_v48  ;;  %v1258_v9 = vadd.f32 %v1172_v44, %v1170_v32  ;;  %v1272_v0 = vadd.f32 %v1176_v21, %v1174_v57  ;;  %v1286_v10 = vadd.f32 %v1180_v1, %v1178_v39 }
 0x38e   : > { %v1189_v51 = vrot.slane %v1188_v16, 4  ;;  %v1203_v7 = vrot.slane %v1202_v46, 4  ;;  %v1217_v27 = vrot.slane %v1216_v22, 4  ;;  %v1231_v34 = vrot.slane %v1230_v18, 4 }
 0x38f   : > { %v1245_v37 = vrot.slane %v1244_v3, 4  ;;  %v1259_v47 = vrot.slane %v1258_v9, 4  ;;  %v1273_v62 = vrot.slane %v1272_v0, 4  ;;  %v1287_v60 = vrot.slane %v1286_v10, 4 }
 0x390   : > { %v1190_v42 = vadd.f32 %v1189_v51, %v1188_v16  ;;  %v1204_v61 = vadd.f32 %v1203_v7, %v1202_v46  ;;  %v1218_v63 = vadd.f32 %v1217_v27, %v1216_v22  ;;  %v1232_v6 = vadd.f32 %v1231_v34, %v1230_v18 }
 0x391   : > { %v1246_v56 = vadd.f32 %v1245_v37, %v1244_v3  ;;  %v1260_v29 = vadd.f32 %v1259_v47, %v1258_v9  ;;  %v1274_v43 = vadd.f32 %v1273_v62, %v1272_v0  ;;  %v1288_v57 = vadd.f32 %v1287_v60, %v1286_v10 }
 0x392   : > { %v1191_v31 = vrot.slane %v1190_v42, 2  ;;  %v1205_v48 = vrot.slane %v1204_v61, 2  ;;  %v1219_v32 = vrot.slane %v1218_v63, 2  ;;  %v1233_v38 = vrot.slane %v1232_v6, 2 }
 0x393   : > { %v1247_v40 = vrot.slane %v1246_v56, 2  ;;  %v1261_v30 = vrot.slane %v1260_v29, 2  ;;  %v1275_v44 = vrot.slane %v1274_v43, 2  ;;  %v1289_v16 = vrot.slane %v1288_v57, 2 }
 0x394   : > { %v1192_v21 = vadd.f32 %v1191_v31, %v1190_v42  ;;  %v1206_v39 = vadd.f32 %v1205_v48, %v1204_v61  ;;  %v1220_v1 = vadd.f32 %v1219_v32, %v1218_v63  ;;  %v1234_v46 = vadd.f32 %v1233_v38, %v1232_v6 }
 0x395   : > { %v1248_v22 = vadd.f32 %v1247_v40, %v1246_v56  ;;  %v1262_v18 = vadd.f32 %v1261_v30, %v1260_v29  ;;  %v1276_v37 = vadd.f32 %v1275_v44, %v1274_v43  ;;  %v1290_v0 = vadd.f32 %v1289_v16, %v1288_v57  ;;  %v466_v29 = vld [vmem:[%s5840_s12] sm:$0xff]  ;;  %v468_v57 = vld [vmem:[%s5840_s12 + $0x10] sm:$0xff] }
 0x396   : > { %v1193_v3 = vrot.slane %v1192_v21, 1  ;;  %v1207_v62 = vrot.slane %v1206_v39, 1  ;;  %v1221_v9 = vrot.slane %v1220_v1, 1  ;;  %v1235_v51 = vrot.slane %v1234_v46, 1 }
 0x397   : > { %v1249_v7 = vrot.slane %v1248_v22, 1  ;;  %v1263_v27 = vrot.slane %v1262_v18, 1  ;;  %v1277_v10 = vrot.slane %v1276_v37, 1  ;;  %v1291_v47 = vrot.slane %v1290_v0, 1 }
 0x398   : > { %v1194_v42 = vadd.f32 %v1193_v3, %v1192_v21  ;;  %v1208_v61 = vadd.f32 %v1207_v62, %v1206_v39  ;;  %v1222_v34 = vadd.f32 %v1221_v9, %v1220_v1  ;;  %v1236_v63 = vadd.f32 %v1235_v51, %v1234_v46 }
 0x399   : > { %v1250_v60 = vadd.f32 %v1249_v7, %v1248_v22  ;;  %v1264_v6 = vadd.f32 %v1263_v27, %v1262_v18  ;;  %v1278_v56 = vadd.f32 %v1277_v10, %v1276_v37  ;;  %v1292_v43 = vadd.f32 %v1291_v47, %v1290_v0  ;;  %v5051_v37 = vld [vmem:[%s5840_s12 + $0x30] sm:$0xff]  ;;  %v5054_v27 = vld [vmem:[%s5840_s12 + $0x40] sm:$0xff] }
 0x39a   : > { %v1316_v31 = vsel %vm734_vm7, %v1208_v61, %v1194_v42  ;;  %v811_v48 = vmul.f32 %v9065_v2, %v9071_v45  ;;  %v834_v32 = vmul.f32 %v9144_v26, %v9036_v55  ;;  %v804_v40 = vmul.f32 %v9076_v12, %v9076_v12  ;;  %v5049_v12 = vld [vmem:[%s5840_s12 + $0x20] sm:$0xff] }
 0x39b   : > { %v1317_v38 = vsel %vm736_vm9, %v1222_v34, %v1316_v31  ;;  %v9164_v30 = vadd.f32 %v9078_v58, %v9063_v24  ;;  %v9167_v44 = vstv %s9146_s27  ;;  %v819_v62 = vand.u32 2147483648, %v9030_v35 }
 0x39c   : > { %v1318_v21 = vsel %vm738_vm10, %v1236_v63, %v1317_v38  ;;  %v812_v39 = vmul.f32 0.5, %v811_v48  ;;  %v835_v45 = vmul.f32 %v9144_v26, %v834_v32  ;;  %v472_v1 = vsub.f32 %v466_v29, %v9167_v44 }
 0x39d   : > { %v1319_v16 = vsel %vm740_vm11, %v1250_v60, %v1318_v21  ;;  %v9174_v46 = vadd.f32 %v804_v40, %v9067_v41  ;;  %5398 = vrsqrt.f32 %v9164_v30  ;;  %v474_v24 = vsub.f32 %v468_v57, %v9167_v44 }
 0x39e   : > { %v1320_v58 = vsel %vm742_vm12, %v1264_v6, %v1319_v16  ;;  %v813_v22 = vsub.f32 1.5, %v812_v39  ;;  %v836_v18 = vmul.f32 0.5, %v835_v45  ;;  %v9186_v41 = vstv %s9148_s8  ;;  %s4865_s8 = scalar_lea.vmem (%p5732_p5), %s9485_s4, %s5222_s20 }
 0x39f   : > { %v1321_v3 = vsel %vm744_vm13, %v1278_v56, %v1320_v58  ;;  %5400 = vrsqrt.f32 %v9174_v46  ;;  %v487_v7 = vsub.f32 %v5049_v12, %v9186_v41  ;;  %v476_v10 = vmul.f32 %v472_v1, %v472_v1 }
 0x3a0   : > { %v1322_v9 = vsel %vm746_vm14, %v1292_v43, %v1321_v3  ;;  %v814_v0 = vmul.f32 %v9065_v2, %v813_v22  ;;  %v837_v51 = vsub.f32 1.5, %v836_v18  ;;  %v478_v42 = vmul.f32 %v474_v24, %v474_v24  ;;  %v5056_v2 = vld [vmem:[%s5840_s12 + $0x50] sm:$0xff] }
 0x3a1   : > { %4805 = vmatpush.msra.mxu1 %v1322_v9  ;;  %5250 = vmatpush.msra.mxu3 %v1322_v9  ;;  %v489_v61 = vsub.f32 %v5051_v37, %v9186_v41  ;;  %v9194_v34 = vstv %s9151_s9  ;;  %v491_v60 = vmul.f32 %v487_v7, %v487_v7  ;;  %v843_v56 = vand.u32 2147483648, %v9036_v55 }
 0x3a2   : > { %v815_v47 = vmul.f32 %v814_v0, %v9030_v35  ;;  %v838_v63 = vmul.f32 %v9144_v26, %v837_v51  ;;  %v506_v43 = vsub.f32 %v5054_v27, %v9194_v34  ;;  %v508_v21 = vsub.f32 %v5056_v2, %v9194_v34  ;;  %v9773_v2 = vld [vmem:[#allocation17_spill] sm:$0xff] }
 0x3a3   : > { %v9200_v6 = vpop.eup %5398  ;;  %v493_v29 = vmul.f32 %v489_v61, %v489_v61  ;;  %v495_v38 = vadd.f32 %v491_v60, %v476_v10  ;;  %v831_v18 = vand.u32 2147483648, %v9164_v30  ;;  %vm828_vm0 = vcmp.eq.f32.partialorder %v9164_v30, inf }
 0x3a4   : > { %v817_v31 = vsel %vm816_vm5, %v9030_v35, %v815_v47  ;;  %v839_v48 = vmul.f32 %v838_v63, %v9036_v55  ;;  %v822_v26 = vmul.f32 %v9200_v6, %v9164_v30  ;;  %v510_v24 = vmul.f32 %v506_v43, %v506_v43  ;;  %v9772_v63 = vld [vmem:[#allocation20_spill] sm:$0xff]  ;;  %v9775_v43 = vld [vmem:[#allocation22_spill] sm:$0xff] }
 0x3a5   : > { %v9212_v32 = vpop.eup %5400  ;;  %v820_v57 = vsel %vm818_vm6, %v819_v62, %v817_v31  ;;  %v497_v40 = vadd.f32 %v493_v29, %v478_v42  ;;  %v512_v12 = vmul.f32 %v508_v21, %v508_v21  ;;  %v9774_v29 = vld [vmem:[#allocation16_spill] sm:$0xff]  ;;  %v9776_v31 = vld [vmem:[#allocation18_spill] sm:$0xff]  ;;  %vm830_vm1 = vcmp.eq.f32.partialorder %v9164_v30, 0.0 }
 0x3a6   : > { %v841_v39 = vsel %vm840_vm8, %v9036_v55, %v839_v48  ;;  %v857_v45 = vsub.f32 1.0, %v820_v57  ;;  %v823_v1 = vmul.f32 %v9200_v6, %v822_v26  ;;  %v846_v35 = vmul.f32 %v9212_v32, %v9174_v46  ;;  %v9777_v48 = vld [vmem:[#allocation23_spill] sm:$0xff]  ;;  %v9778_v26 = vld [vmem:[#allocation9_spill] sm:$0xff] }
 0x3a7   : > { %v844_v16 = vsel %vm842_vm15, %v843_v56, %v841_v39  ;;  %v9225_v62 = vadd.f32 %v510_v24, %v495_v38  ;;  %v9227_v55 = vadd.f32 %v512_v12, %v497_v40  ;;  %vm852_vm2 = vcmp.eq.f32.partialorder %v9174_v46, inf }
 0x3a8   : > { %v859_v58 = vsub.f32 1.0, %v844_v16  ;;  %v861_v22 = vmax.f32 %v857_v45, 0.0  ;;  %v9220_v37 = vmul.f32 0.5, %v823_v1  ;;  %v9223_v3 = vmul.f32 %v9212_v32, %v846_v35 }
 0x3a9   : > { %5402 = vrsqrt.f32 %v9225_v62  ;;  %vm854_vm3 = vcmp.eq.f32.partialorder %v9174_v46, 0.0  ;;  %vm525_vm4 = vcmp.eq.f32.partialorder %v9225_v62, inf  ;;  %vm527_vm5 = vcmp.eq.f32.partialorder %v9225_v62, 0.0 }
 0x3aa   : > { %v863_v9 = vmax.f32 %v859_v58, 0.0  ;;  %v865_v0 = vmul.f32 %v8949_v59, %v861_v22  ;;  %v869_v51 = vmul.f32 %v8957_v5, %v861_v22  ;;  %v873_v7 = vmul.f32 %v8965_v17, %v861_v22 }
 0x3ab   : > { %v877_v27 = vmul.f32 %v8973_v28, %v861_v22  ;;  %v881_v10 = vmul.f32 %v8981_v49, %v861_v22  ;;  %v885_v42 = vmul.f32 %v8989_v8, %v861_v22  ;;  %v889_v61 = vmul.f32 %v8997_v19, %v861_v22 }
 0x3ac   : > { %v867_v47 = vmul.f32 %v8953_v11, %v863_v9  ;;  %v871_v60 = vmul.f32 %v9772_v63, %v863_v9  ;;  %v875_v56 = vmul.f32 %v9773_v2, %v863_v9  ;;  %v879_v59 = vmul.f32 %v9774_v29, %v863_v9 }
 0x3ad   : > { %v883_v5 = vmul.f32 %v9775_v43, %v863_v9  ;;  %v887_v17 = vmul.f32 %v9776_v31, %v863_v9  ;;  %v891_v28 = vmul.f32 %v9777_v48, %v863_v9  ;;  %v893_v49 = vmul.f32 %v9778_v26, %v861_v22 }
 0x3ae   : > { %v895_v8 = vmul.f32 %v9009_v4, %v863_v9  ;;  %v897_v57 = vadd.f32 %v867_v47, %v865_v0  ;;  %v911_v19 = vadd.f32 %v871_v60, %v869_v51  ;;  %v925_v38 = vadd.f32 %v875_v56, %v873_v7 }
 0x3af   : > { %v939_v11 = vadd.f32 %v879_v59, %v877_v27  ;;  %v953_v40 = vadd.f32 %v883_v5, %v881_v10  ;;  %v967_v21 = vadd.f32 %v887_v17, %v885_v42  ;;  %v981_v39 = vadd.f32 %v891_v28, %v889_v61 }
 0x3b0   : > { %v898_v45 = vrot.slane %v897_v57, 4  ;;  %v912_v1 = vrot.slane %v911_v19, 4  ;;  %v926_v35 = vrot.slane %v925_v38, 4  ;;  %v995_v16 = vadd.f32 %v895_v8, %v893_v49 }
 0x3b1   : > { %v940_v24 = vrot.slane %v939_v11, 4  ;;  %v954_v12 = vrot.slane %v953_v40, 4  ;;  %v968_v58 = vrot.slane %v967_v21, 4  ;;  %v982_v63 = vrot.slane %v981_v39, 4 }
 0x3b2   : > { %v899_v2 = vadd.f32 %v898_v45, %v897_v57  ;;  %v913_v29 = vadd.f32 %v912_v1, %v911_v19  ;;  %v927_v22 = vadd.f32 %v926_v35, %v925_v38  ;;  %v996_v43 = vrot.slane %v995_v16, 4 }
 0x3b3   : > { %v941_v4 = vadd.f32 %v940_v24, %v939_v11  ;;  %v955_v9 = vadd.f32 %v954_v12, %v953_v40  ;;  %v969_v0 = vadd.f32 %v968_v58, %v967_v21  ;;  %v983_v51 = vadd.f32 %v982_v63, %v981_v39  ;;  %v467_v11 = vld [vmem:[%s5840_s12 + $0x8] sm:$0xff]  ;;  %v469_v40 = vld [vmem:[%s5840_s12 + $0x18] sm:$0xff] }
 0x3b4   : > { %v900_v7 = vrot.slane %v899_v2, 2  ;;  %v914_v27 = vrot.slane %v913_v29, 2  ;;  %v928_v10 = vrot.slane %v927_v22, 2  ;;  %v997_v42 = vadd.f32 %v996_v43, %v995_v16 }
 0x3b5   : > { %v942_v61 = vrot.slane %v941_v4, 2  ;;  %v956_v47 = vrot.slane %v955_v9, 2  ;;  %v970_v60 = vrot.slane %v969_v0, 2  ;;  %v984_v56 = vrot.slane %v983_v51, 2 }
 0x3b6   : > { %v901_v59 = vadd.f32 %v900_v7, %v899_v2  ;;  %v915_v5 = vadd.f32 %v914_v27, %v913_v29  ;;  %v929_v31 = vadd.f32 %v928_v10, %v927_v22  ;;  %v998_v17 = vrot.slane %v997_v42, 2  ;;  %v5052_v10 = vld [vmem:[%s5840_s12 + $0x38] sm:$0xff] }
 0x3b7   : > { %v943_v48 = vadd.f32 %v942_v61, %v941_v4  ;;  %v957_v28 = vadd.f32 %v956_v47, %v955_v9  ;;  %v971_v26 = vadd.f32 %v970_v60, %v969_v0  ;;  %v985_v49 = vadd.f32 %v984_v56, %v983_v51  ;;  %v5050_v0 = vld [vmem:[%s5840_s12 + $0x28] sm:$0xff] }
 0x3b8   : > { %v902_v8 = vrot.slane %v901_v59, 1  ;;  %v916_v57 = vrot.slane %v915_v5, 1  ;;  %v930_v19 = vrot.slane %v929_v31, 1  ;;  %v999_v38 = vadd.f32 %v998_v17, %v997_v42  ;;  %v5055_v47 = vld [vmem:[%s5840_s12 + $0x48] sm:$0xff] }
 0x3b9   : > { %v944_v21 = vrot.slane %v943_v48, 1  ;;  %v958_v39 = vrot.slane %v957_v28, 1  ;;  %v972_v45 = vrot.slane %v971_v26, 1  ;;  %v986_v1 = vrot.slane %v985_v49, 1 }
 0x3ba   : > { %v903_v35 = vadd.f32 %v902_v8, %v901_v59  ;;  %v917_v16 = vadd.f32 %v916_v57, %v915_v5  ;;  %v931_v24 = vadd.f32 %v930_v19, %v929_v31  ;;  %v1000_v12 = vrot.slane %v999_v38, 1  ;;  %v5057_v31 = vld [vmem:[%s5840_s12 + $0x58] sm:$0xff] }
 0x3bb   : > { %v945_v58 = vadd.f32 %v944_v21, %v943_v48  ;;  %v959_v63 = vadd.f32 %v958_v39, %v957_v28  ;;  %v473_v2 = vsub.f32 %v467_v11, %v9167_v44  ;;  %v475_v29 = vsub.f32 %v469_v40, %v9167_v44 }
 0x3bc   : > { %v973_v22 = vadd.f32 %v972_v45, %v971_v26  ;;  %v1025_v43 = vsel %vm734_vm7, %v917_v16, %v903_v35  ;;  %v825_v4 = vsub.f32 1.5, %v9220_v37  ;;  %v848_v9 = vmul.f32 0.5, %v9223_v3 }
 0x3bd   : > { %v987_v51 = vadd.f32 %v986_v1, %v985_v49  ;;  %v1001_v7 = vadd.f32 %v1000_v12, %v999_v38  ;;  %v1026_v27 = vsel %vm736_vm9, %v931_v24, %v1025_v43  ;;  %5404 = vrsqrt.f32 %v9227_v55 }
 0x3be   : > { %v1027_v42 = vsel %vm738_vm10, %v945_v58, %v1026_v27  ;;  %v826_v44 = vmul.f32 %v9200_v6, %v825_v4  ;;  %v849_v61 = vsub.f32 1.5, %v848_v9  ;;  %v855_v3 = vand.u32 2147483648, %v9174_v46 }
 0x3bf   : > { %v1028_v37 = vsel %vm740_vm11, %v959_v63, %v1027_v42  ;;  %v488_v60 = vsub.f32 %v5050_v0, %v9186_v41  ;;  %v490_v6 = vsub.f32 %v5052_v10, %v9186_v41  ;;  %v477_v48 = vmul.f32 %v473_v2, %v473_v2 }
 0x3c0   : > { %v1029_v56 = vsel %vm742_vm12, %v973_v22, %v1028_v37  ;;  %v827_v59 = vmul.f32 %v826_v44, %v9164_v30  ;;  %v850_v5 = vmul.f32 %v9212_v32, %v849_v61  ;;  %v507_v28 = vsub.f32 %v5055_v47, %v9194_v34  ;;  %v9279_v32 = vpop.eup %5402  ;;  %v9779_v44 = vld [vmem:[#allocation11_spill] sm:$0xff]  ;;  %v9780_v47 = vld [vmem:[#allocation10_spill] sm:$0xff] }
 0x3c1   : > { %v1030_v17 = vsel %vm744_vm13, %v987_v51, %v1029_v56  ;;  %v479_v57 = vmul.f32 %v475_v29, %v475_v29  ;;  %v492_v19 = vmul.f32 %v488_v60, %v488_v60  ;;  %v509_v38 = vsub.f32 %v5057_v31, %v9194_v34  ;;  %v9782_v56 = vld [vmem:[#allocation13_spill] sm:$0xff] }
 0x3c2   : > { %v1031_v26 = vsel %vm746_vm14, %v1001_v7, %v1030_v17  ;;  %v829_v49 = vsel %vm828_vm0, %v9164_v30, %v827_v59  ;;  %v851_v8 = vmul.f32 %v850_v5, %v9174_v46  ;;  %v519_v39 = vmul.f32 %v9279_v32, %v9225_v62 }
 0x3c3   : > { %4783 = vmatpush.msra.mxu0 %v1031_v26  ;;  %v832_v41 = vsel %vm830_vm1, %v831_v18, %v829_v49  ;;  %5236 = vmatpush.msra.mxu2 %v1031_v26  ;;  %v9286_v11 = vpop.eup %5404  ;;  %v494_v45 = vmul.f32 %v490_v6, %v490_v6  ;;  %v496_v18 = vadd.f32 %v492_v19, %v477_v48  ;;  %vm549_vm6 = vcmp.eq.f32.partialorder %v9227_v55, inf }
 0x3c4   : > { %v853_v40 = vsel %vm852_vm2, %v9174_v46, %v851_v8  ;;  %v858_v21 = vsub.f32 1.0, %v832_v41  ;;  %v543_v30 = vmul.f32 %v9286_v11, %v9227_v55  ;;  %v511_v35 = vmul.f32 %v507_v28, %v507_v28 }
 0x3c5   : > { %v856_v1 = vsel %vm854_vm3, %v855_v3, %v853_v40  ;;  %v9298_v24 = vmul.f32 %v9279_v32, %v519_v39  ;;  %v9303_v58 = vadd.f32 %v494_v45, %v479_v57  ;;  %v9305_v63 = vmul.f32 %v509_v38, %v509_v38  ;;  %v9781_v3 = vld [vmem:[#allocation12_spill] sm:$0xff] }
 0x3c6   : > { %v860_v34 = vsub.f32 1.0, %v856_v1  ;;  %v862_v16 = vmax.f32 %v858_v21, 0.0  ;;  %v9301_v12 = vmul.f32 %v9286_v11, %v543_v30  ;;  %v9307_v2 = vadd.f32 %v511_v35, %v496_v18 }
 0x3c7   : > { %vm551_vm8 = vcmp.eq.f32.partialorder %v9227_v55, 0.0 }
 0x3c8   : > { %v864_v46 = vmax.f32 %v860_v34, 0.0  ;;  %v866_v29 = vmul.f32 %v9081_v53, %v862_v16  ;;  %v870_v22 = vmul.f32 %v9085_v15, %v862_v16  ;;  %v874_v43 = vmul.f32 %v9089_v14, %v862_v16 }
 0x3c9   : > { %v878_v4 = vmul.f32 %v9093_v54, %v862_v16  ;;  %v882_v9 = vmul.f32 %v9097_v25, %v862_v16  ;;  %v886_v0 = vmul.f32 %v9101_v33, %v862_v16  ;;  %v890_v51 = vmul.f32 %v9105_v20, %v862_v16 }
 0x3ca   : > { %v868_v7 = vmul.f32 %v9109_v36, %v864_v46  ;;  %v872_v27 = vmul.f32 %v9113_v23, %v864_v46  ;;  %v876_v10 = vmul.f32 %v9117_v13, %v864_v46  ;;  %v880_v42 = vmul.f32 %v9121_v52, %v864_v46 }
 0x3cb   : > { %v884_v61 = vmul.f32 %v9779_v44, %v864_v46  ;;  %v888_v37 = vmul.f32 %v9780_v47, %v864_v46  ;;  %v892_v60 = vmul.f32 %v9781_v3, %v864_v46  ;;  %v894_v59 = vmul.f32 %v9782_v56, %v862_v16 }
 0x3cc   : > { %v896_v5 = vmul.f32 %v9141_v50, %v864_v46  ;;  %v904_v6 = vadd.f32 %v868_v7, %v866_v29  ;;  %v918_v31 = vadd.f32 %v872_v27, %v870_v22  ;;  %v932_v17 = vadd.f32 %v876_v10, %v874_v43 }
 0x3cd   : > { %v946_v48 = vadd.f32 %v880_v42, %v878_v4  ;;  %v960_v28 = vadd.f32 %v884_v61, %v882_v9  ;;  %v974_v26 = vadd.f32 %v888_v37, %v886_v0  ;;  %v988_v49 = vadd.f32 %v892_v60, %v890_v51 }
 0x3ce   : > { %v905_v8 = vrot.slane %v904_v6, 4  ;;  %v919_v57 = vrot.slane %v918_v31, 4  ;;  %v933_v41 = vrot.slane %v932_v17, 4  ;;  %v1002_v19 = vadd.f32 %v896_v5, %v894_v59 }
 0x3cf   : > { %v947_v38 = vrot.slane %v946_v48, 4  ;;  %v961_v40 = vrot.slane %v960_v28, 4  ;;  %v975_v21 = vrot.slane %v974_v26, 4  ;;  %v989_v39 = vrot.slane %v988_v49, 4 }
 0x3d0   : > { %v906_v45 = vadd.f32 %v905_v8, %v904_v6  ;;  %v920_v1 = vadd.f32 %v919_v57, %v918_v31  ;;  %v934_v30 = vadd.f32 %v933_v41, %v932_v17  ;;  %v1003_v18 = vrot.slane %v1002_v19, 4 }
 0x3d1   : > { %v948_v35 = vadd.f32 %v947_v38, %v946_v48  ;;  %v962_v34 = vadd.f32 %v961_v40, %v960_v28  ;;  %v976_v16 = vadd.f32 %v975_v21, %v974_v26  ;;  %v990_v46 = vadd.f32 %v989_v39, %v988_v49 }
 0x3d2   : > { %v907_v29 = vrot.slane %v906_v45, 2  ;;  %v921_v22 = vrot.slane %v920_v1, 2  ;;  %v935_v43 = vrot.slane %v934_v30, 2  ;;  %v1004_v4 = vadd.f32 %v1003_v18, %v1002_v19 }
 0x3d3   : > { %v949_v9 = vrot.slane %v948_v35, 2  ;;  %v963_v0 = vrot.slane %v962_v34, 2  ;;  %v977_v51 = vrot.slane %v976_v16, 2  ;;  %v991_v7 = vrot.slane %v990_v46, 2 }
 0x3d4   : > { %v908_v27 = vadd.f32 %v907_v29, %v906_v45  ;;  %v922_v10 = vadd.f32 %v921_v22, %v920_v1  ;;  %v936_v42 = vadd.f32 %v935_v43, %v934_v30  ;;  %v1005_v61 = vrot.slane %v1004_v4, 2 }
 0x3d5   : > { %v950_v37 = vadd.f32 %v949_v9, %v948_v35  ;;  %v964_v60 = vadd.f32 %v963_v0, %v962_v34  ;;  %v978_v59 = vadd.f32 %v977_v51, %v976_v16  ;;  %v992_v5 = vadd.f32 %v991_v7, %v990_v46 }
 0x3d6   : > { %v909_v6 = vrot.slane %v908_v27, 1  ;;  %v923_v31 = vrot.slane %v922_v10, 1  ;;  %v937_v17 = vrot.slane %v936_v42, 1  ;;  %v1006_v48 = vadd.f32 %v1005_v61, %v1004_v4 }
 0x3d7   : > { %v951_v28 = vrot.slane %v950_v37, 1  ;;  %v965_v26 = vrot.slane %v964_v60, 1  ;;  %v979_v49 = vrot.slane %v978_v59, 1  ;;  %v993_v8 = vrot.slane %v992_v5, 1 }
 0x3d8   : > { %v910_v57 = vadd.f32 %v909_v6, %v908_v27  ;;  %v924_v41 = vadd.f32 %v923_v31, %v922_v10  ;;  %v938_v19 = vadd.f32 %v937_v17, %v936_v42  ;;  %v1007_v38 = vrot.slane %v1006_v48, 1 }
 0x3d9   : > { %v952_v40 = vadd.f32 %v951_v28, %v950_v37  ;;  %v966_v21 = vadd.f32 %v965_v26, %v964_v60  ;;  %v980_v39 = vadd.f32 %v979_v49, %v978_v59  ;;  %v521_v1 = vmul.f32 0.5, %v9298_v24  ;;  %v5603_v26 = vld [vmem:[%s5842_s13 + $0x10] sm:$0xff] }
 0x3da   : > { %v1032_v45 = vsel %vm734_vm7, %v924_v41, %v910_v57  ;;  %v545_v30 = vmul.f32 0.5, %v9301_v12  ;;  %v994_v18 = vadd.f32 %v993_v8, %v992_v5  ;;  %v9331_v34 = vadd.f32 %v9305_v63, %v9303_v58  ;;  %v5604_v8 = vld [vmem:[%s5842_s13 + $0x20] sm:$0xff]  ;;  %v5605_v41 = vld [vmem:[%s5842_s13 + $0x30] sm:$0xff] }
 0x3db   : > { %v1033_v35 = vsel %vm736_vm9, %v938_v19, %v1032_v45  ;;  %5406 = vrsqrt.f32 %v9307_v2  ;;  %v1008_v16 = vadd.f32 %v1007_v38, %v1006_v48  ;;  %v522_v29 = vsub.f32 1.5, %v521_v1  ;;  %v5602_v48 = vld [vmem:[%s5842_s13] sm:$0xff] }
 0x3dc   : > { %v1034_v46 = vsel %vm738_vm10, %v952_v40, %v1033_v35  ;;  %v546_v22 = vsub.f32 1.5, %v545_v30  ;;  %5408 = vrsqrt.f32 %v9331_v34  ;;  %v528_v58 = vand.u32 2147483648, %v9225_v62  ;;  %v5606_v38 = vld [vmem:[%s5842_s13 + $0x40] sm:$0xff]  ;;  %v5609_v30 = vld [vmem:[%s5842_s13 + $0x70] sm:$0xff] }
 0x3dd   : > { %v1035_v43 = vsel %vm740_vm11, %v966_v21, %v1034_v46  ;;  %v523_v12 = vmul.f32 %v9279_v32, %v522_v29  ;;  %v552_v9 = vand.u32 2147483648, %v9227_v55  ;;  %v5607_v21 = vld [vmem:[%s5842_s13 + $0x50] sm:$0xff]  ;;  %v5608_v45 = vld [vmem:[%s5842_s13 + $0x60] sm:$0xff]  ;;  %vm537_vm15 = vcmp.eq.f32.partialorder %v9307_v2, inf }
 0x3de   : > { %v1036_v24 = vsel %vm742_vm12, %v980_v39, %v1035_v43  ;;  %v547_v63 = vmul.f32 %v9286_v11, %v546_v22  ;;  %v5610_v35 = vld [vmem:[%s5842_s13 + $0x80] sm:$0xff]  ;;  %v5611_v46 = vld [vmem:[%s5842_s13 + $0x90] sm:$0xff]  ;;  %vm539_vm0 = vcmp.eq.f32.partialorder %v9307_v2, 0.0  ;;  %vm561_vm1 = vcmp.eq.f32.partialorder %v9331_v34, inf }
 0x3df   : > { %v1037_v4 = vsel %vm744_vm13, %v994_v18, %v1036_v24  ;;  %v524_v51 = vmul.f32 %v523_v12, %v9225_v62  ;;  %v5612_v22 = vld [vmem:[%s5842_s13 + $0xa0] sm:$0xff]  ;;  %v5613_v24 = vld [vmem:[%s5842_s13 + $0xb0] sm:$0xff]  ;;  %vm563_vm2 = vcmp.eq.f32.partialorder %v9331_v34, 0.0 }
 0x3e0   : > { %v1038_v0 = vsel %vm746_vm14, %v1008_v16, %v1037_v4  ;;  %v548_v7 = vmul.f32 %v547_v63, %v9227_v55  ;;  %v5615_v4 = vld [vmem:[%s5842_s13 + $0xd0] sm:$0xff] }
 0x3e1   : > { %v9350_v32 = vpop.eup %5406  ;;  %4806 = vmatpush.msra.mxu1 %v1038_v0  ;;  %5251 = vmatpush.msra.mxu3 %v1038_v0  ;;  %v526_v11 = vsel %vm525_vm4, %v9225_v62, %v524_v51  ;;  %v5616_v0 = vld [vmem:[%s5842_s13 + $0xe0] sm:$0xff] }
 0x3e2   : > { %v550_v27 = vsel %vm549_vm6, %v9227_v55, %v548_v7  ;;  %v531_v10 = vmul.f32 %v9350_v32, %v9307_v2  ;;  %v9358_v42 = vpop.eup %5408  ;;  %v529_v61 = vsel %vm527_vm5, %v528_v58, %v526_v11  ;;  %v5614_v58 = vld [vmem:[%s5842_s13 + $0xc0] sm:$0xff]  ;;  %v5617_v7 = vld [vmem:[%s5842_s13 + $0xf0] sm:$0xff] }
 0x3e3   : > { %v553_v37 = vsel %vm551_vm8, %v552_v9, %v550_v27  ;;  %v566_v60 = vsub.f32 1.0, %v529_v61  ;;  %v555_v62 = vmul.f32 %v9358_v42, %v9331_v34 }
 0x3e4   : > { %v568_v59 = vsub.f32 1.0, %v553_v37  ;;  %v532_v5 = vmul.f32 %v9350_v32, %v531_v10 }
 0x3e5   : > { %v570_v6 = vmax.f32 %v566_v60, 0.0  ;;  %v9366_v17 = vmul.f32 %v9358_v42, %v555_v62 }
 0x3e6   : > { %v572_v55 = vmax.f32 %v568_v59, 0.0  ;;  %v9363_v31 = vmul.f32 0.5, %v532_v5 }
 0x3e7   : > { %v574_v28 = vmul.f32 %v5602_v48, %v570_v6  ;;  %v578_v57 = vmul.f32 %v5604_v8, %v570_v6  ;;  %v582_v40 = vmul.f32 %v5606_v38, %v570_v6  ;;  %v586_v1 = vmul.f32 %v5608_v45, %v570_v6 }
 0x3e8   : > { %v576_v49 = vmul.f32 %v5603_v26, %v572_v55  ;;  %v580_v19 = vmul.f32 %v5605_v41, %v572_v55  ;;  %v584_v39 = vmul.f32 %v5607_v21, %v572_v55  ;;  %v588_v18 = vmul.f32 %v5609_v30, %v572_v55 }
 0x3e9   : > { %v590_v16 = vmul.f32 %v5610_v35, %v570_v6  ;;  %v592_v29 = vmul.f32 %v5611_v46, %v572_v55  ;;  %v594_v43 = vmul.f32 %v5612_v22, %v570_v6  ;;  %v596_v12 = vmul.f32 %v5613_v24, %v572_v55 }
 0x3ea   : > { %v598_v63 = vmul.f32 %v5614_v58, %v570_v6  ;;  %v600_v9 = vmul.f32 %v5615_v4, %v572_v55  ;;  %v602_v51 = vmul.f32 %v5616_v0, %v570_v6  ;;  %v604_v11 = vmul.f32 %v5617_v7, %v572_v55 }
 0x3eb   : > { %v606_v27 = vadd.f32 %v576_v49, %v574_v28  ;;  %v620_v10 = vadd.f32 %v580_v19, %v578_v57  ;;  %v634_v61 = vadd.f32 %v584_v39, %v582_v40  ;;  %v648_v37 = vadd.f32 %v588_v18, %v586_v1 }
 0x3ec   : > { %v662_v60 = vadd.f32 %v592_v29, %v590_v16  ;;  %v676_v59 = vadd.f32 %v596_v12, %v594_v43  ;;  %v690_v5 = vadd.f32 %v600_v9, %v598_v63  ;;  %v704_v62 = vadd.f32 %v604_v11, %v602_v51 }
 0x3ed   : > { %v607_v48 = vrot.slane %v606_v27, 4  ;;  %v621_v26 = vrot.slane %v620_v10, 4  ;;  %v635_v8 = vrot.slane %v634_v61, 4  ;;  %v649_v41 = vrot.slane %v648_v37, 4 }
 0x3ee   : > { %v663_v38 = vrot.slane %v662_v60, 4  ;;  %v677_v21 = vrot.slane %v676_v59, 4  ;;  %v691_v45 = vrot.slane %v690_v5, 4  ;;  %v705_v30 = vrot.slane %v704_v62, 4 }
 0x3ef   : > { %v608_v35 = vadd.f32 %v607_v48, %v606_v27  ;;  %v622_v6 = vadd.f32 %v621_v26, %v620_v10  ;;  %v636_v46 = vadd.f32 %v635_v8, %v634_v61  ;;  %v650_v55 = vadd.f32 %v649_v41, %v648_v37 }
 0x3f0   : > { %v664_v28 = vadd.f32 %v663_v38, %v662_v60  ;;  %v678_v49 = vadd.f32 %v677_v21, %v676_v59  ;;  %v692_v57 = vadd.f32 %v691_v45, %v690_v5  ;;  %v706_v19 = vadd.f32 %v705_v30, %v704_v62 }
 0x3f1   : > { %v609_v40 = vrot.slane %v608_v35, 2  ;;  %v623_v39 = vrot.slane %v622_v6, 2  ;;  %v637_v1 = vrot.slane %v636_v46, 2  ;;  %v651_v18 = vrot.slane %v650_v55, 2 }
 0x3f2   : > { %v665_v16 = vrot.slane %v664_v28, 2  ;;  %v679_v29 = vrot.slane %v678_v49, 2  ;;  %v693_v22 = vrot.slane %v692_v57, 2  ;;  %v707_v43 = vrot.slane %v706_v19, 2 }
 0x3f3   : > { %v610_v24 = vadd.f32 %v609_v40, %v608_v35  ;;  %v624_v12 = vadd.f32 %v623_v39, %v622_v6  ;;  %v638_v58 = vadd.f32 %v637_v1, %v636_v46  ;;  %v652_v63 = vadd.f32 %v651_v18, %v650_v55  ;;  %v9403_v39 = vld [vmem:[%s9484_s3] sm:$0xff] }
 0x3f4   : > { %v666_v4 = vadd.f32 %v665_v16, %v664_v28  ;;  %v680_v9 = vadd.f32 %v679_v29, %v678_v49  ;;  %v694_v0 = vadd.f32 %v693_v22, %v692_v57  ;;  %v708_v51 = vadd.f32 %v707_v43, %v706_v19 }
 0x3f5   : > { %v611_v7 = vrot.slane %v610_v24, 1  ;;  %v625_v11 = vrot.slane %v624_v12, 1  ;;  %v639_v27 = vrot.slane %v638_v58, 1  ;;  %v653_v10 = vrot.slane %v652_v63, 1 }
 0x3f6   : > { %v667_v61 = vrot.slane %v666_v4, 1  ;;  %v681_v37 = vrot.slane %v680_v9, 1  ;;  %v695_v60 = vrot.slane %v694_v0, 1  ;;  %v709_v59 = vrot.slane %v708_v51, 1 }
 0x3f7   : > { %v612_v5 = vadd.f32 %v611_v7, %v610_v24  ;;  %v626_v62 = vadd.f32 %v625_v11, %v624_v12  ;;  %v640_v48 = vadd.f32 %v639_v27, %v638_v58  ;;  %v654_v26 = vadd.f32 %v653_v10, %v652_v63 }
 0x3f8   : > { %v668_v8 = vadd.f32 %v667_v61, %v666_v4  ;;  %v682_v41 = vadd.f32 %v681_v37, %v680_v9  ;;  %v534_v21 = vsub.f32 1.5, %v9363_v31  ;;  %v557_v45 = vmul.f32 0.5, %v9366_v17 }
 0x3f9   : > { %v735_v38 = vsel %vm734_vm7, %v626_v62, %v612_v5  ;;  %v696_v30 = vadd.f32 %v695_v60, %v694_v0  ;;  %v710_v6 = vadd.f32 %v709_v59, %v708_v51  ;;  %v540_v57 = vand.u32 2147483648, %v9307_v2 }
 0x3fa   : > { %v737_v35 = vsel %vm736_vm9, %v640_v48, %v735_v38  ;;  %v535_v55 = vmul.f32 %v9350_v32, %v534_v21  ;;  %v558_v28 = vsub.f32 1.5, %v557_v45  ;;  %v564_v32 = vand.u32 2147483648, %v9331_v34 }
 0x3fb   : > { %v739_v46 = vsel %vm738_vm10, %v654_v26, %v737_v35 }
 0x3fc   : > { %v741_v49 = vsel %vm740_vm11, %v668_v8, %v739_v46  ;;  %v536_v31 = vmul.f32 %v535_v55, %v9307_v2  ;;  %v559_v17 = vmul.f32 %v9358_v42, %v558_v28  ;;  %v9412_v42 = vld [vmem:[%s9484_s3 + $0x8] sm:$0xff] }
 0x3fd   : > { %v743_v19 = vsel %vm742_vm12, %v682_v41, %v741_v49 }
 0x3fe   : > { %v745_v40 = vsel %vm744_vm13, %v696_v30, %v743_v19  ;;  %v538_v18 = vsel %vm537_vm15, %v9307_v2, %v536_v31  ;;  %v560_v16 = vmul.f32 %v559_v17, %v9331_v34 }
 0x3ff   : > { %v747_v1 = vsel %vm746_vm14, %v710_v6, %v745_v40  ;;  %v541_v29 = vsel %vm539_vm0, %v540_v57, %v538_v18 }
 0x400   : > { %4784 = vmatpush.msra.mxu0 %v747_v1  ;;  %5237 = vmatpush.msra.mxu2 %v747_v1  ;;  %v562_v22 = vsel %vm561_vm1, %v9331_v34, %v560_v16  ;;  %v567_v43 = vsub.f32 1.0, %v541_v29 }
 0x401   : > { %4785 = vmatmul.f32.vlgmr.msra.gmra.mxu0 %v9403_v39  ;;  %4788 = vmatmul.f32.vlgmr.msra.gmra.mxu2 %v9412_v42  ;;  %v565_v2 = vsel %vm563_vm2, %v564_v32, %v562_v22 }
 0x402   : > { %v569_v24 = vsub.f32 1.0, %v565_v2  ;;  %v571_v12 = vmax.f32 %v567_v43, 0.0 }
 0x404   : > { %v573_v58 = vmax.f32 %v569_v24, 0.0  ;;  %v575_v63 = vmul.f32 %v9081_v53, %v571_v12  ;;  %v579_v4 = vmul.f32 %v9085_v15, %v571_v12  ;;  %v583_v9 = vmul.f32 %v9089_v14, %v571_v12 }
 0x405   : > { %v587_v0 = vmul.f32 %v9093_v54, %v571_v12  ;;  %v591_v51 = vmul.f32 %v9097_v25, %v571_v12  ;;  %v595_v34 = vmul.f32 %v9101_v33, %v571_v12  ;;  %v599_v7 = vmul.f32 %v9105_v20, %v571_v12 }
 0x406   : > { %v577_v11 = vmul.f32 %v9109_v36, %v573_v58  ;;  %v581_v27 = vmul.f32 %v9113_v23, %v573_v58  ;;  %v585_v10 = vmul.f32 %v9117_v13, %v573_v58  ;;  %v589_v53 = vmul.f32 %v9121_v52, %v573_v58 }
 0x407   : > { %v593_v15 = vmul.f32 %v9779_v44, %v573_v58  ;;  %v597_v14 = vmul.f32 %v9780_v47, %v573_v58  ;;  %v601_v54 = vmul.f32 %v9781_v3, %v573_v58  ;;  %v603_v25 = vmul.f32 %v9782_v56, %v571_v12 }
 0x408   : > { %v605_v33 = vmul.f32 %v9141_v50, %v573_v58  ;;  %v613_v61 = vadd.f32 %v577_v11, %v575_v63  ;;  %v627_v20 = vadd.f32 %v581_v27, %v579_v4  ;;  %v641_v37 = vadd.f32 %v585_v10, %v583_v9 }
 0x409   : > { %v655_v36 = vadd.f32 %v589_v53, %v587_v0  ;;  %v669_v60 = vadd.f32 %v593_v15, %v591_v51  ;;  %v683_v23 = vadd.f32 %v597_v14, %v595_v34  ;;  %v697_v59 = vadd.f32 %v601_v54, %v599_v7 }
 0x40a   : > { %v614_v13 = vrot.slane %v613_v61, 4  ;;  %v628_v5 = vrot.slane %v627_v20, 4  ;;  %v642_v52 = vrot.slane %v641_v37, 4  ;;  %v711_v62 = vadd.f32 %v605_v33, %v603_v25 }
 0x40b   : > { %v656_v44 = vrot.slane %v655_v36, 4  ;;  %v670_v48 = vrot.slane %v669_v60, 4  ;;  %v684_v47 = vrot.slane %v683_v23, 4  ;;  %v698_v26 = vrot.slane %v697_v59, 4 }
 0x40c   : > { %v615_v3 = vadd.f32 %v614_v13, %v613_v61  ;;  %v629_v8 = vadd.f32 %v628_v5, %v627_v20  ;;  %v643_v56 = vadd.f32 %v642_v52, %v641_v37  ;;  %v712_v41 = vrot.slane %v711_v62, 4 }
 0x40d   : > { %v657_v50 = vadd.f32 %v656_v44, %v655_v36  ;;  %v671_v38 = vadd.f32 %v670_v48, %v669_v60  ;;  %v685_v21 = vadd.f32 %v684_v47, %v683_v23  ;;  %v699_v45 = vadd.f32 %v698_v26, %v697_v59 }
 0x40e   : > { %v616_v30 = vrot.slane %v615_v3, 2  ;;  %v630_v35 = vrot.slane %v629_v8, 2  ;;  %v644_v6 = vrot.slane %v643_v56, 2  ;;  %v713_v46 = vadd.f32 %v712_v41, %v711_v62 }
 0x40f   : > { %v658_v55 = vrot.slane %v657_v50, 2  ;;  %v672_v28 = vrot.slane %v671_v38, 2  ;;  %v686_v49 = vrot.slane %v685_v21, 2  ;;  %v700_v57 = vrot.slane %v699_v45, 2 }
 0x410   : > { %v617_v19 = vadd.f32 %v616_v30, %v615_v3  ;;  %v631_v31 = vadd.f32 %v630_v35, %v629_v8  ;;  %v645_v17 = vadd.f32 %v644_v6, %v643_v56  ;;  %v714_v40 = vrot.slane %v713_v46, 2 }
 0x411   : > { %v659_v32 = vadd.f32 %v658_v55, %v657_v50  ;;  %v673_v1 = vadd.f32 %v672_v28, %v671_v38  ;;  %v687_v18 = vadd.f32 %v686_v49, %v685_v21  ;;  %v701_v16 = vadd.f32 %v700_v57, %v699_v45 }
 0x412   : > { %v618_v29 = vrot.slane %v617_v19, 1  ;;  %v632_v22 = vrot.slane %v631_v31, 1  ;;  %v646_v43 = vrot.slane %v645_v17, 1  ;;  %v715_v2 = vadd.f32 %v714_v40, %v713_v46 }
 0x413   : > { %v660_v24 = vrot.slane %v659_v32, 1  ;;  %v674_v12 = vrot.slane %v673_v1, 1  ;;  %v688_v58 = vrot.slane %v687_v18, 1  ;;  %v702_v63 = vrot.slane %v701_v16, 1 }
 0x414   : > { %v619_v4 = vadd.f32 %v618_v29, %v617_v19  ;;  %v633_v9 = vadd.f32 %v632_v22, %v631_v31  ;;  %v647_v0 = vadd.f32 %v646_v43, %v645_v17  ;;  %v716_v51 = vrot.slane %v715_v2, 1 }
 0x415   : > { %v661_v34 = vadd.f32 %v660_v24, %v659_v32  ;;  %v675_v7 = vadd.f32 %v674_v12, %v673_v1  ;;  %v689_v11 = vadd.f32 %v688_v58, %v687_v18  ;;  %v703_v10 = vadd.f32 %v702_v63, %v701_v16 }
 0x416   : > { %v748_v27 = vsel %vm734_vm7, %v633_v9, %v619_v4  ;;  %v717_v15 = vadd.f32 %v716_v51, %v715_v2  ;;  %vm4841_vm7 = vcmask 7168  }
 0x417   : > { %v749_v53 = vsel %vm736_vm9, %v647_v0, %v748_v27 }
 0x418   : > { %v750_v14 = vsel %vm738_vm10, %v661_v34, %v749_v53 }
 0x419   : > { %v751_v54 = vsel %vm740_vm11, %v675_v7, %v750_v14 }
 0x41a   : > { %v752_v25 = vsel %vm742_vm12, %v689_v11, %v751_v54 }
 0x41b   : > { %v753_v33 = vsel %vm744_vm13, %v703_v10, %v752_v25 }
 0x41c   : > { %v754_v61 = vsel %vm746_vm14, %v717_v15, %v753_v33 }
 0x41d   : > { %4807 = vmatpush.msra.mxu1 %v754_v61  ;;  %5252 = vmatpush.msra.mxu3 %v754_v61 }
 0x41e   : > { %4808 = vmatmul.f32.vlgmr.msra.gmra.mxu1 %v9403_v39  ;;  %4811 = vmatmul.f32.vlgmr.msra.gmra.mxu3 %v9412_v42 }
 0x47e   : > { %v4786_v20 = vpop.f32.mrf.mxu0 }
 0x47f   : > { %4815 = vst [vmem:[%s9443_s7] sm:$0xff] %v4786_v20 }
 0x484   : > { %v4789_v37 = vpop.f32.mrf.mxu2 }
 0x485   : > { %4817 = vst [vmem:[%s9443_s7 + $0x10] sm:$0xff] %v4789_v37 }
 0x486   : > { %v4878_v21 = vld [vmem:[%s9443_s7] sm:$0xff] (%p5732_p5) }
 0x487   : > { %4879 = vst [vmem:[%s4865_s8] sm:$0xff] (%p5732_p5), %v4878_v21 }
 0x48c   : > { %v4882_v30 = vld [vmem:[%s9443_s7 + $0x10] sm:$0xff] (%p5732_p5) }
 0x48d   : > { %4883 = vst [vmem:[%s4865_s8 + $0x20] sm:$0xff] (%p5732_p5), %v4882_v30 }
 0x49b   : > { %v4809_v36 = vpop.f32.mrf.mxu1 }
 0x49c   : > { %4816 = vst [vmem:[%s9443_s7 + $0x8] sm:$0xff] %v4809_v36  ;;  %v4819_v60 = vadd.f32 %v4809_v36, %v4786_v20 }
 0x49e   : > { %4820 = vadd.xlane.f32.xlu0 %v4819_v60 }
 0x4a1   : > { %v4812_v39 = vpop.f32.mrf.mxu3 }
 0x4a2   : > { %4818 = vst [vmem:[%s9443_s7 + $0x18] sm:$0xff] %v4812_v39  ;;  %v4822_v23 = vadd.f32 %v4812_v39, %v4789_v37 }
 0x4a3   : > { %v4880_v45 = vld [vmem:[%s9443_s7 + $0x8] sm:$0xff] (%p5732_p5) }
 0x4a4   : > { %4881 = vst [vmem:[%s4865_s8 + $0x8] sm:$0xff] (%p5732_p5), %v4880_v45 }
 0x4a6   : > { %4823 = vadd.xlane.f32.xlu0 %v4822_v23 }
 0x4a9   : > { %v4884_v35 = vld [vmem:[%s9443_s7 + $0x18] sm:$0xff] (%p5732_p5) }
 0x4aa   : > { %4885 = vst [vmem:[%s4865_s8 + $0x28] sm:$0xff] (%p5732_p5), %v4884_v35 }
 0x511   : > { %v4821_v42 = vpop.xlane.xlu0 %4820 }
 0x512   : > { %v4825_v59 = vmul.f32 0.00390625, %v4821_v42 }
 0x514   : > { %4842 = vst.msk [vmem:[%s426_s16] sm:$0xff] %vm4841_vm7, %v4825_v59  ;;  %v4827_v13 = vsub.f32 %v4786_v20, %v4825_v59  ;;  %v4828_v5 = vsub.f32 %v4809_v36, %v4825_v59 }
 0x516   : > { %v4831_v52 = vmul.f32 %v4827_v13, %v4827_v13  ;;  %v4832_v62 = vmul.f32 %v4828_v5, %v4828_v5 }
 0x518   : > { %v4835_v44 = vadd.f32 %v4832_v62, %v4831_v52 }
 0x519   : > { %v4824_v48 = vpop.xlane.xlu0 %4823 }
 0x51a   : > { %v4826_v47 = vmul.f32 0.00390625, %v4824_v48  ;;  %4836 = vadd.xlane.f32.xlu1 %v4835_v44 }
 0x51c   : > { %4843 = vst.msk [vmem:[%s426_s16 + $0x8] sm:$0xff] %vm4841_vm7, %v4826_v47  ;;  %v4829_v26 = vsub.f32 %v4789_v37, %v4826_v47  ;;  %v4830_v3 = vsub.f32 %v4812_v39, %v4826_v47 }
 0x51e   : > { %v4833_v8 = vmul.f32 %v4829_v26, %v4829_v26  ;;  %v4834_v56 = vmul.f32 %v4830_v3, %v4830_v3 }
 0x520   : > { %v4838_v41 = vadd.f32 %v4834_v56, %v4833_v8 }
 0x522   : > { %4839 = vadd.xlane.f32.xlu1 %v4838_v41 }
 0x58d   : > { %v4837_v50 = vpop.xlane.xlu1 %4836 }
 0x58e   : > { %4844 = vst.msk [vmem:[%s431_s19] sm:$0xff] %vm4841_vm7, %v4837_v50 }
 0x592   : > { %4862 = sbr.rel (!%p5732_p5) target bundleno = 1431 (0x597), region = 90 }
 0x595   : > { %v4840_v38 = vpop.xlane.xlu1 %4839 }
 0x596   : > { %4845 = vst.msk [vmem:[%s431_s19 + $0x8] sm:$0xff] %vm4841_vm7, %v4840_v38 }
 0x597 PF: > { %p15_p0 = scmp.ge.s32.totalorder %s5716_s25, 4   ;;  %s9783_s21 = smov %s5655_s22 }
 0x598   : > { %s9784_s22 = smov %s5726_s28  ;;  %s9785_s23 = smov %s5716_s25 }
 0x599   :  { %17 = sbr.rel (!%p15_p0) target bundleno = 2 (0x2), region = 179 }
 0x59e   :  { %4923 = vsyncpa [#allocation6], 1 }
 0x59f   :  { %4925 = vsyncpa [#allocation6 + $0x1], 1 }

</bundles_post_ra>
